<compile_context>
chip_gen: v7x
topology: tpu7x:2x2x1
jax: 0.10.0
libtpu: 0.0.40
codegen_flags: <defaults>
</compile_context>

<pallas_src>
import functools

import jax
import jax.numpy as jnp
from jax.experimental import pallas as pl
from jax.experimental.pallas import tpu as pltpu


_VMEM_LIMIT = 32 * 1024 * 1024      # safe scoped-VMEM ceiling on v5e/v6e/v7x


@functools.lru_cache(maxsize=None)
def _two_tensorcores():
    """v7x has 2 TensorCores per chip -> keep >=2 parallel M tiles there."""
    try:
        kind = jax.devices()[0].device_kind.lower()
    except Exception:
        kind = ""
    return "v7" in kind


# ----------------------------------------------------------------------------
# Kernel 1: fused matmul (+bias, +opt ReLU). Full-K block, bf16 store.
# ----------------------------------------------------------------------------
def _mm_kernel(a_ref, w_ref, b_ref, o_ref, *, relu):
    acc = jnp.dot(a_ref[...], w_ref[...], preferred_element_type=jnp.float32)
    acc = acc + b_ref[...]                 # (1, tn) broadcast over rows
    if relu:
        acc = jnp.maximum(acc, 0.0)
    o_ref[...] = acc.astype(o_ref.dtype)   # bf16 writeback (half the bytes)


def _choose_tm(mp, k, tn, two_tc):
    """Fattest M tile that fits a conservative VMEM budget; on 2-TC parts keep
    at least 2 M tiles so the 'parallel' grid axis can shard across cores."""
    budget = 8 * 1024 * 1024

    def ws(tm):  # approx working set: double-buffered bf16 A/W/out + f32 bias
        return 4 * (tm * k + k * tn + tm * tn) + 4 * tn

    tm = mp
    if two_tc and mp >= 256 and (mp // 2) % 8 == 0:
        tm = mp // 2
    while ws(tm) > budget and tm % 16 == 0 and tm > 128:
        tm //= 2
    return tm


def _pallas_matmul(a_bf16, w_bf16, bias2d_f32, relu):
    m, k = a_bf16.shape
    n = w_bf16.shape[1]
    np_ = max(128, pl.cdiv(n, 128) * 128)      # lane-dense (unmasked) stores
    if np_ != n:
        w_bf16 = jnp.pad(w_bf16, ((0, 0), (0, np_ - n)))
        bias2d_f32 = jnp.pad(bias2d_f32, ((0, 0), (0, np_ - n)))
    mp = pl.cdiv(m, 8) * 8
    if mp != m:
        a_bf16 = jnp.pad(a_bf16, ((0, mp - m), (0, 0)))
    tn = np_ if np_ <= 256 else (256 if np_ % 256 == 0 else 128)
    tm = _choose_tm(mp, k, tn, _two_tensorcores())

    cost = pl.CostEstimate(
        flops=2 * mp * k * np_, transcendentals=0,
        bytes_accessed=2 * (mp * k + k * np_ + mp * np_) + 4 * np_)

    out = pl.pallas_call(
        functools.partial(_mm_kernel, relu=relu),
        out_shape=jax.ShapeDtypeStruct((mp, np_), jnp.bfloat16),
        grid_spec=pltpu.PrefetchScalarGridSpec(
            num_scalar_prefetch=0,
            grid=(mp // tm, np_ // tn),
            in_specs=[
                pl.BlockSpec((tm, k), lambda i, j: (i, 0)),    # A tile, full K
                pl.BlockSpec((k, tn), lambda i, j: (0, j)),    # W tile, full K
                pl.BlockSpec((1, tn), lambda i, j: (0, j)),    # bias tile
            ],
            out_specs=pl.BlockSpec((tm, tn), lambda i, j: (i, j)),
        ),
        compiler_params=pltpu.CompilerParams(
            dimension_semantics=("parallel", "parallel"),
            vmem_limit_bytes=_VMEM_LIMIT),
        cost_estimate=cost,
    )(a_bf16, w_bf16, bias2d_f32)
    if mp != m or np_ != n:
        out = out[:m, :n]
    return out


def matmul(a, w_bf16, bias=None, relu=False):
    """a: (M, K) any float; w_bf16: (K, N) pre-packed bf16; bias: (N,) f32."""
    m, _ = a.shape
    n = w_bf16.shape[1]
    a16 = a.astype(jnp.bfloat16)
    if m < 128:
        # Tiny-M: pallas_call launch + per-step overhead >> FLOPs; use XLA.
        out = jnp.dot(a16, w_bf16, preferred_element_type=jnp.float32)
        if bias is not None:
            out = out + bias[None, :]
        if relu:
            out = jnp.maximum(out, 0.0)
        return out
    bias2d = (jnp.zeros((1, n), jnp.float32) if bias is None
              else bias.reshape(1, n).astype(jnp.float32))
    return _pallas_matmul(a16, w_bf16, bias2d, relu)


# ----------------------------------------------------------------------------
# Kernel 2: direct 3x3 (stride 1, pad 1) conv — no HBM im2col.
# The padded NHWC activation is flattened per image to rows r = i*Wp + j; the
# contribution of tap (di, dj) is a contiguous row-slab shifted by di*Wp + dj,
# so the kernel accumulates 9 shifted matmuls against per-tap weight slabs.
# The Wp-W junk columns per row are discarded when slicing back to (H, W).
# ----------------------------------------------------------------------------
def _conv3x3_kernel(a_ref, w_ref, b_ref, o_ref, *, offs, m_rows, relu):
    acc = jnp.dot(a_ref[pl.ds(offs[0], m_rows), :], w_ref[0],
                  preferred_element_type=jnp.float32)
    for t in range(1, 9):
        acc = acc + jnp.dot(a_ref[pl.ds(offs[t], m_rows), :], w_ref[t],
                            preferred_element_type=jnp.float32)
    acc = acc + b_ref[...]
    if relu:
        acc = jnp.maximum(acc, 0.0)
    o_ref[...] = acc.astype(o_ref.dtype)


def _conv3x3_fused(x, cp, relu):
    """x: (B, H, W, Cin) NHWC; cp['w']: (9*Cin, Np) bf16, cp['b']: (Np,) f32."""
    B, H, W, Cin = x.shape
    np_ = cp["w"].shape[-1]
    cout = cp["cout"]
    Hp, Wp = H + 2, W + 2
    m_rows = H * Wp                       # produce Wp cols/row, 2 are junk
    R = Hp * Wp + 2                       # +2 tail rows keep last tap in-bounds

    xb = jnp.pad(x.astype(jnp.bfloat16), ((0, 0), (1, 1), (1, 1), (0, 0)))
    a = jnp.pad(xb.reshape(B, Hp * Wp, Cin), ((0, 0), (0, 2), (0, 0)))
    w9 = cp["w"].reshape(9, Cin, np_)
    bias2d = cp["b"].reshape(1, np_)
    offs = tuple(di * Wp + dj for di in range(3) for dj in range(3))

    cost = pl.CostEstimate(
        flops=2 * B * m_rows * 9 * Cin * np_, transcendentals=0,
        bytes_accessed=2 * (B * R * Cin + 9 * Cin * np_ + B * m_rows * np_)
        + 4 * np_)

    out = pl.pallas_call(
        functools.partial(_conv3x3_kernel, offs=offs, m_rows=m_rows, relu=relu),
        out_shape=jax.ShapeDtypeStruct((B, m_rows, np_), jnp.bfloat16),
        grid_spec=pltpu.PrefetchScalarGridSpec(
            num_scalar_prefetch=0,
            grid=(B,),
            in_specs=[
                pl.BlockSpec((None, R, Cin), lambda b: (b, 0, 0)),   # activation
                pl.BlockSpec((9, Cin, np_), lambda b: (0, 0, 0)),    # 9 tap slabs
                pl.BlockSpec((1, np_), lambda b: (0, 0)),            # bias
            ],
            out_specs=pl.BlockSpec((None, m_rows, np_), lambda b: (b, 0, 0)),
        ),
        compiler_params=pltpu.CompilerParams(
            dimension_semantics=("parallel",),
            vmem_limit_bytes=_VMEM_LIMIT),
        cost_estimate=cost,
    )(a, w9, bias2d)
    return out.reshape(B, H, Wp, np_)[:, :, :W, :cout]


# ----------------------------------------------------------------------------
# Layer helpers (NHWC). Conv -> Pallas (direct 3x3 or im2col matmul); pooling /
# GroupNorm stats / bilinear resize / sigmoid remain thin XLA glue.
# ----------------------------------------------------------------------------
def conv2d(x, cp, ksize, stride=1, padding=0, relu=False):
    kh = kw = ksize
    B, H, W, Cin = x.shape
    cout = cp["cout"]
    if (ksize == 3 and stride == 1 and padding == 1
            and Cin % 128 == 0 and B * H * W >= 128):
        return _conv3x3_fused(x, cp, relu)
    if padding:
        x = jnp.pad(x, ((0, 0), (padding, padding), (padding, padding), (0, 0)))
    Hpad, Wpad = x.shape[1], x.shape[2]
    Ho = (Hpad - kh) // stride + 1
    Wo = (Wpad - kw) // stride + 1
    xb = x.astype(jnp.bfloat16)
    if kh == 1 and kw == 1 and stride == 1:
        A = xb.reshape(B * Ho * Wo, Cin)           # pure reshape, no transpose
    else:
        cols = [xb[:, i:i + stride * (Ho - 1) + 1:stride,
                   j:j + stride * (Wo - 1) + 1:stride, :]
                for i in range(kh) for j in range(kw)]
        A = jnp.concatenate(cols, axis=-1).reshape(B * Ho * Wo, kh * kw * Cin)
    out = matmul(A, cp["w"], cp["b"], relu=relu)
    return out.reshape(B, Ho, Wo, -1)[..., :cout]


def linear(x, lp, relu=False):
    return matmul(x, lp["w"], lp["b"], relu=relu)


def group_norm(x, weight, bias, groups, eps=1e-5):
    """NHWC GroupNorm; stats in f32, output cast back to input dtype."""
    B, H, W, C = x.shape
    xf = x.astype(jnp.float32)
    xg = xf.reshape(B, H * W, groups, C // groups)
    mean = jnp.mean(xg, axis=(1, 3), keepdims=True)
    var = jnp.mean((xg - mean) ** 2, axis=(1, 3), keepdims=True)
    xn = ((xg - mean) * jax.lax.rsqrt(var + eps)).reshape(B, H, W, C)
    out = xn * weight.reshape(1, 1, 1, C) + bias.reshape(1, 1, 1, C)
    return out.astype(x.dtype)


def group_norm_1d(x, weight, bias, groups, eps=1e-5):
    B, C = x.shape
    xf = x.astype(jnp.float32)
    xg = xf.reshape(B, groups, C // groups)
    mean = jnp.mean(xg, axis=-1, keepdims=True)
    var = jnp.mean((xg - mean) ** 2, axis=-1, keepdims=True)
    xn = ((xg - mean) * jax.lax.rsqrt(var + eps)).reshape(B, C)
    return (xn * weight[None, :] + bias[None, :]).astype(x.dtype)


def relu(x):
    return jnp.maximum(x, 0.0)


def max_pool2d(x, k, s, pad):
    init = jnp.array(-jnp.inf, x.dtype)
    return jax.lax.reduce_window(
        x, init, jax.lax.max, (1, k, k, 1), (1, s, s, 1),
        ((0, 0), (pad, pad), (pad, pad), (0, 0)))


def avg_pool2d(x, k):
    init = jnp.array(0.0, x.dtype)
    s = jax.lax.reduce_window(
        x, init, jax.lax.add, (1, k, k, 1), (1, k, k, 1), "VALID")
    return s / float(k * k)


def upsample_add(x, y):
    up = jax.image.resize(
        x.astype(jnp.float32),
        (x.shape[0], y.shape[1], y.shape[2], x.shape[3]), method="bilinear")
    return up + y.astype(jnp.float32)


def get_groups(channels):
    if channels <= 8:
        return 1
    elif channels <= 16:
        return 2
    elif channels <= 32:
        return 4
    elif channels <= 64:
        return 8
    elif channels <= 128:
        return 16
    else:
        return 32


# ----------------------------------------------------------------------------
# Parameter init + one-time packing (lane-dense bf16 weights, f32 biases)
# ----------------------------------------------------------------------------
def _kaiming_conv(key, cout, cin, kh, kw):
    fan_out = cout * kh * kw
    std = (2.0 / fan_out) ** 0.5
    return std * jax.random.normal(key, (cout, cin, kh, kw), jnp.float32)


def init_params(key, num_classes=8, input_channels=3):
    keys = iter(jax.random.split(key, 64))
    nk = lambda: next(keys)
    ones = lambda c: jnp.ones((c,), jnp.float32)
    zeros = lambda c: jnp.zeros((c,), jnp.float32)

    def conv(cout, cin, k):
        w = _kaiming_conv(nk(), cout, cin, k, k)
        np_ = max(128, ((cout + 127) // 128) * 128)         # lane-dense pad
        wp = w.transpose(2, 3, 1, 0).reshape(k * k * cin, cout)  # (tap,c) rows
        wp = jnp.pad(wp, ((0, 0), (0, np_ - cout))).astype(jnp.bfloat16)
        return {"w": wp, "b": jnp.zeros((np_,), jnp.float32), "cout": cout}

    def lin(cout, cin):
        w = 0.01 * jax.random.normal(nk(), (cout, cin), jnp.float32)
        return {"w": w.T.astype(jnp.bfloat16), "b": zeros(cout)}

    p = {}
    p["stem"] = {
        "gn0_w": ones(input_channels), "gn0_b": zeros(input_channels),
        "conv": conv(64, input_channels, 7),
        "gn1_w": ones(64), "gn1_b": zeros(64),
    }
    dense = []
    for i in range(6):
        cin = 64 + i * 32
        dense.append({
            "gn_a_w": ones(cin), "gn_a_b": zeros(cin),
            "conv1": conv(128, cin, 1),
            "gn_b_w": ones(128), "gn_b_b": zeros(128),
            "conv2": conv(32, 128, 3),
        })
    p["dense"] = dense
    p["trans1"] = {"gn_w": ones(256), "gn_b": zeros(256),
                   "conv": conv(128, 256, 1)}

    def res_block(cin, cout, shortcut):
        d = {"conv1": conv(cout, cin, 3),
             "gn1_w": ones(cout), "gn1_b": zeros(cout),
             "conv2": conv(cout, cout, 3),
             "gn2_w": ones(cout), "gn2_b": zeros(cout)}
        if shortcut:
            d["sc_conv"] = conv(cout, cin, 1)
            d["sc_gn_w"] = ones(cout)
            d["sc_gn_b"] = zeros(cout)
        return d

    p["res1"] = res_block(128, 128, shortcut=False)
    p["res2"] = res_block(128, 256, shortcut=True)
    p["res3"] = res_block(256, 512, shortcut=True)

    p["attn"] = {"fc1": lin(32, 512), "fc2": lin(512, 32), "sp": conv(1, 2, 7)}
    p["fpn"] = {"lat1": conv(256, 128, 1), "lat2": conv(256, 256, 1),
                "lat3": conv(256, 512, 1), "out1": conv(256, 256, 3),
                "out2": conv(256, 256, 3), "out3": conv(256, 256, 3)}
    p["cls"] = {"fc1": lin(512, 512), "gn1_w": ones(512), "gn1_b": zeros(512),
                "fc2": lin(256, 512), "gn2_w": ones(256), "gn2_b": zeros(256),
                "fc3": lin(num_classes, 256)}
    return p


# ----------------------------------------------------------------------------
# Forward pass
# ----------------------------------------------------------------------------
def residual_block(p, x, stride):
    cout = p["conv1"]["cout"]
    out = conv2d(x, p["conv1"], 3, stride=stride, padding=1)
    out = group_norm(out, p["gn1_w"], p["gn1_b"], get_groups(cout))
    out = relu(out)
    out = conv2d(out, p["conv2"], 3, padding=1)
    out = group_norm(out, p["gn2_w"], p["gn2_b"], get_groups(cout))
    if "sc_conv" in p:
        identity = conv2d(x, p["sc_conv"], 1, stride=stride)
        identity = group_norm(identity, p["sc_gn_w"], p["sc_gn_b"],
                              get_groups(cout))
    else:
        identity = x
    return relu(out + identity)


def multiscale_attention(p, x):
    B, H, W, C = x.shape
    avg = jnp.mean(x, axis=(1, 2))
    mx = jnp.max(x, axis=(1, 2))
    pooled = jnp.concatenate([avg, mx], axis=0)     # shared MLP, M = 2B
    h = linear(pooled, p["fc1"], relu=True)
    h = linear(h, p["fc2"])
    ch_att = jax.nn.sigmoid(h[:B] + h[B:]).reshape(B, 1, 1, C)
    x = x * ch_att
    avg_out = jnp.mean(x, axis=-1, keepdims=True)
    max_out = jnp.max(x, axis=-1, keepdims=True)
    spatial = jnp.concatenate([avg_out, max_out], axis=-1)
    sp_att = jax.nn.sigmoid(conv2d(spatial, p["sp"], 7, padding=3))
    return x * sp_att


def hybridnet_forward(params, x_nchw):
    # Single layout change: NCHW (PyTorch) -> NHWC (lane-dense channels).
    x = jnp.transpose(x_nchw, (0, 2, 3, 1))

    # stem: GN(1, Cin) -> Conv 7x7 s2 p3 -> GN -> ReLU -> MaxPool
    s = params["stem"]
    h = group_norm(x, s["gn0_w"], s["gn0_b"], 1)
    h = conv2d(h, s["conv"], 7, stride=2, padding=3)
    h = group_norm(h, s["gn1_w"], s["gn1_b"], get_groups(64))
    h = relu(h)
    h = max_pool2d(h, 3, 2, 1)

    # dense block (6 layers, growth 32)
    features = [h]
    for lp in params["dense"]:
        inp = jnp.concatenate(features, axis=-1)
        cin = inp.shape[-1]
        t = relu(group_norm(inp, lp["gn_a_w"], lp["gn_a_b"], get_groups(cin)))
        t = conv2d(t, lp["conv1"], 1)
        t = relu(group_norm(t, lp["gn_b_w"], lp["gn_b_b"], get_groups(128)))
        t = conv2d(t, lp["conv2"], 3, padding=1)
        features.append(t)
    h = jnp.concatenate(features, axis=-1)            # (B, H, W, 256)

    # transition
    tp = params["trans1"]
    h = group_norm(h, tp["gn_w"], tp["gn_b"], get_groups(256))
    h = conv2d(h, tp["conv"], 1)
    h = avg_pool2d(h, 2)
    c1 = h

    # residual stages
    h = residual_block(params["res1"], h, stride=1)
    h = residual_block(params["res2"], h, stride=2)
    c2 = h
    h = residual_block(params["res3"], h, stride=2)
    c3 = h

    # FPN (computed for fidelity with the reference forward; its outputs are
    # not consumed by the returned logits, so XLA dead-code-eliminates it)
    fp = params["fpn"]
    l3 = conv2d(c3, fp["lat3"], 1)
    l2 = conv2d(c2, fp["lat2"], 1)
    l1 = conv2d(c1, fp["lat1"], 1)
    p3 = conv2d(l3, fp["out3"], 3, padding=1)
    p2 = conv2d(l2 + upsample_add(l3, l2), fp["out2"], 3, padding=1)
    p1 = conv2d(l1 + upsample_add(p2, l1), fp["out1"], 3, padding=1)
    del p1, p3  # unused downstream (matches reference forward)

    # attention + global average pool + classifier
    h = multiscale_attention(params["attn"], h)
    h = jnp.mean(h, axis=(1, 2))                      # AdaptiveAvgPool2d(1)

    cl = params["cls"]
    h = linear(h, cl["fc1"])
    h = relu(group_norm_1d(h, cl["gn1_w"], cl["gn1_b"], get_groups(512)))
    # Dropout is identity at inference
    h = linear(h, cl["fc2"])
    h = relu(group_norm_1d(h, cl["gn2_w"], cl["gn2_b"], get_groups(256)))
    h = linear(h, cl["fc3"])
    return h                                          # (B, num_classes)


# ----------------------------------------------------------------------------
if __name__ == "__main__":
    key = jax.random.PRNGKey(0)
    pkey, xkey = jax.random.split(key)
    params = init_params(pkey, num_classes=8, input_channels=3)
    x = jax.random.normal(xkey, (2, 3, 64, 64), jnp.float32)

    fwd = jax.jit(functools.partial(hybridnet_forward, params))
    out = jax.block_until_ready(fwd(x))
    assert out.shape == (2, 8), out.shape
    assert bool(jnp.all(jnp.isfinite(out)))
    print("KERNEL_OK")
</pallas_src>

<mosaic_0001>
module attributes {stable_mosaic.version = 11 : i64} {
  func.func @_mm_kernel(%arg0: i32, %arg1: i32, %arg2: memref<2048x147xbf16, #tpu.memory_space<vmem>>, %arg3: memref<147x128xbf16, #tpu.memory_space<vmem>>, %arg4: memref<1x128xf32, #tpu.memory_space<vmem>>, %arg5: memref<2048x128xbf16, #tpu.memory_space<vmem>>) attributes {dimension_semantics = [#tpu.dimension_semantics<parallel>, #tpu.dimension_semantics<parallel>], iteration_bounds = array<i64: 1, 1>, scalar_prefetch = 0 : i64, scratch_operands = 0 : i64, tpu.core_type = #tpu.core_type<tc>, window_params = [{transform_indices = @transform_0, window_bounds = array<i64: 2048, 147>}, {transform_indices = @transform_1, window_bounds = array<i64: 147, 128>}, {transform_indices = @transform_2, window_bounds = array<i64: 1, 128>}, {transform_indices = @transform_3, window_bounds = array<i64: 2048, 128>}]} {
    %c0 = arith.constant 0 : index
    %c0_0 = arith.constant 0 : index
    %0 = vector.load %arg2[%c0, %c0_0] : memref<2048x147xbf16, #tpu.memory_space<vmem>>, vector<2048x147xbf16>
    %c0_1 = arith.constant 0 : index
    %c0_2 = arith.constant 0 : index
    %1 = vector.load %arg3[%c0_1, %c0_2] : memref<147x128xbf16, #tpu.memory_space<vmem>>, vector<147x128xbf16>
    %cst = arith.constant dense<0.000000e+00> : vector<2048x128xf32>
    %2 = tpu.matmul %0, %1, %cst {dimension_numbers = #tpu.dot_dimension_numbers<[1], [0], [0], [1], [0, 0, 1, 1], [], []>} : vector<2048x147xbf16>, vector<147x128xbf16>, vector<2048x128xf32> -> vector<2048x128xf32>
    %c0_3 = arith.constant 0 : index
    %c0_4 = arith.constant 0 : index
    %3 = vector.load %arg4[%c0_3, %c0_4] : memref<1x128xf32, #tpu.memory_space<vmem>>, vector<1x128xf32>
    %4 = vector.broadcast %3 : vector<1x128xf32> to vector<2048x128xf32>
    %5 = arith.addf %2, %4 : vector<2048x128xf32>
    %6 = arith.truncf %5 : vector<2048x128xf32> to vector<2048x128xbf16>
    %c0_5 = arith.constant 0 : index
    %c0_6 = arith.constant 0 : index
    %7 = vector.load %arg5[%c0_5, %c0_6] : memref<2048x128xbf16, #tpu.memory_space<vmem>>, vector<2048x128xbf16>
    tpu.vector_store %arg5[%c0_5, %c0_6], %6 {strides = array<i32>} : memref<2048x128xbf16, #tpu.memory_space<vmem>>, vector<2048x128xbf16>,
    return
  }
  func.func @transform_0(%arg0: i32, %arg1: i32) -> (i32, i32) {
    %c0_i32 = arith.constant 0 : i32
    %c0_i32_0 = arith.constant 0 : i32
    return %arg0, %c0_i32 : i32, i32
  }
  func.func @transform_1(%arg0: i32, %arg1: i32) -> (i32, i32) {
    %c0_i32 = arith.constant 0 : i32
    %c0_i32_0 = arith.constant 0 : i32
    return %c0_i32, %arg1 : i32, i32
  }
  func.func @transform_2(%arg0: i32, %arg1: i32) -> (i32, i32) {
    %c0_i32 = arith.constant 0 : i32
    %c0_i32_0 = arith.constant 0 : i32
    return %c0_i32, %arg1 : i32, i32
  }
  func.func @transform_3(%arg0: i32, %arg1: i32) -> (i32, i32) {
    %c0_i32 = arith.constant 0 : i32
    return %arg0, %arg1 : i32, i32
  }
}

module attributes {stable_mosaic.version = 11 : i64} {
  func.func @_mm_kernel(%arg0: i32, %arg1: i32, %arg2: memref<512x64xbf16, #tpu.memory_space<vmem>>, %arg3: memref<64x128xbf16, #tpu.memory_space<vmem>>, %arg4: memref<1x128xf32, #tpu.memory_space<vmem>>, %arg5: memref<512x128xbf16, #tpu.memory_space<vmem>>) attributes {dimension_semantics = [#tpu.dimension_semantics<parallel>, #tpu.dimension_semantics<parallel>], iteration_bounds = array<i64: 1, 1>, scalar_prefetch = 0 : i64, scratch_operands = 0 : i64, tpu.core_type = #tpu.core_type<tc>, window_params = [{transform_indices = @transform_0, window_bounds = array<i64: 512, 64>}, {transform_indices = @transform_1, window_bounds = array<i64: 64, 128>}, {transform_indices = @transform_2, window_bounds = array<i64: 1, 128>}, {transform_indices = @transform_3, window_bounds = array<i64: 512, 128>}]} {
    %c0 = arith.constant 0 : index
    %c0_0 = arith.constant 0 : index
    %0 = vector.load %arg2[%c0, %c0_0] : memref<512x64xbf16, #tpu.memory_space<vmem>>, vector<512x64xbf16>
    %c0_1 = arith.constant 0 : index
    %c0_2 = arith.constant 0 : index
    %1 = vector.load %arg3[%c0_1, %c0_2] : memref<64x128xbf16, #tpu.memory_space<vmem>>, vector<64x128xbf16>
    %cst = arith.constant dense<0.000000e+00> : vector<512x128xf32>
    %2 = tpu.matmul %0, %1, %cst {dimension_numbers = #tpu.dot_dimension_numbers<[1], [0], [0], [1], [0, 0, 1, 1], [], []>} : vector<512x64xbf16>, vector<64x128xbf16>, vector<512x128xf32> -> vector<512x128xf32>
    %c0_3 = arith.constant 0 : index
    %c0_4 = arith.constant 0 : index
    %3 = vector.load %arg4[%c0_3, %c0_4] : memref<1x128xf32, #tpu.memory_space<vmem>>, vector<1x128xf32>
    %4 = vector.broadcast %3 : vector<1x128xf32> to vector<512x128xf32>
    %5 = arith.addf %2, %4 : vector<512x128xf32>
    %6 = arith.truncf %5 : vector<512x128xf32> to vector<512x128xbf16>
    %c0_5 = arith.constant 0 : index
    %c0_6 = arith.constant 0 : index
    %7 = vector.load %arg5[%c0_5, %c0_6] : memref<512x128xbf16, #tpu.memory_space<vmem>>, vector<512x128xbf16>
    tpu.vector_store %arg5[%c0_5, %c0_6], %6 {strides = array<i32>} : memref<512x128xbf16, #tpu.memory_space<vmem>>, vector<512x128xbf16>,
    return
  }
  func.func @transform_0(%arg0: i32, %arg1: i32) -> (i32, i32) {
    %c0_i32 = arith.constant 0 : i32
    %c0_i32_0 = arith.constant 0 : i32
    return %arg0, %c0_i32 : i32, i32
  }
  func.func @transform_1(%arg0: i32, %arg1: i32) -> (i32, i32) {
    %c0_i32 = arith.constant 0 : i32
    %c0_i32_0 = arith.constant 0 : i32
    return %c0_i32, %arg1 : i32, i32
  }
  func.func @transform_2(%arg0: i32, %arg1: i32) -> (i32, i32) {
    %c0_i32 = arith.constant 0 : i32
    %c0_i32_0 = arith.constant 0 : i32
    return %c0_i32, %arg1 : i32, i32
  }
  func.func @transform_3(%arg0: i32, %arg1: i32) -> (i32, i32) {
    %c0_i32 = arith.constant 0 : i32
    return %arg0, %arg1 : i32, i32
  }
}

module attributes {stable_mosaic.version = 11 : i64} {
  func.func @_conv3x3_kernel(%arg0: i32, %arg1: memref<1x326x128xbf16, #tpu.memory_space<vmem>>, %arg2: memref<9x128x128xbf16, #tpu.memory_space<vmem>>, %arg3: memref<1x128xf32, #tpu.memory_space<vmem>>, %arg4: memref<1x288x128xbf16, #tpu.memory_space<vmem>>) attributes {dimension_semantics = [#tpu.dimension_semantics<parallel>], iteration_bounds = array<i64: 2>, scalar_prefetch = 0 : i64, scratch_operands = 0 : i64, tpu.core_type = #tpu.core_type<tc>, window_params = [{transform_indices = @transform_0, window_bounds = array<i64: 1, 326, 128>}, {pipeline_mode = #tpu.pipeline_mode<synchronous>, transform_indices = @transform_1, window_bounds = array<i64: 9, 128, 128>}, {pipeline_mode = #tpu.pipeline_mode<synchronous>, transform_indices = @transform_2, window_bounds = array<i64: 1, 128>}, {transform_indices = @transform_3, window_bounds = array<i64: 1, 288, 128>}]} {
    %c0 = arith.constant 0 : index
    %c0_0 = arith.constant 0 : index
    %c0_1 = arith.constant 0 : index
    %0 = vector.load %arg1[%c0, %c0_0, %c0_1] : memref<1x326x128xbf16, #tpu.memory_space<vmem>>, vector<1x288x128xbf16>
    %1 = vector.shape_cast %0 : vector<1x288x128xbf16> to vector<288x128xbf16>
    %c0_2 = arith.constant 0 : index
    %c0_3 = arith.constant 0 : index
    %c0_4 = arith.constant 0 : index
    %2 = vector.load %arg2[%c0_2, %c0_3, %c0_4] : memref<9x128x128xbf16, #tpu.memory_space<vmem>>, vector<1x128x128xbf16>
    %3 = vector.shape_cast %2 : vector<1x128x128xbf16> to vector<128x128xbf16>
    %cst = arith.constant dense<0.000000e+00> : vector<288x128xf32>
    %4 = tpu.matmul %1, %3, %cst {dimension_numbers = #tpu.dot_dimension_numbers<[1], [0], [0], [1], [0, 0, 1, 1], [], []>} : vector<288x128xbf16>, vector<128x128xbf16>, vector<288x128xf32> -> vector<288x128xf32>
    %c0_5 = arith.constant 0 : index
    %c1 = arith.constant 1 : index
    %c0_6 = arith.constant 0 : index
    %5 = vector.load %arg1[%c0_5, %c1, %c0_6] : memref<1x326x128xbf16, #tpu.memory_space<vmem>>, vector<1x288x128xbf16>
    %6 = vector.shape_cast %5 : vector<1x288x128xbf16> to vector<288x128xbf16>
    %c1_7 = arith.constant 1 : index
    %c0_8 = arith.constant 0 : index
    %c0_9 = arith.constant 0 : index
    %7 = vector.load %arg2[%c1_7, %c0_8, %c0_9] : memref<9x128x128xbf16, #tpu.memory_space<vmem>>, vector<1x128x128xbf16>
    %8 = vector.shape_cast %7 : vector<1x128x128xbf16> to vector<128x128xbf16>
    %cst_10 = arith.constant dense<0.000000e+00> : vector<288x128xf32>
    %9 = tpu.matmul %6, %8, %cst_10 {dimension_numbers = #tpu.dot_dimension_numbers<[1], [0], [0], [1], [0, 0, 1, 1], [], []>} : vector<288x128xbf16>, vector<128x128xbf16>, vector<288x128xf32> -> vector<288x128xf32>
    %10 = arith.addf %4, %9 : vector<288x128xf32>
    %c0_11 = arith.constant 0 : index
    %c2 = arith.constant 2 : index
    %c0_12 = arith.constant 0 : index
    %11 = vector.load %arg1[%c0_11, %c2, %c0_12] : memref<1x326x128xbf16, #tpu.memory_space<vmem>>, vector<1x288x128xbf16>
    %12 = vector.shape_cast %11 : vector<1x288x128xbf16> to vector<288x128xbf16>
    %c2_13 = arith.constant 2 : index
    %c0_14 = arith.constant 0 : index
    %c0_15 = arith.constant 0 : index
    %13 = vector.load %arg2[%c2_13, %c0_14, %c0_15] : memref<9x128x128xbf16, #tpu.memory_space<vmem>>, vector<1x128x128xbf16>
    %14 = vector.shape_cast %13 : vector<1x128x128xbf16> to vector<128x128xbf16>
    %cst_16 = arith.constant dense<0.000000e+00> : vector<288x128xf32>
    %15 = tpu.matmul %12, %14, %cst_16 {dimension_numbers = #tpu.dot_dimension_numbers<[1], [0], [0], [1], [0, 0, 1, 1], [], []>} : vector<288x128xbf16>, vector<128x128xbf16>, vector<288x128xf32> -> vector<288x128xf32>
    %16 = arith.addf %10, %15 : vector<288x128xf32>
    %c0_17 = arith.constant 0 : index
    %c18 = arith.constant 18 : index
    %c0_18 = arith.constant 0 : index
    %17 = vector.load %arg1[%c0_17, %c18, %c0_18] : memref<1x326x128xbf16, #tpu.memory_space<vmem>>, vector<1x288x128xbf16>
    %18 = vector.shape_cast %17 : vector<1x288x128xbf16> to vector<288x128xbf16>
    %c3 = arith.constant 3 : index
    %c0_19 = arith.constant 0 : index
    %c0_20 = arith.constant 0 : index
    %19 = vector.load %arg2[%c3, %c0_19, %c0_20] : memref<9x128x128xbf16, #tpu.memory_space<vmem>>, vector<1x128x128xbf16>
    %20 = vector.shape_cast %19 : vector<1x128x128xbf16> to vector<128x128xbf16>
    %cst_21 = arith.constant dense<0.000000e+00> : vector<288x128xf32>
    %21 = tpu.matmul %18, %20, %cst_21 {dimension_numbers = #tpu.dot_dimension_numbers<[1], [0], [0], [1], [0, 0, 1, 1], [], []>} : vector<288x128xbf16>, vector<128x128xbf16>, vector<288x128xf32> -> vector<288x128xf32>
    %22 = arith.addf %16, %21 : vector<288x128xf32>
    %c0_22 = arith.constant 0 : index
    %c19 = arith.constant 19 : index
    %c0_23 = arith.constant 0 : index
    %23 = vector.load %arg1[%c0_22, %c19, %c0_23] : memref<1x326x128xbf16, #tpu.memory_space<vmem>>, vector<1x288x128xbf16>
    %24 = vector.shape_cast %23 : vector<1x288x128xbf16> to vector<288x128xbf16>
    %c4 = arith.constant 4 : index
    %c0_24 = arith.constant 0 : index
    %c0_25 = arith.constant 0 : index
    %25 = vector.load %arg2[%c4, %c0_24, %c0_25] : memref<9x128x128xbf16, #tpu.memory_space<vmem>>, vector<1x128x128xbf16>
    %26 = vector.shape_cast %25 : vector<1x128x128xbf16> to vector<128x128xbf16>
    %cst_26 = arith.constant dense<0.000000e+00> : vector<288x128xf32>
    %27 = tpu.matmul %24, %26, %cst_26 {dimension_numbers = #tpu.dot_dimension_numbers<[1], [0], [0], [1], [0, 0, 1, 1], [], []>} : vector<288x128xbf16>, vector<128x128xbf16>, vector<288x128xf32> -> vector<288x128xf32>
    %28 = arith.addf %22, %27 : vector<288x128xf32>
    %c0_27 = arith.constant 0 : index
    %c20 = arith.constant 20 : index
    %c0_28 = arith.constant 0 : index
    %29 = vector.load %arg1[%c0_27, %c20, %c0_28] : memref<1x326x128xbf16, #tpu.memory_space<vmem>>, vector<1x288x128xbf16>
    %30 = vector.shape_cast %29 : vector<1x288x128xbf16> to vector<288x128xbf16>
    %c5 = arith.constant 5 : index
    %c0_29 = arith.constant 0 : index
    %c0_30 = arith.constant 0 : index
    %31 = vector.load %arg2[%c5, %c0_29, %c0_30] : memref<9x128x128xbf16, #tpu.memory_space<vmem>>, vector<1x128x128xbf16>
    %32 = vector.shape_cast %31 : vector<1x128x128xbf16> to vector<128x128xbf16>
    %cst_31 = arith.constant dense<0.000000e+00> : vector<288x128xf32>
    %33 = tpu.matmul %30, %32, %cst_31 {dimension_numbers = #tpu.dot_dimension_numbers<[1], [0], [0], [1], [0, 0, 1, 1], [], []>} : vector<288x128xbf16>, vector<128x128xbf16>, vector<288x128xf32> -> vector<288x128xf32>
    %34 = arith.addf %28, %33 : vector<288x128xf32>
    %c0_32 = arith.constant 0 : index
    %c36 = arith.constant 36 : index
    %c0_33 = arith.constant 0 : index
    %35 = vector.load %arg1[%c0_32, %c36, %c0_33] : memref<1x326x128xbf16, #tpu.memory_space<vmem>>, vector<1x288x128xbf16>
    %36 = vector.shape_cast %35 : vector<1x288x128xbf16> to vector<288x128xbf16>
    %c6 = arith.constant 6 : index
    %c0_34 = arith.constant 0 : index
    %c0_35 = arith.constant 0 : index
    %37 = vector.load %arg2[%c6, %c0_34, %c0_35] : memref<9x128x128xbf16, #tpu.memory_space<vmem>>, vector<1x128x128xbf16>
    %38 = vector.shape_cast %37 : vector<1x128x128xbf16> to vector<128x128xbf16>
    %cst_36 = arith.constant dense<0.000000e+00> : vector<288x128xf32>
    %39 = tpu.matmul %36, %38, %cst_36 {dimension_numbers = #tpu.dot_dimension_numbers<[1], [0], [0], [1], [0, 0, 1, 1], [], []>} : vector<288x128xbf16>, vector<128x128xbf16>, vector<288x128xf32> -> vector<288x128xf32>
    %40 = arith.addf %34, %39 : vector<288x128xf32>
    %c0_37 = arith.constant 0 : index
    %c37 = arith.constant 37 : index
    %c0_38 = arith.constant 0 : index
    %41 = vector.load %arg1[%c0_37, %c37, %c0_38] : memref<1x326x128xbf16, #tpu.memory_space<vmem>>, vector<1x288x128xbf16>
    %42 = vector.shape_cast %41 : vector<1x288x128xbf16> to vector<288x128xbf16>
    %c7 = arith.constant 7 : index
    %c0_39 = arith.constant 0 : index
    %c0_40 = arith.constant 0 : index
    %43 = vector.load %arg2[%c7, %c0_39, %c0_40] : memref<9x128x128xbf16, #tpu.memory_space<vmem>>, vector<1x128x128xbf16>
    %44 = vector.shape_cast %43 : vector<1x128x128xbf16> to vector<128x128xbf16>
    %cst_41 = arith.constant dense<0.000000e+00> : vector<288x128xf32>
    %45 = tpu.matmul %42, %44, %cst_41 {dimension_numbers = #tpu.dot_dimension_numbers<[1], [0], [0], [1], [0, 0, 1, 1], [], []>} : vector<288x128xbf16>, vector<128x128xbf16>, vector<288x128xf32> -> vector<288x128xf32>
    %46 = arith.addf %40, %45 : vector<288x128xf32>
    %c0_42 = arith.constant 0 : index
    %c38 = arith.constant 38 : index
    %c0_43 = arith.constant 0 : index
    %47 = vector.load %arg1[%c0_42, %c38, %c0_43] : memref<1x326x128xbf16, #tpu.memory_space<vmem>>, vector<1x288x128xbf16>
    %48 = vector.shape_cast %47 : vector<1x288x128xbf16> to vector<288x128xbf16>
    %c8 = arith.constant 8 : index
    %c0_44 = arith.constant 0 : index
    %c0_45 = arith.constant 0 : index
    %49 = vector.load %arg2[%c8, %c0_44, %c0_45] : memref<9x128x128xbf16, #tpu.memory_space<vmem>>, vector<1x128x128xbf16>
    %50 = vector.shape_cast %49 : vector<1x128x128xbf16> to vector<128x128xbf16>
    %cst_46 = arith.constant dense<0.000000e+00> : vector<288x128xf32>
    %51 = tpu.matmul %48, %50, %cst_46 {dimension_numbers = #tpu.dot_dimension_numbers<[1], [0], [0], [1], [0, 0, 1, 1], [], []>} : vector<288x128xbf16>, vector<128x128xbf16>, vector<288x128xf32> -> vector<288x128xf32>
    %52 = arith.addf %46, %51 : vector<288x128xf32>
    %c0_47 = arith.constant 0 : index
    %c0_48 = arith.constant 0 : index
    %53 = vector.load %arg3[%c0_47, %c0_48] : memref<1x128xf32, #tpu.memory_space<vmem>>, vector<1x128xf32>
    %54 = vector.broadcast %53 : vector<1x128xf32> to vector<288x128xf32>
    %55 = arith.addf %52, %54 : vector<288x128xf32>
    %56 = arith.truncf %55 : vector<288x128xf32> to vector<288x128xbf16>
    %c0_49 = arith.constant 0 : index
    %c0_50 = arith.constant 0 : index
    %c0_51 = arith.constant 0 : index
    %57 = vector.load %arg4[%c0_49, %c0_50, %c0_51] : memref<1x288x128xbf16, #tpu.memory_space<vmem>>, vector<1x288x128xbf16>
    %58 = vector.shape_cast %57 : vector<1x288x128xbf16> to vector<288x128xbf16>
    %59 = vector.shape_cast %56 : vector<288x128xbf16> to vector<1x288x128xbf16>
    tpu.vector_store %arg4[%c0_49, %c0_50, %c0_51], %59 {strides = array<i32>} : memref<1x288x128xbf16, #tpu.memory_space<vmem>>, vector<1x288x128xbf16>,
    return
  }
  func.func @transform_0(%arg0: i32) -> (i32, i32, i32) {
    %c0_i32 = arith.constant 0 : i32
    %c0_i32_0 = arith.constant 0 : i32
    %c0_i32_1 = arith.constant 0 : i32
    return %arg0, %c0_i32, %c0_i32_0 : i32, i32, i32
  }
  func.func @transform_1(%arg0: i32) -> (i32, i32, i32) {
    %c0_i32 = arith.constant 0 : i32
    %c0_i32_0 = arith.constant 0 : i32
    %c0_i32_1 = arith.constant 0 : i32
    %c0_i32_2 = arith.constant 0 : i32
    return %c0_i32, %c0_i32_0, %c0_i32_1 : i32, i32, i32
  }
  func.func @transform_2(%arg0: i32) -> (i32, i32) {
    %c0_i32 = arith.constant 0 : i32
    %c0_i32_0 = arith.constant 0 : i32
    %c0_i32_1 = arith.constant 0 : i32
    return %c0_i32, %c0_i32_0 : i32, i32
  }
  func.func @transform_3(%arg0: i32) -> (i32, i32, i32) {
    %c0_i32 = arith.constant 0 : i32
    %c0_i32_0 = arith.constant 0 : i32
    %c0_i32_1 = arith.constant 0 : i32
    return %arg0, %c0_i32, %c0_i32_0 : i32, i32, i32
  }
}

module attributes {stable_mosaic.version = 11 : i64} {
  func.func @_mm_kernel(%arg0: i32, %arg1: i32, %arg2: memref<512x96xbf16, #tpu.memory_space<vmem>>, %arg3: memref<96x128xbf16, #tpu.memory_space<vmem>>, %arg4: memref<1x128xf32, #tpu.memory_space<vmem>>, %arg5: memref<512x128xbf16, #tpu.memory_space<vmem>>) attributes {dimension_semantics = [#tpu.dimension_semantics<parallel>, #tpu.dimension_semantics<parallel>], iteration_bounds = array<i64: 1, 1>, scalar_prefetch = 0 : i64, scratch_operands = 0 : i64, tpu.core_type = #tpu.core_type<tc>, window_params = [{transform_indices = @transform_0, window_bounds = array<i64: 512, 96>}, {transform_indices = @transform_1, window_bounds = array<i64: 96, 128>}, {transform_indices = @transform_2, window_bounds = array<i64: 1, 128>}, {transform_indices = @transform_3, window_bounds = array<i64: 512, 128>}]} {
    %c0 = arith.constant 0 : index
    %c0_0 = arith.constant 0 : index
    %0 = vector.load %arg2[%c0, %c0_0] : memref<512x96xbf16, #tpu.memory_space<vmem>>, vector<512x96xbf16>
    %c0_1 = arith.constant 0 : index
    %c0_2 = arith.constant 0 : index
    %1 = vector.load %arg3[%c0_1, %c0_2] : memref<96x128xbf16, #tpu.memory_space<vmem>>, vector<96x128xbf16>
    %cst = arith.constant dense<0.000000e+00> : vector<512x128xf32>
    %2 = tpu.matmul %0, %1, %cst {dimension_numbers = #tpu.dot_dimension_numbers<[1], [0], [0], [1], [0, 0, 1, 1], [], []>} : vector<512x96xbf16>, vector<96x128xbf16>, vector<512x128xf32> -> vector<512x128xf32>
    %c0_3 = arith.constant 0 : index
    %c0_4 = arith.constant 0 : index
    %3 = vector.load %arg4[%c0_3, %c0_4] : memref<1x128xf32, #tpu.memory_space<vmem>>, vector<1x128xf32>
    %4 = vector.broadcast %3 : vector<1x128xf32> to vector<512x128xf32>
    %5 = arith.addf %2, %4 : vector<512x128xf32>
    %6 = arith.truncf %5 : vector<512x128xf32> to vector<512x128xbf16>
    %c0_5 = arith.constant 0 : index
    %c0_6 = arith.constant 0 : index
    %7 = vector.load %arg5[%c0_5, %c0_6] : memref<512x128xbf16, #tpu.memory_space<vmem>>, vector<512x128xbf16>
    tpu.vector_store %arg5[%c0_5, %c0_6], %6 {strides = array<i32>} : memref<512x128xbf16, #tpu.memory_space<vmem>>, vector<512x128xbf16>,
    return
  }
  func.func @transform_0(%arg0: i32, %arg1: i32) -> (i32, i32) {
    %c0_i32 = arith.constant 0 : i32
    %c0_i32_0 = arith.constant 0 : i32
    return %arg0, %c0_i32 : i32, i32
  }
  func.func @transform_1(%arg0: i32, %arg1: i32) -> (i32, i32) {
    %c0_i32 = arith.constant 0 : i32
    %c0_i32_0 = arith.constant 0 : i32
    return %c0_i32, %arg1 : i32, i32
  }
  func.func @transform_2(%arg0: i32, %arg1: i32) -> (i32, i32) {
    %c0_i32 = arith.constant 0 : i32
    %c0_i32_0 = arith.constant 0 : i32
    return %c0_i32, %arg1 : i32, i32
  }
  func.func @transform_3(%arg0: i32, %arg1: i32) -> (i32, i32) {
    %c0_i32 = arith.constant 0 : i32
    return %arg0, %arg1 : i32, i32
  }
}

module attributes {stable_mosaic.version = 11 : i64} {
  func.func @_mm_kernel(%arg0: i32, %arg1: i32, %arg2: memref<512x128xbf16, #tpu.memory_space<vmem>>, %arg3: memref<128x128xbf16, #tpu.memory_space<vmem>>, %arg4: memref<1x128xf32, #tpu.memory_space<vmem>>, %arg5: memref<512x128xbf16, #tpu.memory_space<vmem>>) attributes {dimension_semantics = [#tpu.dimension_semantics<parallel>, #tpu.dimension_semantics<parallel>], iteration_bounds = array<i64: 1, 1>, scalar_prefetch = 0 : i64, scratch_operands = 0 : i64, tpu.core_type = #tpu.core_type<tc>, window_params = [{transform_indices = @transform_0, window_bounds = array<i64: 512, 128>}, {transform_indices = @transform_1, window_bounds = array<i64: 128, 128>}, {transform_indices = @transform_2, window_bounds = array<i64: 1, 128>}, {transform_indices = @transform_3, window_bounds = array<i64: 512, 128>}]} {
    %c0 = arith.constant 0 : index
    %c0_0 = arith.constant 0 : index
    %0 = vector.load %arg2[%c0, %c0_0] : memref<512x128xbf16, #tpu.memory_space<vmem>>, vector<512x128xbf16>
    %c0_1 = arith.constant 0 : index
    %c0_2 = arith.constant 0 : index
    %1 = vector.load %arg3[%c0_1, %c0_2] : memref<128x128xbf16, #tpu.memory_space<vmem>>, vector<128x128xbf16>
    %cst = arith.constant dense<0.000000e+00> : vector<512x128xf32>
    %2 = tpu.matmul %0, %1, %cst {dimension_numbers = #tpu.dot_dimension_numbers<[1], [0], [0], [1], [0, 0, 1, 1], [], []>} : vector<512x128xbf16>, vector<128x128xbf16>, vector<512x128xf32> -> vector<512x128xf32>
    %c0_3 = arith.constant 0 : index
    %c0_4 = arith.constant 0 : index
    %3 = vector.load %arg4[%c0_3, %c0_4] : memref<1x128xf32, #tpu.memory_space<vmem>>, vector<1x128xf32>
    %4 = vector.broadcast %3 : vector<1x128xf32> to vector<512x128xf32>
    %5 = arith.addf %2, %4 : vector<512x128xf32>
    %6 = arith.truncf %5 : vector<512x128xf32> to vector<512x128xbf16>
    %c0_5 = arith.constant 0 : index
    %c0_6 = arith.constant 0 : index
    %7 = vector.load %arg5[%c0_5, %c0_6] : memref<512x128xbf16, #tpu.memory_space<vmem>>, vector<512x128xbf16>
    tpu.vector_store %arg5[%c0_5, %c0_6], %6 {strides = array<i32>} : memref<512x128xbf16, #tpu.memory_space<vmem>>, vector<512x128xbf16>,
    return
  }
  func.func @transform_0(%arg0: i32, %arg1: i32) -> (i32, i32) {
    %c0_i32 = arith.constant 0 : i32
    %c0_i32_0 = arith.constant 0 : i32
    return %arg0, %c0_i32 : i32, i32
  }
  func.func @transform_1(%arg0: i32, %arg1: i32) -> (i32, i32) {
    %c0_i32 = arith.constant 0 : i32
    %c0_i32_0 = arith.constant 0 : i32
    return %c0_i32, %arg1 : i32, i32
  }
  func.func @transform_2(%arg0: i32, %arg1: i32) -> (i32, i32) {
    %c0_i32 = arith.constant 0 : i32
    %c0_i32_0 = arith.constant 0 : i32
    return %c0_i32, %arg1 : i32, i32
  }
  func.func @transform_3(%arg0: i32, %arg1: i32) -> (i32, i32) {
    %c0_i32 = arith.constant 0 : i32
    return %arg0, %arg1 : i32, i32
  }
}

module attributes {stable_mosaic.version = 11 : i64} {
  func.func @_mm_kernel(%arg0: i32, %arg1: i32, %arg2: memref<512x160xbf16, #tpu.memory_space<vmem>>, %arg3: memref<160x128xbf16, #tpu.memory_space<vmem>>, %arg4: memref<1x128xf32, #tpu.memory_space<vmem>>, %arg5: memref<512x128xbf16, #tpu.memory_space<vmem>>) attributes {dimension_semantics = [#tpu.dimension_semantics<parallel>, #tpu.dimension_semantics<parallel>], iteration_bounds = array<i64: 1, 1>, scalar_prefetch = 0 : i64, scratch_operands = 0 : i64, tpu.core_type = #tpu.core_type<tc>, window_params = [{transform_indices = @transform_0, window_bounds = array<i64: 512, 160>}, {transform_indices = @transform_1, window_bounds = array<i64: 160, 128>}, {transform_indices = @transform_2, window_bounds = array<i64: 1, 128>}, {transform_indices = @transform_3, window_bounds = array<i64: 512, 128>}]} {
    %c0 = arith.constant 0 : index
    %c0_0 = arith.constant 0 : index
    %0 = vector.load %arg2[%c0, %c0_0] : memref<512x160xbf16, #tpu.memory_space<vmem>>, vector<512x160xbf16>
    %c0_1 = arith.constant 0 : index
    %c0_2 = arith.constant 0 : index
    %1 = vector.load %arg3[%c0_1, %c0_2] : memref<160x128xbf16, #tpu.memory_space<vmem>>, vector<160x128xbf16>
    %cst = arith.constant dense<0.000000e+00> : vector<512x128xf32>
    %2 = tpu.matmul %0, %1, %cst {dimension_numbers = #tpu.dot_dimension_numbers<[1], [0], [0], [1], [0, 0, 1, 1], [], []>} : vector<512x160xbf16>, vector<160x128xbf16>, vector<512x128xf32> -> vector<512x128xf32>
    %c0_3 = arith.constant 0 : index
    %c0_4 = arith.constant 0 : index
    %3 = vector.load %arg4[%c0_3, %c0_4] : memref<1x128xf32, #tpu.memory_space<vmem>>, vector<1x128xf32>
    %4 = vector.broadcast %3 : vector<1x128xf32> to vector<512x128xf32>
    %5 = arith.addf %2, %4 : vector<512x128xf32>
    %6 = arith.truncf %5 : vector<512x128xf32> to vector<512x128xbf16>
    %c0_5 = arith.constant 0 : index
    %c0_6 = arith.constant 0 : index
    %7 = vector.load %arg5[%c0_5, %c0_6] : memref<512x128xbf16, #tpu.memory_space<vmem>>, vector<512x128xbf16>
    tpu.vector_store %arg5[%c0_5, %c0_6], %6 {strides = array<i32>} : memref<512x128xbf16, #tpu.memory_space<vmem>>, vector<512x128xbf16>,
    return
  }
  func.func @transform_0(%arg0: i32, %arg1: i32) -> (i32, i32) {
    %c0_i32 = arith.constant 0 : i32
    %c0_i32_0 = arith.constant 0 : i32
    return %arg0, %c0_i32 : i32, i32
  }
  func.func @transform_1(%arg0: i32, %arg1: i32) -> (i32, i32) {
    %c0_i32 = arith.constant 0 : i32
    %c0_i32_0 = arith.constant 0 : i32
    return %c0_i32, %arg1 : i32, i32
  }
  func.func @transform_2(%arg0: i32, %arg1: i32) -> (i32, i32) {
    %c0_i32 = arith.constant 0 : i32
    %c0_i32_0 = arith.constant 0 : i32
    return %c0_i32, %arg1 : i32, i32
  }
  func.func @transform_3(%arg0: i32, %arg1: i32) -> (i32, i32) {
    %c0_i32 = arith.constant 0 : i32
    return %arg0, %arg1 : i32, i32
  }
}

module attributes {stable_mosaic.version = 11 : i64} {
  func.func @_mm_kernel(%arg0: i32, %arg1: i32, %arg2: memref<512x192xbf16, #tpu.memory_space<vmem>>, %arg3: memref<192x128xbf16, #tpu.memory_space<vmem>>, %arg4: memref<1x128xf32, #tpu.memory_space<vmem>>, %arg5: memref<512x128xbf16, #tpu.memory_space<vmem>>) attributes {dimension_semantics = [#tpu.dimension_semantics<parallel>, #tpu.dimension_semantics<parallel>], iteration_bounds = array<i64: 1, 1>, scalar_prefetch = 0 : i64, scratch_operands = 0 : i64, tpu.core_type = #tpu.core_type<tc>, window_params = [{transform_indices = @transform_0, window_bounds = array<i64: 512, 192>}, {transform_indices = @transform_1, window_bounds = array<i64: 192, 128>}, {transform_indices = @transform_2, window_bounds = array<i64: 1, 128>}, {transform_indices = @transform_3, window_bounds = array<i64: 512, 128>}]} {
    %c0 = arith.constant 0 : index
    %c0_0 = arith.constant 0 : index
    %0 = vector.load %arg2[%c0, %c0_0] : memref<512x192xbf16, #tpu.memory_space<vmem>>, vector<512x192xbf16>
    %c0_1 = arith.constant 0 : index
    %c0_2 = arith.constant 0 : index
    %1 = vector.load %arg3[%c0_1, %c0_2] : memref<192x128xbf16, #tpu.memory_space<vmem>>, vector<192x128xbf16>
    %cst = arith.constant dense<0.000000e+00> : vector<512x128xf32>
    %2 = tpu.matmul %0, %1, %cst {dimension_numbers = #tpu.dot_dimension_numbers<[1], [0], [0], [1], [0, 0, 1, 1], [], []>} : vector<512x192xbf16>, vector<192x128xbf16>, vector<512x128xf32> -> vector<512x128xf32>
    %c0_3 = arith.constant 0 : index
    %c0_4 = arith.constant 0 : index
    %3 = vector.load %arg4[%c0_3, %c0_4] : memref<1x128xf32, #tpu.memory_space<vmem>>, vector<1x128xf32>
    %4 = vector.broadcast %3 : vector<1x128xf32> to vector<512x128xf32>
    %5 = arith.addf %2, %4 : vector<512x128xf32>
    %6 = arith.truncf %5 : vector<512x128xf32> to vector<512x128xbf16>
    %c0_5 = arith.constant 0 : index
    %c0_6 = arith.constant 0 : index
    %7 = vector.load %arg5[%c0_5, %c0_6] : memref<512x128xbf16, #tpu.memory_space<vmem>>, vector<512x128xbf16>
    tpu.vector_store %arg5[%c0_5, %c0_6], %6 {strides = array<i32>} : memref<512x128xbf16, #tpu.memory_space<vmem>>, vector<512x128xbf16>,
    return
  }
  func.func @transform_0(%arg0: i32, %arg1: i32) -> (i32, i32) {
    %c0_i32 = arith.constant 0 : i32
    %c0_i32_0 = arith.constant 0 : i32
    return %arg0, %c0_i32 : i32, i32
  }
  func.func @transform_1(%arg0: i32, %arg1: i32) -> (i32, i32) {
    %c0_i32 = arith.constant 0 : i32
    %c0_i32_0 = arith.constant 0 : i32
    return %c0_i32, %arg1 : i32, i32
  }
  func.func @transform_2(%arg0: i32, %arg1: i32) -> (i32, i32) {
    %c0_i32 = arith.constant 0 : i32
    %c0_i32_0 = arith.constant 0 : i32
    return %c0_i32, %arg1 : i32, i32
  }
  func.func @transform_3(%arg0: i32, %arg1: i32) -> (i32, i32) {
    %c0_i32 = arith.constant 0 : i32
    return %arg0, %arg1 : i32, i32
  }
}

module attributes {stable_mosaic.version = 11 : i64} {
  func.func @_mm_kernel(%arg0: i32, %arg1: i32, %arg2: memref<512x224xbf16, #tpu.memory_space<vmem>>, %arg3: memref<224x128xbf16, #tpu.memory_space<vmem>>, %arg4: memref<1x128xf32, #tpu.memory_space<vmem>>, %arg5: memref<512x128xbf16, #tpu.memory_space<vmem>>) attributes {dimension_semantics = [#tpu.dimension_semantics<parallel>, #tpu.dimension_semantics<parallel>], iteration_bounds = array<i64: 1, 1>, scalar_prefetch = 0 : i64, scratch_operands = 0 : i64, tpu.core_type = #tpu.core_type<tc>, window_params = [{transform_indices = @transform_0, window_bounds = array<i64: 512, 224>}, {transform_indices = @transform_1, window_bounds = array<i64: 224, 128>}, {transform_indices = @transform_2, window_bounds = array<i64: 1, 128>}, {transform_indices = @transform_3, window_bounds = array<i64: 512, 128>}]} {
    %c0 = arith.constant 0 : index
    %c0_0 = arith.constant 0 : index
    %0 = vector.load %arg2[%c0, %c0_0] : memref<512x224xbf16, #tpu.memory_space<vmem>>, vector<512x224xbf16>
    %c0_1 = arith.constant 0 : index
    %c0_2 = arith.constant 0 : index
    %1 = vector.load %arg3[%c0_1, %c0_2] : memref<224x128xbf16, #tpu.memory_space<vmem>>, vector<224x128xbf16>
    %cst = arith.constant dense<0.000000e+00> : vector<512x128xf32>
    %2 = tpu.matmul %0, %1, %cst {dimension_numbers = #tpu.dot_dimension_numbers<[1], [0], [0], [1], [0, 0, 1, 1], [], []>} : vector<512x224xbf16>, vector<224x128xbf16>, vector<512x128xf32> -> vector<512x128xf32>
    %c0_3 = arith.constant 0 : index
    %c0_4 = arith.constant 0 : index
    %3 = vector.load %arg4[%c0_3, %c0_4] : memref<1x128xf32, #tpu.memory_space<vmem>>, vector<1x128xf32>
    %4 = vector.broadcast %3 : vector<1x128xf32> to vector<512x128xf32>
    %5 = arith.addf %2, %4 : vector<512x128xf32>
    %6 = arith.truncf %5 : vector<512x128xf32> to vector<512x128xbf16>
    %c0_5 = arith.constant 0 : index
    %c0_6 = arith.constant 0 : index
    %7 = vector.load %arg5[%c0_5, %c0_6] : memref<512x128xbf16, #tpu.memory_space<vmem>>, vector<512x128xbf16>
    tpu.vector_store %arg5[%c0_5, %c0_6], %6 {strides = array<i32>} : memref<512x128xbf16, #tpu.memory_space<vmem>>, vector<512x128xbf16>,
    return
  }
  func.func @transform_0(%arg0: i32, %arg1: i32) -> (i32, i32) {
    %c0_i32 = arith.constant 0 : i32
    %c0_i32_0 = arith.constant 0 : i32
    return %arg0, %c0_i32 : i32, i32
  }
  func.func @transform_1(%arg0: i32, %arg1: i32) -> (i32, i32) {
    %c0_i32 = arith.constant 0 : i32
    %c0_i32_0 = arith.constant 0 : i32
    return %c0_i32, %arg1 : i32, i32
  }
  func.func @transform_2(%arg0: i32, %arg1: i32) -> (i32, i32) {
    %c0_i32 = arith.constant 0 : i32
    %c0_i32_0 = arith.constant 0 : i32
    return %c0_i32, %arg1 : i32, i32
  }
  func.func @transform_3(%arg0: i32, %arg1: i32) -> (i32, i32) {
    %c0_i32 = arith.constant 0 : i32
    return %arg0, %arg1 : i32, i32
  }
}

module attributes {stable_mosaic.version = 11 : i64} {
  func.func @_mm_kernel(%arg0: i32, %arg1: i32, %arg2: memref<512x256xbf16, #tpu.memory_space<vmem>>, %arg3: memref<256x128xbf16, #tpu.memory_space<vmem>>, %arg4: memref<1x128xf32, #tpu.memory_space<vmem>>, %arg5: memref<512x128xbf16, #tpu.memory_space<vmem>>) attributes {dimension_semantics = [#tpu.dimension_semantics<parallel>, #tpu.dimension_semantics<parallel>], iteration_bounds = array<i64: 1, 1>, scalar_prefetch = 0 : i64, scratch_operands = 0 : i64, tpu.core_type = #tpu.core_type<tc>, window_params = [{transform_indices = @transform_0, window_bounds = array<i64: 512, 256>}, {transform_indices = @transform_1, window_bounds = array<i64: 256, 128>}, {transform_indices = @transform_2, window_bounds = array<i64: 1, 128>}, {transform_indices = @transform_3, window_bounds = array<i64: 512, 128>}]} {
    %c0 = arith.constant 0 : index
    %c0_0 = arith.constant 0 : index
    %0 = vector.load %arg2[%c0, %c0_0] : memref<512x256xbf16, #tpu.memory_space<vmem>>, vector<512x256xbf16>
    %c0_1 = arith.constant 0 : index
    %c0_2 = arith.constant 0 : index
    %1 = vector.load %arg3[%c0_1, %c0_2] : memref<256x128xbf16, #tpu.memory_space<vmem>>, vector<256x128xbf16>
    %cst = arith.constant dense<0.000000e+00> : vector<512x128xf32>
    %2 = tpu.matmul %0, %1, %cst {dimension_numbers = #tpu.dot_dimension_numbers<[1], [0], [0], [1], [0, 0, 1, 1], [], []>} : vector<512x256xbf16>, vector<256x128xbf16>, vector<512x128xf32> -> vector<512x128xf32>
    %c0_3 = arith.constant 0 : index
    %c0_4 = arith.constant 0 : index
    %3 = vector.load %arg4[%c0_3, %c0_4] : memref<1x128xf32, #tpu.memory_space<vmem>>, vector<1x128xf32>
    %4 = vector.broadcast %3 : vector<1x128xf32> to vector<512x128xf32>
    %5 = arith.addf %2, %4 : vector<512x128xf32>
    %6 = arith.truncf %5 : vector<512x128xf32> to vector<512x128xbf16>
    %c0_5 = arith.constant 0 : index
    %c0_6 = arith.constant 0 : index
    %7 = vector.load %arg5[%c0_5, %c0_6] : memref<512x128xbf16, #tpu.memory_space<vmem>>, vector<512x128xbf16>
    tpu.vector_store %arg5[%c0_5, %c0_6], %6 {strides = array<i32>} : memref<512x128xbf16, #tpu.memory_space<vmem>>, vector<512x128xbf16>,
    return
  }
  func.func @transform_0(%arg0: i32, %arg1: i32) -> (i32, i32) {
    %c0_i32 = arith.constant 0 : i32
    %c0_i32_0 = arith.constant 0 : i32
    return %arg0, %c0_i32 : i32, i32
  }
  func.func @transform_1(%arg0: i32, %arg1: i32) -> (i32, i32) {
    %c0_i32 = arith.constant 0 : i32
    %c0_i32_0 = arith.constant 0 : i32
    return %c0_i32, %arg1 : i32, i32
  }
  func.func @transform_2(%arg0: i32, %arg1: i32) -> (i32, i32) {
    %c0_i32 = arith.constant 0 : i32
    %c0_i32_0 = arith.constant 0 : i32
    return %c0_i32, %arg1 : i32, i32
  }
  func.func @transform_3(%arg0: i32, %arg1: i32) -> (i32, i32) {
    %c0_i32 = arith.constant 0 : i32
    return %arg0, %arg1 : i32, i32
  }
}

module attributes {stable_mosaic.version = 11 : i64} {
  func.func @_conv3x3_kernel(%arg0: i32, %arg1: memref<1x102x128xbf16, #tpu.memory_space<vmem>>, %arg2: memref<9x128x128xbf16, #tpu.memory_space<vmem>>, %arg3: memref<1x128xf32, #tpu.memory_space<vmem>>, %arg4: memref<1x80x128xbf16, #tpu.memory_space<vmem>>) attributes {dimension_semantics = [#tpu.dimension_semantics<parallel>], iteration_bounds = array<i64: 2>, scalar_prefetch = 0 : i64, scratch_operands = 0 : i64, tpu.core_type = #tpu.core_type<tc>, window_params = [{transform_indices = @transform_0, window_bounds = array<i64: 1, 102, 128>}, {pipeline_mode = #tpu.pipeline_mode<synchronous>, transform_indices = @transform_1, window_bounds = array<i64: 9, 128, 128>}, {pipeline_mode = #tpu.pipeline_mode<synchronous>, transform_indices = @transform_2, window_bounds = array<i64: 1, 128>}, {transform_indices = @transform_3, window_bounds = array<i64: 1, 80, 128>}]} {
    %c0 = arith.constant 0 : index
    %c0_0 = arith.constant 0 : index
    %c0_1 = arith.constant 0 : index
    %0 = vector.load %arg1[%c0, %c0_0, %c0_1] : memref<1x102x128xbf16, #tpu.memory_space<vmem>>, vector<1x80x128xbf16>
    %1 = vector.shape_cast %0 : vector<1x80x128xbf16> to vector<80x128xbf16>
    %c0_2 = arith.constant 0 : index
    %c0_3 = arith.constant 0 : index
    %c0_4 = arith.constant 0 : index
    %2 = vector.load %arg2[%c0_2, %c0_3, %c0_4] : memref<9x128x128xbf16, #tpu.memory_space<vmem>>, vector<1x128x128xbf16>
    %3 = vector.shape_cast %2 : vector<1x128x128xbf16> to vector<128x128xbf16>
    %cst = arith.constant dense<0.000000e+00> : vector<80x128xf32>
    %4 = tpu.matmul %1, %3, %cst {dimension_numbers = #tpu.dot_dimension_numbers<[1], [0], [0], [1], [0, 0, 1, 1], [], []>} : vector<80x128xbf16>, vector<128x128xbf16>, vector<80x128xf32> -> vector<80x128xf32>
    %c0_5 = arith.constant 0 : index
    %c1 = arith.constant 1 : index
    %c0_6 = arith.constant 0 : index
    %5 = vector.load %arg1[%c0_5, %c1, %c0_6] : memref<1x102x128xbf16, #tpu.memory_space<vmem>>, vector<1x80x128xbf16>
    %6 = vector.shape_cast %5 : vector<1x80x128xbf16> to vector<80x128xbf16>
    %c1_7 = arith.constant 1 : index
    %c0_8 = arith.constant 0 : index
    %c0_9 = arith.constant 0 : index
    %7 = vector.load %arg2[%c1_7, %c0_8, %c0_9] : memref<9x128x128xbf16, #tpu.memory_space<vmem>>, vector<1x128x128xbf16>
    %8 = vector.shape_cast %7 : vector<1x128x128xbf16> to vector<128x128xbf16>
    %cst_10 = arith.constant dense<0.000000e+00> : vector<80x128xf32>
    %9 = tpu.matmul %6, %8, %cst_10 {dimension_numbers = #tpu.dot_dimension_numbers<[1], [0], [0], [1], [0, 0, 1, 1], [], []>} : vector<80x128xbf16>, vector<128x128xbf16>, vector<80x128xf32> -> vector<80x128xf32>
    %10 = arith.addf %4, %9 : vector<80x128xf32>
    %c0_11 = arith.constant 0 : index
    %c2 = arith.constant 2 : index
    %c0_12 = arith.constant 0 : index
    %11 = vector.load %arg1[%c0_11, %c2, %c0_12] : memref<1x102x128xbf16, #tpu.memory_space<vmem>>, vector<1x80x128xbf16>
    %12 = vector.shape_cast %11 : vector<1x80x128xbf16> to vector<80x128xbf16>
    %c2_13 = arith.constant 2 : index
    %c0_14 = arith.constant 0 : index
    %c0_15 = arith.constant 0 : index
    %13 = vector.load %arg2[%c2_13, %c0_14, %c0_15] : memref<9x128x128xbf16, #tpu.memory_space<vmem>>, vector<1x128x128xbf16>
    %14 = vector.shape_cast %13 : vector<1x128x128xbf16> to vector<128x128xbf16>
    %cst_16 = arith.constant dense<0.000000e+00> : vector<80x128xf32>
    %15 = tpu.matmul %12, %14, %cst_16 {dimension_numbers = #tpu.dot_dimension_numbers<[1], [0], [0], [1], [0, 0, 1, 1], [], []>} : vector<80x128xbf16>, vector<128x128xbf16>, vector<80x128xf32> -> vector<80x128xf32>
    %16 = arith.addf %10, %15 : vector<80x128xf32>
    %c0_17 = arith.constant 0 : index
    %c10 = arith.constant 10 : index
    %c0_18 = arith.constant 0 : index
    %17 = vector.load %arg1[%c0_17, %c10, %c0_18] : memref<1x102x128xbf16, #tpu.memory_space<vmem>>, vector<1x80x128xbf16>
    %18 = vector.shape_cast %17 : vector<1x80x128xbf16> to vector<80x128xbf16>
    %c3 = arith.constant 3 : index
    %c0_19 = arith.constant 0 : index
    %c0_20 = arith.constant 0 : index
    %19 = vector.load %arg2[%c3, %c0_19, %c0_20] : memref<9x128x128xbf16, #tpu.memory_space<vmem>>, vector<1x128x128xbf16>
    %20 = vector.shape_cast %19 : vector<1x128x128xbf16> to vector<128x128xbf16>
    %cst_21 = arith.constant dense<0.000000e+00> : vector<80x128xf32>
    %21 = tpu.matmul %18, %20, %cst_21 {dimension_numbers = #tpu.dot_dimension_numbers<[1], [0], [0], [1], [0, 0, 1, 1], [], []>} : vector<80x128xbf16>, vector<128x128xbf16>, vector<80x128xf32> -> vector<80x128xf32>
    %22 = arith.addf %16, %21 : vector<80x128xf32>
    %c0_22 = arith.constant 0 : index
    %c11 = arith.constant 11 : index
    %c0_23 = arith.constant 0 : index
    %23 = vector.load %arg1[%c0_22, %c11, %c0_23] : memref<1x102x128xbf16, #tpu.memory_space<vmem>>, vector<1x80x128xbf16>
    %24 = vector.shape_cast %23 : vector<1x80x128xbf16> to vector<80x128xbf16>
    %c4 = arith.constant 4 : index
    %c0_24 = arith.constant 0 : index
    %c0_25 = arith.constant 0 : index
    %25 = vector.load %arg2[%c4, %c0_24, %c0_25] : memref<9x128x128xbf16, #tpu.memory_space<vmem>>, vector<1x128x128xbf16>
    %26 = vector.shape_cast %25 : vector<1x128x128xbf16> to vector<128x128xbf16>
    %cst_26 = arith.constant dense<0.000000e+00> : vector<80x128xf32>
    %27 = tpu.matmul %24, %26, %cst_26 {dimension_numbers = #tpu.dot_dimension_numbers<[1], [0], [0], [1], [0, 0, 1, 1], [], []>} : vector<80x128xbf16>, vector<128x128xbf16>, vector<80x128xf32> -> vector<80x128xf32>
    %28 = arith.addf %22, %27 : vector<80x128xf32>
    %c0_27 = arith.constant 0 : index
    %c12 = arith.constant 12 : index
    %c0_28 = arith.constant 0 : index
    %29 = vector.load %arg1[%c0_27, %c12, %c0_28] : memref<1x102x128xbf16, #tpu.memory_space<vmem>>, vector<1x80x128xbf16>
    %30 = vector.shape_cast %29 : vector<1x80x128xbf16> to vector<80x128xbf16>
    %c5 = arith.constant 5 : index
    %c0_29 = arith.constant 0 : index
    %c0_30 = arith.constant 0 : index
    %31 = vector.load %arg2[%c5, %c0_29, %c0_30] : memref<9x128x128xbf16, #tpu.memory_space<vmem>>, vector<1x128x128xbf16>
    %32 = vector.shape_cast %31 : vector<1x128x128xbf16> to vector<128x128xbf16>
    %cst_31 = arith.constant dense<0.000000e+00> : vector<80x128xf32>
    %33 = tpu.matmul %30, %32, %cst_31 {dimension_numbers = #tpu.dot_dimension_numbers<[1], [0], [0], [1], [0, 0, 1, 1], [], []>} : vector<80x128xbf16>, vector<128x128xbf16>, vector<80x128xf32> -> vector<80x128xf32>
    %34 = arith.addf %28, %33 : vector<80x128xf32>
    %c0_32 = arith.constant 0 : index
    %c20 = arith.constant 20 : index
    %c0_33 = arith.constant 0 : index
    %35 = vector.load %arg1[%c0_32, %c20, %c0_33] : memref<1x102x128xbf16, #tpu.memory_space<vmem>>, vector<1x80x128xbf16>
    %36 = vector.shape_cast %35 : vector<1x80x128xbf16> to vector<80x128xbf16>
    %c6 = arith.constant 6 : index
    %c0_34 = arith.constant 0 : index
    %c0_35 = arith.constant 0 : index
    %37 = vector.load %arg2[%c6, %c0_34, %c0_35] : memref<9x128x128xbf16, #tpu.memory_space<vmem>>, vector<1x128x128xbf16>
    %38 = vector.shape_cast %37 : vector<1x128x128xbf16> to vector<128x128xbf16>
    %cst_36 = arith.constant dense<0.000000e+00> : vector<80x128xf32>
    %39 = tpu.matmul %36, %38, %cst_36 {dimension_numbers = #tpu.dot_dimension_numbers<[1], [0], [0], [1], [0, 0, 1, 1], [], []>} : vector<80x128xbf16>, vector<128x128xbf16>, vector<80x128xf32> -> vector<80x128xf32>
    %40 = arith.addf %34, %39 : vector<80x128xf32>
    %c0_37 = arith.constant 0 : index
    %c21 = arith.constant 21 : index
    %c0_38 = arith.constant 0 : index
    %41 = vector.load %arg1[%c0_37, %c21, %c0_38] : memref<1x102x128xbf16, #tpu.memory_space<vmem>>, vector<1x80x128xbf16>
    %42 = vector.shape_cast %41 : vector<1x80x128xbf16> to vector<80x128xbf16>
    %c7 = arith.constant 7 : index
    %c0_39 = arith.constant 0 : index
    %c0_40 = arith.constant 0 : index
    %43 = vector.load %arg2[%c7, %c0_39, %c0_40] : memref<9x128x128xbf16, #tpu.memory_space<vmem>>, vector<1x128x128xbf16>
    %44 = vector.shape_cast %43 : vector<1x128x128xbf16> to vector<128x128xbf16>
    %cst_41 = arith.constant dense<0.000000e+00> : vector<80x128xf32>
    %45 = tpu.matmul %42, %44, %cst_41 {dimension_numbers = #tpu.dot_dimension_numbers<[1], [0], [0], [1], [0, 0, 1, 1], [], []>} : vector<80x128xbf16>, vector<128x128xbf16>, vector<80x128xf32> -> vector<80x128xf32>
    %46 = arith.addf %40, %45 : vector<80x128xf32>
    %c0_42 = arith.constant 0 : index
    %c22 = arith.constant 22 : index
    %c0_43 = arith.constant 0 : index
    %47 = vector.load %arg1[%c0_42, %c22, %c0_43] : memref<1x102x128xbf16, #tpu.memory_space<vmem>>, vector<1x80x128xbf16>
    %48 = vector.shape_cast %47 : vector<1x80x128xbf16> to vector<80x128xbf16>
    %c8 = arith.constant 8 : index
    %c0_44 = arith.constant 0 : index
    %c0_45 = arith.constant 0 : index
    %49 = vector.load %arg2[%c8, %c0_44, %c0_45] : memref<9x128x128xbf16, #tpu.memory_space<vmem>>, vector<1x128x128xbf16>
    %50 = vector.shape_cast %49 : vector<1x128x128xbf16> to vector<128x128xbf16>
    %cst_46 = arith.constant dense<0.000000e+00> : vector<80x128xf32>
    %51 = tpu.matmul %48, %50, %cst_46 {dimension_numbers = #tpu.dot_dimension_numbers<[1], [0], [0], [1], [0, 0, 1, 1], [], []>} : vector<80x128xbf16>, vector<128x128xbf16>, vector<80x128xf32> -> vector<80x128xf32>
    %52 = arith.addf %46, %51 : vector<80x128xf32>
    %c0_47 = arith.constant 0 : index
    %c0_48 = arith.constant 0 : index
    %53 = vector.load %arg3[%c0_47, %c0_48] : memref<1x128xf32, #tpu.memory_space<vmem>>, vector<1x128xf32>
    %54 = vector.broadcast %53 : vector<1x128xf32> to vector<80x128xf32>
    %55 = arith.addf %52, %54 : vector<80x128xf32>
    %56 = arith.truncf %55 : vector<80x128xf32> to vector<80x128xbf16>
    %c0_49 = arith.constant 0 : index
    %c0_50 = arith.constant 0 : index
    %c0_51 = arith.constant 0 : index
    %57 = vector.load %arg4[%c0_49, %c0_50, %c0_51] : memref<1x80x128xbf16, #tpu.memory_space<vmem>>, vector<1x80x128xbf16>
    %58 = vector.shape_cast %57 : vector<1x80x128xbf16> to vector<80x128xbf16>
    %59 = vector.shape_cast %56 : vector<80x128xbf16> to vector<1x80x128xbf16>
    tpu.vector_store %arg4[%c0_49, %c0_50, %c0_51], %59 {strides = array<i32>} : memref<1x80x128xbf16, #tpu.memory_space<vmem>>, vector<1x80x128xbf16>,
    return
  }
  func.func @transform_0(%arg0: i32) -> (i32, i32, i32) {
    %c0_i32 = arith.constant 0 : i32
    %c0_i32_0 = arith.constant 0 : i32
    %c0_i32_1 = arith.constant 0 : i32
    return %arg0, %c0_i32, %c0_i32_0 : i32, i32, i32
  }
  func.func @transform_1(%arg0: i32) -> (i32, i32, i32) {
    %c0_i32 = arith.constant 0 : i32
    %c0_i32_0 = arith.constant 0 : i32
    %c0_i32_1 = arith.constant 0 : i32
    %c0_i32_2 = arith.constant 0 : i32
    return %c0_i32, %c0_i32_0, %c0_i32_1 : i32, i32, i32
  }
  func.func @transform_2(%arg0: i32) -> (i32, i32) {
    %c0_i32 = arith.constant 0 : i32
    %c0_i32_0 = arith.constant 0 : i32
    %c0_i32_1 = arith.constant 0 : i32
    return %c0_i32, %c0_i32_0 : i32, i32
  }
  func.func @transform_3(%arg0: i32) -> (i32, i32, i32) {
    %c0_i32 = arith.constant 0 : i32
    %c0_i32_0 = arith.constant 0 : i32
    %c0_i32_1 = arith.constant 0 : i32
    return %arg0, %c0_i32, %c0_i32_0 : i32, i32, i32
  }
}

</mosaic_0001>

<bundles_post_ra>
// kernel: hybridnet_forward.16
= control target key start
LH: loop header
LB: loop body
LE: loop exit
PB: predicated region body
PF: predicated region fallthrough
CT: control target
= control target key end

     0   :  { %v6331_v0 = vmov 0   ;;  %vm1506_vm0 = vcmask 154624   ;;  %vm1891_vm1 = vcmask 1040384   ;;  %vm1892_vm2 = vcmask 1041408   ;;  %s7934_s1 = inlined_call_operand.vmem [shape: bf16[147,128], index: 1, kind: input, shape index: {}]   ;;  %s7935_s0 = inlined_call_operand.vmem [shape: bf16[2048,147], index: 0, kind: input, shape index: {}]   ;;  %s7936_s2 = inlined_call_operand.vmem [shape: f32[1,128], index: 2, kind: input, shape index: {}]   ;;  %s7937_s3 = inlined_call_operand.vmem [shape: bf16[2048,128], index: 3, kind: output, shape index: {}]  }
   0x1   :  { %1898 = vmatprep.subr.bf16.mxu0 %v6331_v0  ;;  %5913 = vmatprep.subr.bf16.mxu1 %v6331_v0  ;;  %v5935_v1 = vld [vmem:[%s7934_s1] sm:$0xff]   ;;  %v5936_v2 = vld [vmem:[%s7934_s1 + $0x8] sm:$0xff]   ;;  %v5937_v3 = vld [vmem:[%s7934_s1 + $0x10] sm:$0xff]   ;;  %v6332_v11 = vmov 65535  }
   0x2   :  { %1899 = vmatpush1.bf16.msra.mxu0 %v5935_v1  ;;  %5923 = vmatpush1.bf16.msra.mxu1 %v5935_v1  ;;  %v5938_v4 = vld [vmem:[%s7934_s1 + $0x18] sm:$0xff]   ;;  %v5947_v5 = vld [vmem:[%s7935_s0 + $0x4] ss:$8 sps:$4 sm:$0xff]   ;;  %v5941_v9 = vld [vmem:[%s7934_s1 + $0x30] sm:$0xff]   ;;  %v1893_v12 = vsel %vm1891_vm1, 4294967295, %v6332_v11 }
   0x3   :  { %1900 = vmatprep.subr.bf16.mxu0 %v6331_v0  ;;  %5914 = vmatprep.subr.bf16.mxu1 %v6331_v0  ;;  %v5950_v6 = vld [vmem:[%s7935_s0 + $0x404] ss:$8 sps:$4 sm:$0xff]   ;;  %v5942_v10 = vld [vmem:[%s7934_s1 + $0x38] sm:$0xff]   ;;  %v5944_v14 = vld [vmem:[%s7934_s1 + $0x48] ss:$0 sps:$4 sm:$0x33]  }
   0x4   :  { %4506 = vmatprep.mubr.msk.bf16.mxu0 %vm1506_vm0, %v5947_v5  ;;  %v5939_v7 = vld [vmem:[%s7934_s1 + $0x20] sm:$0xff]   ;;  %4570 = vmatprep.mubr.msk.bf16.mxu1 %vm1506_vm0, %v5950_v6  ;;  %v5940_v8 = vld [vmem:[%s7934_s1 + $0x28] sm:$0xff]   ;;  %v1894_v15 = vsel %vm1892_vm2, %v1893_v12, 0  ;;  %v5951_v19 = vld [vmem:[%s7935_s0 + $0x14] ss:$8 sps:$4 sm:$0xff]  }
   0x5   :  { %v5943_v13 = vld [vmem:[%s7934_s1 + $0x40] sm:$0xff]   ;;  %v1896_v16 = vand.u32 %v5944_v14, %v1894_v15  ;;  %v5953_v20 = vld [vmem:[%s7935_s0 + $0x414] ss:$8 sps:$4 sm:$0xff]   ;;  %v5955_v21 = vld [vmem:[%s7935_s0 + $0x10] ss:$8 sps:$4 sm:$0xff]  }
   0x6   :  { %1901 = vmatpush1.bf16.msra.mxu0 %v5936_v2  ;;  %5924 = vmatpush1.bf16.msra.mxu1 %v5936_v2  ;;  %v5945_v17 = vld [vmem:[%s7935_s0] ss:$8 sps:$4 sm:$0xff]   ;;  %v5956_v22 = vld [vmem:[%s7935_s0 + $0x410] ss:$8 sps:$4 sm:$0xff]   ;;  %v5957_v23 = vld [vmem:[%s7935_s0 + $0x24] ss:$8 sps:$4 sm:$0xff]  }
   0x7   :  { %1902 = vmatprep.subr.bf16.mxu0 %v6331_v0  ;;  %5915 = vmatprep.subr.bf16.mxu1 %v6331_v0  ;;  %v5948_v18 = vld [vmem:[%s7935_s0 + $0x400] ss:$8 sps:$4 sm:$0xff]   ;;  %v5959_v24 = vld [vmem:[%s7935_s0 + $0x424] ss:$8 sps:$4 sm:$0xff]   ;;  %v5963_v27 = vld [vmem:[%s7935_s0 + $0x34] ss:$8 sps:$4 sm:$0xff]  }
   0x8   :  { %v5961_v25 = vld [vmem:[%s7935_s0 + $0x20] ss:$8 sps:$4 sm:$0xff]   ;;  %v5965_v28 = vld [vmem:[%s7935_s0 + $0x434] ss:$8 sps:$4 sm:$0xff]   ;;  %v5967_v29 = vld [vmem:[%s7935_s0 + $0x30] ss:$8 sps:$4 sm:$0xff]  }
   0x9   :  { %v5962_v26 = vld [vmem:[%s7935_s0 + $0x420] ss:$8 sps:$4 sm:$0xff]   ;;  %v5968_v30 = vld [vmem:[%s7935_s0 + $0x430] ss:$8 sps:$4 sm:$0xff]   ;;  %v5969_v31 = vld [vmem:[%s7935_s0 + $0x44] ss:$8 sps:$4 sm:$0xff]  }
   0xa   :  { %1903 = vmatpush1.bf16.msra.mxu0 %v5937_v3  ;;  %5925 = vmatpush1.bf16.msra.mxu1 %v5937_v3  ;;  %v5971_v32 = vld [vmem:[%s7935_s0 + $0x444] ss:$8 sps:$4 sm:$0xff]   ;;  %v5973_v33 = vld [vmem:[%s7935_s0 + $0x40] ss:$8 sps:$4 sm:$0xff]   ;;  %v5975_v35 = vld [vmem:[%s7935_s0 + $0x54] ss:$8 sps:$4 sm:$0xff]  }
   0xb   :  { %1904 = vmatprep.subr.bf16.mxu0 %v6331_v0  ;;  %5916 = vmatprep.subr.bf16.mxu1 %v6331_v0  ;;  %v5974_v34 = vld [vmem:[%s7935_s0 + $0x440] ss:$8 sps:$4 sm:$0xff]   ;;  %v5977_v36 = vld [vmem:[%s7935_s0 + $0x454] ss:$8 sps:$4 sm:$0xff]   ;;  %v5979_v37 = vld [vmem:[%s7935_s0 + $0x50] ss:$8 sps:$4 sm:$0xff]  }
   0xc   :  { %v5980_v38 = vld [vmem:[%s7935_s0 + $0x450] ss:$8 sps:$4 sm:$0xff]   ;;  %v5981_v39 = vld [vmem:[%s7935_s0 + $0x64] ss:$8 sps:$4 sm:$0xff]   ;;  %v5985_v41 = vld [vmem:[%s7935_s0 + $0x60] ss:$8 sps:$4 sm:$0xff]  }
   0xd   :  { %v5983_v40 = vld [vmem:[%s7935_s0 + $0x464] ss:$8 sps:$4 sm:$0xff]   ;;  %v5986_v42 = vld [vmem:[%s7935_s0 + $0x460] ss:$8 sps:$4 sm:$0xff]   ;;  %v5987_v43 = vld [vmem:[%s7935_s0 + $0x74] ss:$8 sps:$4 sm:$0xff]  }
   0xe   :  { %1905 = vmatpush1.bf16.msra.mxu0 %v5938_v4  ;;  %5926 = vmatpush1.bf16.msra.mxu1 %v5938_v4  ;;  %v5989_v44 = vld [vmem:[%s7935_s0 + $0x474] ss:$8 sps:$4 sm:$0xff]   ;;  %v5991_v45 = vld [vmem:[%s7935_s0 + $0x70] ss:$8 sps:$4 sm:$0xff]   ;;  %v5993_v47 = vld [vmem:[%s7935_s0 + $0x84] ss:$8 sps:$4 sm:$0xff]  }
   0xf   :  { %1906 = vmatprep.subr.bf16.mxu0 %v6331_v0  ;;  %5917 = vmatprep.subr.bf16.mxu1 %v6331_v0  ;;  %v5992_v46 = vld [vmem:[%s7935_s0 + $0x470] ss:$8 sps:$4 sm:$0xff]   ;;  %v5995_v48 = vld [vmem:[%s7935_s0 + $0x484] ss:$8 sps:$4 sm:$0xff]   ;;  %v5997_v49 = vld [vmem:[%s7935_s0 + $0x80] ss:$8 sps:$4 sm:$0xff]  }
  0x10   :  { %v5998_v50 = vld [vmem:[%s7935_s0 + $0x480] ss:$8 sps:$4 sm:$0xff]   ;;  %v5999_v51 = vld [vmem:[%s7935_s0 + $0x94] ss:$8 sps:$4 sm:$0xff]   ;;  %v6003_v53 = vld [vmem:[%s7935_s0 + $0x90] ss:$8 sps:$4 sm:$0xff]  }
  0x11   :  { %v6001_v52 = vld [vmem:[%s7935_s0 + $0x494] ss:$8 sps:$4 sm:$0xff]   ;;  %v6004_v54 = vld [vmem:[%s7935_s0 + $0x490] ss:$8 sps:$4 sm:$0xff]   ;;  %v6005_v55 = vld [vmem:[%s7935_s0 + $0xa4] ss:$8 sps:$4 sm:$0xff]  }
  0x12   :  { %1907 = vmatpush1.bf16.msra.mxu0 %v5939_v7  ;;  %5927 = vmatpush1.bf16.msra.mxu1 %v5939_v7  ;;  %v6007_v56 = vld [vmem:[%s7935_s0 + $0x4a4] ss:$8 sps:$4 sm:$0xff]   ;;  %v6009_v57 = vld [vmem:[%s7935_s0 + $0xa0] ss:$8 sps:$4 sm:$0xff]   ;;  %v6011_v59 = vld [vmem:[%s7935_s0 + $0xb4] ss:$8 sps:$4 sm:$0xff]  }
  0x13   :  { %1908 = vmatprep.subr.bf16.mxu0 %v6331_v0  ;;  %5918 = vmatprep.subr.bf16.mxu1 %v6331_v0  ;;  %v6010_v58 = vld [vmem:[%s7935_s0 + $0x4a0] ss:$8 sps:$4 sm:$0xff]   ;;  %v6013_v60 = vld [vmem:[%s7935_s0 + $0x4b4] ss:$8 sps:$4 sm:$0xff]   ;;  %v6015_v61 = vld [vmem:[%s7935_s0 + $0xb0] ss:$8 sps:$4 sm:$0xff]  }
  0x14   :  { %v6016_v62 = vld [vmem:[%s7935_s0 + $0x4b0] ss:$8 sps:$4 sm:$0xff]   ;;  %v6017_v63 = vld [vmem:[%s7935_s0 + $0xc4] ss:$8 sps:$4 sm:$0xff]   ;;  %v6021_v1 = vld [vmem:[%s7935_s0 + $0xc0] ss:$8 sps:$4 sm:$0xff]  }
  0x15   :  { %v6022_v2 = vld [vmem:[%s7935_s0 + $0x4c0] ss:$8 sps:$4 sm:$0xff]   ;;  %v6023_v3 = vld [vmem:[%s7935_s0 + $0xd4] ss:$8 sps:$4 sm:$0xff]   ;;  %v6027_v5 = vld [vmem:[%s7935_s0 + $0xd0] ss:$8 sps:$4 sm:$0xff]  }
  0x16   :  { %1909 = vmatpush1.bf16.msra.mxu0 %v5940_v8  ;;  %5928 = vmatpush1.bf16.msra.mxu1 %v5940_v8  ;;  %v6025_v4 = vld [vmem:[%s7935_s0 + $0x4d4] ss:$8 sps:$4 sm:$0xff]   ;;  %v6028_v6 = vld [vmem:[%s7935_s0 + $0x4d0] ss:$8 sps:$4 sm:$0xff]   ;;  %v6029_v7 = vld [vmem:[%s7935_s0 + $0xe4] ss:$8 sps:$4 sm:$0xff]  }
  0x17   :  { %1910 = vmatprep.subr.bf16.mxu0 %v6331_v0  ;;  %5919 = vmatprep.subr.bf16.mxu1 %v6331_v0  ;;  %v6031_v8 = vld [vmem:[%s7935_s0 + $0x4e4] ss:$8 sps:$4 sm:$0xff]   ;;  %v6035_v11 = vld [vmem:[%s7935_s0 + $0xf4] ss:$8 sps:$4 sm:$0xff]   ;;  %v6040_v14 = vld [vmem:[%s7935_s0 + $0x4f0] ss:$8 sps:$4 sm:$0xff]  }
  0x18   :  { %v6037_v12 = vld [vmem:[%s7935_s0 + $0x4f4] ss:$8 sps:$4 sm:$0xff]   ;;  %v6041_v15 = vld [vmem:[%s7935_s0 + $0x104] ss:$8 sps:$4 sm:$0xff]  }
  0x1a   :  { %1911 = vmatpush1.bf16.msra.mxu0 %v5941_v9  ;;  %5929 = vmatpush1.bf16.msra.mxu1 %v5941_v9  ;;  %v6033_v9 = vld [vmem:[%s7935_s0 + $0xe0] ss:$8 sps:$4 sm:$0xff]  }
  0x1b   :  { %1912 = vmatprep.subr.bf16.mxu0 %v6331_v0  ;;  %5920 = vmatprep.subr.bf16.mxu1 %v6331_v0 }
  0x1e   :  { %1913 = vmatpush1.bf16.msra.mxu0 %v5942_v10  ;;  %5930 = vmatpush1.bf16.msra.mxu1 %v5942_v10  ;;  %v6034_v10 = vld [vmem:[%s7935_s0 + $0x4e0] ss:$8 sps:$4 sm:$0xff]  }
  0x1f   :  { %1914 = vmatprep.subr.bf16.mxu0 %v6331_v0  ;;  %5921 = vmatprep.subr.bf16.mxu1 %v6331_v0 }
  0x22   :  { %1915 = vmatpush1.bf16.msra.mxu0 %v5943_v13  ;;  %5931 = vmatpush1.bf16.msra.mxu1 %v5943_v13  ;;  %v6039_v13 = vld [vmem:[%s7935_s0 + $0xf0] ss:$8 sps:$4 sm:$0xff]  }
  0x23   :  { %1916 = vmatprep.subr.bf16.mxu0 %v6331_v0  ;;  %5922 = vmatprep.subr.bf16.mxu1 %v6331_v0  ;;  %v6019_v0 = vld [vmem:[%s7935_s0 + $0x4c4] ss:$8 sps:$4 sm:$0xff]  }
  0x26   :  { %1917 = vmatpush1.bf16.msra.mxu0 %v1896_v16  ;;  %5932 = vmatpush1.bf16.msra.mxu1 %v1896_v16  ;;  %v6043_v16 = vld [vmem:[%s7935_s0 + $0x504] ss:$8 sps:$4 sm:$0xff]  }
  0x29   :  { %1931 = vmatmul.mubr.bf16.vlgmr.msra.gmra.mrb[0].mxu0 %v5945_v17  ;;  %2443 = vmatmul.mubr.bf16.vlgmr.msra.gmra.mrb[0].mxu1 %v5948_v18  ;;  %v6045_v17 = vld [vmem:[%s7935_s0 + $0x100] ss:$8 sps:$4 sm:$0xff]  }
  0x2a   :  { %4507 = vmatprep.mubr.msk.bf16.mxu0 %vm1506_vm0, %v5951_v19  ;;  %4571 = vmatprep.mubr.msk.bf16.mxu1 %vm1506_vm0, %v5953_v20  ;;  %v6046_v18 = vld [vmem:[%s7935_s0 + $0x500] ss:$8 sps:$4 sm:$0xff]   ;;  %v6047_v19 = vld [vmem:[%s7935_s0 + $0x114] ss:$8 sps:$4 sm:$0xff]  }
  0x2b   :  { %v6049_v20 = vld [vmem:[%s7935_s0 + $0x514] ss:$8 sps:$4 sm:$0xff]  }
  0x31   :  { %1939 = vmatmul.mubr.bf16.gmra.mrb[4].mxu0 %v5955_v21  ;;  %2451 = vmatmul.mubr.bf16.gmra.mrb[4].mxu1 %v5956_v22  ;;  %v6051_v21 = vld [vmem:[%s7935_s0 + $0x110] ss:$8 sps:$4 sm:$0xff]  }
  0x32   :  { %4508 = vmatprep.mubr.msk.bf16.mxu0 %vm1506_vm0, %v5957_v23  ;;  %4572 = vmatprep.mubr.msk.bf16.mxu1 %vm1506_vm0, %v5959_v24  ;;  %v6052_v22 = vld [vmem:[%s7935_s0 + $0x510] ss:$8 sps:$4 sm:$0xff]   ;;  %v6053_v23 = vld [vmem:[%s7935_s0 + $0x124] ss:$8 sps:$4 sm:$0xff]  }
  0x33   :  { %v6055_v24 = vld [vmem:[%s7935_s0 + $0x524] ss:$8 sps:$4 sm:$0xff]  }
  0x39   :  { %1947 = vmatmul.mubr.bf16.gmra.mrb[8].mxu0 %v5961_v25  ;;  %2459 = vmatmul.mubr.bf16.gmra.mrb[8].mxu1 %v5962_v26  ;;  %v6057_v25 = vld [vmem:[%s7935_s0 + $0x120] ss:$8 sps:$4 sm:$0xff]  }
  0x3a   :  { %4509 = vmatprep.mubr.msk.bf16.mxu0 %vm1506_vm0, %v5963_v27  ;;  %4573 = vmatprep.mubr.msk.bf16.mxu1 %vm1506_vm0, %v5965_v28  ;;  %v6058_v26 = vld [vmem:[%s7935_s0 + $0x520] ss:$8 sps:$4 sm:$0xff]   ;;  %v6059_v27 = vld [vmem:[%s7935_s0 + $0x134] ss:$8 sps:$4 sm:$0xff]  }
  0x3b   :  { %v6061_v28 = vld [vmem:[%s7935_s0 + $0x534] ss:$8 sps:$4 sm:$0xff]  }
  0x41   :  { %1955 = vmatmul.mubr.bf16.gmra.mrb[12].mxu0 %v5967_v29  ;;  %2467 = vmatmul.mubr.bf16.gmra.mrb[12].mxu1 %v5968_v30  ;;  %v6063_v29 = vld [vmem:[%s7935_s0 + $0x130] ss:$8 sps:$4 sm:$0xff]  }
  0x42   :  { %4510 = vmatprep.mubr.msk.bf16.mxu0 %vm1506_vm0, %v5969_v31  ;;  %4574 = vmatprep.mubr.msk.bf16.mxu1 %vm1506_vm0, %v5971_v32  ;;  %v6064_v30 = vld [vmem:[%s7935_s0 + $0x530] ss:$8 sps:$4 sm:$0xff]   ;;  %v6065_v31 = vld [vmem:[%s7935_s0 + $0x144] ss:$8 sps:$4 sm:$0xff]  }
  0x43   :  { %v6067_v32 = vld [vmem:[%s7935_s0 + $0x544] ss:$8 sps:$4 sm:$0xff]  }
  0x49   :  { %1963 = vmatmul.mubr.bf16.gmra.mrb[16].mxu0 %v5973_v33  ;;  %2475 = vmatmul.mubr.bf16.gmra.mrb[16].mxu1 %v5974_v34  ;;  %v6069_v33 = vld [vmem:[%s7935_s0 + $0x140] ss:$8 sps:$4 sm:$0xff]  }
  0x4a   :  { %4511 = vmatprep.mubr.msk.bf16.mxu0 %vm1506_vm0, %v5975_v35  ;;  %4575 = vmatprep.mubr.msk.bf16.mxu1 %vm1506_vm0, %v5977_v36  ;;  %v6070_v34 = vld [vmem:[%s7935_s0 + $0x540] ss:$8 sps:$4 sm:$0xff]   ;;  %v6071_v35 = vld [vmem:[%s7935_s0 + $0x154] ss:$8 sps:$4 sm:$0xff]  }
  0x4b   :  { %v6073_v36 = vld [vmem:[%s7935_s0 + $0x554] ss:$8 sps:$4 sm:$0xff]  }
  0x51   :  { %1971 = vmatmul.mubr.bf16.gmra.mrb[20].mxu0 %v5979_v37  ;;  %2483 = vmatmul.mubr.bf16.gmra.mrb[20].mxu1 %v5980_v38  ;;  %v6075_v37 = vld [vmem:[%s7935_s0 + $0x150] ss:$8 sps:$4 sm:$0xff]  }
  0x52   :  { %4512 = vmatprep.mubr.msk.bf16.mxu0 %vm1506_vm0, %v5981_v39  ;;  %4576 = vmatprep.mubr.msk.bf16.mxu1 %vm1506_vm0, %v5983_v40  ;;  %v6076_v38 = vld [vmem:[%s7935_s0 + $0x550] ss:$8 sps:$4 sm:$0xff]   ;;  %v6077_v39 = vld [vmem:[%s7935_s0 + $0x164] ss:$8 sps:$4 sm:$0xff]  }
  0x53   :  { %v6079_v40 = vld [vmem:[%s7935_s0 + $0x564] ss:$8 sps:$4 sm:$0xff]  }
  0x59   :  { %1979 = vmatmul.mubr.bf16.gmra.mrb[24].mxu0 %v5985_v41  ;;  %2491 = vmatmul.mubr.bf16.gmra.mrb[24].mxu1 %v5986_v42  ;;  %v6081_v41 = vld [vmem:[%s7935_s0 + $0x160] ss:$8 sps:$4 sm:$0xff]  }
  0x5a   :  { %4513 = vmatprep.mubr.msk.bf16.mxu0 %vm1506_vm0, %v5987_v43  ;;  %4577 = vmatprep.mubr.msk.bf16.mxu1 %vm1506_vm0, %v5989_v44  ;;  %v6082_v42 = vld [vmem:[%s7935_s0 + $0x560] ss:$8 sps:$4 sm:$0xff]   ;;  %v6083_v43 = vld [vmem:[%s7935_s0 + $0x174] ss:$8 sps:$4 sm:$0xff]  }
  0x5b   :  { %v6085_v44 = vld [vmem:[%s7935_s0 + $0x574] ss:$8 sps:$4 sm:$0xff]  }
  0x61   :  { %1987 = vmatmul.mubr.bf16.gmra.mrb[28].mxu0 %v5991_v45  ;;  %2499 = vmatmul.mubr.bf16.gmra.mrb[28].mxu1 %v5992_v46  ;;  %v6087_v45 = vld [vmem:[%s7935_s0 + $0x170] ss:$8 sps:$4 sm:$0xff]  }
  0x62   :  { %4514 = vmatprep.mubr.msk.bf16.mxu0 %vm1506_vm0, %v5993_v47  ;;  %4578 = vmatprep.mubr.msk.bf16.mxu1 %vm1506_vm0, %v5995_v48  ;;  %v6088_v46 = vld [vmem:[%s7935_s0 + $0x570] ss:$8 sps:$4 sm:$0xff]   ;;  %v6089_v47 = vld [vmem:[%s7935_s0 + $0x184] ss:$8 sps:$4 sm:$0xff]  }
  0x63   :  { %v6091_v48 = vld [vmem:[%s7935_s0 + $0x584] ss:$8 sps:$4 sm:$0xff]  }
  0x69   :  { %1995 = vmatmul.mubr.bf16.gmra.mrb[32].mxu0 %v5997_v49  ;;  %2507 = vmatmul.mubr.bf16.gmra.mrb[32].mxu1 %v5998_v50  ;;  %v6093_v49 = vld [vmem:[%s7935_s0 + $0x180] ss:$8 sps:$4 sm:$0xff]  }
  0x6a   :  { %4515 = vmatprep.mubr.msk.bf16.mxu0 %vm1506_vm0, %v5999_v51  ;;  %4579 = vmatprep.mubr.msk.bf16.mxu1 %vm1506_vm0, %v6001_v52  ;;  %v6094_v50 = vld [vmem:[%s7935_s0 + $0x580] ss:$8 sps:$4 sm:$0xff]   ;;  %v6095_v51 = vld [vmem:[%s7935_s0 + $0x194] ss:$8 sps:$4 sm:$0xff]  }
  0x6b   :  { %v6097_v52 = vld [vmem:[%s7935_s0 + $0x594] ss:$8 sps:$4 sm:$0xff]  }
  0x71   :  { %2003 = vmatmul.mubr.bf16.gmra.mrb[36].mxu0 %v6003_v53  ;;  %2515 = vmatmul.mubr.bf16.gmra.mrb[36].mxu1 %v6004_v54  ;;  %v6099_v53 = vld [vmem:[%s7935_s0 + $0x190] ss:$8 sps:$4 sm:$0xff]  }
  0x72   :  { %4516 = vmatprep.mubr.msk.bf16.mxu0 %vm1506_vm0, %v6005_v55  ;;  %4580 = vmatprep.mubr.msk.bf16.mxu1 %vm1506_vm0, %v6007_v56  ;;  %v6100_v54 = vld [vmem:[%s7935_s0 + $0x590] ss:$8 sps:$4 sm:$0xff]   ;;  %v6101_v55 = vld [vmem:[%s7935_s0 + $0x1a4] ss:$8 sps:$4 sm:$0xff]  }
  0x73   :  { %v6103_v56 = vld [vmem:[%s7935_s0 + $0x5a4] ss:$8 sps:$4 sm:$0xff]  }
  0x79   :  { %2011 = vmatmul.mubr.bf16.gmra.mrb[40].mxu0 %v6009_v57  ;;  %2523 = vmatmul.mubr.bf16.gmra.mrb[40].mxu1 %v6010_v58  ;;  %v6105_v57 = vld [vmem:[%s7935_s0 + $0x1a0] ss:$8 sps:$4 sm:$0xff]  }
  0x7a   :  { %4517 = vmatprep.mubr.msk.bf16.mxu0 %vm1506_vm0, %v6011_v59  ;;  %4581 = vmatprep.mubr.msk.bf16.mxu1 %vm1506_vm0, %v6013_v60  ;;  %v6106_v58 = vld [vmem:[%s7935_s0 + $0x5a0] ss:$8 sps:$4 sm:$0xff]   ;;  %v6107_v59 = vld [vmem:[%s7935_s0 + $0x1b4] ss:$8 sps:$4 sm:$0xff]  }
  0x7b   :  { %v6109_v60 = vld [vmem:[%s7935_s0 + $0x5b4] ss:$8 sps:$4 sm:$0xff]  }
  0x81   :  { %2019 = vmatmul.mubr.bf16.gmra.mrb[44].mxu0 %v6015_v61  ;;  %2531 = vmatmul.mubr.bf16.gmra.mrb[44].mxu1 %v6016_v62  ;;  %v6772_v61 = vld [vmem:[%s7936_s2] ss:$0 sm:$0xff] }
  0x82   :  { %4518 = vmatprep.mubr.msk.bf16.mxu0 %vm1506_vm0, %v6017_v63  ;;  %4582 = vmatprep.mubr.msk.bf16.mxu1 %vm1506_vm0, %v6019_v0 }
  0x89   :  { %2027 = vmatmul.mubr.bf16.gmra.mrb[48].mxu0 %v6021_v1  ;;  %2539 = vmatmul.mubr.bf16.gmra.mrb[48].mxu1 %v6022_v2  ;;  %v6111_v2 = vld [vmem:[%s7935_s0 + $0x1b0] ss:$8 sps:$4 sm:$0xff]  }
  0x8a   :  { %4519 = vmatprep.mubr.msk.bf16.mxu0 %vm1506_vm0, %v6023_v3  ;;  %4583 = vmatprep.mubr.msk.bf16.mxu1 %vm1506_vm0, %v6025_v4  ;;  %v6112_v3 = vld [vmem:[%s7935_s0 + $0x5b0] ss:$8 sps:$4 sm:$0xff]  }
  0x91   :  { %2035 = vmatmul.mubr.bf16.gmra.mrb[52].mxu0 %v6027_v5  ;;  %2547 = vmatmul.mubr.bf16.gmra.mrb[52].mxu1 %v6028_v6  ;;  %v6113_v6 = vld [vmem:[%s7935_s0 + $0x1c4] ss:$8 sps:$4 sm:$0xff]  }
  0x92   :  { %4520 = vmatprep.mubr.msk.bf16.mxu0 %vm1506_vm0, %v6029_v7  ;;  %4584 = vmatprep.mubr.msk.bf16.mxu1 %vm1506_vm0, %v6031_v8  ;;  %v6115_v7 = vld [vmem:[%s7935_s0 + $0x5c4] ss:$8 sps:$4 sm:$0xff]  }
  0x99   :  { %2043 = vmatmul.mubr.bf16.gmra.mrb[56].mxu0 %v6033_v9  ;;  %2555 = vmatmul.mubr.bf16.gmra.mrb[56].mxu1 %v6034_v10 }
  0x9a   :  { %4521 = vmatprep.mubr.msk.bf16.mxu0 %vm1506_vm0, %v6035_v11  ;;  %4585 = vmatprep.mubr.msk.bf16.mxu1 %vm1506_vm0, %v6037_v12 }
  0xa1   :  { %2051 = vmatmul.mubr.bf16.gmra.mrb[60].mxu0 %v6039_v13  ;;  %2563 = vmatmul.mubr.bf16.gmra.mrb[60].mxu1 %v6040_v14 }
  0xa2   :  { %4522 = vmatprep.mubr.msk.bf16.mxu0 %vm1506_vm0, %v6041_v15  ;;  %4586 = vmatprep.mubr.msk.bf16.mxu1 %vm1506_vm0, %v6043_v16 }
  0xa9   :  { %2059 = vmatmul.mubr.bf16.gmra.mrb[64].mxu0 %v6045_v17  ;;  %2571 = vmatmul.mubr.bf16.gmra.mrb[64].mxu1 %v6046_v18 }
  0xaa   :  { %4523 = vmatprep.mubr.msk.bf16.mxu0 %vm1506_vm0, %v6047_v19  ;;  %4587 = vmatprep.mubr.msk.bf16.mxu1 %vm1506_vm0, %v6049_v20  ;;  %v6117_v20 = vld [vmem:[%s7935_s0 + $0x1c0] ss:$8 sps:$4 sm:$0xff]  }
  0xb1   :  { %2067 = vmatmul.mubr.bf16.gmra.mrb[68].mxu0 %v6051_v21  ;;  %2579 = vmatmul.mubr.bf16.gmra.mrb[68].mxu1 %v6052_v22  ;;  %v6118_v21 = vld [vmem:[%s7935_s0 + $0x5c0] ss:$8 sps:$4 sm:$0xff]  }
  0xb2   :  { %4524 = vmatprep.mubr.msk.bf16.mxu0 %vm1506_vm0, %v6053_v23  ;;  %4588 = vmatprep.mubr.msk.bf16.mxu1 %vm1506_vm0, %v6055_v24  ;;  %v6119_v24 = vld [vmem:[%s7935_s0 + $0x1d4] ss:$8 sps:$4 sm:$0xff]  }
  0xb9   :  { %2075 = vmatmul.mubr.bf16.gmra.mrb[72].mxu0 %v6057_v25  ;;  %2587 = vmatmul.mubr.bf16.gmra.mrb[72].mxu1 %v6058_v26  ;;  %v6121_v25 = vld [vmem:[%s7935_s0 + $0x5d4] ss:$8 sps:$4 sm:$0xff]  }
  0xba   :  { %4525 = vmatprep.mubr.msk.bf16.mxu0 %vm1506_vm0, %v6059_v27  ;;  %4589 = vmatprep.mubr.msk.bf16.mxu1 %vm1506_vm0, %v6061_v28 }
  0xc1   :  { %2083 = vmatmul.mubr.bf16.gmra.mrb[76].mxu0 %v6063_v29  ;;  %2595 = vmatmul.mubr.bf16.gmra.mrb[76].mxu1 %v6064_v30 }
  0xc2   :  { %4526 = vmatprep.mubr.msk.bf16.mxu0 %vm1506_vm0, %v6065_v31  ;;  %4590 = vmatprep.mubr.msk.bf16.mxu1 %vm1506_vm0, %v6067_v32 }
  0xc9   :  { %2091 = vmatmul.mubr.bf16.gmra.mrb[80].mxu0 %v6069_v33  ;;  %2603 = vmatmul.mubr.bf16.gmra.mrb[80].mxu1 %v6070_v34 }
  0xca   :  { %4527 = vmatprep.mubr.msk.bf16.mxu0 %vm1506_vm0, %v6071_v35  ;;  %4591 = vmatprep.mubr.msk.bf16.mxu1 %vm1506_vm0, %v6073_v36 }
  0xd1   :  { %2099 = vmatmul.mubr.bf16.gmra.mrb[84].mxu0 %v6075_v37  ;;  %2611 = vmatmul.mubr.bf16.gmra.mrb[84].mxu1 %v6076_v38  ;;  %v6123_v38 = vld [vmem:[%s7935_s0 + $0x1d0] ss:$8 sps:$4 sm:$0xff]  }
  0xd2   :  { %4528 = vmatprep.mubr.msk.bf16.mxu0 %vm1506_vm0, %v6077_v39  ;;  %4592 = vmatprep.mubr.msk.bf16.mxu1 %vm1506_vm0, %v6079_v40  ;;  %v6124_v39 = vld [vmem:[%s7935_s0 + $0x5d0] ss:$8 sps:$4 sm:$0xff]  }
  0xd9   :  { %2107 = vmatmul.mubr.bf16.gmra.mrb[88].mxu0 %v6081_v41  ;;  %2619 = vmatmul.mubr.bf16.gmra.mrb[88].mxu1 %v6082_v42  ;;  %v6125_v42 = vld [vmem:[%s7935_s0 + $0x1e4] ss:$8 sps:$4 sm:$0xff]  }
  0xda   :  { %4529 = vmatprep.mubr.msk.bf16.mxu0 %vm1506_vm0, %v6083_v43  ;;  %4593 = vmatprep.mubr.msk.bf16.mxu1 %vm1506_vm0, %v6085_v44  ;;  %v6127_v43 = vld [vmem:[%s7935_s0 + $0x5e4] ss:$8 sps:$4 sm:$0xff]  }
  0xe1   :  { %2115 = vmatmul.mubr.bf16.gmra.mrb[92].mxu0 %v6087_v45  ;;  %2627 = vmatmul.mubr.bf16.gmra.mrb[92].mxu1 %v6088_v46 }
  0xe2   :  { %4530 = vmatprep.mubr.msk.bf16.mxu0 %vm1506_vm0, %v6089_v47  ;;  %4594 = vmatprep.mubr.msk.bf16.mxu1 %vm1506_vm0, %v6091_v48 }
  0xe9   :  { %2123 = vmatmul.mubr.bf16.gmra.mrb[96].mxu0 %v6093_v49  ;;  %2635 = vmatmul.mubr.bf16.gmra.mrb[96].mxu1 %v6094_v50 }
  0xea   :  { %4531 = vmatprep.mubr.msk.bf16.mxu0 %vm1506_vm0, %v6095_v51  ;;  %4595 = vmatprep.mubr.msk.bf16.mxu1 %vm1506_vm0, %v6097_v52 }
  0xf1   :  { %2131 = vmatmul.mubr.bf16.gmra.mrb[100].mxu0 %v6099_v53  ;;  %2643 = vmatmul.mubr.bf16.gmra.mrb[100].mxu1 %v6100_v54 }
  0xf2   :  { %4532 = vmatprep.mubr.msk.bf16.mxu0 %vm1506_vm0, %v6101_v55  ;;  %4596 = vmatprep.mubr.msk.bf16.mxu1 %vm1506_vm0, %v6103_v56  ;;  %v6129_v56 = vld [vmem:[%s7935_s0 + $0x1e0] ss:$8 sps:$4 sm:$0xff]  }
  0xf9   :  { %2139 = vmatmul.mubr.bf16.gmra.mrb[104].mxu0 %v6105_v57  ;;  %2651 = vmatmul.mubr.bf16.gmra.mrb[104].mxu1 %v6106_v58  ;;  %v6130_v57 = vld [vmem:[%s7935_s0 + $0x5e0] ss:$8 sps:$4 sm:$0xff]  }
  0xfa   :  { %4533 = vmatprep.mubr.msk.bf16.mxu0 %vm1506_vm0, %v6107_v59  ;;  %4597 = vmatprep.mubr.msk.bf16.mxu1 %vm1506_vm0, %v6109_v60  ;;  %v6131_v60 = vld [vmem:[%s7935_s0 + $0x1f4] ss:$8 sps:$4 sm:$0xff]  }
  0xfc   :  { %v1932_v62 = vpop.f32.mrb[0].mxu0  ;;  %v2444_v63 = vpop.f32.mrb[0].mxu1 }
  0xfd   :  { %v1934_v0 = vpop.f32.mrb[1].mxu0  ;;  %v2446_v1 = vpop.f32.mrb[1].mxu1  ;;  %v1933_v8 = vadd.f32 %v6772_v61, %v1932_v62  ;;  %v2445_v9 = vadd.f32 %v6772_v61, %v2444_v63  ;;  %v6133_v62 = vld [vmem:[%s7935_s0 + $0x5f4] ss:$8 sps:$4 sm:$0xff]  }
  0xfe   :  { %v1935_v4 = vpop.f32.mrb[2].mxu0  ;;  %v2447_v5 = vpop.f32.mrb[2].mxu1 }
  0xff   :  { %v1936_v10 = vadd.f32 %v6772_v61, %v1935_v4  ;;  %v2448_v11 = vadd.f32 %v6772_v61, %v2447_v5  ;;  %v1937_v12 = vpop.f32.mrb[3].mxu0  ;;  %v2449_v13 = vpop.f32.mrb[3].mxu1 }
 0x100   :  { %v6136_v12 = vld [vmem:[%s7935_s0 + $0x5f0] ss:$8 sps:$4 sm:$0xff]  }
 0x101   :  { %v5149_v14 = vpack.c.bf16 %v1936_v10, %v1933_v8  ;;  %v5469_v15 = vpack.c.bf16 %v2448_v11, %v2445_v9  ;;  %2147 = vmatmul.mubr.bf16.gmra.mrb[108].mxu0 %v6111_v2  ;;  %2659 = vmatmul.mubr.bf16.gmra.mrb[108].mxu1 %v6112_v3  ;;  %v6135_v11 = vld [vmem:[%s7935_s0 + $0x1f0] ss:$8 sps:$4 sm:$0xff]  }
 0x102   :  { %4534 = vmatprep.mubr.msk.bf16.mxu0 %vm1506_vm0, %v6113_v6  ;;  %4598 = vmatprep.mubr.msk.bf16.mxu1 %vm1506_vm0, %v6115_v7 }
 0x103   :  { %5150 = vst [vmem:[%s7937_s3] sm:$0xff] %v5149_v14   ;;  %5849 = vst [vmem:[%s7937_s3 + $0x200] sm:$0xff] %v5469_v15   ;;  %v6137_v15 = vld [vmem:[%s7935_s0 + $0x204] ss:$8 sps:$4 sm:$0xff]  }
 0x104   :  { %v1940_v16 = vpop.f32.mrb[4].mxu0  ;;  %v2452_v17 = vpop.f32.mrb[4].mxu1 }
 0x105   :  { %v1942_v18 = vpop.f32.mrb[5].mxu0  ;;  %v2454_v19 = vpop.f32.mrb[5].mxu1  ;;  %v1941_v26 = vadd.f32 %v6772_v61, %v1940_v16  ;;  %v2453_v27 = vadd.f32 %v6772_v61, %v2452_v17  ;;  %v6139_v16 = vld [vmem:[%s7935_s0 + $0x604] ss:$8 sps:$4 sm:$0xff]  }
 0x106   :  { %v1943_v22 = vpop.f32.mrb[6].mxu0  ;;  %v2455_v23 = vpop.f32.mrb[6].mxu1 }
 0x107   :  { %v1944_v28 = vadd.f32 %v6772_v61, %v1943_v22  ;;  %v2456_v29 = vadd.f32 %v6772_v61, %v2455_v23  ;;  %v1945_v30 = vpop.f32.mrb[7].mxu0  ;;  %v2457_v31 = vpop.f32.mrb[7].mxu1 }
 0x108   :  { %v6142_v30 = vld [vmem:[%s7935_s0 + $0x600] ss:$8 sps:$4 sm:$0xff]  }
 0x109   :  { %v5154_v32 = vpack.c.bf16 %v1944_v28, %v1941_v26  ;;  %v5474_v33 = vpack.c.bf16 %v2456_v29, %v2453_v27  ;;  %2155 = vmatmul.mubr.bf16.gmra.mrb[112].mxu0 %v6117_v20  ;;  %2667 = vmatmul.mubr.bf16.gmra.mrb[112].mxu1 %v6118_v21  ;;  %v6141_v29 = vld [vmem:[%s7935_s0 + $0x200] ss:$8 sps:$4 sm:$0xff]  }
 0x10a   :  { %4535 = vmatprep.mubr.msk.bf16.mxu0 %vm1506_vm0, %v6119_v24  ;;  %4599 = vmatprep.mubr.msk.bf16.mxu1 %vm1506_vm0, %v6121_v25 }
 0x10b   :  { %5786 = vst [vmem:[%s7937_s3 + $0x8] sm:$0xff] %v5154_v32   ;;  %5850 = vst [vmem:[%s7937_s3 + $0x208] sm:$0xff] %v5474_v33   ;;  %v6143_v33 = vld [vmem:[%s7935_s0 + $0x214] ss:$8 sps:$4 sm:$0xff]  }
 0x10c   :  { %v1948_v34 = vpop.f32.mrb[8].mxu0  ;;  %v2460_v35 = vpop.f32.mrb[8].mxu1 }
 0x10d   :  { %v1950_v36 = vpop.f32.mrb[9].mxu0  ;;  %v2462_v37 = vpop.f32.mrb[9].mxu1  ;;  %v1949_v44 = vadd.f32 %v6772_v61, %v1948_v34  ;;  %v2461_v45 = vadd.f32 %v6772_v61, %v2460_v35  ;;  %v6145_v34 = vld [vmem:[%s7935_s0 + $0x614] ss:$8 sps:$4 sm:$0xff]  }
 0x10e   :  { %v1951_v40 = vpop.f32.mrb[10].mxu0  ;;  %v2463_v41 = vpop.f32.mrb[10].mxu1 }
 0x10f   :  { %v1952_v46 = vadd.f32 %v6772_v61, %v1951_v40  ;;  %v2464_v47 = vadd.f32 %v6772_v61, %v2463_v41  ;;  %v1953_v48 = vpop.f32.mrb[11].mxu0  ;;  %v2465_v49 = vpop.f32.mrb[11].mxu1 }
 0x110   :  { %v6148_v48 = vld [vmem:[%s7935_s0 + $0x610] ss:$8 sps:$4 sm:$0xff]  }
 0x111   :  { %v5159_v50 = vpack.c.bf16 %v1952_v46, %v1949_v44  ;;  %v5479_v51 = vpack.c.bf16 %v2464_v47, %v2461_v45  ;;  %2163 = vmatmul.mubr.bf16.gmra.mrb[116].mxu0 %v6123_v38  ;;  %2675 = vmatmul.mubr.bf16.gmra.mrb[116].mxu1 %v6124_v39  ;;  %v6147_v47 = vld [vmem:[%s7935_s0 + $0x210] ss:$8 sps:$4 sm:$0xff]  }
 0x112   :  { %4536 = vmatprep.mubr.msk.bf16.mxu0 %vm1506_vm0, %v6125_v42  ;;  %4600 = vmatprep.mubr.msk.bf16.mxu1 %vm1506_vm0, %v6127_v43 }
 0x113   :  { %5787 = vst [vmem:[%s7937_s3 + $0x10] sm:$0xff] %v5159_v50   ;;  %5851 = vst [vmem:[%s7937_s3 + $0x210] sm:$0xff] %v5479_v51   ;;  %v6149_v51 = vld [vmem:[%s7935_s0 + $0x224] ss:$8 sps:$4 sm:$0xff]  }
 0x114   :  { %v1956_v52 = vpop.f32.mrb[12].mxu0  ;;  %v2468_v53 = vpop.f32.mrb[12].mxu1 }
 0x115   :  { %v1958_v54 = vpop.f32.mrb[13].mxu0  ;;  %v2470_v55 = vpop.f32.mrb[13].mxu1  ;;  %v1957_v63 = vadd.f32 %v6772_v61, %v1956_v52  ;;  %v2469_v0 = vadd.f32 %v6772_v61, %v2468_v53  ;;  %v6151_v52 = vld [vmem:[%s7935_s0 + $0x624] ss:$8 sps:$4 sm:$0xff]  }
 0x116   :  { %v1959_v58 = vpop.f32.mrb[14].mxu0  ;;  %v2471_v59 = vpop.f32.mrb[14].mxu1 }
 0x117   :  { %v1960_v1 = vadd.f32 %v6772_v61, %v1959_v58  ;;  %v2472_v2 = vadd.f32 %v6772_v61, %v2471_v59  ;;  %v1961_v3 = vpop.f32.mrb[15].mxu0  ;;  %v2473_v4 = vpop.f32.mrb[15].mxu1 }
 0x118   :  { %v6154_v3 = vld [vmem:[%s7935_s0 + $0x620] ss:$8 sps:$4 sm:$0xff]  }
 0x119   :  { %v5164_v5 = vpack.c.bf16 %v1960_v1, %v1957_v63  ;;  %v5484_v6 = vpack.c.bf16 %v2472_v2, %v2469_v0  ;;  %2171 = vmatmul.mubr.bf16.gmra.mrb[120].mxu0 %v6129_v56  ;;  %2683 = vmatmul.mubr.bf16.gmra.mrb[120].mxu1 %v6130_v57  ;;  %v6153_v2 = vld [vmem:[%s7935_s0 + $0x220] ss:$8 sps:$4 sm:$0xff]  }
 0x11a   :  { %4537 = vmatprep.mubr.msk.bf16.mxu0 %vm1506_vm0, %v6131_v60  ;;  %4601 = vmatprep.mubr.msk.bf16.mxu1 %vm1506_vm0, %v6133_v62 }
 0x11b   :  { %5788 = vst [vmem:[%s7937_s3 + $0x18] sm:$0xff] %v5164_v5   ;;  %5852 = vst [vmem:[%s7937_s3 + $0x218] sm:$0xff] %v5484_v6   ;;  %v6155_v6 = vld [vmem:[%s7935_s0 + $0x234] ss:$8 sps:$4 sm:$0xff]  }
 0x11c   :  { %v1964_v7 = vpop.f32.mrb[16].mxu0  ;;  %v2476_v8 = vpop.f32.mrb[16].mxu1 }
 0x11d   :  { %v1966_v9 = vpop.f32.mrb[17].mxu0  ;;  %v2478_v10 = vpop.f32.mrb[17].mxu1  ;;  %v1965_v17 = vadd.f32 %v6772_v61, %v1964_v7  ;;  %v2477_v18 = vadd.f32 %v6772_v61, %v2476_v8  ;;  %v6157_v7 = vld [vmem:[%s7935_s0 + $0x634] ss:$8 sps:$4 sm:$0xff]  }
 0x11e   :  { %v1967_v13 = vpop.f32.mrb[18].mxu0  ;;  %v2479_v14 = vpop.f32.mrb[18].mxu1 }
 0x11f   :  { %v1968_v19 = vadd.f32 %v6772_v61, %v1967_v13  ;;  %v2480_v20 = vadd.f32 %v6772_v61, %v2479_v14  ;;  %v1969_v21 = vpop.f32.mrb[19].mxu0  ;;  %v2481_v22 = vpop.f32.mrb[19].mxu1 }
 0x120   :  { %v6160_v21 = vld [vmem:[%s7935_s0 + $0x630] ss:$8 sps:$4 sm:$0xff]  }
 0x121   :  { %v5169_v23 = vpack.c.bf16 %v1968_v19, %v1965_v17  ;;  %v5489_v24 = vpack.c.bf16 %v2480_v20, %v2477_v18  ;;  %2179 = vmatmul.mubr.bf16.gmra.mrb[124].mxu0 %v6135_v11  ;;  %2691 = vmatmul.mubr.bf16.gmra.mrb[124].mxu1 %v6136_v12  ;;  %v6159_v20 = vld [vmem:[%s7935_s0 + $0x230] ss:$8 sps:$4 sm:$0xff]  }
 0x122   :  { %4538 = vmatprep.mubr.msk.bf16.mxu0 %vm1506_vm0, %v6137_v15  ;;  %4602 = vmatprep.mubr.msk.bf16.mxu1 %vm1506_vm0, %v6139_v16 }
 0x123   :  { %5789 = vst [vmem:[%s7937_s3 + $0x20] sm:$0xff] %v5169_v23   ;;  %5853 = vst [vmem:[%s7937_s3 + $0x220] sm:$0xff] %v5489_v24   ;;  %v6161_v24 = vld [vmem:[%s7935_s0 + $0x244] ss:$8 sps:$4 sm:$0xff]  }
 0x124   :  { %v1972_v25 = vpop.f32.mrb[20].mxu0  ;;  %v2484_v26 = vpop.f32.mrb[20].mxu1 }
 0x125   :  { %v1974_v27 = vpop.f32.mrb[21].mxu0  ;;  %v2486_v28 = vpop.f32.mrb[21].mxu1  ;;  %v1973_v35 = vadd.f32 %v6772_v61, %v1972_v25  ;;  %v2485_v36 = vadd.f32 %v6772_v61, %v2484_v26  ;;  %v6163_v25 = vld [vmem:[%s7935_s0 + $0x644] ss:$8 sps:$4 sm:$0xff]  }
 0x126   :  { %v1975_v31 = vpop.f32.mrb[22].mxu0  ;;  %v2487_v32 = vpop.f32.mrb[22].mxu1 }
 0x127   :  { %v1976_v37 = vadd.f32 %v6772_v61, %v1975_v31  ;;  %v2488_v38 = vadd.f32 %v6772_v61, %v2487_v32  ;;  %v1977_v39 = vpop.f32.mrb[23].mxu0  ;;  %v2489_v40 = vpop.f32.mrb[23].mxu1 }
 0x128   :  { %v6166_v39 = vld [vmem:[%s7935_s0 + $0x640] ss:$8 sps:$4 sm:$0xff]  }
 0x129   :  { %v5174_v41 = vpack.c.bf16 %v1976_v37, %v1973_v35  ;;  %v5494_v42 = vpack.c.bf16 %v2488_v38, %v2485_v36  ;;  %2187 = vmatmul.mubr.bf16.gmra.mrb[128].mxu0 %v6141_v29  ;;  %2699 = vmatmul.mubr.bf16.gmra.mrb[128].mxu1 %v6142_v30  ;;  %v6165_v38 = vld [vmem:[%s7935_s0 + $0x240] ss:$8 sps:$4 sm:$0xff]  }
 0x12a   :  { %4539 = vmatprep.mubr.msk.bf16.mxu0 %vm1506_vm0, %v6143_v33  ;;  %4603 = vmatprep.mubr.msk.bf16.mxu1 %vm1506_vm0, %v6145_v34 }
 0x12b   :  { %5790 = vst [vmem:[%s7937_s3 + $0x28] sm:$0xff] %v5174_v41   ;;  %5854 = vst [vmem:[%s7937_s3 + $0x228] sm:$0xff] %v5494_v42   ;;  %v6167_v42 = vld [vmem:[%s7935_s0 + $0x254] ss:$8 sps:$4 sm:$0xff]  }
 0x12c   :  { %v1980_v43 = vpop.f32.mrb[24].mxu0  ;;  %v2492_v44 = vpop.f32.mrb[24].mxu1 }
 0x12d   :  { %v1982_v45 = vpop.f32.mrb[25].mxu0  ;;  %v2494_v46 = vpop.f32.mrb[25].mxu1  ;;  %v1981_v53 = vadd.f32 %v6772_v61, %v1980_v43  ;;  %v2493_v54 = vadd.f32 %v6772_v61, %v2492_v44  ;;  %v6169_v43 = vld [vmem:[%s7935_s0 + $0x654] ss:$8 sps:$4 sm:$0xff]  }
 0x12e   :  { %v1983_v49 = vpop.f32.mrb[26].mxu0  ;;  %v2495_v50 = vpop.f32.mrb[26].mxu1 }
 0x12f   :  { %v1984_v55 = vadd.f32 %v6772_v61, %v1983_v49  ;;  %v2496_v56 = vadd.f32 %v6772_v61, %v2495_v50  ;;  %v1985_v57 = vpop.f32.mrb[27].mxu0  ;;  %v2497_v58 = vpop.f32.mrb[27].mxu1 }
 0x130   :  { %v6172_v57 = vld [vmem:[%s7935_s0 + $0x650] ss:$8 sps:$4 sm:$0xff]  }
 0x131   :  { %v5179_v59 = vpack.c.bf16 %v1984_v55, %v1981_v53  ;;  %v5499_v60 = vpack.c.bf16 %v2496_v56, %v2493_v54  ;;  %2195 = vmatmul.mubr.bf16.gmra.mrb[132].mxu0 %v6147_v47  ;;  %2707 = vmatmul.mubr.bf16.gmra.mrb[132].mxu1 %v6148_v48  ;;  %v6171_v56 = vld [vmem:[%s7935_s0 + $0x250] ss:$8 sps:$4 sm:$0xff]  }
 0x132   :  { %4540 = vmatprep.mubr.msk.bf16.mxu0 %vm1506_vm0, %v6149_v51  ;;  %4604 = vmatprep.mubr.msk.bf16.mxu1 %vm1506_vm0, %v6151_v52 }
 0x133   :  { %5791 = vst [vmem:[%s7937_s3 + $0x30] sm:$0xff] %v5179_v59   ;;  %5855 = vst [vmem:[%s7937_s3 + $0x230] sm:$0xff] %v5499_v60   ;;  %v6173_v60 = vld [vmem:[%s7935_s0 + $0x264] ss:$8 sps:$4 sm:$0xff]  }
 0x134   :  { %v1988_v62 = vpop.f32.mrb[28].mxu0  ;;  %v2500_v63 = vpop.f32.mrb[28].mxu1 }
 0x135   :  { %v1990_v0 = vpop.f32.mrb[29].mxu0  ;;  %v2502_v1 = vpop.f32.mrb[29].mxu1  ;;  %v1989_v8 = vadd.f32 %v6772_v61, %v1988_v62  ;;  %v2501_v9 = vadd.f32 %v6772_v61, %v2500_v63  ;;  %v6175_v62 = vld [vmem:[%s7935_s0 + $0x664] ss:$8 sps:$4 sm:$0xff]  }
 0x136   :  { %v1991_v4 = vpop.f32.mrb[30].mxu0  ;;  %v2503_v5 = vpop.f32.mrb[30].mxu1 }
 0x137   :  { %v1992_v10 = vadd.f32 %v6772_v61, %v1991_v4  ;;  %v2504_v11 = vadd.f32 %v6772_v61, %v2503_v5  ;;  %v1993_v12 = vpop.f32.mrb[31].mxu0  ;;  %v2505_v13 = vpop.f32.mrb[31].mxu1 }
 0x138   :  { %v6178_v12 = vld [vmem:[%s7935_s0 + $0x660] ss:$8 sps:$4 sm:$0xff]  }
 0x139   :  { %v5184_v14 = vpack.c.bf16 %v1992_v10, %v1989_v8  ;;  %v5504_v15 = vpack.c.bf16 %v2504_v11, %v2501_v9  ;;  %2203 = vmatmul.mubr.bf16.gmra.mrb[136].mxu0 %v6153_v2  ;;  %2715 = vmatmul.mubr.bf16.gmra.mrb[136].mxu1 %v6154_v3  ;;  %v6177_v11 = vld [vmem:[%s7935_s0 + $0x260] ss:$8 sps:$4 sm:$0xff]  }
 0x13a   :  { %4541 = vmatprep.mubr.msk.bf16.mxu0 %vm1506_vm0, %v6155_v6  ;;  %4605 = vmatprep.mubr.msk.bf16.mxu1 %vm1506_vm0, %v6157_v7 }
 0x13b   :  { %5792 = vst [vmem:[%s7937_s3 + $0x38] sm:$0xff] %v5184_v14   ;;  %5856 = vst [vmem:[%s7937_s3 + $0x238] sm:$0xff] %v5504_v15   ;;  %v6179_v15 = vld [vmem:[%s7935_s0 + $0x274] ss:$8 sps:$4 sm:$0xff]  }
 0x13c   :  { %v1996_v16 = vpop.f32.mrb[32].mxu0  ;;  %v2508_v17 = vpop.f32.mrb[32].mxu1 }
 0x13d   :  { %v1998_v18 = vpop.f32.mrb[33].mxu0  ;;  %v2510_v19 = vpop.f32.mrb[33].mxu1  ;;  %v1997_v26 = vadd.f32 %v6772_v61, %v1996_v16  ;;  %v2509_v27 = vadd.f32 %v6772_v61, %v2508_v17  ;;  %v6181_v16 = vld [vmem:[%s7935_s0 + $0x674] ss:$8 sps:$4 sm:$0xff]  }
 0x13e   :  { %v1999_v22 = vpop.f32.mrb[34].mxu0  ;;  %v2511_v23 = vpop.f32.mrb[34].mxu1 }
 0x13f   :  { %v2000_v28 = vadd.f32 %v6772_v61, %v1999_v22  ;;  %v2512_v29 = vadd.f32 %v6772_v61, %v2511_v23  ;;  %v2001_v30 = vpop.f32.mrb[35].mxu0  ;;  %v2513_v31 = vpop.f32.mrb[35].mxu1 }
 0x140   :  { %v6184_v30 = vld [vmem:[%s7935_s0 + $0x670] ss:$8 sps:$4 sm:$0xff]  }
 0x141   :  { %v5189_v32 = vpack.c.bf16 %v2000_v28, %v1997_v26  ;;  %v5509_v33 = vpack.c.bf16 %v2512_v29, %v2509_v27  ;;  %2211 = vmatmul.mubr.bf16.gmra.mrb[140].mxu0 %v6159_v20  ;;  %2723 = vmatmul.mubr.bf16.gmra.mrb[140].mxu1 %v6160_v21  ;;  %v6183_v29 = vld [vmem:[%s7935_s0 + $0x270] ss:$8 sps:$4 sm:$0xff]  }
 0x142   :  { %4542 = vmatprep.mubr.msk.bf16.mxu0 %vm1506_vm0, %v6161_v24  ;;  %4606 = vmatprep.mubr.msk.bf16.mxu1 %vm1506_vm0, %v6163_v25 }
 0x143   :  { %5793 = vst [vmem:[%s7937_s3 + $0x40] sm:$0xff] %v5189_v32   ;;  %5857 = vst [vmem:[%s7937_s3 + $0x240] sm:$0xff] %v5509_v33   ;;  %v6185_v33 = vld [vmem:[%s7935_s0 + $0x284] ss:$8 sps:$4 sm:$0xff]  }
 0x144   :  { %v2004_v34 = vpop.f32.mrb[36].mxu0  ;;  %v2516_v35 = vpop.f32.mrb[36].mxu1 }
 0x145   :  { %v2006_v36 = vpop.f32.mrb[37].mxu0  ;;  %v2518_v37 = vpop.f32.mrb[37].mxu1  ;;  %v2005_v44 = vadd.f32 %v6772_v61, %v2004_v34  ;;  %v2517_v45 = vadd.f32 %v6772_v61, %v2516_v35  ;;  %v6187_v34 = vld [vmem:[%s7935_s0 + $0x684] ss:$8 sps:$4 sm:$0xff]  }
 0x146   :  { %v2007_v40 = vpop.f32.mrb[38].mxu0  ;;  %v2519_v41 = vpop.f32.mrb[38].mxu1 }
 0x147   :  { %v2008_v46 = vadd.f32 %v6772_v61, %v2007_v40  ;;  %v2520_v47 = vadd.f32 %v6772_v61, %v2519_v41  ;;  %v2009_v48 = vpop.f32.mrb[39].mxu0  ;;  %v2521_v49 = vpop.f32.mrb[39].mxu1 }
 0x148   :  { %v6190_v48 = vld [vmem:[%s7935_s0 + $0x680] ss:$8 sps:$4 sm:$0xff]  }
 0x149   :  { %v5194_v50 = vpack.c.bf16 %v2008_v46, %v2005_v44  ;;  %v5514_v51 = vpack.c.bf16 %v2520_v47, %v2517_v45  ;;  %2219 = vmatmul.mubr.bf16.gmra.mrb[144].mxu0 %v6165_v38  ;;  %2731 = vmatmul.mubr.bf16.gmra.mrb[144].mxu1 %v6166_v39  ;;  %v6189_v47 = vld [vmem:[%s7935_s0 + $0x280] ss:$8 sps:$4 sm:$0xff]  }
 0x14a   :  { %4543 = vmatprep.mubr.msk.bf16.mxu0 %vm1506_vm0, %v6167_v42  ;;  %4607 = vmatprep.mubr.msk.bf16.mxu1 %vm1506_vm0, %v6169_v43 }
 0x14b   :  { %5794 = vst [vmem:[%s7937_s3 + $0x48] sm:$0xff] %v5194_v50   ;;  %5858 = vst [vmem:[%s7937_s3 + $0x248] sm:$0xff] %v5514_v51   ;;  %v6191_v51 = vld [vmem:[%s7935_s0 + $0x294] ss:$8 sps:$4 sm:$0xff]  }
 0x14c   :  { %v2012_v52 = vpop.f32.mrb[40].mxu0  ;;  %v2524_v53 = vpop.f32.mrb[40].mxu1 }
 0x14d   :  { %v2014_v54 = vpop.f32.mrb[41].mxu0  ;;  %v2526_v55 = vpop.f32.mrb[41].mxu1  ;;  %v2013_v63 = vadd.f32 %v6772_v61, %v2012_v52  ;;  %v2525_v0 = vadd.f32 %v6772_v61, %v2524_v53  ;;  %v6193_v52 = vld [vmem:[%s7935_s0 + $0x694] ss:$8 sps:$4 sm:$0xff]  }
 0x14e   :  { %v2015_v58 = vpop.f32.mrb[42].mxu0  ;;  %v2527_v59 = vpop.f32.mrb[42].mxu1 }
 0x14f   :  { %v2016_v1 = vadd.f32 %v6772_v61, %v2015_v58  ;;  %v2528_v2 = vadd.f32 %v6772_v61, %v2527_v59  ;;  %v2017_v3 = vpop.f32.mrb[43].mxu0  ;;  %v2529_v4 = vpop.f32.mrb[43].mxu1 }
 0x150   :  { %v6196_v3 = vld [vmem:[%s7935_s0 + $0x690] ss:$8 sps:$4 sm:$0xff]  }
 0x151   :  { %v5199_v5 = vpack.c.bf16 %v2016_v1, %v2013_v63  ;;  %v5519_v6 = vpack.c.bf16 %v2528_v2, %v2525_v0  ;;  %2227 = vmatmul.mubr.bf16.gmra.mrb[148].mxu0 %v6171_v56  ;;  %2739 = vmatmul.mubr.bf16.gmra.mrb[148].mxu1 %v6172_v57  ;;  %v6195_v2 = vld [vmem:[%s7935_s0 + $0x290] ss:$8 sps:$4 sm:$0xff]  }
 0x152   :  { %4544 = vmatprep.mubr.msk.bf16.mxu0 %vm1506_vm0, %v6173_v60  ;;  %4608 = vmatprep.mubr.msk.bf16.mxu1 %vm1506_vm0, %v6175_v62 }
 0x153   :  { %5795 = vst [vmem:[%s7937_s3 + $0x50] sm:$0xff] %v5199_v5   ;;  %5859 = vst [vmem:[%s7937_s3 + $0x250] sm:$0xff] %v5519_v6   ;;  %v6197_v6 = vld [vmem:[%s7935_s0 + $0x2a4] ss:$8 sps:$4 sm:$0xff]  }
 0x154   :  { %v2020_v7 = vpop.f32.mrb[44].mxu0  ;;  %v2532_v8 = vpop.f32.mrb[44].mxu1 }
 0x155   :  { %v2022_v9 = vpop.f32.mrb[45].mxu0  ;;  %v2534_v10 = vpop.f32.mrb[45].mxu1  ;;  %v2021_v17 = vadd.f32 %v6772_v61, %v2020_v7  ;;  %v2533_v18 = vadd.f32 %v6772_v61, %v2532_v8  ;;  %v6199_v7 = vld [vmem:[%s7935_s0 + $0x6a4] ss:$8 sps:$4 sm:$0xff]  }
 0x156   :  { %v2023_v13 = vpop.f32.mrb[46].mxu0  ;;  %v2535_v14 = vpop.f32.mrb[46].mxu1 }
 0x157   :  { %v2024_v19 = vadd.f32 %v6772_v61, %v2023_v13  ;;  %v2536_v20 = vadd.f32 %v6772_v61, %v2535_v14  ;;  %v2025_v21 = vpop.f32.mrb[47].mxu0  ;;  %v2537_v22 = vpop.f32.mrb[47].mxu1 }
 0x158   :  { %v6202_v21 = vld [vmem:[%s7935_s0 + $0x6a0] ss:$8 sps:$4 sm:$0xff]  }
 0x159   :  { %v5204_v23 = vpack.c.bf16 %v2024_v19, %v2021_v17  ;;  %v5524_v24 = vpack.c.bf16 %v2536_v20, %v2533_v18  ;;  %2235 = vmatmul.mubr.bf16.gmra.mrb[152].mxu0 %v6177_v11  ;;  %2747 = vmatmul.mubr.bf16.gmra.mrb[152].mxu1 %v6178_v12  ;;  %v6201_v20 = vld [vmem:[%s7935_s0 + $0x2a0] ss:$8 sps:$4 sm:$0xff]  }
 0x15a   :  { %4545 = vmatprep.mubr.msk.bf16.mxu0 %vm1506_vm0, %v6179_v15  ;;  %4609 = vmatprep.mubr.msk.bf16.mxu1 %vm1506_vm0, %v6181_v16 }
 0x15b   :  { %5796 = vst [vmem:[%s7937_s3 + $0x58] sm:$0xff] %v5204_v23   ;;  %5860 = vst [vmem:[%s7937_s3 + $0x258] sm:$0xff] %v5524_v24   ;;  %v6203_v24 = vld [vmem:[%s7935_s0 + $0x2b4] ss:$8 sps:$4 sm:$0xff]  }
 0x15c   :  { %v2028_v25 = vpop.f32.mrb[48].mxu0  ;;  %v2540_v26 = vpop.f32.mrb[48].mxu1 }
 0x15d   :  { %v2030_v27 = vpop.f32.mrb[49].mxu0  ;;  %v2542_v28 = vpop.f32.mrb[49].mxu1  ;;  %v2029_v35 = vadd.f32 %v6772_v61, %v2028_v25  ;;  %v2541_v36 = vadd.f32 %v6772_v61, %v2540_v26  ;;  %v6205_v25 = vld [vmem:[%s7935_s0 + $0x6b4] ss:$8 sps:$4 sm:$0xff]  }
 0x15e   :  { %v2031_v31 = vpop.f32.mrb[50].mxu0  ;;  %v2543_v32 = vpop.f32.mrb[50].mxu1 }
 0x15f   :  { %v2032_v37 = vadd.f32 %v6772_v61, %v2031_v31  ;;  %v2544_v38 = vadd.f32 %v6772_v61, %v2543_v32  ;;  %v2033_v39 = vpop.f32.mrb[51].mxu0  ;;  %v2545_v40 = vpop.f32.mrb[51].mxu1 }
 0x160   :  { %v6208_v39 = vld [vmem:[%s7935_s0 + $0x6b0] ss:$8 sps:$4 sm:$0xff]  }
 0x161   :  { %v5209_v41 = vpack.c.bf16 %v2032_v37, %v2029_v35  ;;  %v5529_v42 = vpack.c.bf16 %v2544_v38, %v2541_v36  ;;  %2243 = vmatmul.mubr.bf16.gmra.mrb[156].mxu0 %v6183_v29  ;;  %2755 = vmatmul.mubr.bf16.gmra.mrb[156].mxu1 %v6184_v30  ;;  %v6207_v38 = vld [vmem:[%s7935_s0 + $0x2b0] ss:$8 sps:$4 sm:$0xff]  }
 0x162   :  { %4546 = vmatprep.mubr.msk.bf16.mxu0 %vm1506_vm0, %v6185_v33  ;;  %4610 = vmatprep.mubr.msk.bf16.mxu1 %vm1506_vm0, %v6187_v34 }
 0x163   :  { %5797 = vst [vmem:[%s7937_s3 + $0x60] sm:$0xff] %v5209_v41   ;;  %5861 = vst [vmem:[%s7937_s3 + $0x260] sm:$0xff] %v5529_v42   ;;  %v6209_v42 = vld [vmem:[%s7935_s0 + $0x2c4] ss:$8 sps:$4 sm:$0xff]  }
 0x164   :  { %v2036_v43 = vpop.f32.mrb[52].mxu0  ;;  %v2548_v44 = vpop.f32.mrb[52].mxu1 }
 0x165   :  { %v2038_v45 = vpop.f32.mrb[53].mxu0  ;;  %v2550_v46 = vpop.f32.mrb[53].mxu1  ;;  %v2037_v53 = vadd.f32 %v6772_v61, %v2036_v43  ;;  %v2549_v54 = vadd.f32 %v6772_v61, %v2548_v44  ;;  %v6211_v43 = vld [vmem:[%s7935_s0 + $0x6c4] ss:$8 sps:$4 sm:$0xff]  }
 0x166   :  { %v2039_v49 = vpop.f32.mrb[54].mxu0  ;;  %v2551_v50 = vpop.f32.mrb[54].mxu1 }
 0x167   :  { %v2040_v55 = vadd.f32 %v6772_v61, %v2039_v49  ;;  %v2552_v56 = vadd.f32 %v6772_v61, %v2551_v50  ;;  %v2041_v57 = vpop.f32.mrb[55].mxu0  ;;  %v2553_v58 = vpop.f32.mrb[55].mxu1 }
 0x168   :  { %v6214_v57 = vld [vmem:[%s7935_s0 + $0x6c0] ss:$8 sps:$4 sm:$0xff]  }
 0x169   :  { %v5214_v59 = vpack.c.bf16 %v2040_v55, %v2037_v53  ;;  %v5534_v60 = vpack.c.bf16 %v2552_v56, %v2549_v54  ;;  %2251 = vmatmul.mubr.bf16.gmra.mrb[160].mxu0 %v6189_v47  ;;  %2763 = vmatmul.mubr.bf16.gmra.mrb[160].mxu1 %v6190_v48  ;;  %v6213_v56 = vld [vmem:[%s7935_s0 + $0x2c0] ss:$8 sps:$4 sm:$0xff]  }
 0x16a   :  { %4547 = vmatprep.mubr.msk.bf16.mxu0 %vm1506_vm0, %v6191_v51  ;;  %4611 = vmatprep.mubr.msk.bf16.mxu1 %vm1506_vm0, %v6193_v52 }
 0x16b   :  { %5798 = vst [vmem:[%s7937_s3 + $0x68] sm:$0xff] %v5214_v59   ;;  %5862 = vst [vmem:[%s7937_s3 + $0x268] sm:$0xff] %v5534_v60   ;;  %v6215_v60 = vld [vmem:[%s7935_s0 + $0x2d4] ss:$8 sps:$4 sm:$0xff]  }
 0x16c   :  { %v2044_v62 = vpop.f32.mrb[56].mxu0  ;;  %v2556_v63 = vpop.f32.mrb[56].mxu1 }
 0x16d   :  { %v2046_v0 = vpop.f32.mrb[57].mxu0  ;;  %v2558_v1 = vpop.f32.mrb[57].mxu1  ;;  %v2045_v8 = vadd.f32 %v6772_v61, %v2044_v62  ;;  %v2557_v9 = vadd.f32 %v6772_v61, %v2556_v63  ;;  %v6217_v62 = vld [vmem:[%s7935_s0 + $0x6d4] ss:$8 sps:$4 sm:$0xff]  }
 0x16e   :  { %v2047_v4 = vpop.f32.mrb[58].mxu0  ;;  %v2559_v5 = vpop.f32.mrb[58].mxu1 }
 0x16f   :  { %v2048_v10 = vadd.f32 %v6772_v61, %v2047_v4  ;;  %v2560_v11 = vadd.f32 %v6772_v61, %v2559_v5  ;;  %v2049_v12 = vpop.f32.mrb[59].mxu0  ;;  %v2561_v13 = vpop.f32.mrb[59].mxu1 }
 0x170   :  { %v6220_v12 = vld [vmem:[%s7935_s0 + $0x6d0] ss:$8 sps:$4 sm:$0xff]  }
 0x171   :  { %v5219_v14 = vpack.c.bf16 %v2048_v10, %v2045_v8  ;;  %v5539_v15 = vpack.c.bf16 %v2560_v11, %v2557_v9  ;;  %2259 = vmatmul.mubr.bf16.gmra.mrb[164].mxu0 %v6195_v2  ;;  %2771 = vmatmul.mubr.bf16.gmra.mrb[164].mxu1 %v6196_v3  ;;  %v6219_v11 = vld [vmem:[%s7935_s0 + $0x2d0] ss:$8 sps:$4 sm:$0xff]  }
 0x172   :  { %4548 = vmatprep.mubr.msk.bf16.mxu0 %vm1506_vm0, %v6197_v6  ;;  %4612 = vmatprep.mubr.msk.bf16.mxu1 %vm1506_vm0, %v6199_v7 }
 0x173   :  { %5799 = vst [vmem:[%s7937_s3 + $0x70] sm:$0xff] %v5219_v14   ;;  %5863 = vst [vmem:[%s7937_s3 + $0x270] sm:$0xff] %v5539_v15   ;;  %v6221_v15 = vld [vmem:[%s7935_s0 + $0x2e4] ss:$8 sps:$4 sm:$0xff]  }
 0x174   :  { %v2052_v16 = vpop.f32.mrb[60].mxu0  ;;  %v2564_v17 = vpop.f32.mrb[60].mxu1 }
 0x175   :  { %v2054_v18 = vpop.f32.mrb[61].mxu0  ;;  %v2566_v19 = vpop.f32.mrb[61].mxu1  ;;  %v2053_v26 = vadd.f32 %v6772_v61, %v2052_v16  ;;  %v2565_v27 = vadd.f32 %v6772_v61, %v2564_v17  ;;  %v6223_v16 = vld [vmem:[%s7935_s0 + $0x6e4] ss:$8 sps:$4 sm:$0xff]  }
 0x176   :  { %v2055_v22 = vpop.f32.mrb[62].mxu0  ;;  %v2567_v23 = vpop.f32.mrb[62].mxu1 }
 0x177   :  { %v2056_v28 = vadd.f32 %v6772_v61, %v2055_v22  ;;  %v2568_v29 = vadd.f32 %v6772_v61, %v2567_v23  ;;  %v2057_v30 = vpop.f32.mrb[63].mxu0  ;;  %v2569_v31 = vpop.f32.mrb[63].mxu1 }
 0x178   :  { %v6226_v30 = vld [vmem:[%s7935_s0 + $0x6e0] ss:$8 sps:$4 sm:$0xff]  }
 0x179   :  { %v5224_v32 = vpack.c.bf16 %v2056_v28, %v2053_v26  ;;  %v5544_v33 = vpack.c.bf16 %v2568_v29, %v2565_v27  ;;  %2267 = vmatmul.mubr.bf16.gmra.mrb[168].mxu0 %v6201_v20  ;;  %2779 = vmatmul.mubr.bf16.gmra.mrb[168].mxu1 %v6202_v21  ;;  %v6225_v29 = vld [vmem:[%s7935_s0 + $0x2e0] ss:$8 sps:$4 sm:$0xff]  }
 0x17a   :  { %4549 = vmatprep.mubr.msk.bf16.mxu0 %vm1506_vm0, %v6203_v24  ;;  %4613 = vmatprep.mubr.msk.bf16.mxu1 %vm1506_vm0, %v6205_v25 }
 0x17b   :  { %5800 = vst [vmem:[%s7937_s3 + $0x78] sm:$0xff] %v5224_v32   ;;  %5864 = vst [vmem:[%s7937_s3 + $0x278] sm:$0xff] %v5544_v33   ;;  %v6227_v33 = vld [vmem:[%s7935_s0 + $0x2f4] ss:$8 sps:$4 sm:$0xff]  }
 0x17c   :  { %v2060_v34 = vpop.f32.mrb[64].mxu0  ;;  %v2572_v35 = vpop.f32.mrb[64].mxu1 }
 0x17d   :  { %v2062_v36 = vpop.f32.mrb[65].mxu0  ;;  %v2574_v37 = vpop.f32.mrb[65].mxu1  ;;  %v2061_v44 = vadd.f32 %v6772_v61, %v2060_v34  ;;  %v2573_v45 = vadd.f32 %v6772_v61, %v2572_v35  ;;  %v6229_v34 = vld [vmem:[%s7935_s0 + $0x6f4] ss:$8 sps:$4 sm:$0xff]  }
 0x17e   :  { %v2063_v40 = vpop.f32.mrb[66].mxu0  ;;  %v2575_v41 = vpop.f32.mrb[66].mxu1 }
 0x17f   :  { %v2064_v46 = vadd.f32 %v6772_v61, %v2063_v40  ;;  %v2576_v47 = vadd.f32 %v6772_v61, %v2575_v41  ;;  %v2065_v48 = vpop.f32.mrb[67].mxu0  ;;  %v2577_v49 = vpop.f32.mrb[67].mxu1 }
 0x180   :  { %v6232_v48 = vld [vmem:[%s7935_s0 + $0x6f0] ss:$8 sps:$4 sm:$0xff]  }
 0x181   :  { %v5229_v50 = vpack.c.bf16 %v2064_v46, %v2061_v44  ;;  %v5549_v51 = vpack.c.bf16 %v2576_v47, %v2573_v45  ;;  %2275 = vmatmul.mubr.bf16.gmra.mrb[172].mxu0 %v6207_v38  ;;  %2787 = vmatmul.mubr.bf16.gmra.mrb[172].mxu1 %v6208_v39  ;;  %v6231_v47 = vld [vmem:[%s7935_s0 + $0x2f0] ss:$8 sps:$4 sm:$0xff]  }
 0x182   :  { %4550 = vmatprep.mubr.msk.bf16.mxu0 %vm1506_vm0, %v6209_v42  ;;  %4614 = vmatprep.mubr.msk.bf16.mxu1 %vm1506_vm0, %v6211_v43 }
 0x183   :  { %5801 = vst [vmem:[%s7937_s3 + $0x80] sm:$0xff] %v5229_v50   ;;  %5865 = vst [vmem:[%s7937_s3 + $0x280] sm:$0xff] %v5549_v51   ;;  %v6233_v51 = vld [vmem:[%s7935_s0 + $0x304] ss:$8 sps:$4 sm:$0xff]  }
 0x184   :  { %v2068_v52 = vpop.f32.mrb[68].mxu0  ;;  %v2580_v53 = vpop.f32.mrb[68].mxu1 }
 0x185   :  { %v2070_v54 = vpop.f32.mrb[69].mxu0  ;;  %v2582_v55 = vpop.f32.mrb[69].mxu1  ;;  %v2069_v63 = vadd.f32 %v6772_v61, %v2068_v52  ;;  %v2581_v0 = vadd.f32 %v6772_v61, %v2580_v53  ;;  %v6235_v52 = vld [vmem:[%s7935_s0 + $0x704] ss:$8 sps:$4 sm:$0xff]  }
 0x186   :  { %v2071_v58 = vpop.f32.mrb[70].mxu0  ;;  %v2583_v59 = vpop.f32.mrb[70].mxu1 }
 0x187   :  { %v2072_v1 = vadd.f32 %v6772_v61, %v2071_v58  ;;  %v2584_v2 = vadd.f32 %v6772_v61, %v2583_v59  ;;  %v2073_v3 = vpop.f32.mrb[71].mxu0  ;;  %v2585_v4 = vpop.f32.mrb[71].mxu1 }
 0x189   :  { %v5234_v5 = vpack.c.bf16 %v2072_v1, %v2069_v63  ;;  %v5554_v6 = vpack.c.bf16 %v2584_v2, %v2581_v0  ;;  %2283 = vmatmul.mubr.bf16.gmra.mrb[176].mxu0 %v6213_v56  ;;  %2795 = vmatmul.mubr.bf16.gmra.mrb[176].mxu1 %v6214_v57  ;;  %v6237_v1 = vld [vmem:[%s7935_s0 + $0x300] ss:$8 sps:$4 sm:$0xff]  }
 0x18a   :  { %4551 = vmatprep.mubr.msk.bf16.mxu0 %vm1506_vm0, %v6215_v60  ;;  %4615 = vmatprep.mubr.msk.bf16.mxu1 %vm1506_vm0, %v6217_v62  ;;  %v6238_v2 = vld [vmem:[%s7935_s0 + $0x700] ss:$8 sps:$4 sm:$0xff]  }
 0x18b   :  { %5802 = vst [vmem:[%s7937_s3 + $0x88] sm:$0xff] %v5234_v5   ;;  %5866 = vst [vmem:[%s7937_s3 + $0x288] sm:$0xff] %v5554_v6   ;;  %v6239_v5 = vld [vmem:[%s7935_s0 + $0x314] ss:$8 sps:$4 sm:$0xff]  }
 0x18c   :  { %v2076_v7 = vpop.f32.mrb[72].mxu0  ;;  %v2588_v8 = vpop.f32.mrb[72].mxu1  ;;  %v6241_v6 = vld [vmem:[%s7935_s0 + $0x714] ss:$8 sps:$4 sm:$0xff]  }
 0x18d   :  { %v2078_v9 = vpop.f32.mrb[73].mxu0  ;;  %v2590_v10 = vpop.f32.mrb[73].mxu1  ;;  %v2077_v17 = vadd.f32 %v6772_v61, %v2076_v7  ;;  %v2589_v18 = vadd.f32 %v6772_v61, %v2588_v8  ;;  %v7293_v7 = vld [vmem:[%s7936_s2] ss:$0 sm:$0xff] }
 0x18e   :  { %v2079_v13 = vpop.f32.mrb[74].mxu0  ;;  %v2591_v14 = vpop.f32.mrb[74].mxu1 }
 0x18f   :  { %v2080_v19 = vadd.f32 %v6772_v61, %v2079_v13  ;;  %v2592_v20 = vadd.f32 %v6772_v61, %v2591_v14  ;;  %v2081_v21 = vpop.f32.mrb[75].mxu0  ;;  %v2593_v22 = vpop.f32.mrb[75].mxu1 }
 0x190   :  { %v6244_v21 = vld [vmem:[%s7935_s0 + $0x710] ss:$8 sps:$4 sm:$0xff]  }
 0x191   :  { %v5239_v23 = vpack.c.bf16 %v2080_v19, %v2077_v17  ;;  %v5559_v24 = vpack.c.bf16 %v2592_v20, %v2589_v18  ;;  %2291 = vmatmul.mubr.bf16.gmra.mrb[180].mxu0 %v6219_v11  ;;  %2803 = vmatmul.mubr.bf16.gmra.mrb[180].mxu1 %v6220_v12  ;;  %v6243_v20 = vld [vmem:[%s7935_s0 + $0x310] ss:$8 sps:$4 sm:$0xff]  }
 0x192   :  { %4552 = vmatprep.mubr.msk.bf16.mxu0 %vm1506_vm0, %v6221_v15  ;;  %4616 = vmatprep.mubr.msk.bf16.mxu1 %vm1506_vm0, %v6223_v16 }
 0x193   :  { %5803 = vst [vmem:[%s7937_s3 + $0x90] sm:$0xff] %v5239_v23   ;;  %5867 = vst [vmem:[%s7937_s3 + $0x290] sm:$0xff] %v5559_v24   ;;  %v6245_v24 = vld [vmem:[%s7935_s0 + $0x324] ss:$8 sps:$4 sm:$0xff]  }
 0x194   :  { %v2084_v25 = vpop.f32.mrb[76].mxu0  ;;  %v2596_v26 = vpop.f32.mrb[76].mxu1 }
 0x195   :  { %v2086_v27 = vpop.f32.mrb[77].mxu0  ;;  %v2598_v28 = vpop.f32.mrb[77].mxu1  ;;  %v2085_v35 = vadd.f32 %v6772_v61, %v2084_v25  ;;  %v2597_v36 = vadd.f32 %v6772_v61, %v2596_v26  ;;  %v6247_v25 = vld [vmem:[%s7935_s0 + $0x724] ss:$8 sps:$4 sm:$0xff]  }
 0x196   :  { %v2087_v31 = vpop.f32.mrb[78].mxu0  ;;  %v2599_v32 = vpop.f32.mrb[78].mxu1 }
 0x197   :  { %v2088_v37 = vadd.f32 %v6772_v61, %v2087_v31  ;;  %v2600_v38 = vadd.f32 %v6772_v61, %v2599_v32  ;;  %v2089_v39 = vpop.f32.mrb[79].mxu0  ;;  %v2601_v40 = vpop.f32.mrb[79].mxu1 }
 0x198   :  { %v6250_v39 = vld [vmem:[%s7935_s0 + $0x720] ss:$8 sps:$4 sm:$0xff]  }
 0x199   :  { %v5244_v41 = vpack.c.bf16 %v2088_v37, %v2085_v35  ;;  %v5564_v42 = vpack.c.bf16 %v2600_v38, %v2597_v36  ;;  %2299 = vmatmul.mubr.bf16.gmra.mrb[184].mxu0 %v6225_v29  ;;  %2811 = vmatmul.mubr.bf16.gmra.mrb[184].mxu1 %v6226_v30  ;;  %v6249_v38 = vld [vmem:[%s7935_s0 + $0x320] ss:$8 sps:$4 sm:$0xff]  }
 0x19a   :  { %4553 = vmatprep.mubr.msk.bf16.mxu0 %vm1506_vm0, %v6227_v33  ;;  %4617 = vmatprep.mubr.msk.bf16.mxu1 %vm1506_vm0, %v6229_v34 }
 0x19b   :  { %5804 = vst [vmem:[%s7937_s3 + $0x98] sm:$0xff] %v5244_v41   ;;  %5868 = vst [vmem:[%s7937_s3 + $0x298] sm:$0xff] %v5564_v42   ;;  %v6251_v42 = vld [vmem:[%s7935_s0 + $0x334] ss:$8 sps:$4 sm:$0xff]  }
 0x19c   :  { %v2092_v43 = vpop.f32.mrb[80].mxu0  ;;  %v2604_v44 = vpop.f32.mrb[80].mxu1 }
 0x19d   :  { %v2094_v45 = vpop.f32.mrb[81].mxu0  ;;  %v2606_v46 = vpop.f32.mrb[81].mxu1  ;;  %v2093_v53 = vadd.f32 %v6772_v61, %v2092_v43  ;;  %v2605_v54 = vadd.f32 %v6772_v61, %v2604_v44  ;;  %v6253_v43 = vld [vmem:[%s7935_s0 + $0x734] ss:$8 sps:$4 sm:$0xff]  }
 0x19e   :  { %v2095_v49 = vpop.f32.mrb[82].mxu0  ;;  %v2607_v50 = vpop.f32.mrb[82].mxu1 }
 0x19f   :  { %v2096_v55 = vadd.f32 %v6772_v61, %v2095_v49  ;;  %v2608_v56 = vadd.f32 %v6772_v61, %v2607_v50  ;;  %v2097_v57 = vpop.f32.mrb[83].mxu0  ;;  %v2609_v58 = vpop.f32.mrb[83].mxu1 }
 0x1a0   :  { %v6256_v57 = vld [vmem:[%s7935_s0 + $0x730] ss:$8 sps:$4 sm:$0xff]  }
 0x1a1   :  { %v5249_v59 = vpack.c.bf16 %v2096_v55, %v2093_v53  ;;  %v5569_v60 = vpack.c.bf16 %v2608_v56, %v2605_v54  ;;  %2307 = vmatmul.mubr.bf16.gmra.mrb[188].mxu0 %v6231_v47  ;;  %2819 = vmatmul.mubr.bf16.gmra.mrb[188].mxu1 %v6232_v48  ;;  %v6255_v56 = vld [vmem:[%s7935_s0 + $0x330] ss:$8 sps:$4 sm:$0xff]  }
 0x1a2   :  { %4554 = vmatprep.mubr.msk.bf16.mxu0 %vm1506_vm0, %v6233_v51  ;;  %4618 = vmatprep.mubr.msk.bf16.mxu1 %vm1506_vm0, %v6235_v52 }
 0x1a3   :  { %5805 = vst [vmem:[%s7937_s3 + $0xa0] sm:$0xff] %v5249_v59   ;;  %5869 = vst [vmem:[%s7937_s3 + $0x2a0] sm:$0xff] %v5569_v60   ;;  %v6257_v60 = vld [vmem:[%s7935_s0 + $0x344] ss:$8 sps:$4 sm:$0xff]  }
 0x1a4   :  { %v2100_v62 = vpop.f32.mrb[84].mxu0  ;;  %v2612_v61 = vpop.f32.mrb[84].mxu1 }
 0x1a5   :  { %v2102_v63 = vpop.f32.mrb[85].mxu0  ;;  %v2614_v0 = vpop.f32.mrb[85].mxu1  ;;  %v2101_v8 = vadd.f32 %v7293_v7, %v2100_v62  ;;  %v2613_v9 = vadd.f32 %v7293_v7, %v2612_v61  ;;  %v6259_v62 = vld [vmem:[%s7935_s0 + $0x744] ss:$8 sps:$4 sm:$0xff]  }
 0x1a6   :  { %v2103_v3 = vpop.f32.mrb[86].mxu0  ;;  %v2615_v4 = vpop.f32.mrb[86].mxu1 }
 0x1a7   :  { %v2104_v10 = vadd.f32 %v7293_v7, %v2103_v3  ;;  %v2616_v11 = vadd.f32 %v7293_v7, %v2615_v4  ;;  %v2105_v12 = vpop.f32.mrb[87].mxu0  ;;  %v2617_v13 = vpop.f32.mrb[87].mxu1 }
 0x1a8   :  { %v6262_v12 = vld [vmem:[%s7935_s0 + $0x740] ss:$8 sps:$4 sm:$0xff]  }
 0x1a9   :  { %v5254_v14 = vpack.c.bf16 %v2104_v10, %v2101_v8  ;;  %v5574_v15 = vpack.c.bf16 %v2616_v11, %v2613_v9  ;;  %2315 = vmatmul.mubr.bf16.gmra.mrb[192].mxu0 %v6237_v1  ;;  %2827 = vmatmul.mubr.bf16.gmra.mrb[192].mxu1 %v6238_v2  ;;  %v6261_v11 = vld [vmem:[%s7935_s0 + $0x340] ss:$8 sps:$4 sm:$0xff]  }
 0x1aa   :  { %4555 = vmatprep.mubr.msk.bf16.mxu0 %vm1506_vm0, %v6239_v5  ;;  %4619 = vmatprep.mubr.msk.bf16.mxu1 %vm1506_vm0, %v6241_v6 }
 0x1ab   :  { %5806 = vst [vmem:[%s7937_s3 + $0xa8] sm:$0xff] %v5254_v14   ;;  %5870 = vst [vmem:[%s7937_s3 + $0x2a8] sm:$0xff] %v5574_v15   ;;  %v6263_v15 = vld [vmem:[%s7935_s0 + $0x354] ss:$8 sps:$4 sm:$0xff]  }
 0x1ac   :  { %v2108_v16 = vpop.f32.mrb[88].mxu0  ;;  %v2620_v17 = vpop.f32.mrb[88].mxu1 }
 0x1ad   :  { %v2110_v18 = vpop.f32.mrb[89].mxu0  ;;  %v2622_v19 = vpop.f32.mrb[89].mxu1  ;;  %v2109_v26 = vadd.f32 %v7293_v7, %v2108_v16  ;;  %v2621_v27 = vadd.f32 %v7293_v7, %v2620_v17  ;;  %v6265_v16 = vld [vmem:[%s7935_s0 + $0x754] ss:$8 sps:$4 sm:$0xff]  }
 0x1ae   :  { %v2111_v22 = vpop.f32.mrb[90].mxu0  ;;  %v2623_v23 = vpop.f32.mrb[90].mxu1 }
 0x1af   :  { %v2112_v28 = vadd.f32 %v7293_v7, %v2111_v22  ;;  %v2624_v29 = vadd.f32 %v7293_v7, %v2623_v23  ;;  %v2113_v30 = vpop.f32.mrb[91].mxu0  ;;  %v2625_v31 = vpop.f32.mrb[91].mxu1 }
 0x1b0   :  { %v6268_v30 = vld [vmem:[%s7935_s0 + $0x750] ss:$8 sps:$4 sm:$0xff]  }
 0x1b1   :  { %v5259_v32 = vpack.c.bf16 %v2112_v28, %v2109_v26  ;;  %v5579_v33 = vpack.c.bf16 %v2624_v29, %v2621_v27  ;;  %2323 = vmatmul.mubr.bf16.gmra.mrb[196].mxu0 %v6243_v20  ;;  %2835 = vmatmul.mubr.bf16.gmra.mrb[196].mxu1 %v6244_v21  ;;  %v6267_v29 = vld [vmem:[%s7935_s0 + $0x350] ss:$8 sps:$4 sm:$0xff]  }
 0x1b2   :  { %4556 = vmatprep.mubr.msk.bf16.mxu0 %vm1506_vm0, %v6245_v24  ;;  %4620 = vmatprep.mubr.msk.bf16.mxu1 %vm1506_vm0, %v6247_v25 }
 0x1b3   :  { %5807 = vst [vmem:[%s7937_s3 + $0xb0] sm:$0xff] %v5259_v32   ;;  %5871 = vst [vmem:[%s7937_s3 + $0x2b0] sm:$0xff] %v5579_v33   ;;  %v6269_v33 = vld [vmem:[%s7935_s0 + $0x364] ss:$8 sps:$4 sm:$0xff]  }
 0x1b4   :  { %v2116_v34 = vpop.f32.mrb[92].mxu0  ;;  %v2628_v35 = vpop.f32.mrb[92].mxu1 }
 0x1b5   :  { %v2118_v36 = vpop.f32.mrb[93].mxu0  ;;  %v2630_v37 = vpop.f32.mrb[93].mxu1  ;;  %v2117_v44 = vadd.f32 %v7293_v7, %v2116_v34  ;;  %v2629_v45 = vadd.f32 %v7293_v7, %v2628_v35  ;;  %v6271_v34 = vld [vmem:[%s7935_s0 + $0x764] ss:$8 sps:$4 sm:$0xff]  }
 0x1b6   :  { %v2119_v40 = vpop.f32.mrb[94].mxu0  ;;  %v2631_v41 = vpop.f32.mrb[94].mxu1 }
 0x1b7   :  { %v2120_v46 = vadd.f32 %v7293_v7, %v2119_v40  ;;  %v2632_v47 = vadd.f32 %v7293_v7, %v2631_v41  ;;  %v2121_v48 = vpop.f32.mrb[95].mxu0  ;;  %v2633_v49 = vpop.f32.mrb[95].mxu1 }
 0x1b8   :  { %v6274_v48 = vld [vmem:[%s7935_s0 + $0x760] ss:$8 sps:$4 sm:$0xff]  }
 0x1b9   :  { %v5264_v50 = vpack.c.bf16 %v2120_v46, %v2117_v44  ;;  %v5584_v51 = vpack.c.bf16 %v2632_v47, %v2629_v45  ;;  %2331 = vmatmul.mubr.bf16.gmra.mrb[200].mxu0 %v6249_v38  ;;  %2843 = vmatmul.mubr.bf16.gmra.mrb[200].mxu1 %v6250_v39  ;;  %v6273_v47 = vld [vmem:[%s7935_s0 + $0x360] ss:$8 sps:$4 sm:$0xff]  }
 0x1ba   :  { %4557 = vmatprep.mubr.msk.bf16.mxu0 %vm1506_vm0, %v6251_v42  ;;  %4621 = vmatprep.mubr.msk.bf16.mxu1 %vm1506_vm0, %v6253_v43 }
 0x1bb   :  { %5808 = vst [vmem:[%s7937_s3 + $0xb8] sm:$0xff] %v5264_v50   ;;  %5872 = vst [vmem:[%s7937_s3 + $0x2b8] sm:$0xff] %v5584_v51   ;;  %v6275_v51 = vld [vmem:[%s7935_s0 + $0x374] ss:$8 sps:$4 sm:$0xff]  }
 0x1bc   :  { %v2124_v52 = vpop.f32.mrb[96].mxu0  ;;  %v2636_v53 = vpop.f32.mrb[96].mxu1 }
 0x1bd   :  { %v2126_v54 = vpop.f32.mrb[97].mxu0  ;;  %v2638_v55 = vpop.f32.mrb[97].mxu1  ;;  %v2125_v61 = vadd.f32 %v7293_v7, %v2124_v52  ;;  %v2637_v63 = vadd.f32 %v7293_v7, %v2636_v53  ;;  %v6277_v52 = vld [vmem:[%s7935_s0 + $0x774] ss:$8 sps:$4 sm:$0xff]  }
 0x1be   :  { %v2127_v58 = vpop.f32.mrb[98].mxu0  ;;  %v2639_v59 = vpop.f32.mrb[98].mxu1 }
 0x1bf   :  { %v2128_v0 = vadd.f32 %v7293_v7, %v2127_v58  ;;  %v2640_v1 = vadd.f32 %v7293_v7, %v2639_v59  ;;  %v2129_v2 = vpop.f32.mrb[99].mxu0  ;;  %v2641_v3 = vpop.f32.mrb[99].mxu1 }
 0x1c0   :  { %v6280_v2 = vld [vmem:[%s7935_s0 + $0x770] ss:$8 sps:$4 sm:$0xff]  }
 0x1c1   :  { %v5269_v4 = vpack.c.bf16 %v2128_v0, %v2125_v61  ;;  %v5589_v5 = vpack.c.bf16 %v2640_v1, %v2637_v63  ;;  %2339 = vmatmul.mubr.bf16.gmra.mrb[204].mxu0 %v6255_v56  ;;  %2851 = vmatmul.mubr.bf16.gmra.mrb[204].mxu1 %v6256_v57  ;;  %v6279_v1 = vld [vmem:[%s7935_s0 + $0x370] ss:$8 sps:$4 sm:$0xff]  }
 0x1c2   :  { %4558 = vmatprep.mubr.msk.bf16.mxu0 %vm1506_vm0, %v6257_v60  ;;  %4622 = vmatprep.mubr.msk.bf16.mxu1 %vm1506_vm0, %v6259_v62 }
 0x1c3   :  { %5809 = vst [vmem:[%s7937_s3 + $0xc0] sm:$0xff] %v5269_v4   ;;  %5873 = vst [vmem:[%s7937_s3 + $0x2c0] sm:$0xff] %v5589_v5   ;;  %v6281_v5 = vld [vmem:[%s7935_s0 + $0x384] ss:$8 sps:$4 sm:$0xff]  }
 0x1c4   :  { %v2132_v6 = vpop.f32.mrb[100].mxu0  ;;  %v2644_v8 = vpop.f32.mrb[100].mxu1 }
 0x1c5   :  { %v2134_v9 = vpop.f32.mrb[101].mxu0  ;;  %v2646_v10 = vpop.f32.mrb[101].mxu1  ;;  %v2133_v17 = vadd.f32 %v7293_v7, %v2132_v6  ;;  %v2645_v18 = vadd.f32 %v7293_v7, %v2644_v8  ;;  %v6283_v6 = vld [vmem:[%s7935_s0 + $0x784] ss:$8 sps:$4 sm:$0xff]  }
 0x1c6   :  { %v2135_v13 = vpop.f32.mrb[102].mxu0  ;;  %v2647_v14 = vpop.f32.mrb[102].mxu1 }
 0x1c7   :  { %v2136_v19 = vadd.f32 %v7293_v7, %v2135_v13  ;;  %v2648_v20 = vadd.f32 %v7293_v7, %v2647_v14  ;;  %v2137_v21 = vpop.f32.mrb[103].mxu0  ;;  %v2649_v22 = vpop.f32.mrb[103].mxu1 }
 0x1c8   :  { %v6286_v21 = vld [vmem:[%s7935_s0 + $0x780] ss:$8 sps:$4 sm:$0xff]  }
 0x1c9   :  { %v5274_v23 = vpack.c.bf16 %v2136_v19, %v2133_v17  ;;  %v5594_v24 = vpack.c.bf16 %v2648_v20, %v2645_v18  ;;  %2347 = vmatmul.mubr.bf16.gmra.mrb[208].mxu0 %v6261_v11  ;;  %2859 = vmatmul.mubr.bf16.gmra.mrb[208].mxu1 %v6262_v12  ;;  %v6285_v20 = vld [vmem:[%s7935_s0 + $0x380] ss:$8 sps:$4 sm:$0xff]  }
 0x1ca   :  { %4559 = vmatprep.mubr.msk.bf16.mxu0 %vm1506_vm0, %v6263_v15  ;;  %4623 = vmatprep.mubr.msk.bf16.mxu1 %vm1506_vm0, %v6265_v16 }
 0x1cb   :  { %5810 = vst [vmem:[%s7937_s3 + $0xc8] sm:$0xff] %v5274_v23   ;;  %5874 = vst [vmem:[%s7937_s3 + $0x2c8] sm:$0xff] %v5594_v24   ;;  %v6287_v24 = vld [vmem:[%s7935_s0 + $0x394] ss:$8 sps:$4 sm:$0xff]  }
 0x1cc   :  { %v2140_v25 = vpop.f32.mrb[104].mxu0  ;;  %v2652_v26 = vpop.f32.mrb[104].mxu1 }
 0x1cd   :  { %v2142_v27 = vpop.f32.mrb[105].mxu0  ;;  %v2654_v28 = vpop.f32.mrb[105].mxu1  ;;  %v2141_v35 = vadd.f32 %v7293_v7, %v2140_v25  ;;  %v2653_v36 = vadd.f32 %v7293_v7, %v2652_v26  ;;  %v6289_v25 = vld [vmem:[%s7935_s0 + $0x794] ss:$8 sps:$4 sm:$0xff]  }
 0x1ce   :  { %v2143_v31 = vpop.f32.mrb[106].mxu0  ;;  %v2655_v32 = vpop.f32.mrb[106].mxu1 }
 0x1cf   :  { %v2144_v37 = vadd.f32 %v7293_v7, %v2143_v31  ;;  %v2656_v38 = vadd.f32 %v7293_v7, %v2655_v32  ;;  %v2145_v39 = vpop.f32.mrb[107].mxu0  ;;  %v2657_v40 = vpop.f32.mrb[107].mxu1 }
 0x1d0   :  { %v6292_v39 = vld [vmem:[%s7935_s0 + $0x790] ss:$8 sps:$4 sm:$0xff]  }
 0x1d1   :  { %v5279_v41 = vpack.c.bf16 %v2144_v37, %v2141_v35  ;;  %v5599_v42 = vpack.c.bf16 %v2656_v38, %v2653_v36  ;;  %2355 = vmatmul.mubr.bf16.gmra.mrb[212].mxu0 %v6267_v29  ;;  %2867 = vmatmul.mubr.bf16.gmra.mrb[212].mxu1 %v6268_v30  ;;  %v6291_v38 = vld [vmem:[%s7935_s0 + $0x390] ss:$8 sps:$4 sm:$0xff]  }
 0x1d2   :  { %4560 = vmatprep.mubr.msk.bf16.mxu0 %vm1506_vm0, %v6269_v33  ;;  %4624 = vmatprep.mubr.msk.bf16.mxu1 %vm1506_vm0, %v6271_v34 }
 0x1d3   :  { %5811 = vst [vmem:[%s7937_s3 + $0xd0] sm:$0xff] %v5279_v41   ;;  %5875 = vst [vmem:[%s7937_s3 + $0x2d0] sm:$0xff] %v5599_v42   ;;  %v6293_v42 = vld [vmem:[%s7935_s0 + $0x3a4] ss:$8 sps:$4 sm:$0xff]  }
 0x1d4   :  { %v2148_v43 = vpop.f32.mrb[108].mxu0  ;;  %v2660_v44 = vpop.f32.mrb[108].mxu1 }
 0x1d5   :  { %v2150_v45 = vpop.f32.mrb[109].mxu0  ;;  %v2662_v46 = vpop.f32.mrb[109].mxu1  ;;  %v2149_v53 = vadd.f32 %v7293_v7, %v2148_v43  ;;  %v2661_v54 = vadd.f32 %v7293_v7, %v2660_v44  ;;  %v6295_v43 = vld [vmem:[%s7935_s0 + $0x7a4] ss:$8 sps:$4 sm:$0xff]  }
 0x1d6   :  { %v2151_v49 = vpop.f32.mrb[110].mxu0  ;;  %v2663_v50 = vpop.f32.mrb[110].mxu1 }
 0x1d7   :  { %v2152_v55 = vadd.f32 %v7293_v7, %v2151_v49  ;;  %v2664_v56 = vadd.f32 %v7293_v7, %v2663_v50  ;;  %v2153_v57 = vpop.f32.mrb[111].mxu0  ;;  %v2665_v58 = vpop.f32.mrb[111].mxu1 }
 0x1d8   :  { %v6298_v57 = vld [vmem:[%s7935_s0 + $0x7a0] ss:$8 sps:$4 sm:$0xff]  }
 0x1d9   :  { %v5284_v59 = vpack.c.bf16 %v2152_v55, %v2149_v53  ;;  %v5604_v60 = vpack.c.bf16 %v2664_v56, %v2661_v54  ;;  %2363 = vmatmul.mubr.bf16.gmra.mrb[216].mxu0 %v6273_v47  ;;  %2875 = vmatmul.mubr.bf16.gmra.mrb[216].mxu1 %v6274_v48  ;;  %v6297_v56 = vld [vmem:[%s7935_s0 + $0x3a0] ss:$8 sps:$4 sm:$0xff]  }
 0x1da   :  { %4561 = vmatprep.mubr.msk.bf16.mxu0 %vm1506_vm0, %v6275_v51  ;;  %4625 = vmatprep.mubr.msk.bf16.mxu1 %vm1506_vm0, %v6277_v52 }
 0x1db   :  { %5812 = vst [vmem:[%s7937_s3 + $0xd8] sm:$0xff] %v5284_v59   ;;  %5876 = vst [vmem:[%s7937_s3 + $0x2d8] sm:$0xff] %v5604_v60   ;;  %v6299_v60 = vld [vmem:[%s7935_s0 + $0x3b4] ss:$8 sps:$4 sm:$0xff]  }
 0x1dc   :  { %v2156_v62 = vpop.f32.mrb[112].mxu0  ;;  %v2668_v61 = vpop.f32.mrb[112].mxu1 }
 0x1dd   :  { %v2158_v63 = vpop.f32.mrb[113].mxu0  ;;  %v2670_v0 = vpop.f32.mrb[113].mxu1  ;;  %v2157_v8 = vadd.f32 %v7293_v7, %v2156_v62  ;;  %v2669_v9 = vadd.f32 %v7293_v7, %v2668_v61  ;;  %v6301_v62 = vld [vmem:[%s7935_s0 + $0x7b4] ss:$8 sps:$4 sm:$0xff]  }
 0x1de   :  { %v2159_v3 = vpop.f32.mrb[114].mxu0  ;;  %v2671_v4 = vpop.f32.mrb[114].mxu1 }
 0x1df   :  { %v2160_v10 = vadd.f32 %v7293_v7, %v2159_v3  ;;  %v2672_v11 = vadd.f32 %v7293_v7, %v2671_v4  ;;  %v2161_v12 = vpop.f32.mrb[115].mxu0  ;;  %v2673_v13 = vpop.f32.mrb[115].mxu1 }
 0x1e0   :  { %v6304_v12 = vld [vmem:[%s7935_s0 + $0x7b0] ss:$8 sps:$4 sm:$0xff]  }
 0x1e1   :  { %v5289_v14 = vpack.c.bf16 %v2160_v10, %v2157_v8  ;;  %v5609_v15 = vpack.c.bf16 %v2672_v11, %v2669_v9  ;;  %2371 = vmatmul.mubr.bf16.gmra.mrb[220].mxu0 %v6279_v1  ;;  %2883 = vmatmul.mubr.bf16.gmra.mrb[220].mxu1 %v6280_v2  ;;  %v6303_v11 = vld [vmem:[%s7935_s0 + $0x3b0] ss:$8 sps:$4 sm:$0xff]  }
 0x1e2   :  { %4562 = vmatprep.mubr.msk.bf16.mxu0 %vm1506_vm0, %v6281_v5  ;;  %4626 = vmatprep.mubr.msk.bf16.mxu1 %vm1506_vm0, %v6283_v6 }
 0x1e3   :  { %5813 = vst [vmem:[%s7937_s3 + $0xe0] sm:$0xff] %v5289_v14   ;;  %5877 = vst [vmem:[%s7937_s3 + $0x2e0] sm:$0xff] %v5609_v15   ;;  %v6305_v15 = vld [vmem:[%s7935_s0 + $0x3c4] ss:$8 sps:$4 sm:$0xff]  }
 0x1e4   :  { %v2164_v16 = vpop.f32.mrb[116].mxu0  ;;  %v2676_v17 = vpop.f32.mrb[116].mxu1 }
 0x1e5   :  { %v2166_v18 = vpop.f32.mrb[117].mxu0  ;;  %v2678_v19 = vpop.f32.mrb[117].mxu1  ;;  %v2165_v26 = vadd.f32 %v7293_v7, %v2164_v16  ;;  %v2677_v27 = vadd.f32 %v7293_v7, %v2676_v17  ;;  %v6307_v16 = vld [vmem:[%s7935_s0 + $0x7c4] ss:$8 sps:$4 sm:$0xff]  }
 0x1e6   :  { %v2167_v22 = vpop.f32.mrb[118].mxu0  ;;  %v2679_v23 = vpop.f32.mrb[118].mxu1 }
 0x1e7   :  { %v2168_v28 = vadd.f32 %v7293_v7, %v2167_v22  ;;  %v2680_v29 = vadd.f32 %v7293_v7, %v2679_v23  ;;  %v2169_v30 = vpop.f32.mrb[119].mxu0  ;;  %v2681_v31 = vpop.f32.mrb[119].mxu1 }
 0x1e8   :  { %v6310_v30 = vld [vmem:[%s7935_s0 + $0x7c0] ss:$8 sps:$4 sm:$0xff]  }
 0x1e9   :  { %v5294_v32 = vpack.c.bf16 %v2168_v28, %v2165_v26  ;;  %v5614_v33 = vpack.c.bf16 %v2680_v29, %v2677_v27  ;;  %2379 = vmatmul.mubr.bf16.gmra.mrb[224].mxu0 %v6285_v20  ;;  %2891 = vmatmul.mubr.bf16.gmra.mrb[224].mxu1 %v6286_v21  ;;  %v6309_v29 = vld [vmem:[%s7935_s0 + $0x3c0] ss:$8 sps:$4 sm:$0xff]  }
 0x1ea   :  { %4563 = vmatprep.mubr.msk.bf16.mxu0 %vm1506_vm0, %v6287_v24  ;;  %4627 = vmatprep.mubr.msk.bf16.mxu1 %vm1506_vm0, %v6289_v25 }
 0x1eb   :  { %5814 = vst [vmem:[%s7937_s3 + $0xe8] sm:$0xff] %v5294_v32   ;;  %5878 = vst [vmem:[%s7937_s3 + $0x2e8] sm:$0xff] %v5614_v33   ;;  %v6311_v33 = vld [vmem:[%s7935_s0 + $0x3d4] ss:$8 sps:$4 sm:$0xff]  }
 0x1ec   :  { %v2172_v34 = vpop.f32.mrb[120].mxu0  ;;  %v2684_v35 = vpop.f32.mrb[120].mxu1 }
 0x1ed   :  { %v2174_v36 = vpop.f32.mrb[121].mxu0  ;;  %v2686_v37 = vpop.f32.mrb[121].mxu1  ;;  %v2173_v44 = vadd.f32 %v7293_v7, %v2172_v34  ;;  %v2685_v45 = vadd.f32 %v7293_v7, %v2684_v35  ;;  %v6313_v34 = vld [vmem:[%s7935_s0 + $0x7d4] ss:$8 sps:$4 sm:$0xff]  }
 0x1ee   :  { %v2175_v40 = vpop.f32.mrb[122].mxu0  ;;  %v2687_v41 = vpop.f32.mrb[122].mxu1 }
 0x1ef   :  { %v2176_v46 = vadd.f32 %v7293_v7, %v2175_v40  ;;  %v2688_v47 = vadd.f32 %v7293_v7, %v2687_v41  ;;  %v2177_v48 = vpop.f32.mrb[123].mxu0  ;;  %v2689_v49 = vpop.f32.mrb[123].mxu1 }
 0x1f0   :  { %v6316_v48 = vld [vmem:[%s7935_s0 + $0x7d0] ss:$8 sps:$4 sm:$0xff]  }
 0x1f1   :  { %v5299_v50 = vpack.c.bf16 %v2176_v46, %v2173_v44  ;;  %v5619_v51 = vpack.c.bf16 %v2688_v47, %v2685_v45  ;;  %2387 = vmatmul.mubr.bf16.gmra.mrb[228].mxu0 %v6291_v38  ;;  %2899 = vmatmul.mubr.bf16.gmra.mrb[228].mxu1 %v6292_v39  ;;  %v6315_v47 = vld [vmem:[%s7935_s0 + $0x3d0] ss:$8 sps:$4 sm:$0xff]  }
 0x1f2   :  { %4564 = vmatprep.mubr.msk.bf16.mxu0 %vm1506_vm0, %v6293_v42  ;;  %4628 = vmatprep.mubr.msk.bf16.mxu1 %vm1506_vm0, %v6295_v43 }
 0x1f3   :  { %5815 = vst [vmem:[%s7937_s3 + $0xf0] sm:$0xff] %v5299_v50   ;;  %5879 = vst [vmem:[%s7937_s3 + $0x2f0] sm:$0xff] %v5619_v51   ;;  %v6317_v51 = vld [vmem:[%s7935_s0 + $0x3e4] ss:$8 sps:$4 sm:$0xff]  }
 0x1f4   :  { %v2180_v52 = vpop.f32.mrb[124].mxu0  ;;  %v2692_v53 = vpop.f32.mrb[124].mxu1 }
 0x1f5   :  { %v2182_v54 = vpop.f32.mrb[125].mxu0  ;;  %v2694_v55 = vpop.f32.mrb[125].mxu1  ;;  %v2181_v61 = vadd.f32 %v7293_v7, %v2180_v52  ;;  %v2693_v63 = vadd.f32 %v7293_v7, %v2692_v53  ;;  %v6319_v52 = vld [vmem:[%s7935_s0 + $0x7e4] ss:$8 sps:$4 sm:$0xff]  }
 0x1f6   :  { %v2183_v58 = vpop.f32.mrb[126].mxu0  ;;  %v2695_v59 = vpop.f32.mrb[126].mxu1 }
 0x1f7   :  { %v2184_v0 = vadd.f32 %v7293_v7, %v2183_v58  ;;  %v2696_v1 = vadd.f32 %v7293_v7, %v2695_v59  ;;  %v2185_v2 = vpop.f32.mrb[127].mxu0  ;;  %v2697_v3 = vpop.f32.mrb[127].mxu1 }
 0x1f8   :  { %v6322_v2 = vld [vmem:[%s7935_s0 + $0x7e0] ss:$8 sps:$4 sm:$0xff]  }
 0x1f9   :  { %v5304_v4 = vpack.c.bf16 %v2184_v0, %v2181_v61  ;;  %v5624_v5 = vpack.c.bf16 %v2696_v1, %v2693_v63  ;;  %2395 = vmatmul.mubr.bf16.gmra.mrb[232].mxu0 %v6297_v56  ;;  %2907 = vmatmul.mubr.bf16.gmra.mrb[232].mxu1 %v6298_v57  ;;  %v6321_v1 = vld [vmem:[%s7935_s0 + $0x3e0] ss:$8 sps:$4 sm:$0xff]  }
 0x1fa   :  { %4565 = vmatprep.mubr.msk.bf16.mxu0 %vm1506_vm0, %v6299_v60  ;;  %4629 = vmatprep.mubr.msk.bf16.mxu1 %vm1506_vm0, %v6301_v62 }
 0x1fb   :  { %5816 = vst [vmem:[%s7937_s3 + $0xf8] sm:$0xff] %v5304_v4   ;;  %5880 = vst [vmem:[%s7937_s3 + $0x2f8] sm:$0xff] %v5624_v5   ;;  %v6323_v5 = vld [vmem:[%s7935_s0 + $0x3f4] ss:$8 sps:$4 sm:$0xff]  }
 0x1fc   :  { %v2188_v6 = vpop.f32.mrb[128].mxu0  ;;  %v2700_v8 = vpop.f32.mrb[128].mxu1 }
 0x1fd   :  { %v2190_v9 = vpop.f32.mrb[129].mxu0  ;;  %v2702_v10 = vpop.f32.mrb[129].mxu1  ;;  %v2189_v17 = vadd.f32 %v7293_v7, %v2188_v6  ;;  %v2701_v18 = vadd.f32 %v7293_v7, %v2700_v8  ;;  %v6325_v6 = vld [vmem:[%s7935_s0 + $0x7f4] ss:$8 sps:$4 sm:$0xff]  }
 0x1fe   :  { %v2191_v13 = vpop.f32.mrb[130].mxu0  ;;  %v2703_v14 = vpop.f32.mrb[130].mxu1 }
 0x1ff   :  { %v2192_v19 = vadd.f32 %v7293_v7, %v2191_v13  ;;  %v2704_v20 = vadd.f32 %v7293_v7, %v2703_v14  ;;  %v2193_v21 = vpop.f32.mrb[131].mxu0  ;;  %v2705_v22 = vpop.f32.mrb[131].mxu1 }
 0x200   :  { %v6328_v21 = vld [vmem:[%s7935_s0 + $0x7f0] ss:$8 sps:$4 sm:$0xff]  }
 0x201   :  { %v5309_v23 = vpack.c.bf16 %v2192_v19, %v2189_v17  ;;  %v5629_v24 = vpack.c.bf16 %v2704_v20, %v2701_v18  ;;  %2403 = vmatmul.mubr.bf16.gmra.mrb[236].mxu0 %v6303_v11  ;;  %2915 = vmatmul.mubr.bf16.gmra.mrb[236].mxu1 %v6304_v12  ;;  %v6327_v20 = vld [vmem:[%s7935_s0 + $0x3f0] ss:$8 sps:$4 sm:$0xff]  }
 0x202   :  { %4566 = vmatprep.mubr.msk.bf16.mxu0 %vm1506_vm0, %v6305_v15  ;;  %4630 = vmatprep.mubr.msk.bf16.mxu1 %vm1506_vm0, %v6307_v16 }
 0x203   :  { %5817 = vst [vmem:[%s7937_s3 + $0x100] sm:$0xff] %v5309_v23   ;;  %5881 = vst [vmem:[%s7937_s3 + $0x300] sm:$0xff] %v5629_v24  }
 0x204   :  { %v2196_v25 = vpop.f32.mrb[132].mxu0  ;;  %v2708_v26 = vpop.f32.mrb[132].mxu1 }
 0x205   :  { %v2198_v27 = vpop.f32.mrb[133].mxu0  ;;  %v2710_v28 = vpop.f32.mrb[133].mxu1  ;;  %v2197_v35 = vadd.f32 %v7293_v7, %v2196_v25  ;;  %v2709_v36 = vadd.f32 %v7293_v7, %v2708_v26 }
 0x206   :  { %v2199_v31 = vpop.f32.mrb[134].mxu0  ;;  %v2711_v32 = vpop.f32.mrb[134].mxu1 }
 0x207   :  { %v2200_v37 = vadd.f32 %v7293_v7, %v2199_v31  ;;  %v2712_v38 = vadd.f32 %v7293_v7, %v2711_v32  ;;  %v2201_v39 = vpop.f32.mrb[135].mxu0  ;;  %v2713_v40 = vpop.f32.mrb[135].mxu1 }
 0x209   :  { %v5314_v41 = vpack.c.bf16 %v2200_v37, %v2197_v35  ;;  %v5634_v42 = vpack.c.bf16 %v2712_v38, %v2709_v36  ;;  %2411 = vmatmul.mubr.bf16.gmra.mrb[240].mxu0 %v6309_v29  ;;  %2923 = vmatmul.mubr.bf16.gmra.mrb[240].mxu1 %v6310_v30 }
 0x20a   :  { %4567 = vmatprep.mubr.msk.bf16.mxu0 %vm1506_vm0, %v6311_v33  ;;  %4631 = vmatprep.mubr.msk.bf16.mxu1 %vm1506_vm0, %v6313_v34 }
 0x20b   :  { %5818 = vst [vmem:[%s7937_s3 + $0x108] sm:$0xff] %v5314_v41   ;;  %5882 = vst [vmem:[%s7937_s3 + $0x308] sm:$0xff] %v5634_v42  }
 0x20c   :  { %v2204_v43 = vpop.f32.mrb[136].mxu0  ;;  %v2716_v44 = vpop.f32.mrb[136].mxu1 }
 0x20d   :  { %v2206_v45 = vpop.f32.mrb[137].mxu0  ;;  %v2718_v46 = vpop.f32.mrb[137].mxu1  ;;  %v2205_v53 = vadd.f32 %v7293_v7, %v2204_v43  ;;  %v2717_v54 = vadd.f32 %v7293_v7, %v2716_v44 }
 0x20e   :  { %v2207_v49 = vpop.f32.mrb[138].mxu0  ;;  %v2719_v50 = vpop.f32.mrb[138].mxu1 }
 0x20f   :  { %v2208_v55 = vadd.f32 %v7293_v7, %v2207_v49  ;;  %v2720_v56 = vadd.f32 %v7293_v7, %v2719_v50  ;;  %v2209_v57 = vpop.f32.mrb[139].mxu0  ;;  %v2721_v58 = vpop.f32.mrb[139].mxu1 }
 0x211   :  { %v5319_v59 = vpack.c.bf16 %v2208_v55, %v2205_v53  ;;  %v5639_v60 = vpack.c.bf16 %v2720_v56, %v2717_v54  ;;  %2419 = vmatmul.mubr.bf16.gmra.mrb[244].mxu0 %v6315_v47  ;;  %2931 = vmatmul.mubr.bf16.gmra.mrb[244].mxu1 %v6316_v48 }
 0x212   :  { %4568 = vmatprep.mubr.msk.bf16.mxu0 %vm1506_vm0, %v6317_v51  ;;  %4632 = vmatprep.mubr.msk.bf16.mxu1 %vm1506_vm0, %v6319_v52 }
 0x213   :  { %5819 = vst [vmem:[%s7937_s3 + $0x110] sm:$0xff] %v5319_v59   ;;  %5883 = vst [vmem:[%s7937_s3 + $0x310] sm:$0xff] %v5639_v60  }
 0x214   :  { %v2212_v62 = vpop.f32.mrb[140].mxu0  ;;  %v2724_v61 = vpop.f32.mrb[140].mxu1 }
 0x215   :  { %v2214_v63 = vpop.f32.mrb[141].mxu0  ;;  %v2726_v0 = vpop.f32.mrb[141].mxu1  ;;  %v2213_v8 = vadd.f32 %v7293_v7, %v2212_v62  ;;  %v2725_v9 = vadd.f32 %v7293_v7, %v2724_v61 }
 0x216   :  { %v2215_v3 = vpop.f32.mrb[142].mxu0  ;;  %v2727_v4 = vpop.f32.mrb[142].mxu1 }
 0x217   :  { %v2216_v10 = vadd.f32 %v7293_v7, %v2215_v3  ;;  %v2728_v11 = vadd.f32 %v7293_v7, %v2727_v4  ;;  %v2217_v12 = vpop.f32.mrb[143].mxu0  ;;  %v2729_v13 = vpop.f32.mrb[143].mxu1 }
 0x219   :  { %v5324_v14 = vpack.c.bf16 %v2216_v10, %v2213_v8  ;;  %v5644_v15 = vpack.c.bf16 %v2728_v11, %v2725_v9  ;;  %2427 = vmatmul.mubr.bf16.gmra.mrb[248].mxu0 %v6321_v1  ;;  %2939 = vmatmul.mubr.bf16.gmra.mrb[248].mxu1 %v6322_v2 }
 0x21a   :  { %4569 = vmatprep.mubr.msk.bf16.mxu0 %vm1506_vm0, %v6323_v5  ;;  %4633 = vmatprep.mubr.msk.bf16.mxu1 %vm1506_vm0, %v6325_v6 }
 0x21b   :  { %5820 = vst [vmem:[%s7937_s3 + $0x118] sm:$0xff] %v5324_v14   ;;  %5884 = vst [vmem:[%s7937_s3 + $0x318] sm:$0xff] %v5644_v15  }
 0x21c   :  { %v2220_v16 = vpop.f32.mrb[144].mxu0  ;;  %v2732_v17 = vpop.f32.mrb[144].mxu1 }
 0x21d   :  { %v2222_v18 = vpop.f32.mrb[145].mxu0  ;;  %v2734_v19 = vpop.f32.mrb[145].mxu1  ;;  %v2221_v24 = vadd.f32 %v7293_v7, %v2220_v16  ;;  %v2733_v25 = vadd.f32 %v7293_v7, %v2732_v17 }
 0x21e   :  { %v2223_v22 = vpop.f32.mrb[146].mxu0  ;;  %v2735_v23 = vpop.f32.mrb[146].mxu1 }
 0x21f   :  { %v2224_v26 = vadd.f32 %v7293_v7, %v2223_v22  ;;  %v2736_v27 = vadd.f32 %v7293_v7, %v2735_v23  ;;  %v2225_v28 = vpop.f32.mrb[147].mxu0  ;;  %v2737_v29 = vpop.f32.mrb[147].mxu1 }
 0x221   :  { %v5329_v30 = vpack.c.bf16 %v2224_v26, %v2221_v24  ;;  %v5649_v31 = vpack.c.bf16 %v2736_v27, %v2733_v25  ;;  %2435 = vmatmul.mubr.bf16.gmra.mrb[252].mxu0 %v6327_v20  ;;  %2947 = vmatmul.mubr.bf16.gmra.mrb[252].mxu1 %v6328_v21 }
 0x223   :  { %5821 = vst [vmem:[%s7937_s3 + $0x120] sm:$0xff] %v5329_v30   ;;  %5885 = vst [vmem:[%s7937_s3 + $0x320] sm:$0xff] %v5649_v31  }
 0x224   :  { %v2228_v32 = vpop.f32.mrb[148].mxu0  ;;  %v2740_v33 = vpop.f32.mrb[148].mxu1 }
 0x225   :  { %v2230_v34 = vpop.f32.mrb[149].mxu0  ;;  %v2742_v35 = vpop.f32.mrb[149].mxu1  ;;  %v2229_v38 = vadd.f32 %v7293_v7, %v2228_v32  ;;  %v2741_v39 = vadd.f32 %v7293_v7, %v2740_v33 }
 0x226   :  { %v2231_v36 = vpop.f32.mrb[150].mxu0  ;;  %v2743_v37 = vpop.f32.mrb[150].mxu1 }
 0x227   :  { %v2232_v40 = vadd.f32 %v7293_v7, %v2231_v36  ;;  %v2744_v41 = vadd.f32 %v7293_v7, %v2743_v37  ;;  %v2233_v42 = vpop.f32.mrb[151].mxu0  ;;  %v2745_v43 = vpop.f32.mrb[151].mxu1 }
 0x229   :  { %v5334_v44 = vpack.c.bf16 %v2232_v40, %v2229_v38  ;;  %v5654_v45 = vpack.c.bf16 %v2744_v41, %v2741_v39 }
 0x22b   :  { %5822 = vst [vmem:[%s7937_s3 + $0x128] sm:$0xff] %v5334_v44   ;;  %5886 = vst [vmem:[%s7937_s3 + $0x328] sm:$0xff] %v5654_v45  }
 0x22c   :  { %v2236_v46 = vpop.f32.mrb[152].mxu0  ;;  %v2748_v47 = vpop.f32.mrb[152].mxu1 }
 0x22d   :  { %v2238_v48 = vpop.f32.mrb[153].mxu0  ;;  %v2750_v49 = vpop.f32.mrb[153].mxu1  ;;  %v2237_v52 = vadd.f32 %v7293_v7, %v2236_v46  ;;  %v2749_v53 = vadd.f32 %v7293_v7, %v2748_v47 }
 0x22e   :  { %v2239_v50 = vpop.f32.mrb[154].mxu0  ;;  %v2751_v51 = vpop.f32.mrb[154].mxu1 }
 0x22f   :  { %v2240_v54 = vadd.f32 %v7293_v7, %v2239_v50  ;;  %v2752_v55 = vadd.f32 %v7293_v7, %v2751_v51  ;;  %v2241_v56 = vpop.f32.mrb[155].mxu0  ;;  %v2753_v57 = vpop.f32.mrb[155].mxu1 }
 0x231   :  { %v5339_v58 = vpack.c.bf16 %v2240_v54, %v2237_v52  ;;  %v5659_v59 = vpack.c.bf16 %v2752_v55, %v2749_v53 }
 0x233   :  { %5823 = vst [vmem:[%s7937_s3 + $0x130] sm:$0xff] %v5339_v58   ;;  %5887 = vst [vmem:[%s7937_s3 + $0x330] sm:$0xff] %v5659_v59  }
 0x234   :  { %v2244_v60 = vpop.f32.mrb[156].mxu0  ;;  %v2756_v62 = vpop.f32.mrb[156].mxu1 }
 0x235   :  { %v2246_v61 = vpop.f32.mrb[157].mxu0  ;;  %v2758_v63 = vpop.f32.mrb[157].mxu1  ;;  %v2245_v2 = vadd.f32 %v7293_v7, %v2244_v60  ;;  %v2757_v3 = vadd.f32 %v7293_v7, %v2756_v62 }
 0x236   :  { %v2247_v0 = vpop.f32.mrb[158].mxu0  ;;  %v2759_v1 = vpop.f32.mrb[158].mxu1 }
 0x237   :  { %v2248_v4 = vadd.f32 %v7293_v7, %v2247_v0  ;;  %v2760_v5 = vadd.f32 %v7293_v7, %v2759_v1  ;;  %v2249_v6 = vpop.f32.mrb[159].mxu0  ;;  %v2761_v8 = vpop.f32.mrb[159].mxu1 }
 0x239   :  { %v5344_v9 = vpack.c.bf16 %v2248_v4, %v2245_v2  ;;  %v5664_v10 = vpack.c.bf16 %v2760_v5, %v2757_v3 }
 0x23b   :  { %5824 = vst [vmem:[%s7937_s3 + $0x138] sm:$0xff] %v5344_v9   ;;  %5888 = vst [vmem:[%s7937_s3 + $0x338] sm:$0xff] %v5664_v10  }
 0x23c   :  { %v2252_v11 = vpop.f32.mrb[160].mxu0  ;;  %v2764_v12 = vpop.f32.mrb[160].mxu1 }
 0x23d   :  { %v2254_v13 = vpop.f32.mrb[161].mxu0  ;;  %v2766_v14 = vpop.f32.mrb[161].mxu1  ;;  %v2253_v17 = vadd.f32 %v7293_v7, %v2252_v11  ;;  %v2765_v18 = vadd.f32 %v7293_v7, %v2764_v12 }
 0x23e   :  { %v2255_v15 = vpop.f32.mrb[162].mxu0  ;;  %v2767_v16 = vpop.f32.mrb[162].mxu1 }
 0x23f   :  { %v2256_v19 = vadd.f32 %v7293_v7, %v2255_v15  ;;  %v2768_v20 = vadd.f32 %v7293_v7, %v2767_v16  ;;  %v2257_v21 = vpop.f32.mrb[163].mxu0  ;;  %v2769_v22 = vpop.f32.mrb[163].mxu1 }
 0x241   :  { %v5349_v23 = vpack.c.bf16 %v2256_v19, %v2253_v17  ;;  %v5669_v24 = vpack.c.bf16 %v2768_v20, %v2765_v18 }
 0x243   :  { %5825 = vst [vmem:[%s7937_s3 + $0x140] sm:$0xff] %v5349_v23   ;;  %5889 = vst [vmem:[%s7937_s3 + $0x340] sm:$0xff] %v5669_v24  }
 0x244   :  { %v2260_v25 = vpop.f32.mrb[164].mxu0  ;;  %v2772_v26 = vpop.f32.mrb[164].mxu1 }
 0x245   :  { %v2262_v27 = vpop.f32.mrb[165].mxu0  ;;  %v2774_v28 = vpop.f32.mrb[165].mxu1  ;;  %v2261_v31 = vadd.f32 %v7293_v7, %v2260_v25  ;;  %v2773_v32 = vadd.f32 %v7293_v7, %v2772_v26 }
 0x246   :  { %v2263_v29 = vpop.f32.mrb[166].mxu0  ;;  %v2775_v30 = vpop.f32.mrb[166].mxu1 }
 0x247   :  { %v2264_v33 = vadd.f32 %v7293_v7, %v2263_v29  ;;  %v2776_v34 = vadd.f32 %v7293_v7, %v2775_v30  ;;  %v2265_v35 = vpop.f32.mrb[167].mxu0  ;;  %v2777_v36 = vpop.f32.mrb[167].mxu1 }
 0x249   :  { %v5354_v37 = vpack.c.bf16 %v2264_v33, %v2261_v31  ;;  %v5674_v38 = vpack.c.bf16 %v2776_v34, %v2773_v32 }
 0x24b   :  { %5826 = vst [vmem:[%s7937_s3 + $0x148] sm:$0xff] %v5354_v37   ;;  %5890 = vst [vmem:[%s7937_s3 + $0x348] sm:$0xff] %v5674_v38  }
 0x24c   :  { %v2268_v39 = vpop.f32.mrb[168].mxu0  ;;  %v2780_v40 = vpop.f32.mrb[168].mxu1 }
 0x24d   :  { %v2270_v41 = vpop.f32.mrb[169].mxu0  ;;  %v2782_v42 = vpop.f32.mrb[169].mxu1  ;;  %v2269_v45 = vadd.f32 %v7293_v7, %v2268_v39  ;;  %v2781_v46 = vadd.f32 %v7293_v7, %v2780_v40 }
 0x24e   :  { %v2271_v43 = vpop.f32.mrb[170].mxu0  ;;  %v2783_v44 = vpop.f32.mrb[170].mxu1 }
 0x24f   :  { %v2272_v47 = vadd.f32 %v7293_v7, %v2271_v43  ;;  %v2784_v48 = vadd.f32 %v7293_v7, %v2783_v44  ;;  %v2273_v49 = vpop.f32.mrb[171].mxu0  ;;  %v2785_v50 = vpop.f32.mrb[171].mxu1 }
 0x251   :  { %v5359_v51 = vpack.c.bf16 %v2272_v47, %v2269_v45  ;;  %v5679_v52 = vpack.c.bf16 %v2784_v48, %v2781_v46 }
 0x253   :  { %5827 = vst [vmem:[%s7937_s3 + $0x150] sm:$0xff] %v5359_v51   ;;  %5891 = vst [vmem:[%s7937_s3 + $0x350] sm:$0xff] %v5679_v52  }
 0x254   :  { %v2276_v53 = vpop.f32.mrb[172].mxu0  ;;  %v2788_v54 = vpop.f32.mrb[172].mxu1 }
 0x255   :  { %v2278_v55 = vpop.f32.mrb[173].mxu0  ;;  %v2790_v56 = vpop.f32.mrb[173].mxu1  ;;  %v2277_v59 = vadd.f32 %v7293_v7, %v2276_v53  ;;  %v2789_v60 = vadd.f32 %v7293_v7, %v2788_v54 }
 0x256   :  { %v2279_v57 = vpop.f32.mrb[174].mxu0  ;;  %v2791_v58 = vpop.f32.mrb[174].mxu1 }
 0x257   :  { %v2280_v62 = vadd.f32 %v7293_v7, %v2279_v57  ;;  %v2792_v61 = vadd.f32 %v7293_v7, %v2791_v58  ;;  %v2281_v63 = vpop.f32.mrb[175].mxu0  ;;  %v2793_v0 = vpop.f32.mrb[175].mxu1 }
 0x259   :  { %v5364_v1 = vpack.c.bf16 %v2280_v62, %v2277_v59  ;;  %v5684_v2 = vpack.c.bf16 %v2792_v61, %v2789_v60 }
 0x25b   :  { %5828 = vst [vmem:[%s7937_s3 + $0x158] sm:$0xff] %v5364_v1   ;;  %5892 = vst [vmem:[%s7937_s3 + $0x358] sm:$0xff] %v5684_v2  }
 0x25c   :  { %v2284_v3 = vpop.f32.mrb[176].mxu0  ;;  %v2796_v4 = vpop.f32.mrb[176].mxu1 }
 0x25d   :  { %v2286_v5 = vpop.f32.mrb[177].mxu0  ;;  %v2798_v6 = vpop.f32.mrb[177].mxu1  ;;  %v2285_v10 = vadd.f32 %v7293_v7, %v2284_v3  ;;  %v2797_v11 = vadd.f32 %v7293_v7, %v2796_v4 }
 0x25e   :  { %v2287_v8 = vpop.f32.mrb[178].mxu0  ;;  %v2799_v9 = vpop.f32.mrb[178].mxu1 }
 0x25f   :  { %v2288_v12 = vadd.f32 %v7293_v7, %v2287_v8  ;;  %v2800_v13 = vadd.f32 %v7293_v7, %v2799_v9  ;;  %v2289_v14 = vpop.f32.mrb[179].mxu0  ;;  %v2801_v15 = vpop.f32.mrb[179].mxu1 }
 0x261   :  { %v5369_v16 = vpack.c.bf16 %v2288_v12, %v2285_v10  ;;  %v5689_v17 = vpack.c.bf16 %v2800_v13, %v2797_v11 }
 0x263   :  { %5829 = vst [vmem:[%s7937_s3 + $0x160] sm:$0xff] %v5369_v16   ;;  %5893 = vst [vmem:[%s7937_s3 + $0x360] sm:$0xff] %v5689_v17  }
 0x264   :  { %v2292_v18 = vpop.f32.mrb[180].mxu0  ;;  %v2804_v19 = vpop.f32.mrb[180].mxu1 }
 0x265   :  { %v2294_v20 = vpop.f32.mrb[181].mxu0  ;;  %v2806_v21 = vpop.f32.mrb[181].mxu1  ;;  %v2293_v24 = vadd.f32 %v7293_v7, %v2292_v18  ;;  %v2805_v25 = vadd.f32 %v7293_v7, %v2804_v19 }
 0x266   :  { %v2295_v22 = vpop.f32.mrb[182].mxu0  ;;  %v2807_v23 = vpop.f32.mrb[182].mxu1 }
 0x267   :  { %v2296_v26 = vadd.f32 %v7293_v7, %v2295_v22  ;;  %v2808_v27 = vadd.f32 %v7293_v7, %v2807_v23  ;;  %v2297_v28 = vpop.f32.mrb[183].mxu0  ;;  %v2809_v29 = vpop.f32.mrb[183].mxu1  ;;  %v7752_v7 = vld [vmem:[%s7936_s2] ss:$0 sm:$0xff] }
 0x269   :  { %v5374_v30 = vpack.c.bf16 %v2296_v26, %v2293_v24  ;;  %v5694_v31 = vpack.c.bf16 %v2808_v27, %v2805_v25 }
 0x26b   :  { %5830 = vst [vmem:[%s7937_s3 + $0x168] sm:$0xff] %v5374_v30   ;;  %5894 = vst [vmem:[%s7937_s3 + $0x368] sm:$0xff] %v5694_v31  }
 0x26c   :  { %v2300_v32 = vpop.f32.mrb[184].mxu0  ;;  %v2812_v33 = vpop.f32.mrb[184].mxu1 }
 0x26d   :  { %v2302_v34 = vpop.f32.mrb[185].mxu0  ;;  %v2814_v35 = vpop.f32.mrb[185].mxu1  ;;  %v2301_v38 = vadd.f32 %v7752_v7, %v2300_v32  ;;  %v2813_v39 = vadd.f32 %v7752_v7, %v2812_v33 }
 0x26e   :  { %v2303_v36 = vpop.f32.mrb[186].mxu0  ;;  %v2815_v37 = vpop.f32.mrb[186].mxu1 }
 0x26f   :  { %v2304_v40 = vadd.f32 %v7752_v7, %v2303_v36  ;;  %v2816_v41 = vadd.f32 %v7752_v7, %v2815_v37  ;;  %v2305_v42 = vpop.f32.mrb[187].mxu0  ;;  %v2817_v43 = vpop.f32.mrb[187].mxu1 }
 0x271   :  { %v5379_v44 = vpack.c.bf16 %v2304_v40, %v2301_v38  ;;  %v5699_v45 = vpack.c.bf16 %v2816_v41, %v2813_v39 }
 0x273   :  { %5831 = vst [vmem:[%s7937_s3 + $0x170] sm:$0xff] %v5379_v44   ;;  %5895 = vst [vmem:[%s7937_s3 + $0x370] sm:$0xff] %v5699_v45  }
 0x274   :  { %v2308_v46 = vpop.f32.mrb[188].mxu0  ;;  %v2820_v47 = vpop.f32.mrb[188].mxu1 }
 0x275   :  { %v2310_v48 = vpop.f32.mrb[189].mxu0  ;;  %v2822_v49 = vpop.f32.mrb[189].mxu1  ;;  %v2309_v52 = vadd.f32 %v7752_v7, %v2308_v46  ;;  %v2821_v53 = vadd.f32 %v7752_v7, %v2820_v47 }
 0x276   :  { %v2311_v50 = vpop.f32.mrb[190].mxu0  ;;  %v2823_v51 = vpop.f32.mrb[190].mxu1 }
 0x277   :  { %v2312_v54 = vadd.f32 %v7752_v7, %v2311_v50  ;;  %v2824_v55 = vadd.f32 %v7752_v7, %v2823_v51  ;;  %v2313_v56 = vpop.f32.mrb[191].mxu0  ;;  %v2825_v57 = vpop.f32.mrb[191].mxu1 }
 0x279   :  { %v5384_v58 = vpack.c.bf16 %v2312_v54, %v2309_v52  ;;  %v5704_v59 = vpack.c.bf16 %v2824_v55, %v2821_v53 }
 0x27b   :  { %5832 = vst [vmem:[%s7937_s3 + $0x178] sm:$0xff] %v5384_v58   ;;  %5896 = vst [vmem:[%s7937_s3 + $0x378] sm:$0xff] %v5704_v59  }
 0x27c   :  { %v2316_v60 = vpop.f32.mrb[192].mxu0  ;;  %v2828_v62 = vpop.f32.mrb[192].mxu1 }
 0x27d   :  { %v2318_v61 = vpop.f32.mrb[193].mxu0  ;;  %v2830_v63 = vpop.f32.mrb[193].mxu1  ;;  %v2317_v2 = vadd.f32 %v7752_v7, %v2316_v60  ;;  %v2829_v3 = vadd.f32 %v7752_v7, %v2828_v62 }
 0x27e   :  { %v2319_v0 = vpop.f32.mrb[194].mxu0  ;;  %v2831_v1 = vpop.f32.mrb[194].mxu1 }
 0x27f   :  { %v2320_v4 = vadd.f32 %v7752_v7, %v2319_v0  ;;  %v2832_v5 = vadd.f32 %v7752_v7, %v2831_v1  ;;  %v2321_v6 = vpop.f32.mrb[195].mxu0  ;;  %v2833_v8 = vpop.f32.mrb[195].mxu1 }
 0x281   :  { %v5389_v9 = vpack.c.bf16 %v2320_v4, %v2317_v2  ;;  %v5709_v10 = vpack.c.bf16 %v2832_v5, %v2829_v3 }
 0x283   :  { %5833 = vst [vmem:[%s7937_s3 + $0x180] sm:$0xff] %v5389_v9   ;;  %5897 = vst [vmem:[%s7937_s3 + $0x380] sm:$0xff] %v5709_v10  }
 0x284   :  { %v2324_v11 = vpop.f32.mrb[196].mxu0  ;;  %v2836_v12 = vpop.f32.mrb[196].mxu1 }
 0x285   :  { %v2326_v13 = vpop.f32.mrb[197].mxu0  ;;  %v2838_v14 = vpop.f32.mrb[197].mxu1  ;;  %v2325_v17 = vadd.f32 %v7752_v7, %v2324_v11  ;;  %v2837_v18 = vadd.f32 %v7752_v7, %v2836_v12 }
 0x286   :  { %v2327_v15 = vpop.f32.mrb[198].mxu0  ;;  %v2839_v16 = vpop.f32.mrb[198].mxu1 }
 0x287   :  { %v2328_v19 = vadd.f32 %v7752_v7, %v2327_v15  ;;  %v2840_v20 = vadd.f32 %v7752_v7, %v2839_v16  ;;  %v2329_v21 = vpop.f32.mrb[199].mxu0  ;;  %v2841_v22 = vpop.f32.mrb[199].mxu1 }
 0x289   :  { %v5394_v23 = vpack.c.bf16 %v2328_v19, %v2325_v17  ;;  %v5714_v24 = vpack.c.bf16 %v2840_v20, %v2837_v18 }
 0x28b   :  { %5834 = vst [vmem:[%s7937_s3 + $0x188] sm:$0xff] %v5394_v23   ;;  %5898 = vst [vmem:[%s7937_s3 + $0x388] sm:$0xff] %v5714_v24  }
 0x28c   :  { %v2332_v25 = vpop.f32.mrb[200].mxu0  ;;  %v2844_v26 = vpop.f32.mrb[200].mxu1 }
 0x28d   :  { %v2334_v27 = vpop.f32.mrb[201].mxu0  ;;  %v2846_v28 = vpop.f32.mrb[201].mxu1  ;;  %v2333_v31 = vadd.f32 %v7752_v7, %v2332_v25  ;;  %v2845_v32 = vadd.f32 %v7752_v7, %v2844_v26 }
 0x28e   :  { %v2335_v29 = vpop.f32.mrb[202].mxu0  ;;  %v2847_v30 = vpop.f32.mrb[202].mxu1 }
 0x28f   :  { %v2336_v33 = vadd.f32 %v7752_v7, %v2335_v29  ;;  %v2848_v34 = vadd.f32 %v7752_v7, %v2847_v30  ;;  %v2337_v35 = vpop.f32.mrb[203].mxu0  ;;  %v2849_v36 = vpop.f32.mrb[203].mxu1 }
 0x291   :  { %v5399_v37 = vpack.c.bf16 %v2336_v33, %v2333_v31  ;;  %v5719_v38 = vpack.c.bf16 %v2848_v34, %v2845_v32 }
 0x293   :  { %5835 = vst [vmem:[%s7937_s3 + $0x190] sm:$0xff] %v5399_v37   ;;  %5899 = vst [vmem:[%s7937_s3 + $0x390] sm:$0xff] %v5719_v38  }
 0x294   :  { %v2340_v39 = vpop.f32.mrb[204].mxu0  ;;  %v2852_v40 = vpop.f32.mrb[204].mxu1 }
 0x295   :  { %v2342_v41 = vpop.f32.mrb[205].mxu0  ;;  %v2854_v42 = vpop.f32.mrb[205].mxu1  ;;  %v2341_v45 = vadd.f32 %v7752_v7, %v2340_v39  ;;  %v2853_v46 = vadd.f32 %v7752_v7, %v2852_v40 }
 0x296   :  { %v2343_v43 = vpop.f32.mrb[206].mxu0  ;;  %v2855_v44 = vpop.f32.mrb[206].mxu1 }
 0x297   :  { %v2344_v47 = vadd.f32 %v7752_v7, %v2343_v43  ;;  %v2856_v48 = vadd.f32 %v7752_v7, %v2855_v44  ;;  %v2345_v49 = vpop.f32.mrb[207].mxu0  ;;  %v2857_v50 = vpop.f32.mrb[207].mxu1 }
 0x299   :  { %v5404_v51 = vpack.c.bf16 %v2344_v47, %v2341_v45  ;;  %v5724_v52 = vpack.c.bf16 %v2856_v48, %v2853_v46 }
 0x29b   :  { %5836 = vst [vmem:[%s7937_s3 + $0x198] sm:$0xff] %v5404_v51   ;;  %5900 = vst [vmem:[%s7937_s3 + $0x398] sm:$0xff] %v5724_v52  }
 0x29c   :  { %v2348_v53 = vpop.f32.mrb[208].mxu0  ;;  %v2860_v54 = vpop.f32.mrb[208].mxu1 }
 0x29d   :  { %v2350_v55 = vpop.f32.mrb[209].mxu0  ;;  %v2862_v56 = vpop.f32.mrb[209].mxu1  ;;  %v2349_v59 = vadd.f32 %v7752_v7, %v2348_v53  ;;  %v2861_v60 = vadd.f32 %v7752_v7, %v2860_v54 }
 0x29e   :  { %v2351_v57 = vpop.f32.mrb[210].mxu0  ;;  %v2863_v58 = vpop.f32.mrb[210].mxu1 }
 0x29f   :  { %v2352_v62 = vadd.f32 %v7752_v7, %v2351_v57  ;;  %v2864_v61 = vadd.f32 %v7752_v7, %v2863_v58  ;;  %v2353_v63 = vpop.f32.mrb[211].mxu0  ;;  %v2865_v0 = vpop.f32.mrb[211].mxu1 }
 0x2a1   :  { %v5409_v1 = vpack.c.bf16 %v2352_v62, %v2349_v59  ;;  %v5729_v2 = vpack.c.bf16 %v2864_v61, %v2861_v60 }
 0x2a3   :  { %5837 = vst [vmem:[%s7937_s3 + $0x1a0] sm:$0xff] %v5409_v1   ;;  %5901 = vst [vmem:[%s7937_s3 + $0x3a0] sm:$0xff] %v5729_v2  }
 0x2a4   :  { %v2356_v3 = vpop.f32.mrb[212].mxu0  ;;  %v2868_v4 = vpop.f32.mrb[212].mxu1 }
 0x2a5   :  { %v2358_v5 = vpop.f32.mrb[213].mxu0  ;;  %v2870_v6 = vpop.f32.mrb[213].mxu1  ;;  %v2357_v10 = vadd.f32 %v7752_v7, %v2356_v3  ;;  %v2869_v11 = vadd.f32 %v7752_v7, %v2868_v4 }
 0x2a6   :  { %v2359_v8 = vpop.f32.mrb[214].mxu0  ;;  %v2871_v9 = vpop.f32.mrb[214].mxu1 }
 0x2a7   :  { %v2360_v12 = vadd.f32 %v7752_v7, %v2359_v8  ;;  %v2872_v13 = vadd.f32 %v7752_v7, %v2871_v9  ;;  %v2361_v14 = vpop.f32.mrb[215].mxu0  ;;  %v2873_v15 = vpop.f32.mrb[215].mxu1 }
 0x2a9   :  { %v5414_v16 = vpack.c.bf16 %v2360_v12, %v2357_v10  ;;  %v5734_v17 = vpack.c.bf16 %v2872_v13, %v2869_v11 }
 0x2ab   :  { %5838 = vst [vmem:[%s7937_s3 + $0x1a8] sm:$0xff] %v5414_v16   ;;  %5902 = vst [vmem:[%s7937_s3 + $0x3a8] sm:$0xff] %v5734_v17  }
 0x2ac   :  { %v2364_v18 = vpop.f32.mrb[216].mxu0  ;;  %v2876_v19 = vpop.f32.mrb[216].mxu1 }
 0x2ad   :  { %v2366_v20 = vpop.f32.mrb[217].mxu0  ;;  %v2878_v21 = vpop.f32.mrb[217].mxu1  ;;  %v2365_v24 = vadd.f32 %v7752_v7, %v2364_v18  ;;  %v2877_v25 = vadd.f32 %v7752_v7, %v2876_v19 }
 0x2ae   :  { %v2367_v22 = vpop.f32.mrb[218].mxu0  ;;  %v2879_v23 = vpop.f32.mrb[218].mxu1 }
 0x2af   :  { %v2368_v26 = vadd.f32 %v7752_v7, %v2367_v22  ;;  %v2880_v27 = vadd.f32 %v7752_v7, %v2879_v23  ;;  %v2369_v28 = vpop.f32.mrb[219].mxu0  ;;  %v2881_v29 = vpop.f32.mrb[219].mxu1 }
 0x2b1   :  { %v5419_v30 = vpack.c.bf16 %v2368_v26, %v2365_v24  ;;  %v5739_v31 = vpack.c.bf16 %v2880_v27, %v2877_v25 }
 0x2b3   :  { %5839 = vst [vmem:[%s7937_s3 + $0x1b0] sm:$0xff] %v5419_v30   ;;  %5903 = vst [vmem:[%s7937_s3 + $0x3b0] sm:$0xff] %v5739_v31  }
 0x2b4   :  { %v2372_v32 = vpop.f32.mrb[220].mxu0  ;;  %v2884_v33 = vpop.f32.mrb[220].mxu1 }
 0x2b5   :  { %v2374_v34 = vpop.f32.mrb[221].mxu0  ;;  %v2886_v35 = vpop.f32.mrb[221].mxu1  ;;  %v2373_v38 = vadd.f32 %v7752_v7, %v2372_v32  ;;  %v2885_v39 = vadd.f32 %v7752_v7, %v2884_v33 }
 0x2b6   :  { %v2375_v36 = vpop.f32.mrb[222].mxu0  ;;  %v2887_v37 = vpop.f32.mrb[222].mxu1 }
 0x2b7   :  { %v2376_v40 = vadd.f32 %v7752_v7, %v2375_v36  ;;  %v2888_v41 = vadd.f32 %v7752_v7, %v2887_v37  ;;  %v2377_v42 = vpop.f32.mrb[223].mxu0  ;;  %v2889_v43 = vpop.f32.mrb[223].mxu1 }
 0x2b9   :  { %v5424_v44 = vpack.c.bf16 %v2376_v40, %v2373_v38  ;;  %v5744_v45 = vpack.c.bf16 %v2888_v41, %v2885_v39 }
 0x2bb   :  { %5840 = vst [vmem:[%s7937_s3 + $0x1b8] sm:$0xff] %v5424_v44   ;;  %5904 = vst [vmem:[%s7937_s3 + $0x3b8] sm:$0xff] %v5744_v45  }
 0x2bc   :  { %v2380_v46 = vpop.f32.mrb[224].mxu0  ;;  %v2892_v47 = vpop.f32.mrb[224].mxu1 }
 0x2bd   :  { %v2382_v48 = vpop.f32.mrb[225].mxu0  ;;  %v2894_v49 = vpop.f32.mrb[225].mxu1  ;;  %v2381_v52 = vadd.f32 %v7752_v7, %v2380_v46  ;;  %v2893_v53 = vadd.f32 %v7752_v7, %v2892_v47 }
 0x2be   :  { %v2383_v50 = vpop.f32.mrb[226].mxu0  ;;  %v2895_v51 = vpop.f32.mrb[226].mxu1 }
 0x2bf   :  { %v2384_v54 = vadd.f32 %v7752_v7, %v2383_v50  ;;  %v2896_v55 = vadd.f32 %v7752_v7, %v2895_v51  ;;  %v2385_v56 = vpop.f32.mrb[227].mxu0  ;;  %v2897_v57 = vpop.f32.mrb[227].mxu1 }
 0x2c1   :  { %v5429_v58 = vpack.c.bf16 %v2384_v54, %v2381_v52  ;;  %v5749_v59 = vpack.c.bf16 %v2896_v55, %v2893_v53 }
 0x2c3   :  { %5841 = vst [vmem:[%s7937_s3 + $0x1c0] sm:$0xff] %v5429_v58   ;;  %5905 = vst [vmem:[%s7937_s3 + $0x3c0] sm:$0xff] %v5749_v59  }
 0x2c4   :  { %v2388_v60 = vpop.f32.mrb[228].mxu0  ;;  %v2900_v62 = vpop.f32.mrb[228].mxu1 }
 0x2c5   :  { %v2390_v61 = vpop.f32.mrb[229].mxu0  ;;  %v2902_v63 = vpop.f32.mrb[229].mxu1  ;;  %v2389_v2 = vadd.f32 %v7752_v7, %v2388_v60  ;;  %v2901_v3 = vadd.f32 %v7752_v7, %v2900_v62 }
 0x2c6   :  { %v2391_v0 = vpop.f32.mrb[230].mxu0  ;;  %v2903_v1 = vpop.f32.mrb[230].mxu1 }
 0x2c7   :  { %v2392_v4 = vadd.f32 %v7752_v7, %v2391_v0  ;;  %v2904_v5 = vadd.f32 %v7752_v7, %v2903_v1  ;;  %v2393_v6 = vpop.f32.mrb[231].mxu0  ;;  %v2905_v8 = vpop.f32.mrb[231].mxu1 }
 0x2c9   :  { %v5434_v9 = vpack.c.bf16 %v2392_v4, %v2389_v2  ;;  %v5754_v10 = vpack.c.bf16 %v2904_v5, %v2901_v3 }
 0x2cb   :  { %5842 = vst [vmem:[%s7937_s3 + $0x1c8] sm:$0xff] %v5434_v9   ;;  %5906 = vst [vmem:[%s7937_s3 + $0x3c8] sm:$0xff] %v5754_v10  }
 0x2cc   :  { %v2396_v11 = vpop.f32.mrb[232].mxu0  ;;  %v2908_v12 = vpop.f32.mrb[232].mxu1 }
 0x2cd   :  { %v2398_v13 = vpop.f32.mrb[233].mxu0  ;;  %v2910_v14 = vpop.f32.mrb[233].mxu1  ;;  %v2397_v17 = vadd.f32 %v7752_v7, %v2396_v11  ;;  %v2909_v18 = vadd.f32 %v7752_v7, %v2908_v12 }
 0x2ce   :  { %v2399_v15 = vpop.f32.mrb[234].mxu0  ;;  %v2911_v16 = vpop.f32.mrb[234].mxu1 }
 0x2cf   :  { %v2400_v19 = vadd.f32 %v7752_v7, %v2399_v15  ;;  %v2912_v20 = vadd.f32 %v7752_v7, %v2911_v16  ;;  %v2401_v21 = vpop.f32.mrb[235].mxu0  ;;  %v2913_v22 = vpop.f32.mrb[235].mxu1 }
 0x2d1   :  { %v5439_v23 = vpack.c.bf16 %v2400_v19, %v2397_v17  ;;  %v5759_v24 = vpack.c.bf16 %v2912_v20, %v2909_v18 }
 0x2d3   :  { %5843 = vst [vmem:[%s7937_s3 + $0x1d0] sm:$0xff] %v5439_v23   ;;  %5907 = vst [vmem:[%s7937_s3 + $0x3d0] sm:$0xff] %v5759_v24  }
 0x2d4   :  { %v2404_v25 = vpop.f32.mrb[236].mxu0  ;;  %v2916_v26 = vpop.f32.mrb[236].mxu1 }
 0x2d5   :  { %v2406_v27 = vpop.f32.mrb[237].mxu0  ;;  %v2918_v28 = vpop.f32.mrb[237].mxu1  ;;  %v2405_v31 = vadd.f32 %v7752_v7, %v2404_v25  ;;  %v2917_v32 = vadd.f32 %v7752_v7, %v2916_v26 }
 0x2d6   :  { %v2407_v29 = vpop.f32.mrb[238].mxu0  ;;  %v2919_v30 = vpop.f32.mrb[238].mxu1 }
 0x2d7   :  { %v2408_v33 = vadd.f32 %v7752_v7, %v2407_v29  ;;  %v2920_v34 = vadd.f32 %v7752_v7, %v2919_v30  ;;  %v2409_v35 = vpop.f32.mrb[239].mxu0  ;;  %v2921_v36 = vpop.f32.mrb[239].mxu1 }
 0x2d9   :  { %v5444_v37 = vpack.c.bf16 %v2408_v33, %v2405_v31  ;;  %v5764_v38 = vpack.c.bf16 %v2920_v34, %v2917_v32 }
 0x2db   :  { %5844 = vst [vmem:[%s7937_s3 + $0x1d8] sm:$0xff] %v5444_v37   ;;  %5908 = vst [vmem:[%s7937_s3 + $0x3d8] sm:$0xff] %v5764_v38  }
 0x2dc   :  { %v2412_v39 = vpop.f32.mrb[240].mxu0  ;;  %v2924_v40 = vpop.f32.mrb[240].mxu1 }
 0x2dd   :  { %v2414_v41 = vpop.f32.mrb[241].mxu0  ;;  %v2926_v42 = vpop.f32.mrb[241].mxu1  ;;  %v2413_v45 = vadd.f32 %v7752_v7, %v2412_v39  ;;  %v2925_v46 = vadd.f32 %v7752_v7, %v2924_v40 }
 0x2de   :  { %v2415_v43 = vpop.f32.mrb[242].mxu0  ;;  %v2927_v44 = vpop.f32.mrb[242].mxu1 }
 0x2df   :  { %v2416_v47 = vadd.f32 %v7752_v7, %v2415_v43  ;;  %v2928_v48 = vadd.f32 %v7752_v7, %v2927_v44  ;;  %v2417_v49 = vpop.f32.mrb[243].mxu0  ;;  %v2929_v50 = vpop.f32.mrb[243].mxu1 }
 0x2e1   :  { %v5449_v51 = vpack.c.bf16 %v2416_v47, %v2413_v45  ;;  %v5769_v52 = vpack.c.bf16 %v2928_v48, %v2925_v46 }
 0x2e3   :  { %5845 = vst [vmem:[%s7937_s3 + $0x1e0] sm:$0xff] %v5449_v51   ;;  %5909 = vst [vmem:[%s7937_s3 + $0x3e0] sm:$0xff] %v5769_v52  }
 0x2e4   :  { %v2420_v53 = vpop.f32.mrb[244].mxu0  ;;  %v2932_v54 = vpop.f32.mrb[244].mxu1 }
 0x2e5   :  { %v2422_v55 = vpop.f32.mrb[245].mxu0  ;;  %v2934_v56 = vpop.f32.mrb[245].mxu1  ;;  %v2421_v59 = vadd.f32 %v7752_v7, %v2420_v53  ;;  %v2933_v60 = vadd.f32 %v7752_v7, %v2932_v54 }
 0x2e6   :  { %v2423_v57 = vpop.f32.mrb[246].mxu0  ;;  %v2935_v58 = vpop.f32.mrb[246].mxu1 }
 0x2e7   :  { %v2424_v62 = vadd.f32 %v7752_v7, %v2423_v57  ;;  %v2936_v61 = vadd.f32 %v7752_v7, %v2935_v58  ;;  %v2425_v63 = vpop.f32.mrb[247].mxu0  ;;  %v2937_v0 = vpop.f32.mrb[247].mxu1 }
 0x2e9   :  { %v5454_v1 = vpack.c.bf16 %v2424_v62, %v2421_v59  ;;  %v5774_v2 = vpack.c.bf16 %v2936_v61, %v2933_v60 }
 0x2eb   :  { %5846 = vst [vmem:[%s7937_s3 + $0x1e8] sm:$0xff] %v5454_v1   ;;  %5910 = vst [vmem:[%s7937_s3 + $0x3e8] sm:$0xff] %v5774_v2  }
 0x2ec   :  { %v2428_v3 = vpop.f32.mrb[248].mxu0  ;;  %v2940_v4 = vpop.f32.mrb[248].mxu1 }
 0x2ed   :  { %v2430_v5 = vpop.f32.mrb[249].mxu0  ;;  %v2942_v6 = vpop.f32.mrb[249].mxu1  ;;  %v2429_v10 = vadd.f32 %v7752_v7, %v2428_v3  ;;  %v2941_v11 = vadd.f32 %v7752_v7, %v2940_v4 }
 0x2ee   :  { %v2431_v8 = vpop.f32.mrb[250].mxu0  ;;  %v2943_v9 = vpop.f32.mrb[250].mxu1 }
 0x2ef   :  { %v2432_v12 = vadd.f32 %v7752_v7, %v2431_v8  ;;  %v2944_v13 = vadd.f32 %v7752_v7, %v2943_v9  ;;  %v2433_v14 = vpop.f32.mrb[251].mxu0  ;;  %v2945_v15 = vpop.f32.mrb[251].mxu1 }
 0x2f1   :  { %v5459_v16 = vpack.c.bf16 %v2432_v12, %v2429_v10  ;;  %v5779_v17 = vpack.c.bf16 %v2944_v13, %v2941_v11 }
 0x2f3   :  { %5847 = vst [vmem:[%s7937_s3 + $0x1f0] sm:$0xff] %v5459_v16   ;;  %5911 = vst [vmem:[%s7937_s3 + $0x3f0] sm:$0xff] %v5779_v17  }
 0x2f4   :  { %v2436_v18 = vpop.f32.mrb[252].mxu0  ;;  %v2948_v19 = vpop.f32.mrb[252].mxu1 }
 0x2f5   :  { %v2438_v20 = vpop.f32.mrb[253].mxu0  ;;  %v2950_v21 = vpop.f32.mrb[253].mxu1  ;;  %v2437_v24 = vadd.f32 %v7752_v7, %v2436_v18  ;;  %v2949_v25 = vadd.f32 %v7752_v7, %v2948_v19 }
 0x2f6   :  { %v2439_v22 = vpop.f32.mrb[254].mxu0  ;;  %v2951_v23 = vpop.f32.mrb[254].mxu1 }
 0x2f7   :  { %v2440_v26 = vadd.f32 %v7752_v7, %v2439_v22  ;;  %v2952_v27 = vadd.f32 %v7752_v7, %v2951_v23  ;;  %v2441_v28 = vpop.f32.mrb[255].mxu0  ;;  %v2953_v29 = vpop.f32.mrb[255].mxu1 }
 0x2f9   :  { %v5464_v30 = vpack.c.bf16 %v2440_v26, %v2437_v24  ;;  %v5784_v31 = vpack.c.bf16 %v2952_v27, %v2949_v25 }
 0x2fb   :  { %5848 = vst [vmem:[%s7937_s3 + $0x1f8] sm:$0xff] %v5464_v30   ;;  %5912 = vst [vmem:[%s7937_s3 + $0x3f8] sm:$0xff] %v5784_v31  }

// kernel: hybridnet_forward.17
= control target key start
LH: loop header
LB: loop body
LE: loop exit
PB: predicated region body
PF: predicated region fallthrough
CT: control target
= control target key end

     0   :  { %vm278_vm0 = vcmask 523264   ;;  %s1853_s1 = inlined_call_operand.vmem [shape: bf16[64,128], index: 1, kind: input, shape index: {}]   ;;  %s1854_s0 = inlined_call_operand.vmem [shape: bf16[512,64], index: 0, kind: input, shape index: {}]   ;;  %s1855_s2 = inlined_call_operand.vmem [shape: f32[1,128], index: 2, kind: input, shape index: {}]   ;;  %s1856_s3 = inlined_call_operand.vmem [shape: bf16[512,128], index: 3, kind: output, shape index: {}]  }
   0x1   :  { %v1492_v0 = vld [vmem:[%s1853_s1] sm:$0xff]   ;;  %v1493_v1 = vld [vmem:[%s1853_s1 + $0x8] sm:$0xff]   ;;  %v1494_v2 = vld [vmem:[%s1853_s1 + $0x10] sm:$0xff]  }
   0x2   :  { %1412 = vmatprep.subr.bf16.mxu0 %v1492_v0  ;;  %1484 = vmatprep.subr.bf16.mxu1 %v1492_v0  ;;  %v1496_v3 = vld [vmem:[%s1854_s0] sm:$0xff]   ;;  %v1495_v5 = vld [vmem:[%s1853_s1 + $0x18] sm:$0xff]   ;;  %v1498_v6 = vld [vmem:[%s1854_s0 + $0x8] sm:$0xff]  }
   0x3   :  { %1413 = vmatpush3.bf16.msra.mxu0 %v1492_v0  ;;  %1488 = vmatpush3.bf16.msra.mxu1 %v1492_v0  ;;  %v1497_v4 = vld [vmem:[%s1854_s0 + $0x80] sm:$0xff]   ;;  %v1499_v7 = vld [vmem:[%s1854_s0 + $0x88] sm:$0xff]   ;;  %v1500_v8 = vld [vmem:[%s1854_s0 + $0x10] sm:$0xff]  }
   0x4   :  { %1414 = vmatprep.subr.bf16.mxu0 %v1493_v1  ;;  %1485 = vmatprep.subr.bf16.mxu1 %v1493_v1  ;;  %v1501_v9 = vld [vmem:[%s1854_s0 + $0x90] sm:$0xff]   ;;  %v1502_v10 = vld [vmem:[%s1854_s0 + $0x18] sm:$0xff]   ;;  %v1504_v12 = vld [vmem:[%s1854_s0 + $0x20] sm:$0xff]  }
   0x5   :  { %1420 = vmatprep.mubr.msk.bf16.mxu0 %vm278_vm0, %v1496_v3  ;;  %1452 = vmatprep.mubr.msk.bf16.mxu1 %vm278_vm0, %v1497_v4  ;;  %v1503_v11 = vld [vmem:[%s1854_s0 + $0x98] sm:$0xff]   ;;  %v1505_v13 = vld [vmem:[%s1854_s0 + $0xa0] sm:$0xff]   ;;  %v1506_v14 = vld [vmem:[%s1854_s0 + $0x28] sm:$0xff]  }
   0x6   :  { %v1507_v15 = vld [vmem:[%s1854_s0 + $0xa8] sm:$0xff]   ;;  %v1508_v16 = vld [vmem:[%s1854_s0 + $0x30] sm:$0xff]   ;;  %v1510_v18 = vld [vmem:[%s1854_s0 + $0x38] sm:$0xff]  }
   0x7   :  { %1415 = vmatpush3.bf16.msra.mxu0 %v1493_v1  ;;  %1489 = vmatpush3.bf16.msra.mxu1 %v1493_v1  ;;  %v1509_v17 = vld [vmem:[%s1854_s0 + $0xb0] sm:$0xff]   ;;  %v1511_v19 = vld [vmem:[%s1854_s0 + $0xb8] sm:$0xff]   ;;  %v1512_v20 = vld [vmem:[%s1854_s0 + $0x40] sm:$0xff]  }
   0x8   :  { %1416 = vmatprep.subr.bf16.mxu0 %v1494_v2  ;;  %1486 = vmatprep.subr.bf16.mxu1 %v1494_v2  ;;  %v1513_v21 = vld [vmem:[%s1854_s0 + $0xc0] sm:$0xff]   ;;  %v1514_v22 = vld [vmem:[%s1854_s0 + $0x48] sm:$0xff]   ;;  %v1516_v24 = vld [vmem:[%s1854_s0 + $0x50] sm:$0xff]  }
   0x9   :  { %v1515_v23 = vld [vmem:[%s1854_s0 + $0xc8] sm:$0xff]   ;;  %v1517_v25 = vld [vmem:[%s1854_s0 + $0xd0] sm:$0xff]   ;;  %v1518_v26 = vld [vmem:[%s1854_s0 + $0x58] sm:$0xff]  }
   0xa   :  { %v1519_v27 = vld [vmem:[%s1854_s0 + $0xd8] sm:$0xff]   ;;  %v1520_v28 = vld [vmem:[%s1854_s0 + $0x60] sm:$0xff]   ;;  %v1522_v30 = vld [vmem:[%s1854_s0 + $0x68] sm:$0xff]  }
   0xb   :  { %1417 = vmatpush3.bf16.msra.mxu0 %v1494_v2  ;;  %1490 = vmatpush3.bf16.msra.mxu1 %v1494_v2  ;;  %v1521_v29 = vld [vmem:[%s1854_s0 + $0xe0] sm:$0xff]   ;;  %v1523_v31 = vld [vmem:[%s1854_s0 + $0xe8] sm:$0xff]   ;;  %v1524_v32 = vld [vmem:[%s1854_s0 + $0x70] sm:$0xff]  }
   0xc   :  { %1418 = vmatprep.subr.bf16.mxu0 %v1495_v5  ;;  %1487 = vmatprep.subr.bf16.mxu1 %v1495_v5  ;;  %v1525_v33 = vld [vmem:[%s1854_s0 + $0xf0] sm:$0xff]   ;;  %v1526_v34 = vld [vmem:[%s1854_s0 + $0x78] sm:$0xff]   ;;  %v1691_v37 = vld [vmem:[%s1855_s2] ss:$0 sm:$0xff] }
   0xd   :  { %v1527_v35 = vld [vmem:[%s1854_s0 + $0xf8] sm:$0xff]  }
   0xf   :  { %1419 = vmatpush3.bf16.msra.mxu0 %v1495_v5  ;;  %1491 = vmatpush3.bf16.msra.mxu1 %v1495_v5 }
  0x12   :  { %1421 = vmatmul.mubr.msk.bf16.vlgmr.msra.gmra.mrb[0].mxu0 %vm278_vm0, %v1498_v6  ;;  %1453 = vmatmul.mubr.msk.bf16.vlgmr.msra.gmra.mrb[0].mxu1 %vm278_vm0, %v1499_v7 }
  0x13   :  { %1424 = vmatprep.mubr.msk.bf16.mxu0 %vm278_vm0, %v1500_v8  ;;  %1456 = vmatprep.mubr.msk.bf16.mxu1 %vm278_vm0, %v1501_v9 }
  0x1a   :  { %1425 = vmatmul.mubr.msk.bf16.gmra.mrb[4].mxu0 %vm278_vm0, %v1502_v10  ;;  %1457 = vmatmul.mubr.msk.bf16.gmra.mrb[4].mxu1 %vm278_vm0, %v1503_v11 }
  0x1b   :  { %1428 = vmatprep.mubr.msk.bf16.mxu0 %vm278_vm0, %v1504_v12  ;;  %1460 = vmatprep.mubr.msk.bf16.mxu1 %vm278_vm0, %v1505_v13 }
  0x22   :  { %1429 = vmatmul.mubr.msk.bf16.gmra.mrb[8].mxu0 %vm278_vm0, %v1506_v14  ;;  %1461 = vmatmul.mubr.msk.bf16.gmra.mrb[8].mxu1 %vm278_vm0, %v1507_v15 }
  0x23   :  { %1432 = vmatprep.mubr.msk.bf16.mxu0 %vm278_vm0, %v1508_v16  ;;  %1464 = vmatprep.mubr.msk.bf16.mxu1 %vm278_vm0, %v1509_v17 }
  0x2a   :  { %1433 = vmatmul.mubr.msk.bf16.gmra.mrb[12].mxu0 %vm278_vm0, %v1510_v18  ;;  %1465 = vmatmul.mubr.msk.bf16.gmra.mrb[12].mxu1 %vm278_vm0, %v1511_v19 }
  0x2b   :  { %1436 = vmatprep.mubr.msk.bf16.mxu0 %vm278_vm0, %v1512_v20  ;;  %1468 = vmatprep.mubr.msk.bf16.mxu1 %vm278_vm0, %v1513_v21 }
  0x32   :  { %1437 = vmatmul.mubr.msk.bf16.gmra.mrb[16].mxu0 %vm278_vm0, %v1514_v22  ;;  %1469 = vmatmul.mubr.msk.bf16.gmra.mrb[16].mxu1 %vm278_vm0, %v1515_v23 }
  0x33   :  { %1440 = vmatprep.mubr.msk.bf16.mxu0 %vm278_vm0, %v1516_v24  ;;  %1472 = vmatprep.mubr.msk.bf16.mxu1 %vm278_vm0, %v1517_v25 }
  0x3a   :  { %1441 = vmatmul.mubr.msk.bf16.gmra.mrb[20].mxu0 %vm278_vm0, %v1518_v26  ;;  %1473 = vmatmul.mubr.msk.bf16.gmra.mrb[20].mxu1 %vm278_vm0, %v1519_v27 }
  0x3b   :  { %1444 = vmatprep.mubr.msk.bf16.mxu0 %vm278_vm0, %v1520_v28  ;;  %1476 = vmatprep.mubr.msk.bf16.mxu1 %vm278_vm0, %v1521_v29 }
  0x42   :  { %1445 = vmatmul.mubr.msk.bf16.gmra.mrb[24].mxu0 %vm278_vm0, %v1522_v30  ;;  %1477 = vmatmul.mubr.msk.bf16.gmra.mrb[24].mxu1 %vm278_vm0, %v1523_v31 }
  0x43   :  { %1448 = vmatprep.mubr.msk.bf16.mxu0 %vm278_vm0, %v1524_v32  ;;  %1480 = vmatprep.mubr.msk.bf16.mxu1 %vm278_vm0, %v1525_v33 }
  0x4a   :  { %1449 = vmatmul.mubr.msk.bf16.gmra.mrb[28].mxu0 %vm278_vm0, %v1526_v34  ;;  %1481 = vmatmul.mubr.msk.bf16.gmra.mrb[28].mxu1 %vm278_vm0, %v1527_v35 }
  0xe5   :  { %v1422_v36 = vpop.f32.mrb[0].mxu0  ;;  %v1454_v38 = vpop.f32.mrb[0].mxu1 }
  0xe6   :  { %v409_v39 = vpop.f32.mrb[1].mxu0  ;;  %v537_v40 = vpop.f32.mrb[1].mxu1  ;;  %v418_v43 = vadd.f32 %v1422_v36, %v1691_v37  ;;  %v546_v44 = vadd.f32 %v1454_v38, %v1691_v37 }
  0xe7   :  { %v1423_v41 = vpop.f32.mrb[2].mxu0  ;;  %v1455_v42 = vpop.f32.mrb[2].mxu1  ;;  %v410_v49 = vadd.f32 %v1691_v37, %v409_v39  ;;  %v538_v50 = vadd.f32 %v1691_v37, %v537_v40 }
  0xe8   :  { %v421_v45 = vadd.f32 %v1423_v41, %v1691_v37  ;;  %v549_v46 = vadd.f32 %v1455_v42, %v1691_v37  ;;  %v412_v47 = vpop.f32.mrb[3].mxu0  ;;  %v540_v48 = vpop.f32.mrb[3].mxu1 }
  0xe9   :  { %v413_v51 = vadd.f32 %v1691_v37, %v412_v47  ;;  %v541_v52 = vadd.f32 %v1691_v37, %v540_v48 }
  0xea   :  { %v1193_v53 = vpack.c.bf16 %v421_v45, %v418_v43  ;;  %v1273_v54 = vpack.c.bf16 %v549_v46, %v546_v44 }
  0xeb   :  { %v1188_v55 = vpack.c.bf16 %v413_v51, %v410_v49  ;;  %v1268_v56 = vpack.c.bf16 %v541_v52, %v538_v50 }
  0xec   :  { %1345 = vst [vmem:[%s1856_s3 + $0x8] sm:$0xff] %v1193_v53   ;;  %1361 = vst [vmem:[%s1856_s3 + $0x88] sm:$0xff] %v1273_v54  }
  0xed   :  { %1189 = vst [vmem:[%s1856_s3] sm:$0xff] %v1188_v55   ;;  %1360 = vst [vmem:[%s1856_s3 + $0x80] sm:$0xff] %v1268_v56   ;;  %v1426_v57 = vpop.f32.mrb[4].mxu0  ;;  %v1458_v58 = vpop.f32.mrb[4].mxu1 }
  0xee   :  { %v425_v59 = vpop.f32.mrb[5].mxu0  ;;  %v553_v60 = vpop.f32.mrb[5].mxu1  ;;  %v434_v63 = vadd.f32 %v1426_v57, %v1691_v37  ;;  %v562_v0 = vadd.f32 %v1458_v58, %v1691_v37 }
  0xef   :  { %v1427_v61 = vpop.f32.mrb[6].mxu0  ;;  %v1459_v62 = vpop.f32.mrb[6].mxu1  ;;  %v426_v5 = vadd.f32 %v1691_v37, %v425_v59  ;;  %v554_v6 = vadd.f32 %v1691_v37, %v553_v60 }
  0xf0   :  { %v437_v1 = vadd.f32 %v1427_v61, %v1691_v37  ;;  %v565_v2 = vadd.f32 %v1459_v62, %v1691_v37  ;;  %v428_v3 = vpop.f32.mrb[7].mxu0  ;;  %v556_v4 = vpop.f32.mrb[7].mxu1 }
  0xf1   :  { %v429_v7 = vadd.f32 %v1691_v37, %v428_v3  ;;  %v557_v8 = vadd.f32 %v1691_v37, %v556_v4 }
  0xf2   :  { %v1203_v9 = vpack.c.bf16 %v437_v1, %v434_v63  ;;  %v1283_v10 = vpack.c.bf16 %v565_v2, %v562_v0 }
  0xf3   :  { %v1198_v11 = vpack.c.bf16 %v429_v7, %v426_v5  ;;  %v1278_v12 = vpack.c.bf16 %v557_v8, %v554_v6 }
  0xf4   :  { %1347 = vst [vmem:[%s1856_s3 + $0x18] sm:$0xff] %v1203_v9   ;;  %1363 = vst [vmem:[%s1856_s3 + $0x98] sm:$0xff] %v1283_v10  }
  0xf5   :  { %1346 = vst [vmem:[%s1856_s3 + $0x10] sm:$0xff] %v1198_v11   ;;  %1362 = vst [vmem:[%s1856_s3 + $0x90] sm:$0xff] %v1278_v12   ;;  %v1430_v13 = vpop.f32.mrb[8].mxu0  ;;  %v1462_v14 = vpop.f32.mrb[8].mxu1 }
  0xf6   :  { %v441_v15 = vpop.f32.mrb[9].mxu0  ;;  %v569_v16 = vpop.f32.mrb[9].mxu1  ;;  %v450_v19 = vadd.f32 %v1430_v13, %v1691_v37  ;;  %v578_v20 = vadd.f32 %v1462_v14, %v1691_v37 }
  0xf7   :  { %v1431_v17 = vpop.f32.mrb[10].mxu0  ;;  %v1463_v18 = vpop.f32.mrb[10].mxu1  ;;  %v442_v25 = vadd.f32 %v1691_v37, %v441_v15  ;;  %v570_v26 = vadd.f32 %v1691_v37, %v569_v16 }
  0xf8   :  { %v453_v21 = vadd.f32 %v1431_v17, %v1691_v37  ;;  %v581_v22 = vadd.f32 %v1463_v18, %v1691_v37  ;;  %v444_v23 = vpop.f32.mrb[11].mxu0  ;;  %v572_v24 = vpop.f32.mrb[11].mxu1 }
  0xf9   :  { %v445_v27 = vadd.f32 %v1691_v37, %v444_v23  ;;  %v573_v28 = vadd.f32 %v1691_v37, %v572_v24 }
  0xfa   :  { %v1213_v29 = vpack.c.bf16 %v453_v21, %v450_v19  ;;  %v1293_v30 = vpack.c.bf16 %v581_v22, %v578_v20 }
  0xfb   :  { %v1208_v31 = vpack.c.bf16 %v445_v27, %v442_v25  ;;  %v1288_v32 = vpack.c.bf16 %v573_v28, %v570_v26 }
  0xfc   :  { %1349 = vst [vmem:[%s1856_s3 + $0x28] sm:$0xff] %v1213_v29   ;;  %1365 = vst [vmem:[%s1856_s3 + $0xa8] sm:$0xff] %v1293_v30  }
  0xfd   :  { %1348 = vst [vmem:[%s1856_s3 + $0x20] sm:$0xff] %v1208_v31   ;;  %1364 = vst [vmem:[%s1856_s3 + $0xa0] sm:$0xff] %v1288_v32   ;;  %v1434_v33 = vpop.f32.mrb[12].mxu0  ;;  %v1466_v34 = vpop.f32.mrb[12].mxu1 }
  0xfe   :  { %v457_v35 = vpop.f32.mrb[13].mxu0  ;;  %v585_v36 = vpop.f32.mrb[13].mxu1  ;;  %v466_v40 = vadd.f32 %v1434_v33, %v1691_v37  ;;  %v594_v41 = vadd.f32 %v1466_v34, %v1691_v37 }
  0xff   :  { %v1435_v38 = vpop.f32.mrb[14].mxu0  ;;  %v1467_v39 = vpop.f32.mrb[14].mxu1  ;;  %v458_v46 = vadd.f32 %v1691_v37, %v457_v35  ;;  %v586_v47 = vadd.f32 %v1691_v37, %v585_v36 }
 0x100   :  { %v469_v42 = vadd.f32 %v1435_v38, %v1691_v37  ;;  %v597_v43 = vadd.f32 %v1467_v39, %v1691_v37  ;;  %v460_v44 = vpop.f32.mrb[15].mxu0  ;;  %v588_v45 = vpop.f32.mrb[15].mxu1 }
 0x101   :  { %v461_v48 = vadd.f32 %v1691_v37, %v460_v44  ;;  %v589_v49 = vadd.f32 %v1691_v37, %v588_v45 }
 0x102   :  { %v1223_v50 = vpack.c.bf16 %v469_v42, %v466_v40  ;;  %v1303_v51 = vpack.c.bf16 %v597_v43, %v594_v41 }
 0x103   :  { %v1218_v52 = vpack.c.bf16 %v461_v48, %v458_v46  ;;  %v1298_v53 = vpack.c.bf16 %v589_v49, %v586_v47 }
 0x104   :  { %1351 = vst [vmem:[%s1856_s3 + $0x38] sm:$0xff] %v1223_v50   ;;  %1367 = vst [vmem:[%s1856_s3 + $0xb8] sm:$0xff] %v1303_v51  }
 0x105   :  { %1350 = vst [vmem:[%s1856_s3 + $0x30] sm:$0xff] %v1218_v52   ;;  %1366 = vst [vmem:[%s1856_s3 + $0xb0] sm:$0xff] %v1298_v53   ;;  %v1438_v54 = vpop.f32.mrb[16].mxu0  ;;  %v1470_v55 = vpop.f32.mrb[16].mxu1 }
 0x106   :  { %v473_v56 = vpop.f32.mrb[17].mxu0  ;;  %v601_v57 = vpop.f32.mrb[17].mxu1  ;;  %v482_v60 = vadd.f32 %v1438_v54, %v1691_v37  ;;  %v610_v61 = vadd.f32 %v1470_v55, %v1691_v37 }
 0x107   :  { %v1439_v58 = vpop.f32.mrb[18].mxu0  ;;  %v1471_v59 = vpop.f32.mrb[18].mxu1  ;;  %v474_v2 = vadd.f32 %v1691_v37, %v473_v56  ;;  %v602_v3 = vadd.f32 %v1691_v37, %v601_v57 }
 0x108   :  { %v485_v62 = vadd.f32 %v1439_v58, %v1691_v37  ;;  %v613_v63 = vadd.f32 %v1471_v59, %v1691_v37  ;;  %v476_v0 = vpop.f32.mrb[19].mxu0  ;;  %v604_v1 = vpop.f32.mrb[19].mxu1 }
 0x109   :  { %v477_v4 = vadd.f32 %v1691_v37, %v476_v0  ;;  %v605_v5 = vadd.f32 %v1691_v37, %v604_v1 }
 0x10a   :  { %v1233_v6 = vpack.c.bf16 %v485_v62, %v482_v60  ;;  %v1313_v7 = vpack.c.bf16 %v613_v63, %v610_v61 }
 0x10b   :  { %v1228_v8 = vpack.c.bf16 %v477_v4, %v474_v2  ;;  %v1308_v9 = vpack.c.bf16 %v605_v5, %v602_v3 }
 0x10c   :  { %1353 = vst [vmem:[%s1856_s3 + $0x48] sm:$0xff] %v1233_v6   ;;  %1369 = vst [vmem:[%s1856_s3 + $0xc8] sm:$0xff] %v1313_v7  }
 0x10d   :  { %1352 = vst [vmem:[%s1856_s3 + $0x40] sm:$0xff] %v1228_v8   ;;  %1368 = vst [vmem:[%s1856_s3 + $0xc0] sm:$0xff] %v1308_v9   ;;  %v1442_v10 = vpop.f32.mrb[20].mxu0  ;;  %v1474_v11 = vpop.f32.mrb[20].mxu1 }
 0x10e   :  { %v489_v12 = vpop.f32.mrb[21].mxu0  ;;  %v617_v13 = vpop.f32.mrb[21].mxu1  ;;  %v498_v16 = vadd.f32 %v1442_v10, %v1691_v37  ;;  %v626_v17 = vadd.f32 %v1474_v11, %v1691_v37 }
 0x10f   :  { %v1443_v14 = vpop.f32.mrb[22].mxu0  ;;  %v1475_v15 = vpop.f32.mrb[22].mxu1  ;;  %v490_v22 = vadd.f32 %v1691_v37, %v489_v12  ;;  %v618_v23 = vadd.f32 %v1691_v37, %v617_v13 }
 0x110   :  { %v501_v18 = vadd.f32 %v1443_v14, %v1691_v37  ;;  %v629_v19 = vadd.f32 %v1475_v15, %v1691_v37  ;;  %v492_v20 = vpop.f32.mrb[23].mxu0  ;;  %v620_v21 = vpop.f32.mrb[23].mxu1 }
 0x111   :  { %v493_v24 = vadd.f32 %v1691_v37, %v492_v20  ;;  %v621_v25 = vadd.f32 %v1691_v37, %v620_v21 }
 0x112   :  { %v1243_v26 = vpack.c.bf16 %v501_v18, %v498_v16  ;;  %v1323_v27 = vpack.c.bf16 %v629_v19, %v626_v17 }
 0x113   :  { %v1238_v28 = vpack.c.bf16 %v493_v24, %v490_v22  ;;  %v1318_v29 = vpack.c.bf16 %v621_v25, %v618_v23 }
 0x114   :  { %1355 = vst [vmem:[%s1856_s3 + $0x58] sm:$0xff] %v1243_v26   ;;  %1371 = vst [vmem:[%s1856_s3 + $0xd8] sm:$0xff] %v1323_v27  }
 0x115   :  { %1354 = vst [vmem:[%s1856_s3 + $0x50] sm:$0xff] %v1238_v28   ;;  %1370 = vst [vmem:[%s1856_s3 + $0xd0] sm:$0xff] %v1318_v29   ;;  %v1446_v30 = vpop.f32.mrb[24].mxu0  ;;  %v1478_v31 = vpop.f32.mrb[24].mxu1 }
 0x116   :  { %v505_v32 = vpop.f32.mrb[25].mxu0  ;;  %v633_v33 = vpop.f32.mrb[25].mxu1  ;;  %v514_v36 = vadd.f32 %v1446_v30, %v1691_v37  ;;  %v642_v38 = vadd.f32 %v1478_v31, %v1691_v37 }
 0x117   :  { %v1447_v34 = vpop.f32.mrb[26].mxu0  ;;  %v1479_v35 = vpop.f32.mrb[26].mxu1  ;;  %v506_v43 = vadd.f32 %v1691_v37, %v505_v32  ;;  %v634_v44 = vadd.f32 %v1691_v37, %v633_v33 }
 0x118   :  { %v517_v39 = vadd.f32 %v1447_v34, %v1691_v37  ;;  %v645_v40 = vadd.f32 %v1479_v35, %v1691_v37  ;;  %v508_v41 = vpop.f32.mrb[27].mxu0  ;;  %v636_v42 = vpop.f32.mrb[27].mxu1 }
 0x119   :  { %v509_v45 = vadd.f32 %v1691_v37, %v508_v41  ;;  %v637_v46 = vadd.f32 %v1691_v37, %v636_v42 }
 0x11a   :  { %v1253_v47 = vpack.c.bf16 %v517_v39, %v514_v36  ;;  %v1333_v48 = vpack.c.bf16 %v645_v40, %v642_v38 }
 0x11b   :  { %v1248_v49 = vpack.c.bf16 %v509_v45, %v506_v43  ;;  %v1328_v50 = vpack.c.bf16 %v637_v46, %v634_v44 }
 0x11c   :  { %1357 = vst [vmem:[%s1856_s3 + $0x68] sm:$0xff] %v1253_v47   ;;  %1373 = vst [vmem:[%s1856_s3 + $0xe8] sm:$0xff] %v1333_v48  }
 0x11d   :  { %1356 = vst [vmem:[%s1856_s3 + $0x60] sm:$0xff] %v1248_v49   ;;  %1372 = vst [vmem:[%s1856_s3 + $0xe0] sm:$0xff] %v1328_v50   ;;  %v1450_v51 = vpop.f32.mrb[28].mxu0  ;;  %v1482_v52 = vpop.f32.mrb[28].mxu1 }
 0x11e   :  { %v521_v53 = vpop.f32.mrb[29].mxu0  ;;  %v649_v54 = vpop.f32.mrb[29].mxu1  ;;  %v530_v57 = vadd.f32 %v1450_v51, %v1691_v37  ;;  %v658_v58 = vadd.f32 %v1482_v52, %v1691_v37 }
 0x11f   :  { %v1451_v55 = vpop.f32.mrb[30].mxu0  ;;  %v1483_v56 = vpop.f32.mrb[30].mxu1  ;;  %v522_v63 = vadd.f32 %v1691_v37, %v521_v53  ;;  %v650_v0 = vadd.f32 %v1691_v37, %v649_v54 }
 0x120   :  { %v533_v59 = vadd.f32 %v1451_v55, %v1691_v37  ;;  %v661_v60 = vadd.f32 %v1483_v56, %v1691_v37  ;;  %v524_v61 = vpop.f32.mrb[31].mxu0  ;;  %v652_v62 = vpop.f32.mrb[31].mxu1 }
 0x121   :  { %v525_v1 = vadd.f32 %v1691_v37, %v524_v61  ;;  %v653_v2 = vadd.f32 %v1691_v37, %v652_v62 }
 0x122   :  { %v1263_v3 = vpack.c.bf16 %v533_v59, %v530_v57  ;;  %v1343_v4 = vpack.c.bf16 %v661_v60, %v658_v58 }
 0x123   :  { %v1258_v5 = vpack.c.bf16 %v525_v1, %v522_v63  ;;  %v1338_v6 = vpack.c.bf16 %v653_v2, %v650_v0 }
 0x124   :  { %1359 = vst [vmem:[%s1856_s3 + $0x78] sm:$0xff] %v1263_v3   ;;  %1375 = vst [vmem:[%s1856_s3 + $0xf8] sm:$0xff] %v1343_v4  }
 0x125   :  { %1358 = vst [vmem:[%s1856_s3 + $0x70] sm:$0xff] %v1258_v5   ;;  %1374 = vst [vmem:[%s1856_s3 + $0xf0] sm:$0xff] %v1338_v6  }

// kernel: hybridnet_forward.18
= control target key start
LH: loop header
LB: loop body
LE: loop exit
PB: predicated region body
PF: predicated region fallthrough
CT: control target
= control target key end

     0   :  { %s5802_s12 = smov 0   ;;  %s6706_s0 = inlined_call_operand.vmem [shape: bf16[2,326,128], index: 0, kind: input, shape index: {}]   ;;  %s6707_s1 = inlined_call_operand.vmem [shape: bf16[9,128,128], index: 1, kind: input, shape index: {}]   ;;  %s6708_s2 = inlined_call_operand.vmem [shape: f32[1,128], index: 2, kind: input, shape index: {}]   ;;  %s6709_s3 = inlined_call_operand.vmem [shape: bf16[2,288,128], index: 3, kind: output, shape index: {}]  }
   0x1 LB: > { %s4130_s13 = sadd.s32 4294967295, %s5780_s12   ;;  %p4134_p0 = scmp.ge.s32.totalorder %s5780_s12, 1  ;;  %s5780_s12 = sphi %s5802_s12, %s13_s12  }
   0x2   : > { %p137_p1 = scmp.lt.s32.totalorder %s5780_s12, 3 }
   0x4   : > { %p138_p2 = pnand %p4134_p0, %p137_p1 }
   0x5   : > { %v5597_v0 = vld [vmem:[%s6707_s1 + $0x40] sm:$0xff] (!%p138_p2)   ;;  %p161_p3 = scmp.lt.s32.totalorder (!%p138_p2), %s4130_s13, 1  ;;  %v5599_v2 = vld [vmem:[%s6707_s1 + $0x48] sm:$0xff] (!%p138_p2)   ;;  %v5601_v4 = vld [vmem:[%s6707_s1 + $0x50] sm:$0xff] (!%p138_p2)   ;;  %vm335_vm0 = vsmask.f32 (!%p138_p2), 7424 }
   0x6   : > { %141 = sbr.rel (%p138_p2) target bundleno = 580 (0x244), region = 32  ;;  %v5598_v1 = vld [vmem:[%s6707_s1 + $0x100] sm:$0xff] (!%p138_p2)   ;;  %4815 = vmatprep.subr.bf16.mxu1 (!%p138_p2), %v5597_v0  ;;  %v5600_v3 = vld [vmem:[%s6707_s1 + $0x108] sm:$0xff] (!%p138_p2)   ;;  %v5602_v5 = vld [vmem:[%s6707_s1 + $0x110] sm:$0xff] (!%p138_p2)   ;;  %vm1792_vm1 = vsmask.f32 (!%p138_p2), 6400 }
   0x7   : > { %5023 = vmatprep.subr.bf16.mxu0 (!%p138_p2), %v5598_v1  ;;  %4816 = vmatpush3.bf16.msra.mxu1 (!%p138_p2), %v5597_v0  ;;  %v5603_v6 = vld [vmem:[%s6707_s1 + $0x58] sm:$0xff] (!%p138_p2)   ;;  %v5605_v8 = vld [vmem:[%s6707_s1 + $0x60] sm:$0xff] (!%p138_p2)   ;;  %v5607_v10 = vld [vmem:[%s6707_s1 + $0x68] sm:$0xff] (!%p138_p2)   ;;  %vm2263_vm2 = vcmask (!%p138_p2), 1045504   ;;  %vm991_vm3 = vcmask (!%p138_p2), 1046528   ;;  %vm3535_vm5 = vcmask (!%p138_p2), 1044480  }
   0x8   : > { %5024 = vmatpush3.bf16.msra.mxu0 (!%p138_p2), %v5598_v1  ;;  %4817 = vmatprep.subr.bf16.mxu1 (!%p138_p2), %v5599_v2  ;;  %v5604_v7 = vld [vmem:[%s6707_s1 + $0x118] sm:$0xff] (!%p138_p2)   ;;  %v5606_v9 = vld [vmem:[%s6707_s1 + $0x120] sm:$0xff] (!%p138_p2)   ;;  %v5608_v11 = vld [vmem:[%s6707_s1 + $0x128] sm:$0xff] (!%p138_p2)   ;;  %vm3064_vm4 = vsmask.f32 (!%p138_p2), 5376 }
   0x9   : > { %5025 = vmatprep.subr.bf16.mxu0 (!%p138_p2), %v5600_v3  ;;  %v5609_v17 = vld [vmem:[%s6707_s1 + $0x70] sm:$0xff] (!%p138_p2)   ;;  %v5611_v32 = vld [vmem:[%s6707_s1 + $0x78] sm:$0xff] (!%p138_p2)   ;;  %v5618_v48 = vld [vmem:[%s6707_s1] sm:$0xff] (!%p138_p2)  }
   0xa   : > { %v5610_v20 = vld [vmem:[%s6707_s1 + $0x130] sm:$0xff] (!%p138_p2)   ;;  %v5612_v36 = vld [vmem:[%s6707_s1 + $0x138] sm:$0xff] (!%p138_p2)   ;;  %v5620_v54 = vld [vmem:[%s6707_s1 + $0x140] sm:$0xff] (!%p138_p2)  }
   0xb   : > { %4818 = vmatpush3.bf16.msra.mxu1 (!%p138_p2), %v5599_v2 }
   0xc   : > { %5026 = vmatpush3.bf16.msra.mxu0 (!%p138_p2), %v5600_v3  ;;  %4819 = vmatprep.subr.bf16.mxu1 (!%p138_p2), %v5601_v4 }
   0xd   : > { %s6711_s13 = smov (!%p161_p3, %s4130_s13), 1  ;;  %5027 = vmatprep.subr.bf16.mxu0 %v5602_v5 }
   0xe   : > { %s5587_s30 = smul.u32 164, %s6711_s13 }
   0xf   : > { %4820 = vmatpush3.bf16.msra.mxu1 %v5601_v4  ;;  %s5588_s7 = smul.u32 144, %s6711_s13 }
  0x10   : > { %5028 = vmatpush3.bf16.msra.mxu0 %v5602_v5  ;;  %4821 = vmatprep.subr.bf16.mxu1 %v5603_v6  ;;  %s5846_s10 = scalar_lea.vmem %s6706_s0, %s5587_s30 }
  0x11   : > { %5029 = vmatprep.subr.bf16.mxu0 %v5604_v7  ;;  %v172_v12 = vld [vmem:[%s5846_s10] sm:$0xf]  ;;  %v173_v13 = vld [vmem:[%s5846_s10 + $0x4] sm:$0xf]  ;;  %v5859_v15 = vld [vmem:[%s5846_s10 + $0x8] sm:$0xff]   ;;  %s6650_s11 = scalar_lea.vmem %s6709_s3, %s5588_s7 }
  0x12   : > { %v5856_v14 = vcombine.low %v172_v12, %v173_v13  ;;  %v5862_v16 = vld [vmem:[%s5846_s10 + $0x10] sm:$0xff]   ;;  %v1308_v18 = vld [vmem:[%s5846_s10 + $0x8] sm:$0xe]  ;;  %v5869_v19 = vld [vmem:[%s5846_s10 + $0xc] sm:$0xf]  ;;  %v344_v23 = vshll.u32 %v5859_v15, 16 }
  0x13   : > { %4822 = vmatpush3.bf16.msra.mxu1 %v5603_v6  ;;  %v5878_v24 = vcombine.low %v1308_v18, %v5869_v19  ;;  %v5881_v25 = vld [vmem:[%s5846_s10 + $0x10] sm:$0xff]   ;;  %v1802_v26 = vshrl.u32 %v5862_v16, 16  ;;  %v1805_v27 = vshll.u32 %v5862_v16, 16  ;;  %v348_v40 = vshrl.u32 %v5859_v15, 16  ;;  %v5896_v41 = vld [vmem:[%s5846_s10 + $0x18] sm:$0xff]   ;;  %v5913_v57 = vld [vmem:[%s5846_s10 + $0x20] sm:$0xff]  }
  0x14   : > { %5030 = vmatpush3.bf16.msra.mxu0 %v5604_v7  ;;  %4823 = vmatprep.subr.bf16.mxu1 %v5605_v8  ;;  %v337_v21 = vshrl.u32 %v5856_v14, 16  ;;  %v339_v22 = vshll.u32 %v5856_v14, 16  ;;  %v346_v29 = vrot.slane %v344_v23, 1  ;;  %v352_v35 = vshll.u32 %v5881_v25, 16  ;;  %v5910_v55 = vld [vmem:[%s5846_s10 + $0x18] sm:$0xff]   ;;  %v5917_v60 = vld [vmem:[%s5846_s10 + $0x20] sm:$0xff]  }
  0x15   : > { %5031 = vmatprep.subr.bf16.mxu0 %v5606_v9  ;;  %v1794_v30 = vshrl.u32 %v5878_v24, 16  ;;  %v1797_v31 = vshll.u32 %v5878_v24, 16  ;;  %v1804_v33 = vrot.slane %v1802_v26, 1  ;;  %v1807_v34 = vrot.slane %v1805_v27, 2  ;;  %v5921_v62 = vld [vmem:[%s5846_s10 + $0x28] sm:$0xff]  }
  0x16   : > { %v341_v28 = vrot.slane %v339_v22, 1  ;;  %v1811_v45 = vshrl.u32 %v5896_v41, 16  ;;  %v1814_v46 = vshll.u32 %v5896_v41, 16  ;;  %v354_v47 = vrot.slane %v352_v35, 1  ;;  %v5621_v7 = vld [vmem:[%s6707_s1 + $0x148] sm:$0xff]  }
  0x17   : > { %4824 = vmatpush3.bf16.msra.mxu1 %v5605_v8  ;;  %v1796_v38 = vrot.slane %v1794_v30, 1  ;;  %v1799_v39 = vrot.slane %v1797_v31, 2  ;;  %v1808_v42 = vor.u32 %v1807_v34, %v1804_v33  ;;  %v356_v49 = vshrl.u32 %v5881_v25, 16  ;;  %v5941_v22 = vld [vmem:[%s5846_s10 + $0x28] sm:$0xff]   ;;  %v5950_v31 = vld [vmem:[%s5846_s10 + $0x30] sm:$0xff]   ;;  %v5954_v33 = vld [vmem:[%s5846_s10 + $0x38] sm:$0xff]  }
  0x18   : > { %5032 = vmatpush3.bf16.msra.mxu0 %v5606_v9  ;;  %4825 = vmatprep.subr.bf16.mxu1 %v5607_v10  ;;  %v342_v37 = vor.u32 %v341_v28, %v337_v21  ;;  %v350_v51 = vor.u32 %v348_v40, %v346_v29  ;;  %v1813_v52 = vrot.slane %v1811_v45, 1  ;;  %v1816_v53 = vrot.slane %v1814_v46, 2  ;;  %v5626_v21 = vld [vmem:[%s6707_s1 + $0x150] sm:$0xff]  }
  0x19   : > { %5033 = vmatprep.subr.bf16.mxu0 %v5608_v11  ;;  %v1800_v44 = vor.u32 %v1799_v39, %v1796_v38  ;;  %v358_v58 = vor.u32 %v356_v49, %v354_v47  ;;  %v360_v59 = vshll.u32 %v5910_v55, 16  ;;  %v364_v61 = vshrl.u32 %v5910_v55, 16  ;;  %v5946_v28 = vld [vmem:[%s5846_s10 + $0x30] sm:$0xff]  }
  0x1a   : > { %v347_v43 = vsel %vm335_vm0, %v342_v37, %v346_v29  ;;  %v1817_v56 = vor.u32 %v1816_v53, %v1813_v52  ;;  %v355_v63 = vsel %vm335_vm0, %v350_v51, %v354_v47  ;;  %v1820_v1 = vshrl.u32 %v5913_v57, 16  ;;  %v5634_v46 = vld [vmem:[%s6707_s1 + $0x10] sm:$0xff]   ;;  %v5633_v53 = vld [vmem:[%s6707_s1 + $0x160] sm:$0xff]  }
  0x1b   : > { %4826 = vmatpush3.bf16.msra.mxu1 %v5607_v10  ;;  %4831 = vmatprep.mubr.bf16.mxu1 %v347_v43  ;;  %v1809_v50 = vsel %vm1792_vm1, %v1800_v44, %v1808_v42  ;;  %v1823_v2 = vshll.u32 %v5913_v57, 16  ;;  %v362_v3 = vrot.slane %v360_v59, 1  ;;  %v368_v4 = vshll.u32 %v5917_v60, 16  ;;  %v5627_v10 = vld [vmem:[%s6707_s1 + $0x8] sm:$0xff]   ;;  %v5628_v43 = vld [vmem:[%s6707_s1 + $0x158] sm:$0xff]  }
  0x1c   : > { %5034 = vmatpush3.bf16.msra.mxu0 %v5608_v11  ;;  %4827 = vmatprep.subr.bf16.mxu1 %v5609_v17  ;;  %v1818_v0 = vsel %vm1792_vm1, %v1808_v42, %v1817_v56  ;;  %v1829_v5 = vshrl.u32 %v5921_v62, 16  ;;  %v1832_v6 = vshll.u32 %v5921_v62, 16  ;;  %v1822_v8 = vrot.slane %v1820_v1, 1  ;;  %v5983_v1 = vld [vmem:[%s5846_s10 + $0x40] sm:$0xff]  }
  0x1d   : > { %5035 = vmatprep.subr.bf16.mxu0 %v5610_v20  ;;  %5039 = vmatprep.mubr.bf16.mxu0 %v1809_v50  ;;  %v1825_v9 = vrot.slane %v1823_v2, 2  ;;  %v363_v11 = vsel %vm335_vm0, %v358_v58, %v362_v3  ;;  %v370_v18 = vrot.slane %v368_v4, 1  ;;  %v372_v23 = vshrl.u32 %v5917_v60, 16 }
  0x1e   : > { %v1831_v12 = vrot.slane %v1829_v5, 1  ;;  %v376_v30 = vshll.u32 %v5941_v22, 16  ;;  %v1841_v37 = vshll.u32 %v5946_v28, 16  ;;  %v384_v39 = vshll.u32 %v5950_v31, 16 }
  0x1f   : > { %4828 = vmatpush3.bf16.msra.mxu1 %v5609_v17  ;;  %v1826_v13 = vor.u32 %v1825_v9, %v1822_v8  ;;  %v366_v17 = vor.u32 %v364_v61, %v362_v3  ;;  %v374_v29 = vor.u32 %v372_v23, %v370_v18  ;;  %v1847_v40 = vshrl.u32 %v5954_v33, 16  ;;  %v5979_v61 = vld [vmem:[%s5846_s10 + $0x40] sm:$0xff]   ;;  %v5635_v3 = vld [vmem:[%s6707_s1 + $0x168] sm:$0xff]  }
  0x20   : > { %5036 = vmatpush3.bf16.msra.mxu0 %v5610_v20  ;;  %4829 = vmatprep.subr.bf16.mxu1 %v5611_v32  ;;  %v1834_v20 = vrot.slane %v1832_v6, 2  ;;  %v378_v38 = vrot.slane %v376_v30, 1  ;;  %v1850_v42 = vshll.u32 %v5954_v33, 16  ;;  %v1843_v45 = vrot.slane %v1841_v37, 2  ;;  %v5641_v30 = vld [vmem:[%s6707_s1 + $0x18] sm:$0xff]  }
  0x21   : > { %5037 = vmatprep.subr.bf16.mxu0 %v5612_v36  ;;  %v1827_v26 = vsel %vm1792_vm1, %v1817_v56, %v1826_v13  ;;  %v371_v34 = vsel %vm335_vm0, %v366_v17, %v370_v18  ;;  %v386_v51 = vrot.slane %v384_v39, 1  ;;  %v388_v56 = vshrl.u32 %v5950_v31, 16  ;;  %v2242_v37 = vld [vmem:[%s5846_s10 + $0x8] sm:$0xc] }
  0x22   : > { %v1835_v27 = vor.u32 %v1834_v20, %v1831_v12  ;;  %v379_v47 = vsel %vm335_vm0, %v374_v29, %v378_v38  ;;  %v1852_v52 = vrot.slane %v1850_v42, 2  ;;  %v1856_v4 = vshrl.u32 %v5979_v61, 16  ;;  %v5640_v29 = vld [vmem:[%s6707_s1 + $0x170] sm:$0xff]  }
  0x23   : > { %4830 = vmatpush3.bf16.msra.mxu1 %v5611_v32  ;;  %v380_v32 = vshrl.u32 %v5941_v22, 16  ;;  %v1859_v5 = vshll.u32 %v5979_v61, 16  ;;  %v2265_v39 = vrot.slane %v5862_v16, 2 }
  0x24   : > { %5038 = vmatpush3.bf16.msra.mxu0 %v5612_v36  ;;  %4867 = vmatprep.subr.bf16.mxu1 %v5618_v48  ;;  %v1836_v35 = vsel %vm1792_vm1, %v1826_v13, %v1835_v27  ;;  %v1838_v36 = vshrl.u32 %v5946_v28, 16 }
  0x25   : > { %5075 = vmatprep.subr.bf16.mxu0 %v5620_v54  ;;  %v382_v50 = vor.u32 %v380_v32, %v378_v38  ;;  %v1861_v12 = vrot.slane %v1859_v5, 2  ;;  %v4297_v38 = vcombine.low %v2242_v37, %v5869_v19  ;;  %v2269_v5 = vrot.slane %v5913_v57, 2  ;;  %v5657_v37 = vld [vmem:[%s6707_s1 + $0x190] sm:$0xff]  }
  0x26   : > { %4832 = vmatmul.mubr.bf16.vlgmr.msra.gmra.mrb[0].mxu1 %v355_v63  ;;  %v1840_v44 = vrot.slane %v1838_v36, 1  ;;  %v390_v63 = vor.u32 %v388_v56, %v386_v51  ;;  %v404_v36 = vshrl.u32 %v5983_v1, 16 }
  0x27   : > { %5040 = vmatmul.mubr.bf16.vlgmr.msra.gmra.mrb[0].mxu0 %v1818_v0  ;;  %4868 = vmatpush3.bf16.msra.mxu1 %v5618_v48  ;;  %v1849_v48 = vrot.slane %v1847_v40, 1  ;;  %v387_v2 = vsel %vm335_vm0, %v382_v50, %v386_v51  ;;  %v6017_v40 = vld [vmem:[%s5846_s10 + $0x50] sm:$0xff]   ;;  %v2264_v19 = vrot.slane %v4297_v38, 2 }
  0x28   : > { %5076 = vmatpush3.bf16.msra.mxu0 %v5620_v54  ;;  %4835 = vmatprep.mubr.bf16.mxu1 %v363_v11  ;;  %v1844_v49 = vor.u32 %v1843_v45, %v1840_v44  ;;  %v5974_v54 = vld [vmem:[%s5846_s10 + $0x38] sm:$0xff]   ;;  %v1858_v11 = vrot.slane %v1856_v4, 1  ;;  %v420_v51 = vshrl.u32 %v6017_v40, 16 }
  0x29   : > { %5077 = vmatprep.subr.bf16.mxu0 %v5621_v7  ;;  %4869 = vmatprep.subr.bf16.mxu1 %v5627_v10  ;;  %v1853_v59 = vor.u32 %v1852_v52, %v1849_v48  ;;  %v392_v0 = vshll.u32 %v5974_v54, 16  ;;  %v396_v6 = vshrl.u32 %v5974_v54, 16  ;;  %v416_v48 = vshll.u32 %v6017_v40, 16 }
  0x2a   : > { %5043 = vmatprep.mubr.bf16.mxu0 %v1827_v26  ;;  %v1845_v58 = vsel %vm1792_vm1, %v1835_v27, %v1844_v49 }
  0x2b   : > { %4870 = vmatpush3.bf16.msra.mxu1 %v5627_v10  ;;  %v1854_v8 = vsel %vm1792_vm1, %v1844_v49, %v1853_v59  ;;  %v394_v9 = vrot.slane %v392_v0, 1  ;;  %v400_v10 = vshll.u32 %v5983_v1, 16  ;;  %v5642_v49 = vld [vmem:[%s6707_s1 + $0x178] sm:$0xff]   ;;  %v418_v56 = vrot.slane %v416_v48, 1 }
  0x2c   : > { %5078 = vmatpush3.bf16.msra.mxu0 %v5621_v7  ;;  %4871 = vmatprep.subr.bf16.mxu1 %v5634_v46  ;;  %v5993_v7 = vld [vmem:[%s5846_s10 + $0x48] sm:$0xff]   ;;  %v2267_v0 = vrot.slane %v5896_v41, 2  ;;  %v5663_v48 = vld [vmem:[%s6707_s1 + $0x198] sm:$0xff]  }
  0x2d   : > { %5079 = vmatprep.subr.bf16.mxu0 %v5626_v21  ;;  %v1865_v13 = vshrl.u32 %v5993_v7, 16  ;;  %v1868_v17 = vshll.u32 %v5993_v7, 16  ;;  %v395_v18 = vsel %vm335_vm0, %v390_v63, %v394_v9  ;;  %v402_v20 = vrot.slane %v400_v10, 1 }
  0x2e   : > { %4836 = vmatmul.mubr.bf16.gmra.mrb[4].mxu1 %v371_v34  ;;  %v398_v23 = vor.u32 %v396_v6, %v394_v9  ;;  %v422_v4 = vor.u32 %v420_v51, %v418_v56  ;;  %v5649_v6 = vld [vmem:[%s6707_s1 + $0x180] sm:$0xff]   ;;  %v2268_v57 = vsel %vm2263_vm2, %v2265_v39, %v2267_v0 }
  0x2f   : > { %5044 = vmatmul.mubr.bf16.gmra.mrb[4].mxu0 %v1836_v35  ;;  %4839 = vmatprep.mubr.bf16.mxu1 %v379_v47  ;;  %v1867_v26 = vrot.slane %v1865_v13, 1  ;;  %v1870_v27 = vrot.slane %v1868_v17, 2  ;;  %v6010_v35 = vld [vmem:[%s5846_s10 + $0x48] sm:$0xff]   ;;  %v6026_v47 = vld [vmem:[%s5846_s10 + $0x58] sm:$0xff]   ;;  %v5654_v17 = vld [vmem:[%s6707_s1 + $0x30] sm:$0xff]  }
  0x30   : > { %5080 = vmatpush3.bf16.msra.mxu0 %v5626_v21  ;;  %4872 = vmatpush3.bf16.msra.mxu1 %v5634_v46  ;;  %v1862_v21 = vor.u32 %v1861_v12, %v1858_v11  ;;  %v403_v42 = vsel %vm335_vm0, %v398_v23, %v402_v20  ;;  %v408_v44 = vshll.u32 %v6010_v35, 16  ;;  %v412_v45 = vshrl.u32 %v6010_v35, 16  ;;  %v5646_v46 = vld [vmem:[%s6707_s1 + $0x20] sm:$0xff]   ;;  %v6067_v23 = vld [vmem:[%s5846_s10 + $0x70] sm:$0xff]  }
  0x31   : > { %5081 = vmatprep.subr.bf16.mxu0 %v5628_v43  ;;  %5047 = vmatprep.mubr.bf16.mxu0 %v1845_v58  ;;  %v6007_v34 = vor.u32 %v1870_v27, %v1867_v26  ;;  %v424_v52 = vshll.u32 %v6026_v47, 16  ;;  %v6038_v58 = vld [vmem:[%s5846_s10 + $0x60] sm:$0xff]   ;;  %v428_v10 = vshrl.u32 %v6026_v47, 16  ;;  %v2271_v27 = vrot.slane %v5921_v62, 2 }
  0x32   : > { %v1863_v32 = vsel %vm1792_vm1, %v1853_v59, %v1862_v21  ;;  %4873 = vmatprep.subr.bf16.mxu1 %v5641_v30  ;;  %v410_v50 = vrot.slane %v408_v44, 1  ;;  %v432_v41 = vshll.u32 %v6038_v58, 16  ;;  %v436_v11 = vshrl.u32 %v6038_v58, 16 }
  0x33   : > { %v1872_v16 = vsel %vm1792_vm1, %v1862_v21, %v6007_v34  ;;  %v448_v38 = vshll.u32 %v6067_v23, 16  ;;  %v452_v44 = vshrl.u32 %v6067_v23, 16 }
  0x34   : > { %5082 = vmatpush3.bf16.msra.mxu0 %v5628_v43  ;;  %4874 = vmatpush3.bf16.msra.mxu1 %v5641_v30  ;;  %v406_v43 = vor.u32 %v404_v36, %v402_v20  ;;  %v414_v63 = vor.u32 %v412_v45, %v410_v50  ;;  %v5653_v20 = vld [vmem:[%s6707_s1 + $0x188] sm:$0xff]   ;;  %v434_v21 = vrot.slane %v432_v41, 1  ;;  %v2273_v36 = vrot.slane %v5946_v28, 2  ;;  %v5660_v41 = vld [vmem:[%s5846_s10 + $0x50] sm:$0xff]  }
  0x35   : > { %5083 = vmatprep.subr.bf16.mxu0 %v5633_v53  ;;  %4875 = vmatprep.subr.bf16.mxu1 %v5646_v46 }
  0x36   : > { %4840 = vmatmul.mubr.bf16.gmra.mrb[8].mxu1 %v387_v2  ;;  %v411_v59 = vsel %vm335_vm0, %v406_v43, %v410_v50  ;;  %v426_v2 = vrot.slane %v424_v52, 1  ;;  %v419_v9 = vsel %vm335_vm0, %v414_v63, %v418_v56  ;;  %v2272_v43 = vsel %vm2263_vm2, %v2269_v5, %v2271_v27 }
  0x37   : > { %5048 = vmatmul.mubr.bf16.gmra.mrb[8].mxu0 %v1854_v8  ;;  %4843 = vmatprep.mubr.bf16.mxu1 %v395_v18  ;;  %v6050_v8 = vld [vmem:[%s5846_s10 + $0x68] sm:$0xff]   ;;  %v2270_v18 = vsel %vm2263_vm2, %v2267_v0, %v2269_v5  ;;  %v2275_v50 = vrot.slane %v5954_v33, 2  ;;  %v2277_v56 = vrot.slane %v5979_v61, 2  ;;  %v5667_v61 = vld [vmem:[%s6707_s1 + $0x1a0] sm:$0xff]  }
  0x38   : > { %5084 = vmatpush3.bf16.msra.mxu0 %v5633_v53  ;;  %5051 = vmatprep.mubr.bf16.mxu0 %v1863_v32  ;;  %v2266_v53 = vsel %vm2263_vm2, %v2264_v19, %v2265_v39  ;;  %v427_v12 = vsel %vm335_vm0, %v422_v4, %v426_v2  ;;  %v440_v13 = vshll.u32 %v6050_v8, 16  ;;  %v430_v26 = vor.u32 %v428_v10, %v426_v2  ;;  %v6071_v32 = vld [vmem:[%s5846_s10 + $0x78] sm:$0xff]  }
  0x39   : > { %5085 = vmatprep.subr.bf16.mxu0 %v5635_v3  ;;  %4876 = vmatpush3.bf16.msra.mxu1 %v5646_v46  ;;  %v444_v62 = vshrl.u32 %v6050_v8, 16  ;;  %v456_v45 = vshll.u32 %v6071_v32, 16  ;;  %v2274_v46 = vsel %vm2263_vm2, %v2271_v27, %v2273_v36  ;;  %v450_v19 = vrot.slane %v448_v38, 1  ;;  %v5675_v27 = vld [vmem:[%s6707_s1 + $0x1b0] sm:$0xff]  }
  0x3a   : > { %v442_v30 = vrot.slane %v440_v13, 1  ;;  %v435_v39 = vsel %vm335_vm0, %v430_v26, %v434_v21  ;;  %v460_v0 = vshrl.u32 %v6071_v32, 16  ;;  %v2276_v2 = vsel %vm2263_vm2, %v2273_v36, %v2275_v50 }
  0x3b   : > { %v454_v51 = vor.u32 %v452_v44, %v450_v19  ;;  %v458_v52 = vrot.slane %v456_v45, 1  ;;  %v5666_v45 = vld [vmem:[%s5846_s10 + $0x68] sm:$0xff]  }
  0x3c   : > { %5086 = vmatpush3.bf16.msra.mxu0 %v5635_v3  ;;  %v5650_v3 = vld [vmem:[%s6707_s1 + $0x28] sm:$0xff]  }
  0x3d   : > { %5087 = vmatprep.subr.bf16.mxu0 %v5640_v29  ;;  %4877 = vmatprep.subr.bf16.mxu1 %v5650_v3 }
  0x3e   : > { %4844 = vmatmul.mubr.bf16.gmra.mrb[12].mxu1 %v403_v42  ;;  %v5659_v42 = vld [vmem:[%s6707_s1 + $0x38] sm:$0xff]  }
  0x3f   : > { %5052 = vmatmul.mubr.bf16.gmra.mrb[12].mxu0 %v1872_v16  ;;  %4847 = vmatprep.mubr.bf16.mxu1 %v411_v59  ;;  %v6089_v16 = vld [vmem:[%s5846_s10 + $0x80] sm:$0xff]  }
  0x40   : > { %5088 = vmatpush3.bf16.msra.mxu0 %v5640_v29  ;;  %5091 = vmatprep.mubr.bf16.mxu0 %v2266_v53  ;;  %v438_v29 = vor.u32 %v436_v11, %v434_v21  ;;  %v6096_v53 = vld [vmem:[%s5846_s10 + $0x88] sm:$0xff]   ;;  %v6102_v59 = vld [vmem:[%s6707_s1 + $0x80] sm:$0xff]   ;;  %v464_v63 = vshll.u32 %v6089_v16, 16  ;;  %v468_v4 = vshrl.u32 %v6089_v16, 16  ;;  %v462_v11 = vor.u32 %v460_v0, %v458_v52  ;;  %v5674_v0 = vld [vmem:[%s6707_s1 + $0x90] sm:$0xff]  }
  0x41   : > { %5089 = vmatprep.subr.bf16.mxu0 %v5642_v49  ;;  %4878 = vmatpush3.bf16.msra.mxu1 %v5650_v3  ;;  %v459_v3 = vsel %vm335_vm0, %v454_v51, %v458_v52  ;;  %v472_v5 = vshll.u32 %v6096_v53, 16  ;;  %v5669_v51 = vld [vmem:[%s5846_s10 + $0x78] sm:$0xff]  }
  0x42   : > { %4879 = vmatprep.subr.bf16.mxu1 %v5654_v17  ;;  %v443_v28 = vsel %vm335_vm0, %v438_v29, %v442_v30  ;;  %v466_v10 = vrot.slane %v464_v63, 1 }
  0x44   : > { %5090 = vmatpush3.bf16.msra.mxu0 %v5642_v49  ;;  %v446_v49 = vor.u32 %v444_v62, %v442_v30  ;;  %v470_v13 = vor.u32 %v468_v4, %v466_v10  ;;  %v467_v21 = vsel %vm335_vm0, %v462_v11, %v466_v10  ;;  %v5679_v62 = vld [vmem:[%s6707_s1 + $0x1b8] sm:$0xff]   ;;  %v5683_v10 = vld [vmem:[%s6707_s1 + $0xa0] sm:$0xff]  }
  0x45   : > { %5127 = vmatprep.subr.bf16.mxu0 %v5649_v6  ;;  %4880 = vmatpush3.bf16.msra.mxu1 %v5654_v17  ;;  %v474_v17 = vrot.slane %v472_v5, 1  ;;  %v5678_v4 = vld [vmem:[%s6707_s1 + $0x98] sm:$0xff]   ;;  %v2580_v5 = vld [vmem:[%s5846_s10 + $0x10] sm:$0xc] }
  0x46   : > { %4848 = vmatmul.mubr.bf16.gmra.mrb[16].mxu1 %v419_v9  ;;  %4881 = vmatprep.subr.bf16.mxu1 %v5659_v42  ;;  %v451_v33 = vsel %vm335_vm0, %v446_v49, %v450_v19  ;;  %v6118_v9 = vld [vmem:[%s5846_s10 + $0x90] ss:$0 sps:$4 sm:$0x11]   ;;  %v2287_v49 = vrot.slane %v5666_v45, 2  ;;  %v5698_v45 = vld [vmem:[%s6707_s1 + $0x1d8] sm:$0xff]  }
  0x47   : > { %5092 = vmatmul.mubr.bf16.vlgmr.msra.gmra.mrb[0].mxu0 %v2268_v57  ;;  %4851 = vmatprep.mubr.bf16.mxu1 %v427_v12  ;;  %v5671_v57 = vld [vmem:[%s6707_s1 + $0x1a8] sm:$0xff]   ;;  %v2279_v12 = vrot.slane %v5993_v7, 2  ;;  %v480_v26 = vshll.u32 %v6118_v9, 16  ;;  %v475_v30 = vsel %vm335_vm0, %v470_v13, %v474_v17  ;;  %v5662_v7 = vld [vmem:[%s5846_s10 + $0x58] sm:$0xff]   ;;  %v5668_v19 = vld [vmem:[%s5846_s10 + $0x70] sm:$0xff]  }
  0x48   : > { %5095 = vmatprep.mubr.bf16.mxu0 %v2270_v18  ;;  %5128 = vmatpush3.bf16.msra.mxu0 %v5649_v6  ;;  %v2278_v6 = vsel %vm2263_vm2, %v2275_v50, %v2277_v56  ;;  %v2281_v18 = vrot.slane %v5660_v41, 2  ;;  %v2289_v50 = vrot.slane %v5668_v19, 2  ;;  %v5677_v11 = vld [vmem:[%s5846_s10 + $0x98] ss:$0 sps:$4 sm:$0x33]   ;;  %v5687_v13 = vld [vmem:[%s6707_s1 + $0xa8] sm:$0xff]  }
  0x49   : > { %5129 = vmatprep.subr.bf16.mxu0 %v5653_v20  ;;  %4882 = vmatpush3.bf16.msra.mxu1 %v5659_v42  ;;  %v2280_v29 = vsel %vm2263_vm2, %v2277_v56, %v2279_v12  ;;  %v2283_v42 = vrot.slane %v5662_v7, 2  ;;  %v5670_v56 = vld [vmem:[%s6707_s1 + $0x88] sm:$0xff]  }
  0x4a   : > { %4919 = vmatprep.subr.bf16.mxu1 %v6102_v59  ;;  %v2282_v36 = vsel %vm2263_vm2, %v2279_v12, %v2281_v18  ;;  %v2290_v63 = vsel %vm2263_vm2, %v2287_v49, %v2289_v50 }
  0x4b   : > { %v2284_v44 = vsel %vm2263_vm2, %v2281_v18, %v2283_v42 }
  0x4c   : > { %5130 = vmatpush3.bf16.msra.mxu0 %v5653_v20  ;;  %v476_v20 = vshrl.u32 %v6096_v53, 16 }
  0x4d   : > { %5131 = vmatprep.subr.bf16.mxu0 %v5657_v37 }
  0x4e   : > { %4852 = vmatmul.mubr.bf16.gmra.mrb[20].mxu1 %v435_v39  ;;  %v478_v38 = vor.u32 %v476_v20, %v474_v17  ;;  %v482_v39 = vrot.slane %v480_v26, 1  ;;  %v2299_v17 = vrot.slane %v5677_v11, 2 }
  0x4f   : > { %5096 = vmatmul.mubr.bf16.gmra.mrb[4].mxu0 %v2272_v43  ;;  %4855 = vmatprep.mubr.bf16.mxu1 %v443_v28 }
  0x50   : > { %5099 = vmatprep.mubr.bf16.mxu0 %v2274_v46  ;;  %5132 = vmatpush3.bf16.msra.mxu0 %v5657_v37  ;;  %v5664_v37 = vld [vmem:[%s5846_s10 + $0x60] sm:$0xff]   ;;  %v483_v28 = vsel %vm335_vm0, %v478_v38, %v482_v39  ;;  %v6220_v38 = vld [vmem:[%s5846_s10 + $0x30] sm:$0xff]   ;;  %v5690_v39 = vld [vmem:[%s6707_s1 + $0x1c8] sm:$0xff]  }
  0x51   : > { %5133 = vmatprep.subr.bf16.mxu0 %v5663_v48  ;;  %v2285_v43 = vrot.slane %v5664_v37, 2 }
  0x53   : > { %v2286_v46 = vsel %vm2263_vm2, %v2283_v42, %v2285_v43  ;;  %v2288_v52 = vsel %vm2263_vm2, %v2285_v43, %v2287_v49  ;;  %v5694_v43 = vld [vmem:[%s6707_s1 + $0x1d0] sm:$0xff]  }
  0x54   : > { %5134 = vmatpush3.bf16.msra.mxu0 %v5663_v48  ;;  %v6146_v48 = vld [vmem:[%s6707_s1 + $0x1c0] sm:$0xff]  }
  0x55   : > { %5135 = vmatprep.subr.bf16.mxu0 %v5667_v61 }
  0x56   : > { %4856 = vmatmul.mubr.bf16.gmra.mrb[24].mxu1 %v451_v33  ;;  %v5672_v33 = vld [vmem:[%s5846_s10 + $0x80] sm:$0xff]  }
  0x57   : > { %5100 = vmatmul.mubr.bf16.gmra.mrb[8].mxu0 %v2276_v2  ;;  %4859 = vmatprep.mubr.bf16.mxu1 %v459_v3  ;;  %v5673_v2 = vld [vmem:[%s5846_s10 + $0x88] sm:$0xff]  }
  0x58   : > { %5103 = vmatprep.mubr.bf16.mxu0 %v2278_v6  ;;  %5136 = vmatpush3.bf16.msra.mxu0 %v5667_v61  ;;  %v2293_v61 = vrot.slane %v5672_v33, 2  ;;  %v6174_v6 = vld [vmem:[%s5846_s10 + $0x14] sm:$0xf] }
  0x59   : > { %5137 = vmatprep.subr.bf16.mxu0 %v5671_v57  ;;  %v5711_v33 = vld [vmem:[%s6707_s1 + $0x1f0] sm:$0xff]  }
  0x5c   : > { %5138 = vmatpush3.bf16.msra.mxu0 %v5671_v57 }
  0x5d   : > { %5139 = vmatprep.subr.bf16.mxu0 %v5675_v27 }
  0x5e   : > { %4860 = vmatmul.mubr.bf16.gmra.mrb[28].mxu1 %v467_v21  ;;  %v5691_v21 = vld [vmem:[%s6707_s1 + $0xb0] sm:$0xff]  }
  0x5f   : > { %5104 = vmatmul.mubr.bf16.gmra.mrb[12].mxu0 %v2280_v29  ;;  %4863 = vmatprep.mubr.bf16.mxu1 %v475_v30  ;;  %v5695_v29 = vld [vmem:[%s6707_s1 + $0xb8] sm:$0xff]  }
  0x60   : > { %5107 = vmatprep.mubr.bf16.mxu0 %v2282_v36  ;;  %5140 = vmatpush3.bf16.msra.mxu0 %v5675_v27  ;;  %v6200_v27 = vld [vmem:[%s5846_s10 + $0x20] sm:$0xff]  }
  0x61   : > { %5141 = vmatprep.subr.bf16.mxu0 %v5679_v62  ;;  %v2730_v30 = vrot.slane %v6200_v27, 2  ;;  %v6216_v36 = vld [vmem:[%s6707_s1 + $0xc0] sm:$0xff]  }
  0x64   : > { %5142 = vmatpush3.bf16.msra.mxu0 %v5679_v62  ;;  %v2734_v62 = vrot.slane %v6220_v38, 2 }
  0x65   : > { %5179 = vmatprep.subr.bf16.mxu0 %v6146_v48 }
  0x66   : > { %4864 = vmatmul.mubr.bf16.gmra.mrb[32].mxu1 %v483_v28 }
  0x67   : > { %5108 = vmatmul.mubr.bf16.gmra.mrb[16].mxu0 %v2284_v44  ;;  %4883 = vmatprep.mubr.bf16.mxu1 %v5856_v14  ;;  %v2291_v14 = vrot.slane %v5669_v51, 2  ;;  %v6240_v44 = vld [vmem:[%s5846_s10 + $0x40] sm:$0xff]   ;;  %v5707_v51 = vld [vmem:[%s6707_s1 + $0x1e8] sm:$0xff]  }
  0x68   : > { %5111 = vmatprep.mubr.bf16.mxu0 %v2286_v46  ;;  %v2738_v46 = vrot.slane %v6240_v44, 2 }
  0x69   : > { %v2292_v3 = vsel %vm2263_vm2, %v2289_v50, %v2291_v14  ;;  %v6258_v50 = vld [vmem:[%s5846_s10 + $0x50] sm:$0xff]  }
  0x6e   : > { %4884 = vmatmul.mubr.bf16.vlgmr.msra.gmra.mrb[0].mxu1 %v5859_v15  ;;  %v2294_v15 = vsel %vm2263_vm2, %v2291_v14, %v2293_v61 }
  0x6f   : > { %5112 = vmatmul.mubr.bf16.gmra.mrb[20].mxu0 %v2288_v52  ;;  %4920 = vmatpush3.bf16.msra.mxu1 %v6102_v59  ;;  %v2295_v59 = vrot.slane %v5673_v2, 2  ;;  %v2742_v52 = vrot.slane %v6258_v50, 2  ;;  %v6282_v2 = vld [vmem:[%s5846_s10 + $0x68] sm:$0xff]  }
  0x70   : > { %4887 = vmatprep.mubr.bf16.mxu1 %v5881_v25  ;;  %5115 = vmatprep.mubr.bf16.mxu0 %v2290_v63  ;;  %v5676_v25 = vld [vmem:[%s5846_s10 + $0x90] sm:$0xff]   ;;  %v970_v63 = vld [vmem:[%s5846_s10] sm:$0xe] }
  0x71   : > { %4921 = vmatprep.subr.bf16.mxu1 %v5670_v56  ;;  %v2297_v41 = vrot.slane %v5676_v25, 2  ;;  %v2296_v57 = vsel %vm2263_vm2, %v2293_v61, %v2295_v59  ;;  %v5732_v25 = vld [vmem:[%s5846_s10 + $0x8] sm:$0xff]  }
  0x73   : > { %4922 = vmatpush3.bf16.msra.mxu1 %v5670_v56  ;;  %v2298_v12 = vsel %vm2263_vm2, %v2295_v59, %v2297_v41  ;;  %v2300_v26 = vsel %vm2263_vm2, %v2297_v41, %v2299_v17 }
  0x74   : > { %4923 = vmatprep.subr.bf16.mxu1 %v5674_v0 }
  0x76   : > { %4888 = vmatmul.mubr.bf16.gmra.mrb[4].mxu1 %v5910_v55  ;;  %v6182_v55 = vcombine.low %v2580_v5, %v6174_v6  ;;  %v2748_v5 = vrot.slane %v6282_v2, 2 }
  0x77   : > { %5116 = vmatmul.mubr.bf16.gmra.mrb[24].mxu0 %v2292_v3  ;;  %4891 = vmatprep.mubr.bf16.mxu1 %v5917_v60  ;;  %v6185_v60 = vld [vmem:[%s5846_s10 + $0x18] sm:$0xff]  }
  0x78   : > { %5119 = vmatprep.mubr.bf16.mxu0 %v2294_v15  ;;  %4924 = vmatpush3.bf16.msra.mxu1 %v5674_v0  ;;  %v2727_v18 = vrot.slane %v6182_v55, 2  ;;  %v2728_v20 = vrot.slane %v6185_v60, 2  ;;  %v5731_v0 = vld [vmem:[%s5846_s10 + $0x4] sm:$0xf]  ;;  %v5715_v3 = vld [vmem:[%s6707_s1 + $0x1f8] sm:$0xff]  }
  0x79   : > { %4925 = vmatprep.subr.bf16.mxu1 %v5678_v4  ;;  %v4204_v61 = vcombine.low %v970_v63, %v5731_v0  ;;  %v3066_v0 = vshrl.u32 %v6182_v55, 16 }
  0x7a   : > { %v2731_v37 = vsel %vm2263_vm2, %v2728_v20, %v2730_v30 }
  0x7b   : > { %v992_v59 = vrot.slane %v4204_v61, 1 }
  0x7c   : > { %4926 = vmatpush3.bf16.msra.mxu1 %v5678_v4  ;;  %v993_v4 = vrot.slane %v5732_v25, 1 }
  0x7d   : > { %4927 = vmatprep.subr.bf16.mxu1 %v5683_v10 }
  0x7e   : > { %4892 = vmatmul.mubr.bf16.gmra.mrb[8].mxu1 %v5941_v22  ;;  %v2729_v22 = vsel %vm2263_vm2, %v2727_v18, %v2728_v20  ;;  %v994_v41 = vsel %vm991_vm3, %v992_v59, %v993_v4  ;;  %v5734_v18 = vld [vmem:[%s5846_s10 + $0x18] sm:$0xff]   ;;  %v5716_v59 = vld [vmem:[%s6707_s1 + $0xe0] sm:$0xff]  }
  0x7f   : > { %5120 = vmatmul.mubr.bf16.gmra.mrb[28].mxu0 %v2296_v57  ;;  %4895 = vmatprep.mubr.bf16.mxu1 %v5950_v31  ;;  %v6204_v31 = vld [vmem:[%s5846_s10 + $0x28] sm:$0xff]   ;;  %v6304_v57 = vld [vmem:[%s5846_s10 + $0x78] sm:$0xff]   ;;  %v997_v20 = vrot.slane %v5734_v18, 1  ;;  %v5739_v18 = vld [vmem:[%s5846_s10 + $0x40] sm:$0xff]  }
  0x80   : > { %5123 = vmatprep.mubr.bf16.mxu0 %v2298_v12  ;;  %4928 = vmatpush3.bf16.msra.mxu1 %v5683_v10  ;;  %v2732_v7 = vrot.slane %v6204_v31, 2  ;;  %v6300_v10 = vld [vmem:[%s5846_s10 + $0x70] sm:$0xff]  }
  0x81   : > { %4929 = vmatprep.subr.bf16.mxu1 %v5687_v13  ;;  %v5733_v12 = vld [vmem:[%s5846_s10 + $0x10] sm:$0xff]   ;;  %v2750_v17 = vrot.slane %v6300_v10, 2 }
  0x82   : > { %v2735_v28 = vsel %vm2263_vm2, %v2732_v7, %v2734_v62 }
  0x84   : > { %4930 = vmatpush3.bf16.msra.mxu1 %v5687_v13  ;;  %v995_v13 = vrot.slane %v5733_v12, 1 }
  0x85   : > { %4931 = vmatprep.subr.bf16.mxu1 %v5691_v21 }
  0x86   : > { %4896 = vmatmul.mubr.bf16.gmra.mrb[12].mxu1 %v5974_v54  ;;  %v2733_v54 = vsel %vm2263_vm2, %v2730_v30, %v2732_v7  ;;  %v998_v30 = vsel %vm991_vm3, %v995_v13, %v997_v20 }
  0x87   : > { %5124 = vmatmul.mubr.bf16.gmra.mrb[32].mxu0 %v2300_v26  ;;  %4899 = vmatprep.mubr.bf16.mxu1 %v5983_v1  ;;  %v6224_v1 = vld [vmem:[%s5846_s10 + $0x38] sm:$0xff]   ;;  %v996_v26 = vsel %vm991_vm3, %v993_v4, %v995_v13 }
  0x88   : > { %5143 = vmatprep.mubr.bf16.mxu0 %v2729_v22  ;;  %4932 = vmatpush3.bf16.msra.mxu1 %v5691_v21  ;;  %v2736_v42 = vrot.slane %v6224_v1, 2  ;;  %v2752_v21 = vrot.slane %v6304_v57, 2  ;;  %v2751_v22 = vsel %vm2263_vm2, %v2748_v5, %v2750_v17 }
  0x89   : > { %4933 = vmatprep.subr.bf16.mxu1 %v5695_v29 }
  0x8a   : > { %v2739_v49 = vsel %vm2263_vm2, %v2736_v42, %v2738_v46  ;;  %v2753_v7 = vsel %vm2263_vm2, %v2750_v17, %v2752_v21  ;;  %v5718_v17 = vld [vmem:[%s6707_s1 + $0xe8] sm:$0xff]  }
  0x8c   : > { %4934 = vmatpush3.bf16.msra.mxu1 %v5695_v29  ;;  %v6315_v29 = vld [vmem:[%s5846_s10 + $0x80] sm:$0xff]  }
  0x8d   : > { %4971 = vmatprep.subr.bf16.mxu1 %v6216_v36 }
  0x8e   : > { %4900 = vmatmul.mubr.bf16.gmra.mrb[16].mxu1 %v6010_v35  ;;  %v6243_v35 = vld [vmem:[%s5846_s10 + $0x48] sm:$0xff]  }
  0x8f   : > { %5144 = vmatmul.mubr.bf16.vlgmr.msra.gmra.mrb[0].mxu0 %v2731_v37  ;;  %4903 = vmatprep.mubr.bf16.mxu1 %v6017_v40  ;;  %v2737_v40 = vsel %vm2263_vm2, %v2734_v62, %v2736_v42  ;;  %v2740_v19 = vrot.slane %v6243_v35, 2  ;;  %v5706_v37 = vld [vmem:[%s6707_s1 + $0xc8] sm:$0xff]   ;;  %v2754_v42 = vrot.slane %v6315_v29, 2 }
  0x90   : > { %5147 = vmatprep.mubr.bf16.mxu0 %v2733_v54  ;;  %5180 = vmatpush3.bf16.msra.mxu0 %v6146_v48  ;;  %v5703_v48 = vld [vmem:[%s6707_s1 + $0x1e0] sm:$0xff]   ;;  %v6323_v54 = vld [vmem:[%s5846_s10 + $0x88] sm:$0xff]  }
  0x91   : > { %5181 = vmatprep.subr.bf16.mxu0 %v5690_v39  ;;  %v2743_v14 = vsel %vm2263_vm2, %v2740_v19, %v2742_v52 }
  0x94   : > { %5182 = vmatpush3.bf16.msra.mxu0 %v5690_v39  ;;  %v5735_v39 = vld [vmem:[%s5846_s10 + $0x20] sm:$0xff]  }
  0x95   : > { %5183 = vmatprep.subr.bf16.mxu0 %v5694_v43  ;;  %v999_v62 = vrot.slane %v5735_v39, 1 }
  0x96   : > { %4904 = vmatmul.mubr.bf16.gmra.mrb[20].mxu1 %v6026_v47  ;;  %v2741_v47 = vsel %vm2263_vm2, %v2738_v46, %v2740_v19 }
  0x97   : > { %5148 = vmatmul.mubr.bf16.gmra.mrb[4].mxu0 %v2735_v28  ;;  %4907 = vmatprep.mubr.bf16.mxu1 %v6038_v58  ;;  %v6262_v58 = vld [vmem:[%s5846_s10 + $0x58] sm:$0xff]   ;;  %v1000_v46 = vsel %vm991_vm3, %v997_v20, %v999_v62  ;;  %v1007_v20 = vrot.slane %v5739_v18, 1  ;;  %v5744_v18 = vld [vmem:[%s5846_s10 + $0x60] sm:$0xff]  }
  0x98   : > { %5151 = vmatprep.mubr.bf16.mxu0 %v2737_v40  ;;  %5184 = vmatpush3.bf16.msra.mxu0 %v5694_v43  ;;  %v2744_v56 = vrot.slane %v6262_v58, 2  ;;  %v5736_v43 = vld [vmem:[%s5846_s10 + $0x28] sm:$0xff]   ;;  %v5710_v40 = vld [vmem:[%s6707_s1 + $0xd0] sm:$0xff]  }
  0x99   : > { %5185 = vmatprep.subr.bf16.mxu0 %v5698_v45  ;;  %v1001_v28 = vrot.slane %v5736_v43, 1  ;;  %v5720_v43 = vld [vmem:[%s6707_s1 + $0xf0] sm:$0xff]  }
  0x9b   : > { %v1002_v19 = vsel %vm991_vm3, %v999_v62, %v1001_v28  ;;  %v3092_v62 = vshrl.u32 %v6204_v31, 16 }
  0x9c   : > { %5186 = vmatpush3.bf16.msra.mxu0 %v5698_v45  ;;  %v2756_v45 = vrot.slane %v6323_v54, 2 }
  0x9d   : > { %5187 = vmatprep.subr.bf16.mxu0 %v5703_v48 }
  0x9e   : > { %4908 = vmatmul.mubr.bf16.gmra.mrb[24].mxu1 %v6050_v8  ;;  %v6277_v8 = vld [vmem:[%s5846_s10 + $0x60] sm:$0xff]  }
  0x9f   : > { %5152 = vmatmul.mubr.bf16.gmra.mrb[8].mxu0 %v2739_v49  ;;  %4911 = vmatprep.mubr.bf16.mxu1 %v6067_v23  ;;  %v2745_v23 = vsel %vm2263_vm2, %v2742_v52, %v2744_v56  ;;  %v2746_v15 = vrot.slane %v6277_v8, 2  ;;  %v2757_v49 = vsel %vm2263_vm2, %v2754_v42, %v2756_v45  ;;  %v5737_v52 = vld [vmem:[%s5846_s10 + $0x30] sm:$0xff]  }
  0xa0   : > { %5155 = vmatprep.mubr.bf16.mxu0 %v2741_v47  ;;  %5188 = vmatpush3.bf16.msra.mxu0 %v5703_v48  ;;  %v6337_v48 = vld [vmem:[%s5846_s10 + $0x90] sm:$0xff]   ;;  %v6341_v47 = vld [vmem:[%s5846_s10 + $0x98] sm:$0xff]  }
  0xa1   : > { %5189 = vmatprep.subr.bf16.mxu0 %v5707_v51  ;;  %v2749_v11 = vsel %vm2263_vm2, %v2746_v15, %v2748_v5  ;;  %v2758_v63 = vrot.slane %v6337_v48, 2  ;;  %v2760_v61 = vrot.slane %v6341_v47, 2 }
  0xa3   : > { %v2759_v4 = vsel %vm2263_vm2, %v2756_v45, %v2758_v63 }
  0xa4   : > { %5190 = vmatpush3.bf16.msra.mxu0 %v5707_v51  ;;  %v5714_v51 = vld [vmem:[%s6707_s1 + $0xd8] sm:$0xff]  }
  0xa5   : > { %5191 = vmatprep.subr.bf16.mxu0 %v5711_v33 }
  0xa6   : > { %4912 = vmatmul.mubr.bf16.gmra.mrb[28].mxu1 %v6071_v32  ;;  %v6295_v32 = vld [vmem:[%s6707_s1 + $0x200] sm:$0xff]  }
  0xa7   : > { %5156 = vmatmul.mubr.bf16.gmra.mrb[12].mxu0 %v2743_v14  ;;  %4915 = vmatprep.mubr.bf16.mxu1 %v6089_v16  ;;  %v2747_v16 = vsel %vm2263_vm2, %v2744_v56, %v2746_v15  ;;  %v1003_v56 = vrot.slane %v5737_v52, 1  ;;  %v3077_v15 = vshll.u32 %v6185_v60, 16  ;;  %v5722_v52 = vld [vmem:[%s6707_s1 + $0xf8] sm:$0xff]  }
  0xa8   : > { %5159 = vmatprep.mubr.bf16.mxu0 %v2745_v23  ;;  %5192 = vmatpush3.bf16.msra.mxu0 %v5711_v33  ;;  %v5738_v33 = vld [vmem:[%s5846_s10 + $0x38] sm:$0xff]   ;;  %v3069_v23 = vshll.u32 %v6182_v55, 16  ;;  %v2761_v55 = vsel %vm2263_vm2, %v2758_v63, %v2760_v61 }
  0xa9   : > { %5193 = vmatprep.subr.bf16.mxu0 %v5715_v3  ;;  %v1005_v14 = vrot.slane %v5738_v33, 1  ;;  %v1004_v25 = vsel %vm991_vm3, %v1001_v28, %v1003_v56  ;;  %v3079_v13 = vrot.slane %v3077_v15, 3  ;;  %v3110_v15 = vshrl.u32 %v6224_v1, 16 }
  0xab   : > { %v1006_v5 = vsel %vm991_vm3, %v1003_v56, %v1005_v14  ;;  %v1008_v28 = vsel %vm991_vm3, %v1005_v14, %v1007_v20  ;;  %v5741_v56 = vld [vmem:[%s5846_s10 + $0x50] sm:$0xff]   ;;  %v5742_v14 = vld [vmem:[%s5846_s10 + $0x58] sm:$0xff]  }
  0xac   : > { %5194 = vmatpush3.bf16.msra.mxu0 %v5715_v3  ;;  %v3074_v3 = vshrl.u32 %v6185_v60, 16  ;;  %v1011_v63 = vrot.slane %v5741_v56, 1  ;;  %v5723_v56 = vld [vmem:[%s6707_s1 + $0x218] sm:$0xff]  }
  0xad   : > { %5231 = vmatprep.subr.bf16.mxu0 %v6295_v32 }
  0xae   : > { %4916 = vmatmul.mubr.bf16.gmra.mrb[32].mxu1 %v6096_v53  ;;  %v3076_v12 = vrot.slane %v3074_v3, 2 }
  0xaf   : > { %5160 = vmatmul.mubr.bf16.gmra.mrb[16].mxu0 %v2747_v16  ;;  %4935 = vmatprep.mubr.bf16.mxu1 %v994_v41  ;;  %v5713_v16 = vld [vmem:[%s5846_s10 + $0xa0] ss:$0 sps:$4 sm:$0x33]   ;;  %v3068_v41 = vrot.slane %v3066_v0, 2  ;;  %v1013_v0 = vrot.slane %v5742_v14, 1 }
  0xb0   : > { %5163 = vmatprep.mubr.bf16.mxu0 %v2749_v11  ;;  %v3071_v11 = vrot.slane %v3069_v23, 3  ;;  %v3080_v39 = vor.u32 %v3079_v13, %v3076_v12  ;;  %v3104_v23 = vshll.u32 %v6220_v38, 16  ;;  %v5719_v13 = vld [vmem:[%s6707_s1 + $0x208] sm:$0xff]  }
  0xb6   : > { %4936 = vmatmul.mubr.bf16.vlgmr.msra.gmra.mrb[0].mxu1 %v996_v26  ;;  %v5740_v26 = vld [vmem:[%s5846_s10 + $0x48] sm:$0xff]  }
  0xb7   : > { %5164 = vmatmul.mubr.bf16.gmra.mrb[20].mxu0 %v2751_v22  ;;  %4972 = vmatpush3.bf16.msra.mxu1 %v6216_v36  ;;  %v2755_v36 = vsel %vm2263_vm2, %v2752_v21, %v2754_v42  ;;  %v2762_v21 = vrot.slane %v5713_v16, 2  ;;  %v1009_v22 = vrot.slane %v5740_v26, 1  ;;  %v3095_v42 = vshll.u32 %v6204_v31, 16 }
  0xb8   : > { %4939 = vmatprep.mubr.bf16.mxu1 %v998_v30  ;;  %5167 = vmatprep.mubr.bf16.mxu0 %v2753_v7  ;;  %v3083_v30 = vshrl.u32 %v6200_v27, 16  ;;  %v3086_v7 = vshll.u32 %v6200_v27, 16 }
  0xb9   : > { %4973 = vmatprep.subr.bf16.mxu1 %v5706_v37  ;;  %v1010_v45 = vsel %vm991_vm3, %v1007_v20, %v1009_v22  ;;  %v1015_v20 = vrot.slane %v5744_v18, 1 }
  0xbb   : > { %4974 = vmatpush3.bf16.msra.mxu1 %v5706_v37  ;;  %v3072_v37 = vor.u32 %v3071_v11, %v3068_v41  ;;  %v3106_v41 = vrot.slane %v3104_v23, 3  ;;  %v3112_v11 = vrot.slane %v3110_v15, 2  ;;  %v3140_v15 = vshll.u32 %v6258_v50, 16 }
  0xbc   : > { %4975 = vmatprep.subr.bf16.mxu1 %v5710_v40 }
  0xbe   : > { %4940 = vmatmul.mubr.bf16.gmra.mrb[4].mxu1 %v1000_v46  ;;  %v3085_v46 = vrot.slane %v3083_v30, 2  ;;  %v3119_v30 = vshrl.u32 %v6240_v44, 16 }
  0xbf   : > { %5168 = vmatmul.mubr.bf16.gmra.mrb[24].mxu0 %v2755_v36  ;;  %4943 = vmatprep.mubr.bf16.mxu1 %v1002_v19  ;;  %v3088_v36 = vrot.slane %v3086_v7, 3  ;;  %v3081_v19 = vsel %vm3064_vm4, %v3072_v37, %v3080_v39  ;;  %v3122_v7 = vshll.u32 %v6240_v44, 16 }
  0xc0   : > { %5171 = vmatprep.mubr.bf16.mxu0 %v2757_v49  ;;  %4976 = vmatpush3.bf16.msra.mxu1 %v5710_v40  ;;  %v2763_v40 = vsel %vm2263_vm2, %v2760_v61, %v2762_v21  ;;  %v3094_v49 = vrot.slane %v3092_v62, 2  ;;  %v3101_v61 = vshrl.u32 %v6220_v38, 16  ;;  %v5745_v21 = vld [vmem:[%s5846_s10 + $0x68] sm:$0xff]   ;;  %v3131_v62 = vshll.u32 %v6243_v35, 16 }
  0xc1   : > { %4977 = vmatprep.subr.bf16.mxu1 %v5714_v51  ;;  %v3089_v33 = vor.u32 %v3088_v36, %v3085_v46  ;;  %v1017_v26 = vrot.slane %v5745_v21, 1  ;;  %v3121_v46 = vrot.slane %v3119_v30, 2  ;;  %v3124_v36 = vrot.slane %v3122_v7, 3  ;;  %v5725_v21 = vld [vmem:[%s6707_s1 + $0x228] sm:$0xff]  }
  0xc2   : > { %v3103_v16 = vrot.slane %v3101_v61, 2  ;;  %v5747_v61 = vld [vmem:[%s5846_s10 + $0x78] sm:$0xff]   ;;  %v1025_v7 = vrot.slane %v6096_v53, 1 }
  0xc3   : > { %v1021_v23 = vrot.slane %v5747_v61, 1  ;;  %v5749_v61 = vld [vmem:[%s5846_s10 + $0x10] sm:$0xff]  }
  0xc4   : > { %4978 = vmatpush3.bf16.msra.mxu1 %v5714_v51  ;;  %v3097_v51 = vrot.slane %v3095_v42, 3  ;;  %v5721_v42 = vld [vmem:[%s6707_s1 + $0x210] sm:$0xff]  }
  0xc5   : > { %4979 = vmatprep.subr.bf16.mxu1 %v5716_v59 }
  0xc6   : > { %4944 = vmatmul.mubr.bf16.gmra.mrb[8].mxu1 %v1004_v25  ;;  %v3098_v3 = vor.u32 %v3097_v51, %v3094_v49  ;;  %v1012_v25 = vsel %vm991_vm3, %v1009_v22, %v1011_v63  ;;  %v3107_v22 = vor.u32 %v3106_v41, %v3103_v16 }
  0xc7   : > { %5172 = vmatmul.mubr.bf16.gmra.mrb[28].mxu0 %v2759_v4  ;;  %4947 = vmatprep.mubr.bf16.mxu1 %v1006_v5  ;;  %v3090_v4 = vsel %vm3064_vm4, %v3080_v39, %v3089_v33  ;;  %v1014_v5 = vsel %vm991_vm3, %v1011_v63, %v1013_v0  ;;  %v3128_v39 = vshrl.u32 %v6243_v35, 16 }
  0xc8   : > { %5175 = vmatprep.mubr.bf16.mxu0 %v2761_v55  ;;  %4980 = vmatpush3.bf16.msra.mxu1 %v5716_v59  ;;  %v3113_v59 = vshll.u32 %v6224_v1, 16  ;;  %v3099_v55 = vsel %vm3064_vm4, %v3089_v33, %v3098_v3  ;;  %v5746_v33 = vld [vmem:[%s5846_s10 + $0x70] sm:$0xff]  }
  0xc9   : > { %4981 = vmatprep.subr.bf16.mxu1 %v5718_v17  ;;  %v3130_v51 = vrot.slane %v3128_v39, 2  ;;  %v1019_v14 = vrot.slane %v5746_v33, 1  ;;  %v3158_v39 = vshll.u32 %v6277_v8, 16  ;;  %v1027_v33 = vrot.slane %v6118_v9, 1 }
  0xca   : > { %v3115_v12 = vrot.slane %v3113_v59, 3 }
  0xcb   : > { %v1020_v16 = vsel %vm991_vm3, %v1017_v26, %v1019_v14  ;;  %v1028_v9 = vsel %vm991_vm3, %v1025_v7, %v1027_v33  ;;  %v3209_v33 = vshrl.u32 %v6337_v48, 16 }
  0xcc   : > { %4982 = vmatpush3.bf16.msra.mxu1 %v5718_v17  ;;  %v6397_v17 = vld [vmem:[%s6707_s1 + $0x100] sm:$0xff]   ;;  %v3116_v37 = vor.u32 %v3115_v12, %v3112_v11  ;;  %v3142_v12 = vrot.slane %v3140_v15, 3  ;;  %v3176_v15 = vshll.u32 %v6300_v10, 16 }
  0xcd   : > { %4983 = vmatprep.subr.bf16.mxu1 %v5720_v43 }
  0xce   : > { %4948 = vmatmul.mubr.bf16.gmra.mrb[12].mxu1 %v1008_v28  ;;  %v3569_v28 = vrot.slane %v6341_v47, 3  ;;  %v3117_v49 = vsel %vm3064_vm4, %v3107_v22, %v3116_v37 }
  0xcf   : > { %5176 = vmatmul.mubr.bf16.gmra.mrb[32].mxu0 %v2763_v40  ;;  %4951 = vmatprep.mubr.bf16.mxu1 %v1010_v45  ;;  %v1018_v40 = vsel %vm991_vm3, %v1015_v20, %v1017_v26  ;;  %v3108_v45 = vsel %vm3064_vm4, %v3098_v3, %v3107_v22  ;;  %v3137_v3 = vshrl.u32 %v6258_v50, 16  ;;  %v5748_v26 = vld [vmem:[%s5846_s10 + $0x80] sm:$0xff]  }
  0xd0   : > { %5195 = vmatprep.mubr.bf16.mxu0 %v3081_v19  ;;  %4984 = vmatpush3.bf16.msra.mxu1 %v5720_v43  ;;  %v6411_v43 = vld [vmem:[%s5846_s10 + $0xa0] ss:$0 sps:$4 sm:$0x77]   ;;  %v1023_v22 = vrot.slane %v5748_v26, 1  ;;  %v3194_v26 = vshll.u32 %v6315_v29, 16 }
  0xd1   : > { %4985 = vmatprep.subr.bf16.mxu1 %v5722_v52  ;;  %v3571_v19 = vrot.slane %v6411_v43, 3  ;;  %v3139_v11 = vrot.slane %v3137_v3, 2  ;;  %v3173_v3 = vshrl.u32 %v6300_v10, 16 }
  0xd2   : > { %v1026_v53 = vsel %vm991_vm3, %v1023_v22, %v1025_v7 }
  0xd3   : > { %v6425_v63 = vsel %vm3535_vm5, %v3569_v28, %v3571_v19  ;;  %v3143_v30 = vor.u32 %v3142_v12, %v3139_v11  ;;  %v3160_v19 = vrot.slane %v3158_v39, 3  ;;  %v3203_v39 = vshll.u32 %v6323_v54, 16 }
  0xd4   : > { %4986 = vmatpush3.bf16.msra.mxu1 %v5722_v52  ;;  %v3133_v52 = vrot.slane %v3131_v62, 3 }
  0xd5   : > { %5283 = vmatprep.subr.bf16.mxu1 %v6397_v17 }
  0xd6   : > { %4952 = vmatmul.mubr.bf16.gmra.mrb[16].mxu1 %v1012_v25  ;;  %v3134_v59 = vor.u32 %v3133_v52, %v3130_v51  ;;  %v3146_v25 = vshrl.u32 %v6262_v58, 16 }
  0xd7   : > { %5196 = vmatmul.mubr.bf16.vlgmr.msra.gmra.mrb[0].mxu0 %v3090_v4  ;;  %4955 = vmatprep.mubr.bf16.mxu1 %v1014_v5  ;;  %v3149_v4 = vshll.u32 %v6262_v58, 16  ;;  %v5724_v5 = vld [vmem:[%s6707_s1 + $0x220] sm:$0xff]  }
  0xd8   : > { %5199 = vmatprep.mubr.bf16.mxu0 %v3099_v55  ;;  %5232 = vmatpush3.bf16.msra.mxu0 %v6295_v32  ;;  %v1016_v32 = vsel %vm991_vm3, %v1013_v0, %v1015_v20  ;;  %v3125_v0 = vor.u32 %v3124_v36, %v3121_v46  ;;  %v1022_v55 = vsel %vm991_vm3, %v1019_v14, %v1021_v23  ;;  %v3148_v18 = vrot.slane %v3146_v25, 2 }
  0xd9   : > { %5233 = vmatprep.subr.bf16.mxu0 %v5719_v13  ;;  %v3151_v20 = vrot.slane %v3149_v4, 3  ;;  %v3144_v46 = vsel %vm3064_vm4, %v3134_v59, %v3143_v30  ;;  %v1455_v14 = vrot.slane %v5878_v24, 1  ;;  %v3182_v25 = vshrl.u32 %v6304_v57, 16 }
  0xda   : > { %v3126_v41 = vsel %vm3064_vm4, %v3116_v37, %v3125_v0  ;;  %v3155_v37 = vshrl.u32 %v6277_v8, 16  ;;  %v3185_v4 = vshll.u32 %v6304_v57, 16 }
  0xdb   : > { %v3152_v62 = vor.u32 %v3151_v20, %v3148_v18  ;;  %v3184_v11 = vrot.slane %v3182_v25, 2  ;;  %v3211_v25 = vrot.slane %v3209_v33, 2 }
  0xdc   : > { %5234 = vmatpush3.bf16.msra.mxu0 %v5719_v13  ;;  %v3135_v13 = vsel %vm3064_vm4, %v3125_v0, %v3134_v59  ;;  %v3157_v36 = vrot.slane %v3155_v37, 2  ;;  %v3187_v12 = vrot.slane %v3185_v4, 3  ;;  %v3200_v37 = vshrl.u32 %v6323_v54, 16 }
  0xdd   : > { %5235 = vmatprep.subr.bf16.mxu0 %v5721_v42 }
  0xde   : > { %4956 = vmatmul.mubr.bf16.gmra.mrb[20].mxu1 %v1016_v32  ;;  %v3167_v32 = vshll.u32 %v6282_v2, 16  ;;  %v3161_v0 = vor.u32 %v3160_v19, %v3157_v36  ;;  %v3188_v7 = vor.u32 %v3187_v12, %v3184_v11  ;;  %v3205_v36 = vrot.slane %v3203_v39, 3  ;;  %v5752_v19 = vld [vmem:[%s5846_s10 + $0x28] sm:$0xff]   ;;  %v5757_v12 = vld [vmem:[%s5846_s10 + $0x40] sm:$0xff]  }
  0xdf   : > { %5200 = vmatmul.mubr.bf16.gmra.mrb[4].mxu0 %v3108_v45  ;;  %4959 = vmatprep.mubr.bf16.mxu1 %v1018_v40  ;;  %v5726_v40 = vld [vmem:[%s6707_s1 + $0x230] sm:$0xff]   ;;  %v1024_v45 = vsel %vm991_vm3, %v1021_v23, %v1023_v22  ;;  %v1456_v23 = vrot.slane %v5749_v61, 1  ;;  %v5751_v22 = vld [vmem:[%s5846_s10 + $0x20] sm:$0xff]  }
  0xe0   : > { %5203 = vmatprep.mubr.bf16.mxu0 %v3117_v49  ;;  %5236 = vmatpush3.bf16.msra.mxu0 %v5721_v42  ;;  %v3164_v42 = vshrl.u32 %v6282_v2, 16  ;;  %v3153_v49 = vsel %vm3064_vm4, %v3143_v30, %v3152_v62  ;;  %v3169_v52 = vrot.slane %v3167_v32, 3  ;;  %v3162_v24 = vsel %vm3064_vm4, %v3152_v62, %v3161_v0 }
  0xe1   : > { %5237 = vmatprep.subr.bf16.mxu0 %v5723_v56  ;;  %v1460_v30 = vrot.slane %v5751_v22, 1  ;;  %v3514_v22 = vld [vmem:[%s5846_s10 + $0x10] sm:$0x8] }
  0xe2   : > { %v3166_v51 = vrot.slane %v3164_v42, 2 }
  0xe4   : > { %5238 = vmatpush3.bf16.msra.mxu0 %v5723_v56  ;;  %v5728_v56 = vld [vmem:[%s6707_s1 + $0x238] sm:$0xff]   ;;  %v3170_v59 = vor.u32 %v3169_v52, %v3166_v51  ;;  %v5753_v52 = vld [vmem:[%s5846_s10 + $0x30] sm:$0xff]  }
  0xe5   : > { %5239 = vmatprep.subr.bf16.mxu0 %v5724_v5 }
  0xe6   : > { %4960 = vmatmul.mubr.bf16.gmra.mrb[24].mxu1 %v1020_v16  ;;  %v3175_v16 = vrot.slane %v3173_v3, 2 }
  0xe7   : > { %5204 = vmatmul.mubr.bf16.gmra.mrb[8].mxu0 %v3126_v41  ;;  %4963 = vmatprep.mubr.bf16.mxu1 %v1022_v55  ;;  %v3178_v41 = vrot.slane %v3176_v15, 3  ;;  %v3171_v55 = vsel %vm3064_vm4, %v3161_v0, %v3170_v59  ;;  %v5754_v0 = vld [vmem:[%s6707_s1 + $0x108] sm:$0xff]  }
  0xe8   : > { %5207 = vmatprep.mubr.bf16.mxu0 %v3135_v13  ;;  %5240 = vmatpush3.bf16.msra.mxu0 %v5724_v5  ;;  %v1457_v5 = vsel %vm991_vm3, %v1455_v14, %v1456_v23  ;;  %v5750_v13 = vld [vmem:[%s5846_s10 + $0x18] sm:$0xff]   ;;  %v3212_v14 = vshll.u32 %v6337_v48, 16 }
  0xe9   : > { %5241 = vmatprep.subr.bf16.mxu0 %v5725_v21  ;;  %v1458_v18 = vrot.slane %v5750_v13, 1  ;;  %v3179_v20 = vor.u32 %v3178_v41, %v3175_v16  ;;  %v5756_v41 = vld [vmem:[%s5846_s10 + $0x38] sm:$0xff]   ;;  %v1468_v13 = vrot.slane %v5757_v12, 1 }
  0xea   : > { %v3214_v4 = vrot.slane %v3212_v14, 3  ;;  %v5763_v14 = vld [vmem:[%s6707_s1 + $0x130] sm:$0xff]  }
  0xeb   : > { %v1459_v62 = vsel %vm991_vm3, %v1456_v23, %v1458_v18  ;;  %v3180_v42 = vsel %vm3064_vm4, %v3170_v59, %v3179_v20  ;;  %v3218_v23 = vshrl.u32 %v6341_v47, 16 }
  0xec   : > { %5242 = vmatpush3.bf16.msra.mxu0 %v5725_v21  ;;  %v3191_v21 = vshrl.u32 %v6315_v29, 16  ;;  %v3215_v11 = vor.u32 %v3214_v4, %v3211_v25 }
  0xed   : > { %5243 = vmatprep.subr.bf16.mxu0 %v5726_v40 }
  0xee   : > { %4964 = vmatmul.mubr.bf16.gmra.mrb[28].mxu1 %v1024_v45  ;;  %v3193_v32 = vrot.slane %v3191_v21, 2  ;;  %v1461_v45 = vsel %vm991_vm3, %v1458_v18, %v1460_v30  ;;  %v3227_v18 = vshrl.u32 %v6411_v43, 16 }
  0xef   : > { %5208 = vmatmul.mubr.bf16.gmra.mrb[12].mxu0 %v3144_v46  ;;  %4967 = vmatprep.mubr.bf16.mxu1 %v1026_v53  ;;  %v3189_v46 = vsel %vm3064_vm4, %v3179_v20, %v3188_v7  ;;  %v3202_v53 = vrot.slane %v3200_v37, 2  ;;  %v3230_v20 = vshll.u32 %v6411_v43, 16 }
  0xf0   : > { %5211 = vmatprep.mubr.bf16.mxu0 %v3153_v49  ;;  %5244 = vmatpush3.bf16.msra.mxu0 %v5726_v40  ;;  %v3196_v40 = vrot.slane %v3194_v26, 3  ;;  %v1462_v49 = vrot.slane %v5752_v19, 1  ;;  %v5758_v26 = vld [vmem:[%s6707_s1 + $0x118] sm:$0xff]   ;;  %v3229_v39 = vrot.slane %v3227_v18, 2 }
  0xf1   : > { %5245 = vmatprep.subr.bf16.mxu0 %v5728_v56  ;;  %v3206_v61 = vor.u32 %v3205_v36, %v3202_v53  ;;  %v6515_v53 = vld [vmem:[%s5846_s10 + $0x50] sm:$0xff]   ;;  %v6561_v18 = vld [vmem:[%s5846_s10 + $0x78] sm:$0xff]  }
  0xf2   : > { %v3197_v51 = vor.u32 %v3196_v40, %v3193_v32  ;;  %v1463_v3 = vsel %vm991_vm3, %v1460_v30, %v1462_v49  ;;  %v5759_v32 = vld [vmem:[%s6707_s1 + $0x120] sm:$0xff]   ;;  %v5760_v40 = vld [vmem:[%s5846_s10 + $0x48] sm:$0xff]   ;;  %v1472_v36 = vrot.slane %v6515_v53, 1 }
  0xf4   : > { %5246 = vmatpush3.bf16.msra.mxu0 %v5728_v56  ;;  %v1464_v56 = vrot.slane %v5753_v52, 1  ;;  %v3198_v15 = vsel %vm3064_vm4, %v3188_v7, %v3197_v51  ;;  %v3216_v7 = vsel %vm3064_vm4, %v3206_v61, %v3215_v11 }
  0xf6   : > { %4968 = vmatmul.mubr.bf16.gmra.mrb[32].mxu1 %v1028_v9  ;;  %v1465_v59 = vsel %vm991_vm3, %v1462_v49, %v1464_v56  ;;  %v5755_v9 = vld [vmem:[%s6707_s1 + $0x110] sm:$0xff]   ;;  %v5762_v49 = vld [vmem:[%s6707_s1 + $0x128] sm:$0xff]  }
  0xf7   : > { %5212 = vmatmul.mubr.bf16.gmra.mrb[16].mxu0 %v3162_v24  ;;  %4987 = vmatprep.mubr.bf16.mxu1 %v1457_v5  ;;  %v3207_v24 = vsel %vm3064_vm4, %v3197_v51, %v3206_v61  ;;  %v3220_v5 = vrot.slane %v3218_v23, 2  ;;  %v3539_v61 = vrot.slane %v6200_v27, 3  ;;  %v6535_v23 = vld [vmem:[%s5846_s10 + $0x60] sm:$0xff]  }
  0xf8   : > { %5215 = vmatprep.mubr.bf16.mxu0 %v3171_v55  ;;  %v1466_v55 = vrot.slane %v5756_v41, 1  ;;  %v3545_v41 = vrot.slane %v6224_v1, 3  ;;  %v3547_v1 = vrot.slane %v6240_v44, 3 }
  0xfa   : > { %v1467_v30 = vsel %vm991_vm3, %v1464_v56, %v1466_v55  ;;  %v1469_v37 = vsel %vm991_vm3, %v1466_v55, %v1468_v13 }
  0xfe   : > { %4988 = vmatmul.mubr.bf16.vlgmr.msra.gmra.mrb[0].mxu1 %v1459_v62  ;;  %v3232_v62 = vrot.slane %v3230_v20, 3  ;;  %v6566_v20 = vld [vmem:[%s5846_s10 + $0x80] sm:$0xff]  }
  0xff   : > { %5216 = vmatmul.mubr.bf16.gmra.mrb[20].mxu0 %v3180_v42  ;;  %5291 = vmatpush3.bf16.msra.mxu1 %v6397_v17  ;;  %v3221_v17 = vshll.u32 %v6341_v47, 16  ;;  %v4390_v42 = vcombine.low %v3514_v22, %v6174_v6  ;;  %v3537_v6 = vrot.slane %v6185_v60, 3  ;;  %v6530_v60 = vld [vmem:[%s5846_s10 + $0x58] sm:$0xff]  }
 0x100   : > { %4991 = vmatprep.mubr.bf16.mxu1 %v1461_v45  ;;  %5219 = vmatprep.mubr.bf16.mxu0 %v3189_v46  ;;  %v1470_v45 = vrot.slane %v5760_v40, 1  ;;  %v3233_v46 = vor.u32 %v3232_v62, %v3229_v39  ;;  %v6575_v39 = vld [vmem:[%s5846_s10 + $0x88] sm:$0xff]   ;;  %v3551_v62 = vrot.slane %v6258_v50, 3  ;;  %v3553_v40 = vrot.slane %v6262_v58, 3 }
 0x101   : > { %5284 = vmatprep.subr.bf16.mxu1 %v5754_v0  ;;  %v3223_v16 = vrot.slane %v3221_v17, 3  ;;  %v3536_v19 = vrot.slane %v4390_v42, 3  ;;  %v1476_v17 = vrot.slane %v6535_v23, 1  ;;  %v3540_v25 = vsel %vm3535_vm5, %v3537_v6, %v3539_v61 }
 0x102   : > { %v1471_v51 = vsel %vm991_vm3, %v1468_v13, %v1470_v45  ;;  %v1473_v56 = vsel %vm991_vm3, %v1470_v45, %v1472_v36  ;;  %v1486_v44 = vrot.slane %v6575_v39, 1  ;;  %v1874_v42 = vshrl.u32 %v6515_v53, 16 }
 0x103   : > { %5292 = vmatpush3.bf16.msra.mxu1 %v5754_v0  ;;  %v3224_v21 = vor.u32 %v3223_v16, %v3220_v5  ;;  %v3538_v33 = vsel %vm3535_vm5, %v3536_v19, %v3537_v6  ;;  %v1474_v0 = vrot.slane %v6530_v60, 1  ;;  %v6552_v5 = vld [vmem:[%s5846_s10 + $0x70] sm:$0xff]   ;;  %v3554_v50 = vsel %vm3535_vm5, %v3551_v62, %v3553_v40 }
 0x104   : > { %5285 = vmatprep.subr.bf16.mxu1 %v5755_v9  ;;  %v1480_v16 = vrot.slane %v6552_v5, 1  ;;  %v1876_v6 = vrot.slane %v1874_v42, 1  ;;  %v3555_v58 = vrot.slane %v6277_v8, 3 }
 0x105   : > { %v3225_v43 = vsel %vm3064_vm4, %v3215_v11, %v3224_v21  ;;  %v3234_v52 = vsel %vm3064_vm4, %v3224_v21, %v3233_v46  ;;  %v1477_v4 = vsel %vm991_vm3, %v1474_v0, %v1476_v17  ;;  %v1484_v21 = vrot.slane %v6566_v20, 1  ;;  %v5730_v46 = vld [vmem:[%s5846_s10 + $0x98] ss:$0 sps:$4 sm:$0x11]  }
 0x106   : > { %4992 = vmatmul.mubr.bf16.gmra.mrb[4].mxu1 %v1463_v3  ;;  %v3541_v3 = vrot.slane %v6204_v31, 3 }
 0x107   : > { %5220 = vmatmul.mubr.bf16.gmra.mrb[24].mxu0 %v3198_v15  ;;  %4995 = vmatprep.mubr.bf16.mxu1 %v1465_v59  ;;  %v5766_v15 = vld [vmem:[%s6707_s1 + $0x138] sm:$0xff]   ;;  %v1475_v59 = vsel %vm991_vm3, %v1472_v36, %v1474_v0  ;;  %v1487_v45 = vsel %vm991_vm3, %v1484_v21, %v1486_v44  ;;  %v3557_v0 = vrot.slane %v6282_v2, 3 }
 0x108   : > { %5223 = vmatprep.mubr.bf16.mxu0 %v3207_v24  ;;  %5293 = vmatpush3.bf16.msra.mxu1 %v5755_v9  ;;  %v3542_v27 = vsel %vm3535_vm5, %v3539_v61, %v3541_v3  ;;  %v6547_v9 = vld [vmem:[%s5846_s10 + $0x68] sm:$0xff]   ;;  %v3543_v24 = vrot.slane %v6220_v38, 3  ;;  %v1482_v38 = vrot.slane %v6561_v18, 1 }
 0x109   : > { %5286 = vmatprep.subr.bf16.mxu1 %v5758_v26  ;;  %v1478_v31 = vrot.slane %v6547_v9, 1  ;;  %v3558_v8 = vsel %vm3535_vm5, %v3555_v58, %v3557_v0  ;;  %v1904_v2 = vshll.u32 %v6547_v9, 16 }
 0x10a   : > { %v3544_v11 = vsel %vm3535_vm5, %v3541_v3, %v3543_v24  ;;  %v3546_v13 = vsel %vm3535_vm5, %v3543_v24, %v3545_v41  ;;  %v1483_v22 = vsel %vm991_vm3, %v1480_v16, %v1482_v38  ;;  %v1910_v24 = vshrl.u32 %v6552_v5, 16 }
 0x10b   : > { %v1479_v55 = vsel %vm991_vm3, %v1476_v17, %v1478_v31  ;;  %v1481_v12 = vsel %vm991_vm3, %v1478_v31, %v1480_v16  ;;  %v3561_v16 = vrot.slane %v6304_v57, 3  ;;  %v1922_v57 = vshll.u32 %v6561_v18, 16 }
 0x10c   : > { %5294 = vmatpush3.bf16.msra.mxu1 %v5758_v26  ;;  %v3549_v26 = vrot.slane %v6243_v35, 3  ;;  %v6580_v35 = vld [vmem:[%s5846_s10 + $0x90] sm:$0xff]  }
 0x10d   : > { %5287 = vmatprep.subr.bf16.mxu1 %v5759_v32 }
 0x10e   : > { %4996 = vmatmul.mubr.bf16.gmra.mrb[8].mxu1 %v1467_v30  ;;  %v3548_v30 = vsel %vm3535_vm5, %v3545_v41, %v3547_v1  ;;  %v3552_v36 = vsel %vm3535_vm5, %v3549_v26, %v3551_v62  ;;  %v1924_v62 = vrot.slane %v1922_v57, 2 }
 0x10f   : > { %5224 = vmatmul.mubr.bf16.gmra.mrb[28].mxu0 %v3216_v7  ;;  %4999 = vmatprep.mubr.bf16.mxu1 %v1469_v37  ;;  %v1485_v7 = vsel %vm991_vm3, %v1482_v38, %v1484_v21  ;;  %v3550_v37 = vsel %vm3535_vm5, %v3547_v1, %v3549_v26  ;;  %v1912_v38 = vrot.slane %v1910_v24, 1  ;;  %v3563_v21 = vrot.slane %v6315_v29, 3 }
 0x110   : > { %5227 = vmatprep.mubr.bf16.mxu0 %v3225_v43  ;;  %5295 = vmatpush3.bf16.msra.mxu1 %v5759_v32  ;;  %v1488_v43 = vrot.slane %v6580_v35, 1  ;;  %v1877_v32 = vshll.u32 %v6515_v53, 16  ;;  %v1886_v53 = vshll.u32 %v6530_v60, 16 }
 0x111   : > { %5288 = vmatprep.subr.bf16.mxu1 %v5762_v49 }
 0x112   : > { %v1489_v19 = vsel %vm991_vm3, %v1486_v44, %v1488_v43  ;;  %v1888_v3 = vrot.slane %v1886_v53, 2 }
 0x114   : > { %5296 = vmatpush3.bf16.msra.mxu1 %v5762_v49  ;;  %v1879_v49 = vrot.slane %v1877_v32, 2 }
 0x115   : > { %5289 = vmatprep.subr.bf16.mxu1 %v5763_v14 }
 0x116   : > { %5000 = vmatmul.mubr.bf16.gmra.mrb[12].mxu1 %v1471_v51  ;;  %v1490_v51 = vrot.slane %v5730_v46, 1 }
 0x117   : > { %5228 = vmatmul.mubr.bf16.gmra.mrb[32].mxu0 %v3234_v52  ;;  %5003 = vmatprep.mubr.bf16.mxu1 %v1473_v56  ;;  %v1883_v52 = vshrl.u32 %v6530_v60, 16  ;;  %v1880_v56 = vor.u32 %v1879_v49, %v1876_v6 }
 0x118   : > { %5247 = vmatprep.mubr.bf16.mxu0 %v3538_v33  ;;  %5297 = vmatpush3.bf16.msra.mxu1 %v5763_v14  ;;  %v1892_v33 = vshrl.u32 %v6535_v23, 16  ;;  %v1895_v14 = vshll.u32 %v6535_v23, 16  ;;  %v1491_v61 = vsel %vm991_vm3, %v1488_v43, %v1490_v51  ;;  %v1901_v23 = vshrl.u32 %v6547_v9, 16 }
 0x119   : > { %5290 = vmatprep.subr.bf16.mxu1 %v5766_v15  ;;  %v1885_v17 = vrot.slane %v1883_v52, 1  ;;  %v3564_v43 = vsel %vm3535_vm5, %v3561_v16, %v3563_v21 }
 0x11a   : > { %v1894_v60 = vrot.slane %v1892_v33, 1 }
 0x11c   : > { %5298 = vmatpush3.bf16.msra.mxu1 %v5766_v15  ;;  %v3556_v15 = vsel %vm3535_vm5, %v3553_v40, %v3555_v58 }
 0x11e   : > { %5004 = vmatmul.mubr.bf16.gmra.mrb[16].mxu1 %v1475_v59  ;;  %v1881_v59 = vsel %vm1792_vm1, %v6007_v34, %v1880_v56  ;;  %v1913_v34 = vshll.u32 %v6552_v5, 16  ;;  %v1919_v5 = vshrl.u32 %v6561_v18, 16 }
 0x11f   : > { %5248 = vmatmul.mubr.bf16.vlgmr.msra.gmra.mrb[0].mxu0 %v3540_v25  ;;  %5007 = vmatprep.mubr.bf16.mxu1 %v1477_v4  ;;  %v1897_v25 = vrot.slane %v1895_v14, 2  ;;  %v1889_v4 = vor.u32 %v1888_v3, %v1885_v17 }
 0x120   : > { %5251 = vmatprep.mubr.bf16.mxu0 %v3542_v27  ;;  %v3559_v27 = vrot.slane %v6300_v10, 3  ;;  %v1915_v9 = vrot.slane %v1913_v34, 2  ;;  %v1921_v44 = vrot.slane %v1919_v5, 1 }
 0x121   : > { %v1898_v31 = vor.u32 %v1897_v25, %v1894_v60  ;;  %v1890_v41 = vsel %vm1792_vm1, %v1880_v56, %v1889_v4  ;;  %v5773_v56 = vld [vmem:[%s5846_s10 + $0x98] ss:$0 sps:$4 sm:$0x33]  }
 0x122   : > { %v3562_v1 = vsel %vm3535_vm5, %v3559_v27, %v3561_v16  ;;  %v1916_v26 = vor.u32 %v1915_v9, %v1912_v38  ;;  %v1925_v29 = vor.u32 %v1924_v62, %v1921_v44  ;;  %v1958_v33 = vshll.u32 %v5773_v56, 16  ;;  %v6641_v38 = vld [vmem:[%s6708_s2] ss:$0 sm:$0xff] }
 0x124   : > { %v1926_v6 = vsel %vm1792_vm1, %v1916_v26, %v1925_v29  ;;  %v1960_v17 = vrot.slane %v1958_v33, 2 }
 0x126   : > { %5008 = vmatmul.mubr.bf16.gmra.mrb[20].mxu1 %v1479_v55  ;;  %v1903_v55 = vrot.slane %v1901_v23, 1 }
 0x127   : > { %5252 = vmatmul.mubr.bf16.gmra.mrb[4].mxu0 %v3544_v11  ;;  %5011 = vmatprep.mubr.bf16.mxu1 %v1481_v12  ;;  %v1906_v11 = vrot.slane %v1904_v2, 2  ;;  %v3560_v12 = vsel %vm3535_vm5, %v3557_v0, %v3559_v27 }
 0x128   : > { %5255 = vmatprep.mubr.bf16.mxu0 %v3546_v13  ;;  %v1899_v13 = vsel %vm1792_vm1, %v1889_v4, %v1898_v31 }
 0x129   : > { %v1907_v10 = vor.u32 %v1906_v11, %v1903_v55 }
 0x12b   : > { %v1917_v42 = vsel %vm1792_vm1, %v1907_v10, %v1916_v26 }
 0x12e   : > { %5012 = vmatmul.mubr.bf16.gmra.mrb[24].mxu1 %v1483_v22  ;;  %v1928_v22 = vshrl.u32 %v6566_v20, 16 }
 0x12f   : > { %5256 = vmatmul.mubr.bf16.gmra.mrb[8].mxu0 %v3548_v30  ;;  %5015 = vmatprep.mubr.bf16.mxu1 %v1485_v7  ;;  %v1931_v30 = vshll.u32 %v6566_v20, 16  ;;  %v3565_v7 = vrot.slane %v6323_v54, 3  ;;  %v1937_v20 = vshrl.u32 %v6575_v39, 16  ;;  %v1940_v54 = vshll.u32 %v6575_v39, 16 }
 0x130   : > { %5259 = vmatprep.mubr.bf16.mxu0 %v3550_v37  ;;  %v1908_v37 = vsel %vm1792_vm1, %v1898_v31, %v1907_v10  ;;  %v1930_v32 = vrot.slane %v1928_v22, 1 }
 0x131   : > { %v1933_v18 = vrot.slane %v1931_v30, 2  ;;  %v3566_v40 = vsel %vm3535_vm5, %v3563_v21, %v3565_v7  ;;  %v1939_v49 = vrot.slane %v1937_v20, 1 }
 0x133   : > { %v1934_v46 = vor.u32 %v1933_v18, %v1930_v32 }
 0x135   : > { %v1935_v52 = vsel %vm1792_vm1, %v1925_v29, %v1934_v46 }
 0x136   : > { %5016 = vmatmul.mubr.bf16.gmra.mrb[28].mxu1 %v1487_v45  ;;  %v3567_v45 = vrot.slane %v6337_v48, 3 }
 0x137   : > { %5260 = vmatmul.mubr.bf16.gmra.mrb[12].mxu0 %v3552_v36  ;;  %5019 = vmatprep.mubr.bf16.mxu1 %v1489_v19  ;;  %v1946_v36 = vshrl.u32 %v6580_v35, 16  ;;  %v1949_v19 = vshll.u32 %v6580_v35, 16  ;;  %v1955_v35 = vshrl.u32 %v5773_v56, 16 }
 0x138   : > { %5263 = vmatprep.mubr.bf16.mxu0 %v3554_v50  ;;  %v1942_v50 = vrot.slane %v1940_v54, 2  ;;  %v3568_v51 = vsel %vm3535_vm5, %v3565_v7, %v3567_v45  ;;  %v3570_v48 = vsel %vm3535_vm5, %v3567_v45, %v3569_v28 }
 0x139   : > { %v1948_v53 = vrot.slane %v1946_v36, 1  ;;  %v1951_v58 = vrot.slane %v1949_v19, 2 }
 0x13a   : > { %v1943_v39 = vor.u32 %v1942_v50, %v1939_v49 }
 0x13b   : > { %v1952_v14 = vor.u32 %v1951_v58, %v1948_v53 }
 0x13c   : > { %v1944_v0 = vsel %vm1792_vm1, %v1934_v46, %v1943_v39 }
 0x13d   : > { %v1953_v3 = vsel %vm1792_vm1, %v1943_v39, %v1952_v14 }
 0x13e   : > { %5020 = vmatmul.mubr.bf16.gmra.mrb[32].mxu1 %v1491_v61  ;;  %v1957_v61 = vrot.slane %v1955_v35, 1 }
 0x13f   : > { %5264 = vmatmul.mubr.bf16.gmra.mrb[16].mxu0 %v3556_v15  ;;  %5055 = vmatprep.mubr.bf16.mxu1 %v1881_v59 }
 0x140   : > { %5267 = vmatprep.mubr.bf16.mxu0 %v3558_v8  ;;  %v1961_v47 = vor.u32 %v1960_v17, %v1957_v61 }
 0x142   : > { %v1962_v28 = vsel %vm1792_vm1, %v1952_v14, %v1961_v47 }
 0x146   : > { %5056 = vmatmul.mubr.bf16.vlgmr.msra.gmra.mrb[16].mxu1 %v1890_v41 }
 0x147   : > { %5268 = vmatmul.mubr.bf16.gmra.mrb[20].mxu0 %v3560_v12  ;;  %5059 = vmatprep.mubr.bf16.mxu1 %v1899_v13 }
 0x148   : > { %5271 = vmatprep.mubr.bf16.mxu0 %v3562_v1 }
 0x14e   : > { %5060 = vmatmul.mubr.bf16.gmra.mrb[20].mxu1 %v1908_v37 }
 0x14f   : > { %5272 = vmatmul.mubr.bf16.gmra.mrb[24].mxu0 %v3564_v43  ;;  %5063 = vmatprep.mubr.bf16.mxu1 %v1917_v42 }
 0x150   : > { %5275 = vmatprep.mubr.bf16.mxu0 %v3566_v40 }
 0x156   : > { %5064 = vmatmul.mubr.bf16.gmra.mrb[24].mxu1 %v1926_v6 }
 0x157   : > { %5276 = vmatmul.mubr.bf16.gmra.mrb[28].mxu0 %v3568_v51  ;;  %5067 = vmatprep.mubr.bf16.mxu1 %v1935_v52 }
 0x158   : > { %5279 = vmatprep.mubr.bf16.mxu0 %v3570_v48 }
 0x15e   : > { %5068 = vmatmul.mubr.bf16.gmra.mrb[28].mxu1 %v1944_v0 }
 0x15f   : > { %5280 = vmatmul.mubr.bf16.gmra.mrb[32].mxu0 %v6425_v63  ;;  %5071 = vmatprep.mubr.bf16.mxu1 %v1953_v3 }
 0x166   : > { %5072 = vmatmul.mubr.bf16.gmra.mrb[32].mxu1 %v1962_v28 }
 0x1d1   : > { %v4989_v15 = vpop.f32.mrb[0].mxu1 }
 0x1d2   : > { %v1592_v59 = vpop.f32.mrb[1].mxu1 }
 0x1d3   : > { %v4990_v60 = vpop.f32.mrb[2].mxu1 }
 0x1d4   : > { %v1595_v25 = vpop.f32.mrb[3].mxu1 }
 0x1d9   : > { %v4993_v8 = vpop.f32.mrb[4].mxu1 }
 0x1da   : > { %v1608_v4 = vpop.f32.mrb[5].mxu1 }
 0x1db   : > { %v4994_v23 = vpop.f32.mrb[6].mxu1 }
 0x1dc   : > { %v1611_v2 = vpop.f32.mrb[7].mxu1 }
 0x1e1   : > { %v4997_v27 = vpop.f32.mrb[8].mxu1 }
 0x1e2   : > { %v1624_v31 = vpop.f32.mrb[9].mxu1 }
 0x1e3   : > { %v4998_v24 = vpop.f32.mrb[10].mxu1 }
 0x1e4   : > { %v1627_v34 = vpop.f32.mrb[11].mxu1 }
 0x1e9   : > { %v5001_v16 = vpop.f32.mrb[12].mxu1 }
 0x1ea   : > { %v1640_v63 = vpop.f32.mrb[13].mxu1 }
 0x1eb   : > { %v5002_v41 = vpop.f32.mrb[14].mxu1 }
 0x1ec   : > { %v1643_v55 = vpop.f32.mrb[15].mxu1 }
 0x1f2   : > { %v5249_v11 = vpop.f32.mrb[0].mxu0 }
 0x1f3   : > { %v5299_v12 = vadd.f32 %v5249_v11, %v4989_v15  ;;  %v3673_v13 = vpop.f32.mrb[1].mxu0 }
 0x1f4   : > { %v5300_v9 = vadd.f32 %v3673_v13, %v1592_v59  ;;  %v5250_v1 = vpop.f32.mrb[2].mxu0 }
 0x1f5   : > { %v5301_v10 = vadd.f32 %v5250_v1, %v4990_v60  ;;  %v3676_v5 = vpop.f32.mrb[3].mxu0  ;;  %v3861_v21 = vadd.f32 %v5299_v12, %v6641_v38 }
 0x1f6   : > { %v5302_v57 = vadd.f32 %v3676_v5, %v1595_v25  ;;  %v3859_v22 = vadd.f32 %v5300_v9, %v6641_v38 }
 0x1f7   : > { %v3862_v26 = vadd.f32 %v5301_v10, %v6641_v38 }
 0x1f8   : > { %v3860_v30 = vadd.f32 %v5302_v57, %v6641_v38 }
 0x1f9   : > { %v4482_v7 = vpack.c.bf16 %v3862_v26, %v3861_v21 }
 0x1fa   : > { %v4477_v37 = vpack.c.bf16 %v3860_v30, %v3859_v22  ;;  %v5253_v44 = vpop.f32.mrb[4].mxu0 }
 0x1fb   : > { %4564 = vst [vmem:[%s6650_s11 + $0x8] sm:$0xff] %v4482_v7   ;;  %v5303_v62 = vadd.f32 %v5253_v44, %v4993_v8  ;;  %v3689_v43 = vpop.f32.mrb[5].mxu0 }
 0x1fc   : > { %4478 = vst [vmem:[%s6650_s11] sm:$0xff] %v4477_v37   ;;  %v5304_v42 = vadd.f32 %v3689_v43, %v1608_v4  ;;  %v5254_v32 = vpop.f32.mrb[6].mxu0 }
 0x1fd   : > { %v5305_v18 = vadd.f32 %v5254_v32, %v4994_v23  ;;  %v3692_v40 = vpop.f32.mrb[7].mxu0  ;;  %v3865_v20 = vadd.f32 %v5303_v62, %v6641_v38 }
 0x1fe   : > { %v5306_v29 = vadd.f32 %v3692_v40, %v1611_v2  ;;  %v3863_v45 = vadd.f32 %v5304_v42, %v6641_v38 }
 0x1ff   : > { %v3866_v54 = vadd.f32 %v5305_v18, %v6641_v38 }
 0x200   : > { %v3864_v46 = vadd.f32 %v5306_v29, %v6641_v38 }
 0x201   : > { %v4492_v36 = vpack.c.bf16 %v3866_v54, %v3865_v20 }
 0x202   : > { %v4487_v19 = vpack.c.bf16 %v3864_v46, %v3863_v45  ;;  %v5257_v6 = vpop.f32.mrb[8].mxu0 }
 0x203   : > { %4566 = vst [vmem:[%s6650_s11 + $0x18] sm:$0xff] %v4492_v36   ;;  %v5307_v49 = vadd.f32 %v5257_v6, %v4997_v27  ;;  %v3705_v50 = vpop.f32.mrb[9].mxu0 }
 0x204   : > { %4565 = vst [vmem:[%s6650_s11 + $0x10] sm:$0xff] %v4487_v19   ;;  %v5308_v51 = vadd.f32 %v3705_v50, %v1624_v31  ;;  %v5258_v52 = vpop.f32.mrb[10].mxu0 }
 0x205   : > { %v5309_v53 = vadd.f32 %v5258_v52, %v4998_v24  ;;  %v3708_v58 = vpop.f32.mrb[11].mxu0  ;;  %v3869_v39 = vadd.f32 %v5307_v49, %v6641_v38 }
 0x206   : > { %v5310_v48 = vadd.f32 %v3708_v58, %v1627_v34  ;;  %v3867_v35 = vadd.f32 %v5308_v51, %v6641_v38 }
 0x207   : > { %v3870_v56 = vadd.f32 %v5309_v53, %v6641_v38 }
 0x208   : > { %v3868_v33 = vadd.f32 %v5310_v48, %v6641_v38 }
 0x209   : > { %v4502_v14 = vpack.c.bf16 %v3870_v56, %v3869_v39 }
 0x20a   : > { %v4497_v0 = vpack.c.bf16 %v3868_v33, %v3867_v35  ;;  %v5261_v61 = vpop.f32.mrb[12].mxu0 }
 0x20b   : > { %4568 = vst [vmem:[%s6650_s11 + $0x28] sm:$0xff] %v4502_v14   ;;  %v5311_v17 = vadd.f32 %v5261_v61, %v5001_v16  ;;  %v3721_v3 = vpop.f32.mrb[13].mxu0 }
 0x20c   : > { %4567 = vst [vmem:[%s6650_s11 + $0x20] sm:$0xff] %v4497_v0   ;;  %v5312_v47 = vadd.f32 %v3721_v3, %v1640_v63  ;;  %v5262_v28 = vpop.f32.mrb[14].mxu0 }
 0x20d   : > { %v5313_v15 = vadd.f32 %v5262_v28, %v5002_v41  ;;  %v3724_v59 = vpop.f32.mrb[15].mxu0  ;;  %v3873_v25 = vadd.f32 %v5311_v17, %v6641_v38 }
 0x20e   : > { %v5314_v60 = vadd.f32 %v3724_v59, %v1643_v55  ;;  %v3871_v4 = vadd.f32 %v5312_v47, %v6641_v38 }
 0x20f   : > { %v3874_v8 = vadd.f32 %v5313_v15, %v6641_v38 }
 0x210   : > { %v3872_v23 = vadd.f32 %v5314_v60, %v6641_v38 }
 0x211   : > { %v4512_v2 = vpack.c.bf16 %v3874_v8, %v3873_v25 }
 0x212   : > { %v4507_v27 = vpack.c.bf16 %v3872_v23, %v3871_v4  ;;  %v5265_v31 = vpop.f32.mrb[16].mxu0 }
 0x213   : > { %4570 = vst [vmem:[%s6650_s11 + $0x38] sm:$0xff] %v4512_v2   ;;  %v3737_v24 = vpop.f32.mrb[17].mxu0 }
 0x214   : > { %4569 = vst [vmem:[%s6650_s11 + $0x30] sm:$0xff] %v4507_v27   ;;  %v5266_v34 = vpop.f32.mrb[18].mxu0 }
 0x215   : > { %v3740_v16 = vpop.f32.mrb[19].mxu0 }
 0x219   : > { %v5057_v63 = vpop.f32.mrb[16].mxu1 }
 0x21a   : > { %v5315_v41 = vadd.f32 %v5265_v31, %v5057_v63  ;;  %v5269_v11 = vpop.f32.mrb[20].mxu0  ;;  %v2127_v55 = vpop.f32.mrb[17].mxu1 }
 0x21b   : > { %v5316_v12 = vadd.f32 %v3737_v24, %v2127_v55  ;;  %v3753_v13 = vpop.f32.mrb[21].mxu0  ;;  %v5058_v9 = vpop.f32.mrb[18].mxu1 }
 0x21c   : > { %v5317_v1 = vadd.f32 %v5266_v34, %v5058_v9  ;;  %v5270_v10 = vpop.f32.mrb[22].mxu0  ;;  %v2130_v5 = vpop.f32.mrb[19].mxu1  ;;  %v3877_v26 = vadd.f32 %v5315_v41, %v6641_v38 }
 0x21d   : > { %v5318_v57 = vadd.f32 %v3740_v16, %v2130_v5  ;;  %v3756_v21 = vpop.f32.mrb[23].mxu0  ;;  %v3875_v30 = vadd.f32 %v5316_v12, %v6641_v38 }
 0x21e   : > { %v3878_v22 = vadd.f32 %v5317_v1, %v6641_v38 }
 0x21f   : > { %v3876_v7 = vadd.f32 %v5318_v57, %v6641_v38 }
 0x220   : > { %v4522_v37 = vpack.c.bf16 %v3878_v22, %v3877_v26 }
 0x221   : > { %v4517_v44 = vpack.c.bf16 %v3876_v7, %v3875_v30  ;;  %v5061_v62 = vpop.f32.mrb[20].mxu1 }
 0x222   : > { %4572 = vst [vmem:[%s6650_s11 + $0x48] sm:$0xff] %v4522_v37   ;;  %v5319_v43 = vadd.f32 %v5269_v11, %v5061_v62  ;;  %v5273_v42 = vpop.f32.mrb[24].mxu0  ;;  %v2143_v32 = vpop.f32.mrb[21].mxu1 }
 0x223   : > { %4571 = vst [vmem:[%s6650_s11 + $0x40] sm:$0xff] %v4517_v44   ;;  %v5320_v18 = vadd.f32 %v3753_v13, %v2143_v32  ;;  %v3769_v40 = vpop.f32.mrb[25].mxu0  ;;  %v5062_v29 = vpop.f32.mrb[22].mxu1 }
 0x224   : > { %v5321_v20 = vadd.f32 %v5270_v10, %v5062_v29  ;;  %v5274_v54 = vpop.f32.mrb[26].mxu0  ;;  %v2146_v45 = vpop.f32.mrb[23].mxu1  ;;  %v3881_v19 = vadd.f32 %v5319_v43, %v6641_v38 }
 0x225   : > { %v5322_v46 = vadd.f32 %v3756_v21, %v2146_v45  ;;  %v3772_v36 = vpop.f32.mrb[27].mxu0  ;;  %v3879_v49 = vadd.f32 %v5320_v18, %v6641_v38 }
 0x226   : > { %v3882_v6 = vadd.f32 %v5321_v20, %v6641_v38 }
 0x227   : > { %v3880_v50 = vadd.f32 %v5322_v46, %v6641_v38 }
 0x228   : > { %v4532_v51 = vpack.c.bf16 %v3882_v6, %v3881_v19 }
 0x229   : > { %v4527_v52 = vpack.c.bf16 %v3880_v50, %v3879_v49  ;;  %v5065_v53 = vpop.f32.mrb[24].mxu1 }
 0x22a   : > { %4574 = vst [vmem:[%s6650_s11 + $0x58] sm:$0xff] %v4532_v51   ;;  %v5323_v58 = vadd.f32 %v5273_v42, %v5065_v53  ;;  %v5277_v48 = vpop.f32.mrb[28].mxu0  ;;  %v2159_v39 = vpop.f32.mrb[25].mxu1 }
 0x22b   : > { %4573 = vst [vmem:[%s6650_s11 + $0x50] sm:$0xff] %v4527_v52   ;;  %v5324_v56 = vadd.f32 %v3769_v40, %v2159_v39  ;;  %v3785_v35 = vpop.f32.mrb[29].mxu0  ;;  %v5066_v33 = vpop.f32.mrb[26].mxu1 }
 0x22c   : > { %v5325_v14 = vadd.f32 %v5274_v54, %v5066_v33  ;;  %v5278_v0 = vpop.f32.mrb[30].mxu0  ;;  %v2162_v61 = vpop.f32.mrb[27].mxu1  ;;  %v3885_v47 = vadd.f32 %v5323_v58, %v6641_v38 }
 0x22d   : > { %v5326_v17 = vadd.f32 %v3772_v36, %v2162_v61  ;;  %v3788_v3 = vpop.f32.mrb[31].mxu0  ;;  %v3883_v15 = vadd.f32 %v5324_v56, %v6641_v38 }
 0x22e   : > { %v3886_v28 = vadd.f32 %v5325_v14, %v6641_v38 }
 0x22f   : > { %v3884_v59 = vadd.f32 %v5326_v17, %v6641_v38 }
 0x230   : > { %v4542_v60 = vpack.c.bf16 %v3886_v28, %v3885_v47 }
 0x231   : > { %v4537_v25 = vpack.c.bf16 %v3884_v59, %v3883_v15  ;;  %v5069_v8 = vpop.f32.mrb[28].mxu1 }
 0x232   : > { %4576 = vst [vmem:[%s6650_s11 + $0x68] sm:$0xff] %v4542_v60   ;;  %v5327_v4 = vadd.f32 %v5277_v48, %v5069_v8  ;;  %v5281_v23 = vpop.f32.mrb[32].mxu0  ;;  %v2175_v2 = vpop.f32.mrb[29].mxu1 }
 0x233   : > { %4575 = vst [vmem:[%s6650_s11 + $0x60] sm:$0xff] %v4537_v25   ;;  %v5328_v27 = vadd.f32 %v3785_v35, %v2175_v2  ;;  %v3801_v31 = vpop.f32.mrb[33].mxu0  ;;  %v5070_v24 = vpop.f32.mrb[30].mxu1 }
 0x234   : > { %v5329_v34 = vadd.f32 %v5278_v0, %v5070_v24  ;;  %v5282_v16 = vpop.f32.mrb[34].mxu0  ;;  %v2178_v63 = vpop.f32.mrb[31].mxu1  ;;  %v3889_v55 = vadd.f32 %v5327_v4, %v6641_v38 }
 0x235   : > { %v5330_v41 = vadd.f32 %v3788_v3, %v2178_v63  ;;  %v3804_v11 = vpop.f32.mrb[35].mxu0  ;;  %v3887_v13 = vadd.f32 %v5328_v27, %v6641_v38 }
 0x236   : > { %v3890_v12 = vadd.f32 %v5329_v34, %v6641_v38 }
 0x237   : > { %v3888_v9 = vadd.f32 %v5330_v41, %v6641_v38 }
 0x238   : > { %v4552_v1 = vpack.c.bf16 %v3890_v12, %v3889_v55 }
 0x239   : > { %v4547_v10 = vpack.c.bf16 %v3888_v9, %v3887_v13  ;;  %v5073_v5 = vpop.f32.mrb[32].mxu1 }
 0x23a   : > { %4578 = vst [vmem:[%s6650_s11 + $0x78] sm:$0xff] %v4552_v1   ;;  %v5331_v57 = vadd.f32 %v5281_v23, %v5073_v5  ;;  %v2191_v21 = vpop.f32.mrb[33].mxu1 }
 0x23b   : > { %4577 = vst [vmem:[%s6650_s11 + $0x70] sm:$0xff] %v4547_v10   ;;  %v5332_v26 = vadd.f32 %v3801_v31, %v2191_v21  ;;  %v5074_v22 = vpop.f32.mrb[34].mxu1 }
 0x23c   : > { %v5333_v30 = vadd.f32 %v5282_v16, %v5074_v22  ;;  %v2194_v7 = vpop.f32.mrb[35].mxu1  ;;  %v3893_v44 = vadd.f32 %v5331_v57, %v6641_v38 }
 0x23d   : > { %v5334_v37 = vadd.f32 %v3804_v11, %v2194_v7  ;;  %v3891_v43 = vadd.f32 %v5332_v26, %v6641_v38 }
 0x23e   : > { %v3894_v62 = vadd.f32 %v5333_v30, %v6641_v38 }
 0x23f   : > { %v3892_v42 = vadd.f32 %v5334_v37, %v6641_v38 }
 0x240   : > { %v4562_v32 = vpack.c.bf16 %v3894_v62, %v3893_v44 }
 0x241   : > { %v4557_v18 = vpack.c.bf16 %v3892_v42, %v3891_v43 }
 0x242   : > { %4580 = vst [vmem:[%s6650_s11 + $0x88] sm:$0xff] %v4562_v32  }
 0x243   : > { %4579 = vst [vmem:[%s6650_s11 + $0x80] sm:$0xff] %v4557_v18  }
 0x244 PF: > { %s13_s12 = sadd.s32 1, %s5780_s12  }
 0x245   : > { %p10_p4 = scmp.ge.s32.totalorder %s13_s12, 4  }
 0x247   :  { %12 = sbr.rel (!%p10_p4) target bundleno = 1 (0x1), region = 70 }

// kernel: hybridnet_forward.19
= control target key start
LH: loop header
LB: loop body
LE: loop exit
PB: predicated region body
PF: predicated region fallthrough
CT: control target
= control target key end

     0   :  { %vm294_vm0 = vcmask 785408   ;;  %s1889_s1 = inlined_call_operand.vmem [shape: bf16[96,128], index: 1, kind: input, shape index: {}]   ;;  %s1890_s0 = inlined_call_operand.vmem [shape: bf16[512,96], index: 0, kind: input, shape index: {}]   ;;  %s1891_s2 = inlined_call_operand.vmem [shape: f32[1,128], index: 2, kind: input, shape index: {}]   ;;  %s1892_s3 = inlined_call_operand.vmem [shape: bf16[512,128], index: 3, kind: output, shape index: {}]  }
   0x1   :  { %v1520_v0 = vld [vmem:[%s1889_s1] sm:$0xff]   ;;  %v1521_v1 = vld [vmem:[%s1889_s1 + $0x8] sm:$0xff]   ;;  %v1522_v2 = vld [vmem:[%s1889_s1 + $0x10] sm:$0xff]  }
   0x2   :  { %1432 = vmatprep.subr.bf16.mxu0 %v1520_v0  ;;  %1508 = vmatprep.subr.bf16.mxu1 %v1520_v0  ;;  %v1526_v3 = vld [vmem:[%s1890_s0] sm:$0xff]   ;;  %v1523_v5 = vld [vmem:[%s1889_s1 + $0x18] sm:$0xff]   ;;  %v1525_v7 = vld [vmem:[%s1889_s1 + $0x28] sm:$0xff]  }
   0x3   :  { %1433 = vmatpush3.bf16.msra.mxu0 %v1520_v0  ;;  %1514 = vmatpush3.bf16.msra.mxu1 %v1520_v0  ;;  %v1527_v4 = vld [vmem:[%s1890_s0 + $0x80] sm:$0xff]   ;;  %v1528_v8 = vld [vmem:[%s1890_s0 + $0x8] sm:$0xff]   ;;  %v1530_v10 = vld [vmem:[%s1890_s0 + $0x10] sm:$0xff]  }
   0x4   :  { %1434 = vmatprep.subr.bf16.mxu0 %v1521_v1  ;;  %1509 = vmatprep.subr.bf16.mxu1 %v1521_v1  ;;  %v1524_v6 = vld [vmem:[%s1889_s1 + $0x20] sm:$0xff]   ;;  %v1529_v9 = vld [vmem:[%s1890_s0 + $0x88] sm:$0xff]   ;;  %v1531_v11 = vld [vmem:[%s1890_s0 + $0x90] sm:$0xff]  }
   0x5   :  { %1444 = vmatprep.mubr.msk.bf16.mxu0 %vm294_vm0, %v1526_v3  ;;  %1476 = vmatprep.mubr.msk.bf16.mxu1 %vm294_vm0, %v1527_v4  ;;  %v1532_v12 = vld [vmem:[%s1890_s0 + $0x18] sm:$0xff]   ;;  %v1534_v14 = vld [vmem:[%s1890_s0 + $0x20] sm:$0xff]   ;;  %v1536_v16 = vld [vmem:[%s1890_s0 + $0x28] sm:$0xff]  }
   0x6   :  { %v1533_v13 = vld [vmem:[%s1890_s0 + $0x98] sm:$0xff]   ;;  %v1535_v15 = vld [vmem:[%s1890_s0 + $0xa0] sm:$0xff]   ;;  %v1537_v17 = vld [vmem:[%s1890_s0 + $0xa8] sm:$0xff]  }
   0x7   :  { %1435 = vmatpush3.bf16.msra.mxu0 %v1521_v1  ;;  %1515 = vmatpush3.bf16.msra.mxu1 %v1521_v1  ;;  %v1538_v18 = vld [vmem:[%s1890_s0 + $0x30] sm:$0xff]   ;;  %v1540_v20 = vld [vmem:[%s1890_s0 + $0x38] sm:$0xff]   ;;  %v1542_v22 = vld [vmem:[%s1890_s0 + $0x40] sm:$0xff]  }
   0x8   :  { %1436 = vmatprep.subr.bf16.mxu0 %v1522_v2  ;;  %1510 = vmatprep.subr.bf16.mxu1 %v1522_v2  ;;  %v1539_v19 = vld [vmem:[%s1890_s0 + $0xb0] sm:$0xff]   ;;  %v1541_v21 = vld [vmem:[%s1890_s0 + $0xb8] sm:$0xff]   ;;  %v1543_v23 = vld [vmem:[%s1890_s0 + $0xc0] sm:$0xff]  }
   0x9   :  { %v1544_v24 = vld [vmem:[%s1890_s0 + $0x48] sm:$0xff]   ;;  %v1546_v26 = vld [vmem:[%s1890_s0 + $0x50] sm:$0xff]   ;;  %v1548_v28 = vld [vmem:[%s1890_s0 + $0x58] sm:$0xff]  }
   0xa   :  { %v1545_v25 = vld [vmem:[%s1890_s0 + $0xc8] sm:$0xff]   ;;  %v1547_v27 = vld [vmem:[%s1890_s0 + $0xd0] sm:$0xff]   ;;  %v1549_v29 = vld [vmem:[%s1890_s0 + $0xd8] sm:$0xff]  }
   0xb   :  { %1437 = vmatpush3.bf16.msra.mxu0 %v1522_v2  ;;  %1516 = vmatpush3.bf16.msra.mxu1 %v1522_v2  ;;  %v1550_v30 = vld [vmem:[%s1890_s0 + $0x60] sm:$0xff]   ;;  %v1552_v32 = vld [vmem:[%s1890_s0 + $0x68] sm:$0xff]   ;;  %v1554_v34 = vld [vmem:[%s1890_s0 + $0x70] sm:$0xff]  }
   0xc   :  { %1438 = vmatprep.subr.bf16.mxu0 %v1523_v5  ;;  %1511 = vmatprep.subr.bf16.mxu1 %v1523_v5  ;;  %v1551_v31 = vld [vmem:[%s1890_s0 + $0xe0] sm:$0xff]   ;;  %v1553_v33 = vld [vmem:[%s1890_s0 + $0xe8] sm:$0xff]   ;;  %v1555_v35 = vld [vmem:[%s1890_s0 + $0xf0] sm:$0xff]  }
   0xd   :  { %v1556_v36 = vld [vmem:[%s1890_s0 + $0x78] sm:$0xff]   ;;  %v1727_v39 = vld [vmem:[%s1891_s2] ss:$0 sm:$0xff] }
   0xe   :  { %v1557_v37 = vld [vmem:[%s1890_s0 + $0xf8] sm:$0xff]  }
   0xf   :  { %1439 = vmatpush3.bf16.msra.mxu0 %v1523_v5  ;;  %1517 = vmatpush3.bf16.msra.mxu1 %v1523_v5 }
  0x10   :  { %1440 = vmatprep.subr.bf16.mxu0 %v1524_v6  ;;  %1512 = vmatprep.subr.bf16.mxu1 %v1524_v6 }
  0x13   :  { %1441 = vmatpush3.bf16.msra.mxu0 %v1524_v6  ;;  %1518 = vmatpush3.bf16.msra.mxu1 %v1524_v6 }
  0x14   :  { %1442 = vmatprep.subr.bf16.mxu0 %v1525_v7  ;;  %1513 = vmatprep.subr.bf16.mxu1 %v1525_v7 }
  0x17   :  { %1443 = vmatpush3.bf16.msra.mxu0 %v1525_v7  ;;  %1519 = vmatpush3.bf16.msra.mxu1 %v1525_v7 }
  0x1a   :  { %1445 = vmatmul.mubr.msk.bf16.vlgmr.msra.gmra.mrb[0].mxu0 %vm294_vm0, %v1528_v8  ;;  %1477 = vmatmul.mubr.msk.bf16.vlgmr.msra.gmra.mrb[0].mxu1 %vm294_vm0, %v1529_v9 }
  0x1b   :  { %1448 = vmatprep.mubr.msk.bf16.mxu0 %vm294_vm0, %v1530_v10  ;;  %1480 = vmatprep.mubr.msk.bf16.mxu1 %vm294_vm0, %v1531_v11 }
  0x22   :  { %1449 = vmatmul.mubr.msk.bf16.gmra.mrb[4].mxu0 %vm294_vm0, %v1532_v12  ;;  %1481 = vmatmul.mubr.msk.bf16.gmra.mrb[4].mxu1 %vm294_vm0, %v1533_v13 }
  0x23   :  { %1452 = vmatprep.mubr.msk.bf16.mxu0 %vm294_vm0, %v1534_v14  ;;  %1484 = vmatprep.mubr.msk.bf16.mxu1 %vm294_vm0, %v1535_v15 }
  0x2a   :  { %1453 = vmatmul.mubr.msk.bf16.gmra.mrb[8].mxu0 %vm294_vm0, %v1536_v16  ;;  %1485 = vmatmul.mubr.msk.bf16.gmra.mrb[8].mxu1 %vm294_vm0, %v1537_v17 }
  0x2b   :  { %1456 = vmatprep.mubr.msk.bf16.mxu0 %vm294_vm0, %v1538_v18  ;;  %1488 = vmatprep.mubr.msk.bf16.mxu1 %vm294_vm0, %v1539_v19 }
  0x32   :  { %1457 = vmatmul.mubr.msk.bf16.gmra.mrb[12].mxu0 %vm294_vm0, %v1540_v20  ;;  %1489 = vmatmul.mubr.msk.bf16.gmra.mrb[12].mxu1 %vm294_vm0, %v1541_v21 }
  0x33   :  { %1460 = vmatprep.mubr.msk.bf16.mxu0 %vm294_vm0, %v1542_v22  ;;  %1492 = vmatprep.mubr.msk.bf16.mxu1 %vm294_vm0, %v1543_v23 }
  0x3a   :  { %1461 = vmatmul.mubr.msk.bf16.gmra.mrb[16].mxu0 %vm294_vm0, %v1544_v24  ;;  %1493 = vmatmul.mubr.msk.bf16.gmra.mrb[16].mxu1 %vm294_vm0, %v1545_v25 }
  0x3b   :  { %1464 = vmatprep.mubr.msk.bf16.mxu0 %vm294_vm0, %v1546_v26  ;;  %1496 = vmatprep.mubr.msk.bf16.mxu1 %vm294_vm0, %v1547_v27 }
  0x42   :  { %1465 = vmatmul.mubr.msk.bf16.gmra.mrb[20].mxu0 %vm294_vm0, %v1548_v28  ;;  %1497 = vmatmul.mubr.msk.bf16.gmra.mrb[20].mxu1 %vm294_vm0, %v1549_v29 }
  0x43   :  { %1468 = vmatprep.mubr.msk.bf16.mxu0 %vm294_vm0, %v1550_v30  ;;  %1500 = vmatprep.mubr.msk.bf16.mxu1 %vm294_vm0, %v1551_v31 }
  0x4a   :  { %1469 = vmatmul.mubr.msk.bf16.gmra.mrb[24].mxu0 %vm294_vm0, %v1552_v32  ;;  %1501 = vmatmul.mubr.msk.bf16.gmra.mrb[24].mxu1 %vm294_vm0, %v1553_v33 }
  0x4b   :  { %1472 = vmatprep.mubr.msk.bf16.mxu0 %vm294_vm0, %v1554_v34  ;;  %1504 = vmatprep.mubr.msk.bf16.mxu1 %vm294_vm0, %v1555_v35 }
  0x52   :  { %1473 = vmatmul.mubr.msk.bf16.gmra.mrb[28].mxu0 %vm294_vm0, %v1556_v36  ;;  %1505 = vmatmul.mubr.msk.bf16.gmra.mrb[28].mxu1 %vm294_vm0, %v1557_v37 }
  0xed   :  { %v1446_v38 = vpop.f32.mrb[0].mxu0  ;;  %v1478_v40 = vpop.f32.mrb[0].mxu1 }
  0xee   :  { %v425_v41 = vpop.f32.mrb[1].mxu0  ;;  %v553_v42 = vpop.f32.mrb[1].mxu1  ;;  %v434_v45 = vadd.f32 %v1446_v38, %v1727_v39  ;;  %v562_v46 = vadd.f32 %v1478_v40, %v1727_v39 }
  0xef   :  { %v1447_v43 = vpop.f32.mrb[2].mxu0  ;;  %v1479_v44 = vpop.f32.mrb[2].mxu1  ;;  %v426_v51 = vadd.f32 %v1727_v39, %v425_v41  ;;  %v554_v52 = vadd.f32 %v1727_v39, %v553_v42 }
  0xf0   :  { %v437_v47 = vadd.f32 %v1447_v43, %v1727_v39  ;;  %v565_v48 = vadd.f32 %v1479_v44, %v1727_v39  ;;  %v428_v49 = vpop.f32.mrb[3].mxu0  ;;  %v556_v50 = vpop.f32.mrb[3].mxu1 }
  0xf1   :  { %v429_v53 = vadd.f32 %v1727_v39, %v428_v49  ;;  %v557_v54 = vadd.f32 %v1727_v39, %v556_v50 }
  0xf2   :  { %v1211_v55 = vpack.c.bf16 %v437_v47, %v434_v45  ;;  %v1291_v56 = vpack.c.bf16 %v565_v48, %v562_v46 }
  0xf3   :  { %v1206_v57 = vpack.c.bf16 %v429_v53, %v426_v51  ;;  %v1286_v58 = vpack.c.bf16 %v557_v54, %v554_v52 }
  0xf4   :  { %1363 = vst [vmem:[%s1892_s3 + $0x8] sm:$0xff] %v1211_v55   ;;  %1379 = vst [vmem:[%s1892_s3 + $0x88] sm:$0xff] %v1291_v56  }
  0xf5   :  { %1207 = vst [vmem:[%s1892_s3] sm:$0xff] %v1206_v57   ;;  %1378 = vst [vmem:[%s1892_s3 + $0x80] sm:$0xff] %v1286_v58   ;;  %v1450_v59 = vpop.f32.mrb[4].mxu0  ;;  %v1482_v60 = vpop.f32.mrb[4].mxu1 }
  0xf6   :  { %v441_v61 = vpop.f32.mrb[5].mxu0  ;;  %v569_v62 = vpop.f32.mrb[5].mxu1  ;;  %v450_v1 = vadd.f32 %v1450_v59, %v1727_v39  ;;  %v578_v2 = vadd.f32 %v1482_v60, %v1727_v39 }
  0xf7   :  { %v1451_v63 = vpop.f32.mrb[6].mxu0  ;;  %v1483_v0 = vpop.f32.mrb[6].mxu1  ;;  %v442_v7 = vadd.f32 %v1727_v39, %v441_v61  ;;  %v570_v8 = vadd.f32 %v1727_v39, %v569_v62 }
  0xf8   :  { %v453_v3 = vadd.f32 %v1451_v63, %v1727_v39  ;;  %v581_v4 = vadd.f32 %v1483_v0, %v1727_v39  ;;  %v444_v5 = vpop.f32.mrb[7].mxu0  ;;  %v572_v6 = vpop.f32.mrb[7].mxu1 }
  0xf9   :  { %v445_v9 = vadd.f32 %v1727_v39, %v444_v5  ;;  %v573_v10 = vadd.f32 %v1727_v39, %v572_v6 }
  0xfa   :  { %v1221_v11 = vpack.c.bf16 %v453_v3, %v450_v1  ;;  %v1301_v12 = vpack.c.bf16 %v581_v4, %v578_v2 }
  0xfb   :  { %v1216_v13 = vpack.c.bf16 %v445_v9, %v442_v7  ;;  %v1296_v14 = vpack.c.bf16 %v573_v10, %v570_v8 }
  0xfc   :  { %1365 = vst [vmem:[%s1892_s3 + $0x18] sm:$0xff] %v1221_v11   ;;  %1381 = vst [vmem:[%s1892_s3 + $0x98] sm:$0xff] %v1301_v12  }
  0xfd   :  { %1364 = vst [vmem:[%s1892_s3 + $0x10] sm:$0xff] %v1216_v13   ;;  %1380 = vst [vmem:[%s1892_s3 + $0x90] sm:$0xff] %v1296_v14   ;;  %v1454_v15 = vpop.f32.mrb[8].mxu0  ;;  %v1486_v16 = vpop.f32.mrb[8].mxu1 }
  0xfe   :  { %v457_v17 = vpop.f32.mrb[9].mxu0  ;;  %v585_v18 = vpop.f32.mrb[9].mxu1  ;;  %v466_v21 = vadd.f32 %v1454_v15, %v1727_v39  ;;  %v594_v22 = vadd.f32 %v1486_v16, %v1727_v39 }
  0xff   :  { %v1455_v19 = vpop.f32.mrb[10].mxu0  ;;  %v1487_v20 = vpop.f32.mrb[10].mxu1  ;;  %v458_v27 = vadd.f32 %v1727_v39, %v457_v17  ;;  %v586_v28 = vadd.f32 %v1727_v39, %v585_v18 }
 0x100   :  { %v469_v23 = vadd.f32 %v1455_v19, %v1727_v39  ;;  %v597_v24 = vadd.f32 %v1487_v20, %v1727_v39  ;;  %v460_v25 = vpop.f32.mrb[11].mxu0  ;;  %v588_v26 = vpop.f32.mrb[11].mxu1 }
 0x101   :  { %v461_v29 = vadd.f32 %v1727_v39, %v460_v25  ;;  %v589_v30 = vadd.f32 %v1727_v39, %v588_v26 }
 0x102   :  { %v1231_v31 = vpack.c.bf16 %v469_v23, %v466_v21  ;;  %v1311_v32 = vpack.c.bf16 %v597_v24, %v594_v22 }
 0x103   :  { %v1226_v33 = vpack.c.bf16 %v461_v29, %v458_v27  ;;  %v1306_v34 = vpack.c.bf16 %v589_v30, %v586_v28 }
 0x104   :  { %1367 = vst [vmem:[%s1892_s3 + $0x28] sm:$0xff] %v1231_v31   ;;  %1383 = vst [vmem:[%s1892_s3 + $0xa8] sm:$0xff] %v1311_v32  }
 0x105   :  { %1366 = vst [vmem:[%s1892_s3 + $0x20] sm:$0xff] %v1226_v33   ;;  %1382 = vst [vmem:[%s1892_s3 + $0xa0] sm:$0xff] %v1306_v34   ;;  %v1458_v35 = vpop.f32.mrb[12].mxu0  ;;  %v1490_v36 = vpop.f32.mrb[12].mxu1 }
 0x106   :  { %v473_v37 = vpop.f32.mrb[13].mxu0  ;;  %v601_v38 = vpop.f32.mrb[13].mxu1  ;;  %v482_v42 = vadd.f32 %v1458_v35, %v1727_v39  ;;  %v610_v43 = vadd.f32 %v1490_v36, %v1727_v39 }
 0x107   :  { %v1459_v40 = vpop.f32.mrb[14].mxu0  ;;  %v1491_v41 = vpop.f32.mrb[14].mxu1  ;;  %v474_v48 = vadd.f32 %v1727_v39, %v473_v37  ;;  %v602_v49 = vadd.f32 %v1727_v39, %v601_v38 }
 0x108   :  { %v485_v44 = vadd.f32 %v1459_v40, %v1727_v39  ;;  %v613_v45 = vadd.f32 %v1491_v41, %v1727_v39  ;;  %v476_v46 = vpop.f32.mrb[15].mxu0  ;;  %v604_v47 = vpop.f32.mrb[15].mxu1 }
 0x109   :  { %v477_v50 = vadd.f32 %v1727_v39, %v476_v46  ;;  %v605_v51 = vadd.f32 %v1727_v39, %v604_v47 }
 0x10a   :  { %v1241_v52 = vpack.c.bf16 %v485_v44, %v482_v42  ;;  %v1321_v53 = vpack.c.bf16 %v613_v45, %v610_v43 }
 0x10b   :  { %v1236_v54 = vpack.c.bf16 %v477_v50, %v474_v48  ;;  %v1316_v55 = vpack.c.bf16 %v605_v51, %v602_v49 }
 0x10c   :  { %1369 = vst [vmem:[%s1892_s3 + $0x38] sm:$0xff] %v1241_v52   ;;  %1385 = vst [vmem:[%s1892_s3 + $0xb8] sm:$0xff] %v1321_v53  }
 0x10d   :  { %1368 = vst [vmem:[%s1892_s3 + $0x30] sm:$0xff] %v1236_v54   ;;  %1384 = vst [vmem:[%s1892_s3 + $0xb0] sm:$0xff] %v1316_v55   ;;  %v1462_v56 = vpop.f32.mrb[16].mxu0  ;;  %v1494_v57 = vpop.f32.mrb[16].mxu1 }
 0x10e   :  { %v489_v58 = vpop.f32.mrb[17].mxu0  ;;  %v617_v59 = vpop.f32.mrb[17].mxu1  ;;  %v498_v62 = vadd.f32 %v1462_v56, %v1727_v39  ;;  %v626_v63 = vadd.f32 %v1494_v57, %v1727_v39 }
 0x10f   :  { %v1463_v60 = vpop.f32.mrb[18].mxu0  ;;  %v1495_v61 = vpop.f32.mrb[18].mxu1  ;;  %v490_v4 = vadd.f32 %v1727_v39, %v489_v58  ;;  %v618_v5 = vadd.f32 %v1727_v39, %v617_v59 }
 0x110   :  { %v501_v0 = vadd.f32 %v1463_v60, %v1727_v39  ;;  %v629_v1 = vadd.f32 %v1495_v61, %v1727_v39  ;;  %v492_v2 = vpop.f32.mrb[19].mxu0  ;;  %v620_v3 = vpop.f32.mrb[19].mxu1 }
 0x111   :  { %v493_v6 = vadd.f32 %v1727_v39, %v492_v2  ;;  %v621_v7 = vadd.f32 %v1727_v39, %v620_v3 }
 0x112   :  { %v1251_v8 = vpack.c.bf16 %v501_v0, %v498_v62  ;;  %v1331_v9 = vpack.c.bf16 %v629_v1, %v626_v63 }
 0x113   :  { %v1246_v10 = vpack.c.bf16 %v493_v6, %v490_v4  ;;  %v1326_v11 = vpack.c.bf16 %v621_v7, %v618_v5 }
 0x114   :  { %1371 = vst [vmem:[%s1892_s3 + $0x48] sm:$0xff] %v1251_v8   ;;  %1387 = vst [vmem:[%s1892_s3 + $0xc8] sm:$0xff] %v1331_v9  }
 0x115   :  { %1370 = vst [vmem:[%s1892_s3 + $0x40] sm:$0xff] %v1246_v10   ;;  %1386 = vst [vmem:[%s1892_s3 + $0xc0] sm:$0xff] %v1326_v11   ;;  %v1466_v12 = vpop.f32.mrb[20].mxu0  ;;  %v1498_v13 = vpop.f32.mrb[20].mxu1 }
 0x116   :  { %v505_v14 = vpop.f32.mrb[21].mxu0  ;;  %v633_v15 = vpop.f32.mrb[21].mxu1  ;;  %v514_v18 = vadd.f32 %v1466_v12, %v1727_v39  ;;  %v642_v19 = vadd.f32 %v1498_v13, %v1727_v39 }
 0x117   :  { %v1467_v16 = vpop.f32.mrb[22].mxu0  ;;  %v1499_v17 = vpop.f32.mrb[22].mxu1  ;;  %v506_v24 = vadd.f32 %v1727_v39, %v505_v14  ;;  %v634_v25 = vadd.f32 %v1727_v39, %v633_v15 }
 0x118   :  { %v517_v20 = vadd.f32 %v1467_v16, %v1727_v39  ;;  %v645_v21 = vadd.f32 %v1499_v17, %v1727_v39  ;;  %v508_v22 = vpop.f32.mrb[23].mxu0  ;;  %v636_v23 = vpop.f32.mrb[23].mxu1 }
 0x119   :  { %v509_v26 = vadd.f32 %v1727_v39, %v508_v22  ;;  %v637_v27 = vadd.f32 %v1727_v39, %v636_v23 }
 0x11a   :  { %v1261_v28 = vpack.c.bf16 %v517_v20, %v514_v18  ;;  %v1341_v29 = vpack.c.bf16 %v645_v21, %v642_v19 }
 0x11b   :  { %v1256_v30 = vpack.c.bf16 %v509_v26, %v506_v24  ;;  %v1336_v31 = vpack.c.bf16 %v637_v27, %v634_v25 }
 0x11c   :  { %1373 = vst [vmem:[%s1892_s3 + $0x58] sm:$0xff] %v1261_v28   ;;  %1389 = vst [vmem:[%s1892_s3 + $0xd8] sm:$0xff] %v1341_v29  }
 0x11d   :  { %1372 = vst [vmem:[%s1892_s3 + $0x50] sm:$0xff] %v1256_v30   ;;  %1388 = vst [vmem:[%s1892_s3 + $0xd0] sm:$0xff] %v1336_v31   ;;  %v1470_v32 = vpop.f32.mrb[24].mxu0  ;;  %v1502_v33 = vpop.f32.mrb[24].mxu1 }
 0x11e   :  { %v521_v34 = vpop.f32.mrb[25].mxu0  ;;  %v649_v35 = vpop.f32.mrb[25].mxu1  ;;  %v530_v38 = vadd.f32 %v1470_v32, %v1727_v39  ;;  %v658_v40 = vadd.f32 %v1502_v33, %v1727_v39 }
 0x11f   :  { %v1471_v36 = vpop.f32.mrb[26].mxu0  ;;  %v1503_v37 = vpop.f32.mrb[26].mxu1  ;;  %v522_v45 = vadd.f32 %v1727_v39, %v521_v34  ;;  %v650_v46 = vadd.f32 %v1727_v39, %v649_v35 }
 0x120   :  { %v533_v41 = vadd.f32 %v1471_v36, %v1727_v39  ;;  %v661_v42 = vadd.f32 %v1503_v37, %v1727_v39  ;;  %v524_v43 = vpop.f32.mrb[27].mxu0  ;;  %v652_v44 = vpop.f32.mrb[27].mxu1 }
 0x121   :  { %v525_v47 = vadd.f32 %v1727_v39, %v524_v43  ;;  %v653_v48 = vadd.f32 %v1727_v39, %v652_v44 }
 0x122   :  { %v1271_v49 = vpack.c.bf16 %v533_v41, %v530_v38  ;;  %v1351_v50 = vpack.c.bf16 %v661_v42, %v658_v40 }
 0x123   :  { %v1266_v51 = vpack.c.bf16 %v525_v47, %v522_v45  ;;  %v1346_v52 = vpack.c.bf16 %v653_v48, %v650_v46 }
 0x124   :  { %1375 = vst [vmem:[%s1892_s3 + $0x68] sm:$0xff] %v1271_v49   ;;  %1391 = vst [vmem:[%s1892_s3 + $0xe8] sm:$0xff] %v1351_v50  }
 0x125   :  { %1374 = vst [vmem:[%s1892_s3 + $0x60] sm:$0xff] %v1266_v51   ;;  %1390 = vst [vmem:[%s1892_s3 + $0xe0] sm:$0xff] %v1346_v52   ;;  %v1474_v53 = vpop.f32.mrb[28].mxu0  ;;  %v1506_v54 = vpop.f32.mrb[28].mxu1 }
 0x126   :  { %v537_v55 = vpop.f32.mrb[29].mxu0  ;;  %v665_v56 = vpop.f32.mrb[29].mxu1  ;;  %v546_v59 = vadd.f32 %v1474_v53, %v1727_v39  ;;  %v674_v60 = vadd.f32 %v1506_v54, %v1727_v39 }
 0x127   :  { %v1475_v57 = vpop.f32.mrb[30].mxu0  ;;  %v1507_v58 = vpop.f32.mrb[30].mxu1  ;;  %v538_v1 = vadd.f32 %v1727_v39, %v537_v55  ;;  %v666_v2 = vadd.f32 %v1727_v39, %v665_v56 }
 0x128   :  { %v549_v61 = vadd.f32 %v1475_v57, %v1727_v39  ;;  %v677_v62 = vadd.f32 %v1507_v58, %v1727_v39  ;;  %v540_v63 = vpop.f32.mrb[31].mxu0  ;;  %v668_v0 = vpop.f32.mrb[31].mxu1 }
 0x129   :  { %v541_v3 = vadd.f32 %v1727_v39, %v540_v63  ;;  %v669_v4 = vadd.f32 %v1727_v39, %v668_v0 }
 0x12a   :  { %v1281_v5 = vpack.c.bf16 %v549_v61, %v546_v59  ;;  %v1361_v6 = vpack.c.bf16 %v677_v62, %v674_v60 }
 0x12b   :  { %v1276_v7 = vpack.c.bf16 %v541_v3, %v538_v1  ;;  %v1356_v8 = vpack.c.bf16 %v669_v4, %v666_v2 }
 0x12c   :  { %1377 = vst [vmem:[%s1892_s3 + $0x78] sm:$0xff] %v1281_v5   ;;  %1393 = vst [vmem:[%s1892_s3 + $0xf8] sm:$0xff] %v1361_v6  }
 0x12d   :  { %1376 = vst [vmem:[%s1892_s3 + $0x70] sm:$0xff] %v1276_v7   ;;  %1392 = vst [vmem:[%s1892_s3 + $0xf0] sm:$0xff] %v1356_v8  }

// kernel: hybridnet_forward.21
= control target key start
LH: loop header
LB: loop body
LE: loop exit
PB: predicated region body
PF: predicated region fallthrough
CT: control target
= control target key end

     0   :  { %s1796_s1 = inlined_call_operand.vmem [shape: bf16[128,128], index: 1, kind: input, shape index: {}]   ;;  %s1797_s0 = inlined_call_operand.vmem [shape: bf16[512,128], index: 0, kind: input, shape index: {}]   ;;  %s1798_s2 = inlined_call_operand.vmem [shape: f32[1,128], index: 2, kind: input, shape index: {}]   ;;  %s1799_s3 = inlined_call_operand.vmem [shape: bf16[512,128], index: 3, kind: output, shape index: {}]  }
   0x1   :  { %v1451_v0 = vld [vmem:[%s1796_s1] sm:$0xff]   ;;  %v1452_v1 = vld [vmem:[%s1796_s1 + $0x8] sm:$0xff]   ;;  %v1453_v2 = vld [vmem:[%s1796_s1 + $0x10] sm:$0xff]  }
   0x2   :  { %1355 = vmatprep.subr.bf16.mxu0 %v1451_v0  ;;  %1435 = vmatprep.subr.bf16.mxu1 %v1451_v0  ;;  %v1454_v3 = vld [vmem:[%s1796_s1 + $0x18] sm:$0xff]   ;;  %v1459_v4 = vld [vmem:[%s1797_s0] sm:$0xff]   ;;  %v1456_v7 = vld [vmem:[%s1796_s1 + $0x28] sm:$0xff]  }
   0x3   :  { %1356 = vmatpush3.bf16.msra.mxu0 %v1451_v0  ;;  %1443 = vmatpush3.bf16.msra.mxu1 %v1451_v0  ;;  %v1460_v5 = vld [vmem:[%s1797_s0 + $0x80] sm:$0xff]   ;;  %v1457_v8 = vld [vmem:[%s1796_s1 + $0x30] sm:$0xff]   ;;  %v1458_v9 = vld [vmem:[%s1796_s1 + $0x38] sm:$0xff]  }
   0x4   :  { %1357 = vmatprep.subr.bf16.mxu0 %v1452_v1  ;;  %1436 = vmatprep.subr.bf16.mxu1 %v1452_v1  ;;  %v1455_v6 = vld [vmem:[%s1796_s1 + $0x20] sm:$0xff]   ;;  %v1461_v10 = vld [vmem:[%s1797_s0 + $0x8] sm:$0xff]   ;;  %v1463_v12 = vld [vmem:[%s1797_s0 + $0x10] sm:$0xff]  }
   0x5   :  { %1371 = vmatprep.mubr.bf16.mxu0 %v1459_v4  ;;  %1403 = vmatprep.mubr.bf16.mxu1 %v1460_v5  ;;  %v1462_v11 = vld [vmem:[%s1797_s0 + $0x88] sm:$0xff]   ;;  %v1464_v13 = vld [vmem:[%s1797_s0 + $0x90] sm:$0xff]   ;;  %v1465_v14 = vld [vmem:[%s1797_s0 + $0x18] sm:$0xff]  }
   0x6   :  { %v1466_v15 = vld [vmem:[%s1797_s0 + $0x98] sm:$0xff]   ;;  %v1467_v16 = vld [vmem:[%s1797_s0 + $0x20] sm:$0xff]   ;;  %v1469_v18 = vld [vmem:[%s1797_s0 + $0x28] sm:$0xff]  }
   0x7   :  { %1358 = vmatpush3.bf16.msra.mxu0 %v1452_v1  ;;  %1444 = vmatpush3.bf16.msra.mxu1 %v1452_v1  ;;  %v1468_v17 = vld [vmem:[%s1797_s0 + $0xa0] sm:$0xff]   ;;  %v1470_v19 = vld [vmem:[%s1797_s0 + $0xa8] sm:$0xff]   ;;  %v1471_v20 = vld [vmem:[%s1797_s0 + $0x30] sm:$0xff]  }
   0x8   :  { %1359 = vmatprep.subr.bf16.mxu0 %v1453_v2  ;;  %1437 = vmatprep.subr.bf16.mxu1 %v1453_v2  ;;  %v1472_v21 = vld [vmem:[%s1797_s0 + $0xb0] sm:$0xff]   ;;  %v1473_v22 = vld [vmem:[%s1797_s0 + $0x38] sm:$0xff]   ;;  %v1475_v24 = vld [vmem:[%s1797_s0 + $0x40] sm:$0xff]  }
   0x9   :  { %v1474_v23 = vld [vmem:[%s1797_s0 + $0xb8] sm:$0xff]   ;;  %v1476_v25 = vld [vmem:[%s1797_s0 + $0xc0] sm:$0xff]   ;;  %v1477_v26 = vld [vmem:[%s1797_s0 + $0x48] sm:$0xff]  }
   0xa   :  { %v1478_v27 = vld [vmem:[%s1797_s0 + $0xc8] sm:$0xff]   ;;  %v1479_v28 = vld [vmem:[%s1797_s0 + $0x50] sm:$0xff]   ;;  %v1481_v30 = vld [vmem:[%s1797_s0 + $0x58] sm:$0xff]  }
   0xb   :  { %1360 = vmatpush3.bf16.msra.mxu0 %v1453_v2  ;;  %1445 = vmatpush3.bf16.msra.mxu1 %v1453_v2  ;;  %v1480_v29 = vld [vmem:[%s1797_s0 + $0xd0] sm:$0xff]   ;;  %v1482_v31 = vld [vmem:[%s1797_s0 + $0xd8] sm:$0xff]   ;;  %v1483_v32 = vld [vmem:[%s1797_s0 + $0x60] sm:$0xff]  }
   0xc   :  { %1361 = vmatprep.subr.bf16.mxu0 %v1454_v3  ;;  %1438 = vmatprep.subr.bf16.mxu1 %v1454_v3  ;;  %v1484_v33 = vld [vmem:[%s1797_s0 + $0xe0] sm:$0xff]   ;;  %v1485_v34 = vld [vmem:[%s1797_s0 + $0x68] sm:$0xff]   ;;  %v1487_v36 = vld [vmem:[%s1797_s0 + $0x70] sm:$0xff]  }
   0xd   :  { %v1486_v35 = vld [vmem:[%s1797_s0 + $0xe8] sm:$0xff]   ;;  %v1488_v37 = vld [vmem:[%s1797_s0 + $0xf0] sm:$0xff]   ;;  %v1489_v38 = vld [vmem:[%s1797_s0 + $0x78] sm:$0xff]  }
   0xe   :  { %v1490_v39 = vld [vmem:[%s1797_s0 + $0xf8] sm:$0xff]   ;;  %v1634_v41 = vld [vmem:[%s1798_s2] ss:$0 sm:$0xff] }
   0xf   :  { %1362 = vmatpush3.bf16.msra.mxu0 %v1454_v3  ;;  %1446 = vmatpush3.bf16.msra.mxu1 %v1454_v3 }
  0x10   :  { %1363 = vmatprep.subr.bf16.mxu0 %v1455_v6  ;;  %1439 = vmatprep.subr.bf16.mxu1 %v1455_v6 }
  0x13   :  { %1364 = vmatpush3.bf16.msra.mxu0 %v1455_v6  ;;  %1447 = vmatpush3.bf16.msra.mxu1 %v1455_v6 }
  0x14   :  { %1365 = vmatprep.subr.bf16.mxu0 %v1456_v7  ;;  %1440 = vmatprep.subr.bf16.mxu1 %v1456_v7 }
  0x17   :  { %1366 = vmatpush3.bf16.msra.mxu0 %v1456_v7  ;;  %1448 = vmatpush3.bf16.msra.mxu1 %v1456_v7 }
  0x18   :  { %1367 = vmatprep.subr.bf16.mxu0 %v1457_v8  ;;  %1441 = vmatprep.subr.bf16.mxu1 %v1457_v8 }
  0x1b   :  { %1368 = vmatpush3.bf16.msra.mxu0 %v1457_v8  ;;  %1449 = vmatpush3.bf16.msra.mxu1 %v1457_v8 }
  0x1c   :  { %1369 = vmatprep.subr.bf16.mxu0 %v1458_v9  ;;  %1442 = vmatprep.subr.bf16.mxu1 %v1458_v9 }
  0x1f   :  { %1370 = vmatpush3.bf16.msra.mxu0 %v1458_v9  ;;  %1450 = vmatpush3.bf16.msra.mxu1 %v1458_v9 }
  0x22   :  { %1372 = vmatmul.mubr.bf16.vlgmr.msra.gmra.mrb[0].mxu0 %v1461_v10  ;;  %1404 = vmatmul.mubr.bf16.vlgmr.msra.gmra.mrb[0].mxu1 %v1462_v11 }
  0x23   :  { %1375 = vmatprep.mubr.bf16.mxu0 %v1463_v12  ;;  %1407 = vmatprep.mubr.bf16.mxu1 %v1464_v13 }
  0x2a   :  { %1376 = vmatmul.mubr.bf16.gmra.mrb[4].mxu0 %v1465_v14  ;;  %1408 = vmatmul.mubr.bf16.gmra.mrb[4].mxu1 %v1466_v15 }
  0x2b   :  { %1379 = vmatprep.mubr.bf16.mxu0 %v1467_v16  ;;  %1411 = vmatprep.mubr.bf16.mxu1 %v1468_v17 }
  0x32   :  { %1380 = vmatmul.mubr.bf16.gmra.mrb[8].mxu0 %v1469_v18  ;;  %1412 = vmatmul.mubr.bf16.gmra.mrb[8].mxu1 %v1470_v19 }
  0x33   :  { %1383 = vmatprep.mubr.bf16.mxu0 %v1471_v20  ;;  %1415 = vmatprep.mubr.bf16.mxu1 %v1472_v21 }
  0x3a   :  { %1384 = vmatmul.mubr.bf16.gmra.mrb[12].mxu0 %v1473_v22  ;;  %1416 = vmatmul.mubr.bf16.gmra.mrb[12].mxu1 %v1474_v23 }
  0x3b   :  { %1387 = vmatprep.mubr.bf16.mxu0 %v1475_v24  ;;  %1419 = vmatprep.mubr.bf16.mxu1 %v1476_v25 }
  0x42   :  { %1388 = vmatmul.mubr.bf16.gmra.mrb[16].mxu0 %v1477_v26  ;;  %1420 = vmatmul.mubr.bf16.gmra.mrb[16].mxu1 %v1478_v27 }
  0x43   :  { %1391 = vmatprep.mubr.bf16.mxu0 %v1479_v28  ;;  %1423 = vmatprep.mubr.bf16.mxu1 %v1480_v29 }
  0x4a   :  { %1392 = vmatmul.mubr.bf16.gmra.mrb[20].mxu0 %v1481_v30  ;;  %1424 = vmatmul.mubr.bf16.gmra.mrb[20].mxu1 %v1482_v31 }
  0x4b   :  { %1395 = vmatprep.mubr.bf16.mxu0 %v1483_v32  ;;  %1427 = vmatprep.mubr.bf16.mxu1 %v1484_v33 }
  0x52   :  { %1396 = vmatmul.mubr.bf16.gmra.mrb[24].mxu0 %v1485_v34  ;;  %1428 = vmatmul.mubr.bf16.gmra.mrb[24].mxu1 %v1486_v35 }
  0x53   :  { %1399 = vmatprep.mubr.bf16.mxu0 %v1487_v36  ;;  %1431 = vmatprep.mubr.bf16.mxu1 %v1488_v37 }
  0x5a   :  { %1400 = vmatmul.mubr.bf16.gmra.mrb[28].mxu0 %v1489_v38  ;;  %1432 = vmatmul.mubr.bf16.gmra.mrb[28].mxu1 %v1490_v39 }
  0xf5   :  { %v1373_v40 = vpop.f32.mrb[0].mxu0  ;;  %v1405_v42 = vpop.f32.mrb[0].mxu1 }
  0xf6   :  { %v376_v43 = vpop.f32.mrb[1].mxu0  ;;  %v504_v44 = vpop.f32.mrb[1].mxu1  ;;  %v385_v47 = vadd.f32 %v1373_v40, %v1634_v41  ;;  %v513_v48 = vadd.f32 %v1405_v42, %v1634_v41 }
  0xf7   :  { %v1374_v45 = vpop.f32.mrb[2].mxu0  ;;  %v1406_v46 = vpop.f32.mrb[2].mxu1  ;;  %v377_v53 = vadd.f32 %v1634_v41, %v376_v43  ;;  %v505_v54 = vadd.f32 %v1634_v41, %v504_v44 }
  0xf8   :  { %v388_v49 = vadd.f32 %v1374_v45, %v1634_v41  ;;  %v516_v50 = vadd.f32 %v1406_v46, %v1634_v41  ;;  %v379_v51 = vpop.f32.mrb[3].mxu0  ;;  %v507_v52 = vpop.f32.mrb[3].mxu1 }
  0xf9   :  { %v380_v55 = vadd.f32 %v1634_v41, %v379_v51  ;;  %v508_v56 = vadd.f32 %v1634_v41, %v507_v52 }
  0xfa   :  { %v1132_v57 = vpack.c.bf16 %v388_v49, %v385_v47  ;;  %v1212_v58 = vpack.c.bf16 %v516_v50, %v513_v48 }
  0xfb   :  { %v1127_v59 = vpack.c.bf16 %v380_v55, %v377_v53  ;;  %v1207_v60 = vpack.c.bf16 %v508_v56, %v505_v54 }
  0xfc   :  { %1284 = vst [vmem:[%s1799_s3 + $0x8] sm:$0xff] %v1132_v57   ;;  %1300 = vst [vmem:[%s1799_s3 + $0x88] sm:$0xff] %v1212_v58  }
  0xfd   :  { %1128 = vst [vmem:[%s1799_s3] sm:$0xff] %v1127_v59   ;;  %1299 = vst [vmem:[%s1799_s3 + $0x80] sm:$0xff] %v1207_v60   ;;  %v1377_v61 = vpop.f32.mrb[4].mxu0  ;;  %v1409_v62 = vpop.f32.mrb[4].mxu1 }
  0xfe   :  { %v392_v63 = vpop.f32.mrb[5].mxu0  ;;  %v520_v0 = vpop.f32.mrb[5].mxu1  ;;  %v401_v3 = vadd.f32 %v1377_v61, %v1634_v41  ;;  %v529_v4 = vadd.f32 %v1409_v62, %v1634_v41 }
  0xff   :  { %v1378_v1 = vpop.f32.mrb[6].mxu0  ;;  %v1410_v2 = vpop.f32.mrb[6].mxu1  ;;  %v393_v9 = vadd.f32 %v1634_v41, %v392_v63  ;;  %v521_v10 = vadd.f32 %v1634_v41, %v520_v0 }
 0x100   :  { %v404_v5 = vadd.f32 %v1378_v1, %v1634_v41  ;;  %v532_v6 = vadd.f32 %v1410_v2, %v1634_v41  ;;  %v395_v7 = vpop.f32.mrb[7].mxu0  ;;  %v523_v8 = vpop.f32.mrb[7].mxu1 }
 0x101   :  { %v396_v11 = vadd.f32 %v1634_v41, %v395_v7  ;;  %v524_v12 = vadd.f32 %v1634_v41, %v523_v8 }
 0x102   :  { %v1142_v13 = vpack.c.bf16 %v404_v5, %v401_v3  ;;  %v1222_v14 = vpack.c.bf16 %v532_v6, %v529_v4 }
 0x103   :  { %v1137_v15 = vpack.c.bf16 %v396_v11, %v393_v9  ;;  %v1217_v16 = vpack.c.bf16 %v524_v12, %v521_v10 }
 0x104   :  { %1286 = vst [vmem:[%s1799_s3 + $0x18] sm:$0xff] %v1142_v13   ;;  %1302 = vst [vmem:[%s1799_s3 + $0x98] sm:$0xff] %v1222_v14  }
 0x105   :  { %1285 = vst [vmem:[%s1799_s3 + $0x10] sm:$0xff] %v1137_v15   ;;  %1301 = vst [vmem:[%s1799_s3 + $0x90] sm:$0xff] %v1217_v16   ;;  %v1381_v17 = vpop.f32.mrb[8].mxu0  ;;  %v1413_v18 = vpop.f32.mrb[8].mxu1 }
 0x106   :  { %v408_v19 = vpop.f32.mrb[9].mxu0  ;;  %v536_v20 = vpop.f32.mrb[9].mxu1  ;;  %v417_v23 = vadd.f32 %v1381_v17, %v1634_v41  ;;  %v545_v24 = vadd.f32 %v1413_v18, %v1634_v41 }
 0x107   :  { %v1382_v21 = vpop.f32.mrb[10].mxu0  ;;  %v1414_v22 = vpop.f32.mrb[10].mxu1  ;;  %v409_v29 = vadd.f32 %v1634_v41, %v408_v19  ;;  %v537_v30 = vadd.f32 %v1634_v41, %v536_v20 }
 0x108   :  { %v420_v25 = vadd.f32 %v1382_v21, %v1634_v41  ;;  %v548_v26 = vadd.f32 %v1414_v22, %v1634_v41  ;;  %v411_v27 = vpop.f32.mrb[11].mxu0  ;;  %v539_v28 = vpop.f32.mrb[11].mxu1 }
 0x109   :  { %v412_v31 = vadd.f32 %v1634_v41, %v411_v27  ;;  %v540_v32 = vadd.f32 %v1634_v41, %v539_v28 }
 0x10a   :  { %v1152_v33 = vpack.c.bf16 %v420_v25, %v417_v23  ;;  %v1232_v34 = vpack.c.bf16 %v548_v26, %v545_v24 }
 0x10b   :  { %v1147_v35 = vpack.c.bf16 %v412_v31, %v409_v29  ;;  %v1227_v36 = vpack.c.bf16 %v540_v32, %v537_v30 }
 0x10c   :  { %1288 = vst [vmem:[%s1799_s3 + $0x28] sm:$0xff] %v1152_v33   ;;  %1304 = vst [vmem:[%s1799_s3 + $0xa8] sm:$0xff] %v1232_v34  }
 0x10d   :  { %1287 = vst [vmem:[%s1799_s3 + $0x20] sm:$0xff] %v1147_v35   ;;  %1303 = vst [vmem:[%s1799_s3 + $0xa0] sm:$0xff] %v1227_v36   ;;  %v1385_v37 = vpop.f32.mrb[12].mxu0  ;;  %v1417_v38 = vpop.f32.mrb[12].mxu1 }
 0x10e   :  { %v424_v39 = vpop.f32.mrb[13].mxu0  ;;  %v552_v40 = vpop.f32.mrb[13].mxu1  ;;  %v433_v44 = vadd.f32 %v1385_v37, %v1634_v41  ;;  %v561_v45 = vadd.f32 %v1417_v38, %v1634_v41 }
 0x10f   :  { %v1386_v42 = vpop.f32.mrb[14].mxu0  ;;  %v1418_v43 = vpop.f32.mrb[14].mxu1  ;;  %v425_v50 = vadd.f32 %v1634_v41, %v424_v39  ;;  %v553_v51 = vadd.f32 %v1634_v41, %v552_v40 }
 0x110   :  { %v436_v46 = vadd.f32 %v1386_v42, %v1634_v41  ;;  %v564_v47 = vadd.f32 %v1418_v43, %v1634_v41  ;;  %v427_v48 = vpop.f32.mrb[15].mxu0  ;;  %v555_v49 = vpop.f32.mrb[15].mxu1 }
 0x111   :  { %v428_v52 = vadd.f32 %v1634_v41, %v427_v48  ;;  %v556_v53 = vadd.f32 %v1634_v41, %v555_v49 }
 0x112   :  { %v1162_v54 = vpack.c.bf16 %v436_v46, %v433_v44  ;;  %v1242_v55 = vpack.c.bf16 %v564_v47, %v561_v45 }
 0x113   :  { %v1157_v56 = vpack.c.bf16 %v428_v52, %v425_v50  ;;  %v1237_v57 = vpack.c.bf16 %v556_v53, %v553_v51 }
 0x114   :  { %1290 = vst [vmem:[%s1799_s3 + $0x38] sm:$0xff] %v1162_v54   ;;  %1306 = vst [vmem:[%s1799_s3 + $0xb8] sm:$0xff] %v1242_v55  }
 0x115   :  { %1289 = vst [vmem:[%s1799_s3 + $0x30] sm:$0xff] %v1157_v56   ;;  %1305 = vst [vmem:[%s1799_s3 + $0xb0] sm:$0xff] %v1237_v57   ;;  %v1389_v58 = vpop.f32.mrb[16].mxu0  ;;  %v1421_v59 = vpop.f32.mrb[16].mxu1 }
 0x116   :  { %v440_v60 = vpop.f32.mrb[17].mxu0  ;;  %v568_v61 = vpop.f32.mrb[17].mxu1  ;;  %v449_v0 = vadd.f32 %v1389_v58, %v1634_v41  ;;  %v577_v1 = vadd.f32 %v1421_v59, %v1634_v41 }
 0x117   :  { %v1390_v62 = vpop.f32.mrb[18].mxu0  ;;  %v1422_v63 = vpop.f32.mrb[18].mxu1  ;;  %v441_v6 = vadd.f32 %v1634_v41, %v440_v60  ;;  %v569_v7 = vadd.f32 %v1634_v41, %v568_v61 }
 0x118   :  { %v452_v2 = vadd.f32 %v1390_v62, %v1634_v41  ;;  %v580_v3 = vadd.f32 %v1422_v63, %v1634_v41  ;;  %v443_v4 = vpop.f32.mrb[19].mxu0  ;;  %v571_v5 = vpop.f32.mrb[19].mxu1 }
 0x119   :  { %v444_v8 = vadd.f32 %v1634_v41, %v443_v4  ;;  %v572_v9 = vadd.f32 %v1634_v41, %v571_v5 }
 0x11a   :  { %v1172_v10 = vpack.c.bf16 %v452_v2, %v449_v0  ;;  %v1252_v11 = vpack.c.bf16 %v580_v3, %v577_v1 }
 0x11b   :  { %v1167_v12 = vpack.c.bf16 %v444_v8, %v441_v6  ;;  %v1247_v13 = vpack.c.bf16 %v572_v9, %v569_v7 }
 0x11c   :  { %1292 = vst [vmem:[%s1799_s3 + $0x48] sm:$0xff] %v1172_v10   ;;  %1308 = vst [vmem:[%s1799_s3 + $0xc8] sm:$0xff] %v1252_v11  }
 0x11d   :  { %1291 = vst [vmem:[%s1799_s3 + $0x40] sm:$0xff] %v1167_v12   ;;  %1307 = vst [vmem:[%s1799_s3 + $0xc0] sm:$0xff] %v1247_v13   ;;  %v1393_v14 = vpop.f32.mrb[20].mxu0  ;;  %v1425_v15 = vpop.f32.mrb[20].mxu1 }
 0x11e   :  { %v456_v16 = vpop.f32.mrb[21].mxu0  ;;  %v584_v17 = vpop.f32.mrb[21].mxu1  ;;  %v465_v20 = vadd.f32 %v1393_v14, %v1634_v41  ;;  %v593_v21 = vadd.f32 %v1425_v15, %v1634_v41 }
 0x11f   :  { %v1394_v18 = vpop.f32.mrb[22].mxu0  ;;  %v1426_v19 = vpop.f32.mrb[22].mxu1  ;;  %v457_v26 = vadd.f32 %v1634_v41, %v456_v16  ;;  %v585_v27 = vadd.f32 %v1634_v41, %v584_v17 }
 0x120   :  { %v468_v22 = vadd.f32 %v1394_v18, %v1634_v41  ;;  %v596_v23 = vadd.f32 %v1426_v19, %v1634_v41  ;;  %v459_v24 = vpop.f32.mrb[23].mxu0  ;;  %v587_v25 = vpop.f32.mrb[23].mxu1 }
 0x121   :  { %v460_v28 = vadd.f32 %v1634_v41, %v459_v24  ;;  %v588_v29 = vadd.f32 %v1634_v41, %v587_v25 }
 0x122   :  { %v1182_v30 = vpack.c.bf16 %v468_v22, %v465_v20  ;;  %v1262_v31 = vpack.c.bf16 %v596_v23, %v593_v21 }
 0x123   :  { %v1177_v32 = vpack.c.bf16 %v460_v28, %v457_v26  ;;  %v1257_v33 = vpack.c.bf16 %v588_v29, %v585_v27 }
 0x124   :  { %1294 = vst [vmem:[%s1799_s3 + $0x58] sm:$0xff] %v1182_v30   ;;  %1310 = vst [vmem:[%s1799_s3 + $0xd8] sm:$0xff] %v1262_v31  }
 0x125   :  { %1293 = vst [vmem:[%s1799_s3 + $0x50] sm:$0xff] %v1177_v32   ;;  %1309 = vst [vmem:[%s1799_s3 + $0xd0] sm:$0xff] %v1257_v33   ;;  %v1397_v34 = vpop.f32.mrb[24].mxu0  ;;  %v1429_v35 = vpop.f32.mrb[24].mxu1 }
 0x126   :  { %v472_v36 = vpop.f32.mrb[25].mxu0  ;;  %v600_v37 = vpop.f32.mrb[25].mxu1  ;;  %v481_v40 = vadd.f32 %v1397_v34, %v1634_v41  ;;  %v609_v42 = vadd.f32 %v1429_v35, %v1634_v41 }
 0x127   :  { %v1398_v38 = vpop.f32.mrb[26].mxu0  ;;  %v1430_v39 = vpop.f32.mrb[26].mxu1  ;;  %v473_v47 = vadd.f32 %v1634_v41, %v472_v36  ;;  %v601_v48 = vadd.f32 %v1634_v41, %v600_v37 }
 0x128   :  { %v484_v43 = vadd.f32 %v1398_v38, %v1634_v41  ;;  %v612_v44 = vadd.f32 %v1430_v39, %v1634_v41  ;;  %v475_v45 = vpop.f32.mrb[27].mxu0  ;;  %v603_v46 = vpop.f32.mrb[27].mxu1 }
 0x129   :  { %v476_v49 = vadd.f32 %v1634_v41, %v475_v45  ;;  %v604_v50 = vadd.f32 %v1634_v41, %v603_v46 }
 0x12a   :  { %v1192_v51 = vpack.c.bf16 %v484_v43, %v481_v40  ;;  %v1272_v52 = vpack.c.bf16 %v612_v44, %v609_v42 }
 0x12b   :  { %v1187_v53 = vpack.c.bf16 %v476_v49, %v473_v47  ;;  %v1267_v54 = vpack.c.bf16 %v604_v50, %v601_v48 }
 0x12c   :  { %1296 = vst [vmem:[%s1799_s3 + $0x68] sm:$0xff] %v1192_v51   ;;  %1312 = vst [vmem:[%s1799_s3 + $0xe8] sm:$0xff] %v1272_v52  }
 0x12d   :  { %1295 = vst [vmem:[%s1799_s3 + $0x60] sm:$0xff] %v1187_v53   ;;  %1311 = vst [vmem:[%s1799_s3 + $0xe0] sm:$0xff] %v1267_v54   ;;  %v1401_v55 = vpop.f32.mrb[28].mxu0  ;;  %v1433_v56 = vpop.f32.mrb[28].mxu1 }
 0x12e   :  { %v488_v57 = vpop.f32.mrb[29].mxu0  ;;  %v616_v58 = vpop.f32.mrb[29].mxu1  ;;  %v497_v61 = vadd.f32 %v1401_v55, %v1634_v41  ;;  %v625_v62 = vadd.f32 %v1433_v56, %v1634_v41 }
 0x12f   :  { %v1402_v59 = vpop.f32.mrb[30].mxu0  ;;  %v1434_v60 = vpop.f32.mrb[30].mxu1  ;;  %v489_v3 = vadd.f32 %v1634_v41, %v488_v57  ;;  %v617_v4 = vadd.f32 %v1634_v41, %v616_v58 }
 0x130   :  { %v500_v63 = vadd.f32 %v1402_v59, %v1634_v41  ;;  %v628_v0 = vadd.f32 %v1434_v60, %v1634_v41  ;;  %v491_v1 = vpop.f32.mrb[31].mxu0  ;;  %v619_v2 = vpop.f32.mrb[31].mxu1 }
 0x131   :  { %v492_v5 = vadd.f32 %v1634_v41, %v491_v1  ;;  %v620_v6 = vadd.f32 %v1634_v41, %v619_v2 }
 0x132   :  { %v1202_v7 = vpack.c.bf16 %v500_v63, %v497_v61  ;;  %v1282_v8 = vpack.c.bf16 %v628_v0, %v625_v62 }
 0x133   :  { %v1197_v9 = vpack.c.bf16 %v492_v5, %v489_v3  ;;  %v1277_v10 = vpack.c.bf16 %v620_v6, %v617_v4 }
 0x134   :  { %1298 = vst [vmem:[%s1799_s3 + $0x78] sm:$0xff] %v1202_v7   ;;  %1314 = vst [vmem:[%s1799_s3 + $0xf8] sm:$0xff] %v1282_v8  }
 0x135   :  { %1297 = vst [vmem:[%s1799_s3 + $0x70] sm:$0xff] %v1197_v9   ;;  %1313 = vst [vmem:[%s1799_s3 + $0xf0] sm:$0xff] %v1277_v10  }

// kernel: hybridnet_forward.23
= control target key start
LH: loop header
LB: loop body
LE: loop exit
PB: predicated region body
PF: predicated region fallthrough
CT: control target
= control target key end

     0   :  { %v1717_v0 = vmov 0   ;;  %vm454_vm0 = vcmask 261120   ;;  %s2157_s1 = inlined_call_operand.vmem [shape: bf16[160,128], index: 1, kind: input, shape index: {}]   ;;  %s2158_s0 = inlined_call_operand.vmem [shape: bf16[512,160], index: 0, kind: input, shape index: {}]   ;;  %s2159_s2 = inlined_call_operand.vmem [shape: f32[1,128], index: 2, kind: input, shape index: {}]   ;;  %s2160_s3 = inlined_call_operand.vmem [shape: bf16[512,128], index: 3, kind: output, shape index: {}]  }
   0x1   :  { %551 = vmatprep.subr.bf16.mxu0 %v1717_v0  ;;  %1590 = vmatprep.subr.bf16.mxu1 %v1717_v0  ;;  %v1611_v1 = vld [vmem:[%s2157_s1] sm:$0xff]   ;;  %v1612_v2 = vld [vmem:[%s2157_s1 + $0x8] sm:$0xff]   ;;  %v1613_v3 = vld [vmem:[%s2157_s1 + $0x10] sm:$0xff]  }
   0x2   :  { %552 = vmatpush1.bf16.msra.mxu0 %v1611_v1  ;;  %1600 = vmatpush1.bf16.msra.mxu1 %v1611_v1  ;;  %v1614_v4 = vld [vmem:[%s2157_s1 + $0x18] sm:$0xff]   ;;  %v1623_v5 = vld [vmem:[%s2158_s0 + $0x4] ss:$8 sps:$4 sm:$0xff]   ;;  %v1617_v9 = vld [vmem:[%s2157_s1 + $0x30] sm:$0xff]  }
   0x3   :  { %553 = vmatprep.subr.bf16.mxu0 %v1717_v0  ;;  %1591 = vmatprep.subr.bf16.mxu1 %v1717_v0  ;;  %v1626_v6 = vld [vmem:[%s2158_s0 + $0x104] ss:$8 sps:$4 sm:$0xff]   ;;  %v1618_v10 = vld [vmem:[%s2157_s1 + $0x38] sm:$0xff]   ;;  %v1621_v13 = vld [vmem:[%s2158_s0] ss:$8 sps:$4 sm:$0xff]  }
   0x4   :  { %1239 = vmatprep.mubr.msk.bf16.mxu0 %vm454_vm0, %v1623_v5  ;;  %v1615_v7 = vld [vmem:[%s2157_s1 + $0x20] sm:$0xff]   ;;  %1255 = vmatprep.mubr.msk.bf16.mxu1 %vm454_vm0, %v1626_v6  ;;  %v1616_v8 = vld [vmem:[%s2157_s1 + $0x28] sm:$0xff]   ;;  %v1627_v15 = vld [vmem:[%s2158_s0 + $0x14] ss:$8 sps:$4 sm:$0xff]  }
   0x5   :  { %v1619_v11 = vld [vmem:[%s2157_s1 + $0x40] sm:$0xff]   ;;  %v1620_v12 = vld [vmem:[%s2157_s1 + $0x48] sm:$0xff]   ;;  %v1629_v16 = vld [vmem:[%s2158_s0 + $0x114] ss:$8 sps:$4 sm:$0xff]  }
   0x6   :  { %554 = vmatpush1.bf16.msra.mxu0 %v1612_v2  ;;  %1601 = vmatpush1.bf16.msra.mxu1 %v1612_v2  ;;  %v1624_v14 = vld [vmem:[%s2158_s0 + $0x100] ss:$8 sps:$4 sm:$0xff]   ;;  %v1631_v17 = vld [vmem:[%s2158_s0 + $0x10] ss:$8 sps:$4 sm:$0xff]   ;;  %v1633_v19 = vld [vmem:[%s2158_s0 + $0x24] ss:$8 sps:$4 sm:$0xff]  }
   0x7   :  { %555 = vmatprep.subr.bf16.mxu0 %v1717_v0  ;;  %1592 = vmatprep.subr.bf16.mxu1 %v1717_v0  ;;  %v1632_v18 = vld [vmem:[%s2158_s0 + $0x110] ss:$8 sps:$4 sm:$0xff]   ;;  %v1635_v20 = vld [vmem:[%s2158_s0 + $0x124] ss:$8 sps:$4 sm:$0xff]   ;;  %v1637_v21 = vld [vmem:[%s2158_s0 + $0x20] ss:$8 sps:$4 sm:$0xff]  }
   0x8   :  { %v1638_v22 = vld [vmem:[%s2158_s0 + $0x120] ss:$8 sps:$4 sm:$0xff]   ;;  %v1639_v23 = vld [vmem:[%s2158_s0 + $0x34] ss:$8 sps:$4 sm:$0xff]   ;;  %v1643_v25 = vld [vmem:[%s2158_s0 + $0x30] ss:$8 sps:$4 sm:$0xff]  }
   0x9   :  { %v1641_v24 = vld [vmem:[%s2158_s0 + $0x134] ss:$8 sps:$4 sm:$0xff]   ;;  %v1644_v26 = vld [vmem:[%s2158_s0 + $0x130] ss:$8 sps:$4 sm:$0xff]   ;;  %v1645_v27 = vld [vmem:[%s2158_s0 + $0x44] ss:$8 sps:$4 sm:$0xff]  }
   0xa   :  { %556 = vmatpush1.bf16.msra.mxu0 %v1613_v3  ;;  %1602 = vmatpush1.bf16.msra.mxu1 %v1613_v3  ;;  %v1647_v28 = vld [vmem:[%s2158_s0 + $0x144] ss:$8 sps:$4 sm:$0xff]   ;;  %v1649_v29 = vld [vmem:[%s2158_s0 + $0x40] ss:$8 sps:$4 sm:$0xff]   ;;  %v1651_v31 = vld [vmem:[%s2158_s0 + $0x54] ss:$8 sps:$4 sm:$0xff]  }
   0xb   :  { %557 = vmatprep.subr.bf16.mxu0 %v1717_v0  ;;  %1593 = vmatprep.subr.bf16.mxu1 %v1717_v0  ;;  %v1650_v30 = vld [vmem:[%s2158_s0 + $0x140] ss:$8 sps:$4 sm:$0xff]   ;;  %v1653_v32 = vld [vmem:[%s2158_s0 + $0x154] ss:$8 sps:$4 sm:$0xff]   ;;  %v1655_v33 = vld [vmem:[%s2158_s0 + $0x50] ss:$8 sps:$4 sm:$0xff]  }
   0xc   :  { %v1656_v34 = vld [vmem:[%s2158_s0 + $0x150] ss:$8 sps:$4 sm:$0xff]   ;;  %v1657_v35 = vld [vmem:[%s2158_s0 + $0x64] ss:$8 sps:$4 sm:$0xff]   ;;  %v1661_v37 = vld [vmem:[%s2158_s0 + $0x60] ss:$8 sps:$4 sm:$0xff]  }
   0xd   :  { %v1659_v36 = vld [vmem:[%s2158_s0 + $0x164] ss:$8 sps:$4 sm:$0xff]   ;;  %v1662_v38 = vld [vmem:[%s2158_s0 + $0x160] ss:$8 sps:$4 sm:$0xff]   ;;  %v1663_v39 = vld [vmem:[%s2158_s0 + $0x74] ss:$8 sps:$4 sm:$0xff]  }
   0xe   :  { %558 = vmatpush1.bf16.msra.mxu0 %v1614_v4  ;;  %1603 = vmatpush1.bf16.msra.mxu1 %v1614_v4  ;;  %v1665_v40 = vld [vmem:[%s2158_s0 + $0x174] ss:$8 sps:$4 sm:$0xff]   ;;  %v1667_v41 = vld [vmem:[%s2158_s0 + $0x70] ss:$8 sps:$4 sm:$0xff]   ;;  %v1669_v43 = vld [vmem:[%s2158_s0 + $0x84] ss:$8 sps:$4 sm:$0xff]  }
   0xf   :  { %559 = vmatprep.subr.bf16.mxu0 %v1717_v0  ;;  %1594 = vmatprep.subr.bf16.mxu1 %v1717_v0  ;;  %v1668_v42 = vld [vmem:[%s2158_s0 + $0x170] ss:$8 sps:$4 sm:$0xff]   ;;  %v1671_v44 = vld [vmem:[%s2158_s0 + $0x184] ss:$8 sps:$4 sm:$0xff]   ;;  %v1673_v45 = vld [vmem:[%s2158_s0 + $0x80] ss:$8 sps:$4 sm:$0xff]  }
  0x10   :  { %v1674_v46 = vld [vmem:[%s2158_s0 + $0x180] ss:$8 sps:$4 sm:$0xff]   ;;  %v1675_v47 = vld [vmem:[%s2158_s0 + $0x94] ss:$8 sps:$4 sm:$0xff]   ;;  %v1679_v49 = vld [vmem:[%s2158_s0 + $0x90] ss:$8 sps:$4 sm:$0xff]  }
  0x11   :  { %v1677_v48 = vld [vmem:[%s2158_s0 + $0x194] ss:$8 sps:$4 sm:$0xff]   ;;  %v1680_v50 = vld [vmem:[%s2158_s0 + $0x190] ss:$8 sps:$4 sm:$0xff]   ;;  %v1681_v51 = vld [vmem:[%s2158_s0 + $0xa4] ss:$8 sps:$4 sm:$0xff]  }
  0x12   :  { %560 = vmatpush1.bf16.msra.mxu0 %v1615_v7  ;;  %1604 = vmatpush1.bf16.msra.mxu1 %v1615_v7  ;;  %v1683_v52 = vld [vmem:[%s2158_s0 + $0x1a4] ss:$8 sps:$4 sm:$0xff]   ;;  %v1685_v53 = vld [vmem:[%s2158_s0 + $0xa0] ss:$8 sps:$4 sm:$0xff]   ;;  %v1687_v55 = vld [vmem:[%s2158_s0 + $0xb4] ss:$8 sps:$4 sm:$0xff]  }
  0x13   :  { %561 = vmatprep.subr.bf16.mxu0 %v1717_v0  ;;  %1595 = vmatprep.subr.bf16.mxu1 %v1717_v0  ;;  %v1686_v54 = vld [vmem:[%s2158_s0 + $0x1a0] ss:$8 sps:$4 sm:$0xff]   ;;  %v1689_v56 = vld [vmem:[%s2158_s0 + $0x1b4] ss:$8 sps:$4 sm:$0xff]   ;;  %v1691_v57 = vld [vmem:[%s2158_s0 + $0xb0] ss:$8 sps:$4 sm:$0xff]  }
  0x14   :  { %v1692_v58 = vld [vmem:[%s2158_s0 + $0x1b0] ss:$8 sps:$4 sm:$0xff]   ;;  %v1693_v59 = vld [vmem:[%s2158_s0 + $0xc4] ss:$8 sps:$4 sm:$0xff]   ;;  %v1697_v61 = vld [vmem:[%s2158_s0 + $0xc0] ss:$8 sps:$4 sm:$0xff]  }
  0x15   :  { %v1695_v60 = vld [vmem:[%s2158_s0 + $0x1c4] ss:$8 sps:$4 sm:$0xff]   ;;  %v1698_v62 = vld [vmem:[%s2158_s0 + $0x1c0] ss:$8 sps:$4 sm:$0xff]   ;;  %v1699_v63 = vld [vmem:[%s2158_s0 + $0xd4] ss:$8 sps:$4 sm:$0xff]  }
  0x16   :  { %562 = vmatpush1.bf16.msra.mxu0 %v1616_v8  ;;  %1605 = vmatpush1.bf16.msra.mxu1 %v1616_v8  ;;  %v1703_v1 = vld [vmem:[%s2158_s0 + $0xd0] ss:$8 sps:$4 sm:$0xff]   ;;  %v1705_v3 = vld [vmem:[%s2158_s0 + $0xe4] ss:$8 sps:$4 sm:$0xff]   ;;  %v1709_v5 = vld [vmem:[%s2158_s0 + $0xe0] ss:$8 sps:$4 sm:$0xff]  }
  0x17   :  { %563 = vmatprep.subr.bf16.mxu0 %v1717_v0  ;;  %1596 = vmatprep.subr.bf16.mxu1 %v1717_v0  ;;  %v1704_v2 = vld [vmem:[%s2158_s0 + $0x1d0] ss:$8 sps:$4 sm:$0xff]   ;;  %v1707_v4 = vld [vmem:[%s2158_s0 + $0x1e4] ss:$8 sps:$4 sm:$0xff]   ;;  %v1710_v6 = vld [vmem:[%s2158_s0 + $0x1e0] ss:$8 sps:$4 sm:$0xff]  }
  0x18   :  { %v1711_v7 = vld [vmem:[%s2158_s0 + $0xf4] ss:$8 sps:$4 sm:$0xff]  }
  0x19   :  { %v1713_v8 = vld [vmem:[%s2158_s0 + $0x1f4] ss:$8 sps:$4 sm:$0xff]  }
  0x1a   :  { %564 = vmatpush1.bf16.msra.mxu0 %v1617_v9  ;;  %1606 = vmatpush1.bf16.msra.mxu1 %v1617_v9  ;;  %v1715_v9 = vld [vmem:[%s2158_s0 + $0xf0] ss:$8 sps:$4 sm:$0xff]  }
  0x1b   :  { %565 = vmatprep.subr.bf16.mxu0 %v1717_v0  ;;  %1597 = vmatprep.subr.bf16.mxu1 %v1717_v0 }
  0x1e   :  { %566 = vmatpush1.bf16.msra.mxu0 %v1618_v10  ;;  %1607 = vmatpush1.bf16.msra.mxu1 %v1618_v10  ;;  %v1716_v10 = vld [vmem:[%s2158_s0 + $0x1f0] ss:$8 sps:$4 sm:$0xff]  }
  0x1f   :  { %567 = vmatprep.subr.bf16.mxu0 %v1717_v0  ;;  %1598 = vmatprep.subr.bf16.mxu1 %v1717_v0 }
  0x22   :  { %568 = vmatpush1.bf16.msra.mxu0 %v1619_v11  ;;  %1608 = vmatpush1.bf16.msra.mxu1 %v1619_v11  ;;  %v1995_v11 = vld [vmem:[%s2159_s2] ss:$0 sm:$0xff] }
  0x23   :  { %569 = vmatprep.subr.bf16.mxu0 %v1717_v0  ;;  %1599 = vmatprep.subr.bf16.mxu1 %v1717_v0  ;;  %v1701_v0 = vld [vmem:[%s2158_s0 + $0x1d4] ss:$8 sps:$4 sm:$0xff]  }
  0x26   :  { %570 = vmatpush1.bf16.msra.mxu0 %v1620_v12  ;;  %1609 = vmatpush1.bf16.msra.mxu1 %v1620_v12 }
  0x29   :  { %584 = vmatmul.mubr.bf16.vlgmr.msra.gmra.mrb[0].mxu0 %v1621_v13  ;;  %712 = vmatmul.mubr.bf16.vlgmr.msra.gmra.mrb[0].mxu1 %v1624_v14 }
  0x2a   :  { %1240 = vmatprep.mubr.msk.bf16.mxu0 %vm454_vm0, %v1627_v15  ;;  %1256 = vmatprep.mubr.msk.bf16.mxu1 %vm454_vm0, %v1629_v16 }
  0x31   :  { %592 = vmatmul.mubr.bf16.gmra.mrb[4].mxu0 %v1631_v17  ;;  %720 = vmatmul.mubr.bf16.gmra.mrb[4].mxu1 %v1632_v18 }
  0x32   :  { %1241 = vmatprep.mubr.msk.bf16.mxu0 %vm454_vm0, %v1633_v19  ;;  %1257 = vmatprep.mubr.msk.bf16.mxu1 %vm454_vm0, %v1635_v20 }
  0x39   :  { %600 = vmatmul.mubr.bf16.gmra.mrb[8].mxu0 %v1637_v21  ;;  %728 = vmatmul.mubr.bf16.gmra.mrb[8].mxu1 %v1638_v22 }
  0x3a   :  { %1242 = vmatprep.mubr.msk.bf16.mxu0 %vm454_vm0, %v1639_v23  ;;  %1258 = vmatprep.mubr.msk.bf16.mxu1 %vm454_vm0, %v1641_v24 }
  0x41   :  { %608 = vmatmul.mubr.bf16.gmra.mrb[12].mxu0 %v1643_v25  ;;  %736 = vmatmul.mubr.bf16.gmra.mrb[12].mxu1 %v1644_v26 }
  0x42   :  { %1243 = vmatprep.mubr.msk.bf16.mxu0 %vm454_vm0, %v1645_v27  ;;  %1259 = vmatprep.mubr.msk.bf16.mxu1 %vm454_vm0, %v1647_v28 }
  0x49   :  { %616 = vmatmul.mubr.bf16.gmra.mrb[16].mxu0 %v1649_v29  ;;  %744 = vmatmul.mubr.bf16.gmra.mrb[16].mxu1 %v1650_v30 }
  0x4a   :  { %1244 = vmatprep.mubr.msk.bf16.mxu0 %vm454_vm0, %v1651_v31  ;;  %1260 = vmatprep.mubr.msk.bf16.mxu1 %vm454_vm0, %v1653_v32 }
  0x51   :  { %624 = vmatmul.mubr.bf16.gmra.mrb[20].mxu0 %v1655_v33  ;;  %752 = vmatmul.mubr.bf16.gmra.mrb[20].mxu1 %v1656_v34 }
  0x52   :  { %1245 = vmatprep.mubr.msk.bf16.mxu0 %vm454_vm0, %v1657_v35  ;;  %1261 = vmatprep.mubr.msk.bf16.mxu1 %vm454_vm0, %v1659_v36 }
  0x59   :  { %632 = vmatmul.mubr.bf16.gmra.mrb[24].mxu0 %v1661_v37  ;;  %760 = vmatmul.mubr.bf16.gmra.mrb[24].mxu1 %v1662_v38 }
  0x5a   :  { %1246 = vmatprep.mubr.msk.bf16.mxu0 %vm454_vm0, %v1663_v39  ;;  %1262 = vmatprep.mubr.msk.bf16.mxu1 %vm454_vm0, %v1665_v40 }
  0x61   :  { %640 = vmatmul.mubr.bf16.gmra.mrb[28].mxu0 %v1667_v41  ;;  %768 = vmatmul.mubr.bf16.gmra.mrb[28].mxu1 %v1668_v42 }
  0x62   :  { %1247 = vmatprep.mubr.msk.bf16.mxu0 %vm454_vm0, %v1669_v43  ;;  %1263 = vmatprep.mubr.msk.bf16.mxu1 %vm454_vm0, %v1671_v44 }
  0x69   :  { %648 = vmatmul.mubr.bf16.gmra.mrb[32].mxu0 %v1673_v45  ;;  %776 = vmatmul.mubr.bf16.gmra.mrb[32].mxu1 %v1674_v46 }
  0x6a   :  { %1248 = vmatprep.mubr.msk.bf16.mxu0 %vm454_vm0, %v1675_v47  ;;  %1264 = vmatprep.mubr.msk.bf16.mxu1 %vm454_vm0, %v1677_v48 }
  0x71   :  { %656 = vmatmul.mubr.bf16.gmra.mrb[36].mxu0 %v1679_v49  ;;  %784 = vmatmul.mubr.bf16.gmra.mrb[36].mxu1 %v1680_v50 }
  0x72   :  { %1249 = vmatprep.mubr.msk.bf16.mxu0 %vm454_vm0, %v1681_v51  ;;  %1265 = vmatprep.mubr.msk.bf16.mxu1 %vm454_vm0, %v1683_v52 }
  0x79   :  { %664 = vmatmul.mubr.bf16.gmra.mrb[40].mxu0 %v1685_v53  ;;  %792 = vmatmul.mubr.bf16.gmra.mrb[40].mxu1 %v1686_v54 }
  0x7a   :  { %1250 = vmatprep.mubr.msk.bf16.mxu0 %vm454_vm0, %v1687_v55  ;;  %1266 = vmatprep.mubr.msk.bf16.mxu1 %vm454_vm0, %v1689_v56 }
  0x81   :  { %672 = vmatmul.mubr.bf16.gmra.mrb[44].mxu0 %v1691_v57  ;;  %800 = vmatmul.mubr.bf16.gmra.mrb[44].mxu1 %v1692_v58 }
  0x82   :  { %1251 = vmatprep.mubr.msk.bf16.mxu0 %vm454_vm0, %v1693_v59  ;;  %1267 = vmatprep.mubr.msk.bf16.mxu1 %vm454_vm0, %v1695_v60 }
  0x89   :  { %680 = vmatmul.mubr.bf16.gmra.mrb[48].mxu0 %v1697_v61  ;;  %808 = vmatmul.mubr.bf16.gmra.mrb[48].mxu1 %v1698_v62 }
  0x8a   :  { %1252 = vmatprep.mubr.msk.bf16.mxu0 %vm454_vm0, %v1699_v63  ;;  %1268 = vmatprep.mubr.msk.bf16.mxu1 %vm454_vm0, %v1701_v0 }
  0x91   :  { %688 = vmatmul.mubr.bf16.gmra.mrb[52].mxu0 %v1703_v1  ;;  %816 = vmatmul.mubr.bf16.gmra.mrb[52].mxu1 %v1704_v2 }
  0x92   :  { %1253 = vmatprep.mubr.msk.bf16.mxu0 %vm454_vm0, %v1705_v3  ;;  %1269 = vmatprep.mubr.msk.bf16.mxu1 %vm454_vm0, %v1707_v4 }
  0x99   :  { %696 = vmatmul.mubr.bf16.gmra.mrb[56].mxu0 %v1709_v5  ;;  %824 = vmatmul.mubr.bf16.gmra.mrb[56].mxu1 %v1710_v6 }
  0x9a   :  { %1254 = vmatprep.mubr.msk.bf16.mxu0 %vm454_vm0, %v1711_v7  ;;  %1270 = vmatprep.mubr.msk.bf16.mxu1 %vm454_vm0, %v1713_v8 }
  0xa1   :  { %704 = vmatmul.mubr.bf16.gmra.mrb[60].mxu0 %v1715_v9  ;;  %832 = vmatmul.mubr.bf16.gmra.mrb[60].mxu1 %v1716_v10 }
  0xfc   :  { %v585_v12 = vpop.f32.mrb[0].mxu0  ;;  %v713_v13 = vpop.f32.mrb[0].mxu1 }
  0xfd   :  { %v587_v14 = vpop.f32.mrb[1].mxu0  ;;  %v715_v15 = vpop.f32.mrb[1].mxu1  ;;  %v586_v18 = vadd.f32 %v1995_v11, %v585_v12  ;;  %v714_v19 = vadd.f32 %v1995_v11, %v713_v13 }
  0xfe   :  { %v588_v16 = vpop.f32.mrb[2].mxu0  ;;  %v716_v17 = vpop.f32.mrb[2].mxu1 }
  0xff   :  { %v589_v20 = vadd.f32 %v1995_v11, %v588_v16  ;;  %v717_v21 = vadd.f32 %v1995_v11, %v716_v17  ;;  %v590_v22 = vpop.f32.mrb[3].mxu0  ;;  %v718_v23 = vpop.f32.mrb[3].mxu1 }
 0x101   :  { %v1402_v24 = vpack.c.bf16 %v589_v20, %v586_v18  ;;  %v1482_v25 = vpack.c.bf16 %v717_v21, %v714_v19 }
 0x103   :  { %1403 = vst [vmem:[%s2160_s3] sm:$0xff] %v1402_v24   ;;  %1574 = vst [vmem:[%s2160_s3 + $0x80] sm:$0xff] %v1482_v25  }
 0x104   :  { %v593_v26 = vpop.f32.mrb[4].mxu0  ;;  %v721_v27 = vpop.f32.mrb[4].mxu1 }
 0x105   :  { %v595_v28 = vpop.f32.mrb[5].mxu0  ;;  %v723_v29 = vpop.f32.mrb[5].mxu1  ;;  %v594_v32 = vadd.f32 %v1995_v11, %v593_v26  ;;  %v722_v33 = vadd.f32 %v1995_v11, %v721_v27 }
 0x106   :  { %v596_v30 = vpop.f32.mrb[6].mxu0  ;;  %v724_v31 = vpop.f32.mrb[6].mxu1 }
 0x107   :  { %v597_v34 = vadd.f32 %v1995_v11, %v596_v30  ;;  %v725_v35 = vadd.f32 %v1995_v11, %v724_v31  ;;  %v598_v36 = vpop.f32.mrb[7].mxu0  ;;  %v726_v37 = vpop.f32.mrb[7].mxu1 }
 0x109   :  { %v1407_v38 = vpack.c.bf16 %v597_v34, %v594_v32  ;;  %v1487_v39 = vpack.c.bf16 %v725_v35, %v722_v33 }
 0x10b   :  { %1559 = vst [vmem:[%s2160_s3 + $0x8] sm:$0xff] %v1407_v38   ;;  %1575 = vst [vmem:[%s2160_s3 + $0x88] sm:$0xff] %v1487_v39  }
 0x10c   :  { %v601_v40 = vpop.f32.mrb[8].mxu0  ;;  %v729_v41 = vpop.f32.mrb[8].mxu1 }
 0x10d   :  { %v603_v42 = vpop.f32.mrb[9].mxu0  ;;  %v731_v43 = vpop.f32.mrb[9].mxu1  ;;  %v602_v46 = vadd.f32 %v1995_v11, %v601_v40  ;;  %v730_v47 = vadd.f32 %v1995_v11, %v729_v41 }
 0x10e   :  { %v604_v44 = vpop.f32.mrb[10].mxu0  ;;  %v732_v45 = vpop.f32.mrb[10].mxu1 }
 0x10f   :  { %v605_v48 = vadd.f32 %v1995_v11, %v604_v44  ;;  %v733_v49 = vadd.f32 %v1995_v11, %v732_v45  ;;  %v606_v50 = vpop.f32.mrb[11].mxu0  ;;  %v734_v51 = vpop.f32.mrb[11].mxu1 }
 0x111   :  { %v1412_v52 = vpack.c.bf16 %v605_v48, %v602_v46  ;;  %v1492_v53 = vpack.c.bf16 %v733_v49, %v730_v47 }
 0x113   :  { %1560 = vst [vmem:[%s2160_s3 + $0x10] sm:$0xff] %v1412_v52   ;;  %1576 = vst [vmem:[%s2160_s3 + $0x90] sm:$0xff] %v1492_v53  }
 0x114   :  { %v609_v54 = vpop.f32.mrb[12].mxu0  ;;  %v737_v55 = vpop.f32.mrb[12].mxu1 }
 0x115   :  { %v611_v56 = vpop.f32.mrb[13].mxu0  ;;  %v739_v57 = vpop.f32.mrb[13].mxu1  ;;  %v610_v60 = vadd.f32 %v1995_v11, %v609_v54  ;;  %v738_v61 = vadd.f32 %v1995_v11, %v737_v55 }
 0x116   :  { %v612_v58 = vpop.f32.mrb[14].mxu0  ;;  %v740_v59 = vpop.f32.mrb[14].mxu1 }
 0x117   :  { %v613_v62 = vadd.f32 %v1995_v11, %v612_v58  ;;  %v741_v63 = vadd.f32 %v1995_v11, %v740_v59  ;;  %v614_v0 = vpop.f32.mrb[15].mxu0  ;;  %v742_v1 = vpop.f32.mrb[15].mxu1 }
 0x119   :  { %v1417_v2 = vpack.c.bf16 %v613_v62, %v610_v60  ;;  %v1497_v3 = vpack.c.bf16 %v741_v63, %v738_v61 }
 0x11b   :  { %1561 = vst [vmem:[%s2160_s3 + $0x18] sm:$0xff] %v1417_v2   ;;  %1577 = vst [vmem:[%s2160_s3 + $0x98] sm:$0xff] %v1497_v3  }
 0x11c   :  { %v617_v4 = vpop.f32.mrb[16].mxu0  ;;  %v745_v5 = vpop.f32.mrb[16].mxu1 }
 0x11d   :  { %v619_v6 = vpop.f32.mrb[17].mxu0  ;;  %v747_v7 = vpop.f32.mrb[17].mxu1  ;;  %v618_v10 = vadd.f32 %v1995_v11, %v617_v4  ;;  %v746_v12 = vadd.f32 %v1995_v11, %v745_v5 }
 0x11e   :  { %v620_v8 = vpop.f32.mrb[18].mxu0  ;;  %v748_v9 = vpop.f32.mrb[18].mxu1 }
 0x11f   :  { %v621_v13 = vadd.f32 %v1995_v11, %v620_v8  ;;  %v749_v14 = vadd.f32 %v1995_v11, %v748_v9  ;;  %v622_v15 = vpop.f32.mrb[19].mxu0  ;;  %v750_v16 = vpop.f32.mrb[19].mxu1 }
 0x121   :  { %v1422_v17 = vpack.c.bf16 %v621_v13, %v618_v10  ;;  %v1502_v18 = vpack.c.bf16 %v749_v14, %v746_v12 }
 0x123   :  { %1562 = vst [vmem:[%s2160_s3 + $0x20] sm:$0xff] %v1422_v17   ;;  %1578 = vst [vmem:[%s2160_s3 + $0xa0] sm:$0xff] %v1502_v18  }
 0x124   :  { %v625_v19 = vpop.f32.mrb[20].mxu0  ;;  %v753_v20 = vpop.f32.mrb[20].mxu1 }
 0x125   :  { %v627_v21 = vpop.f32.mrb[21].mxu0  ;;  %v755_v22 = vpop.f32.mrb[21].mxu1  ;;  %v626_v25 = vadd.f32 %v1995_v11, %v625_v19  ;;  %v754_v26 = vadd.f32 %v1995_v11, %v753_v20 }
 0x126   :  { %v628_v23 = vpop.f32.mrb[22].mxu0  ;;  %v756_v24 = vpop.f32.mrb[22].mxu1 }
 0x127   :  { %v629_v27 = vadd.f32 %v1995_v11, %v628_v23  ;;  %v757_v28 = vadd.f32 %v1995_v11, %v756_v24  ;;  %v630_v29 = vpop.f32.mrb[23].mxu0  ;;  %v758_v30 = vpop.f32.mrb[23].mxu1 }
 0x129   :  { %v1427_v31 = vpack.c.bf16 %v629_v27, %v626_v25  ;;  %v1507_v32 = vpack.c.bf16 %v757_v28, %v754_v26 }
 0x12b   :  { %1563 = vst [vmem:[%s2160_s3 + $0x28] sm:$0xff] %v1427_v31   ;;  %1579 = vst [vmem:[%s2160_s3 + $0xa8] sm:$0xff] %v1507_v32  }
 0x12c   :  { %v633_v33 = vpop.f32.mrb[24].mxu0  ;;  %v761_v34 = vpop.f32.mrb[24].mxu1 }
 0x12d   :  { %v635_v35 = vpop.f32.mrb[25].mxu0  ;;  %v763_v36 = vpop.f32.mrb[25].mxu1  ;;  %v634_v39 = vadd.f32 %v1995_v11, %v633_v33  ;;  %v762_v40 = vadd.f32 %v1995_v11, %v761_v34 }
 0x12e   :  { %v636_v37 = vpop.f32.mrb[26].mxu0  ;;  %v764_v38 = vpop.f32.mrb[26].mxu1 }
 0x12f   :  { %v637_v41 = vadd.f32 %v1995_v11, %v636_v37  ;;  %v765_v42 = vadd.f32 %v1995_v11, %v764_v38  ;;  %v638_v43 = vpop.f32.mrb[27].mxu0  ;;  %v766_v44 = vpop.f32.mrb[27].mxu1 }
 0x131   :  { %v1432_v45 = vpack.c.bf16 %v637_v41, %v634_v39  ;;  %v1512_v46 = vpack.c.bf16 %v765_v42, %v762_v40 }
 0x133   :  { %1564 = vst [vmem:[%s2160_s3 + $0x30] sm:$0xff] %v1432_v45   ;;  %1580 = vst [vmem:[%s2160_s3 + $0xb0] sm:$0xff] %v1512_v46  }
 0x134   :  { %v641_v47 = vpop.f32.mrb[28].mxu0  ;;  %v769_v48 = vpop.f32.mrb[28].mxu1 }
 0x135   :  { %v643_v49 = vpop.f32.mrb[29].mxu0  ;;  %v771_v50 = vpop.f32.mrb[29].mxu1  ;;  %v642_v53 = vadd.f32 %v1995_v11, %v641_v47  ;;  %v770_v54 = vadd.f32 %v1995_v11, %v769_v48 }
 0x136   :  { %v644_v51 = vpop.f32.mrb[30].mxu0  ;;  %v772_v52 = vpop.f32.mrb[30].mxu1 }
 0x137   :  { %v645_v55 = vadd.f32 %v1995_v11, %v644_v51  ;;  %v773_v56 = vadd.f32 %v1995_v11, %v772_v52  ;;  %v646_v57 = vpop.f32.mrb[31].mxu0  ;;  %v774_v58 = vpop.f32.mrb[31].mxu1 }
 0x139   :  { %v1437_v59 = vpack.c.bf16 %v645_v55, %v642_v53  ;;  %v1517_v60 = vpack.c.bf16 %v773_v56, %v770_v54 }
 0x13b   :  { %1565 = vst [vmem:[%s2160_s3 + $0x38] sm:$0xff] %v1437_v59   ;;  %1581 = vst [vmem:[%s2160_s3 + $0xb8] sm:$0xff] %v1517_v60  }
 0x13c   :  { %v649_v61 = vpop.f32.mrb[32].mxu0  ;;  %v777_v62 = vpop.f32.mrb[32].mxu1 }
 0x13d   :  { %v651_v63 = vpop.f32.mrb[33].mxu0  ;;  %v779_v0 = vpop.f32.mrb[33].mxu1  ;;  %v650_v3 = vadd.f32 %v1995_v11, %v649_v61  ;;  %v778_v4 = vadd.f32 %v1995_v11, %v777_v62 }
 0x13e   :  { %v652_v1 = vpop.f32.mrb[34].mxu0  ;;  %v780_v2 = vpop.f32.mrb[34].mxu1 }
 0x13f   :  { %v653_v5 = vadd.f32 %v1995_v11, %v652_v1  ;;  %v781_v6 = vadd.f32 %v1995_v11, %v780_v2  ;;  %v654_v7 = vpop.f32.mrb[35].mxu0  ;;  %v782_v8 = vpop.f32.mrb[35].mxu1 }
 0x141   :  { %v1442_v9 = vpack.c.bf16 %v653_v5, %v650_v3  ;;  %v1522_v10 = vpack.c.bf16 %v781_v6, %v778_v4 }
 0x143   :  { %1566 = vst [vmem:[%s2160_s3 + $0x40] sm:$0xff] %v1442_v9   ;;  %1582 = vst [vmem:[%s2160_s3 + $0xc0] sm:$0xff] %v1522_v10  }
 0x144   :  { %v657_v12 = vpop.f32.mrb[36].mxu0  ;;  %v785_v13 = vpop.f32.mrb[36].mxu1 }
 0x145   :  { %v659_v14 = vpop.f32.mrb[37].mxu0  ;;  %v787_v15 = vpop.f32.mrb[37].mxu1  ;;  %v658_v18 = vadd.f32 %v1995_v11, %v657_v12  ;;  %v786_v19 = vadd.f32 %v1995_v11, %v785_v13 }
 0x146   :  { %v660_v16 = vpop.f32.mrb[38].mxu0  ;;  %v788_v17 = vpop.f32.mrb[38].mxu1 }
 0x147   :  { %v661_v20 = vadd.f32 %v1995_v11, %v660_v16  ;;  %v789_v21 = vadd.f32 %v1995_v11, %v788_v17  ;;  %v662_v22 = vpop.f32.mrb[39].mxu0  ;;  %v790_v23 = vpop.f32.mrb[39].mxu1 }
 0x149   :  { %v1447_v24 = vpack.c.bf16 %v661_v20, %v658_v18  ;;  %v1527_v25 = vpack.c.bf16 %v789_v21, %v786_v19 }
 0x14b   :  { %1567 = vst [vmem:[%s2160_s3 + $0x48] sm:$0xff] %v1447_v24   ;;  %1583 = vst [vmem:[%s2160_s3 + $0xc8] sm:$0xff] %v1527_v25  }
 0x14c   :  { %v665_v26 = vpop.f32.mrb[40].mxu0  ;;  %v793_v27 = vpop.f32.mrb[40].mxu1 }
 0x14d   :  { %v667_v28 = vpop.f32.mrb[41].mxu0  ;;  %v795_v29 = vpop.f32.mrb[41].mxu1  ;;  %v666_v32 = vadd.f32 %v1995_v11, %v665_v26  ;;  %v794_v33 = vadd.f32 %v1995_v11, %v793_v27 }
 0x14e   :  { %v668_v30 = vpop.f32.mrb[42].mxu0  ;;  %v796_v31 = vpop.f32.mrb[42].mxu1 }
 0x14f   :  { %v669_v34 = vadd.f32 %v1995_v11, %v668_v30  ;;  %v797_v35 = vadd.f32 %v1995_v11, %v796_v31  ;;  %v670_v36 = vpop.f32.mrb[43].mxu0  ;;  %v798_v37 = vpop.f32.mrb[43].mxu1 }
 0x151   :  { %v1452_v38 = vpack.c.bf16 %v669_v34, %v666_v32  ;;  %v1532_v39 = vpack.c.bf16 %v797_v35, %v794_v33 }
 0x153   :  { %1568 = vst [vmem:[%s2160_s3 + $0x50] sm:$0xff] %v1452_v38   ;;  %1584 = vst [vmem:[%s2160_s3 + $0xd0] sm:$0xff] %v1532_v39  }
 0x154   :  { %v673_v40 = vpop.f32.mrb[44].mxu0  ;;  %v801_v41 = vpop.f32.mrb[44].mxu1 }
 0x155   :  { %v675_v42 = vpop.f32.mrb[45].mxu0  ;;  %v803_v43 = vpop.f32.mrb[45].mxu1  ;;  %v674_v46 = vadd.f32 %v1995_v11, %v673_v40  ;;  %v802_v47 = vadd.f32 %v1995_v11, %v801_v41 }
 0x156   :  { %v676_v44 = vpop.f32.mrb[46].mxu0  ;;  %v804_v45 = vpop.f32.mrb[46].mxu1 }
 0x157   :  { %v677_v48 = vadd.f32 %v1995_v11, %v676_v44  ;;  %v805_v49 = vadd.f32 %v1995_v11, %v804_v45  ;;  %v678_v50 = vpop.f32.mrb[47].mxu0  ;;  %v806_v51 = vpop.f32.mrb[47].mxu1 }
 0x159   :  { %v1457_v52 = vpack.c.bf16 %v677_v48, %v674_v46  ;;  %v1537_v53 = vpack.c.bf16 %v805_v49, %v802_v47 }
 0x15b   :  { %1569 = vst [vmem:[%s2160_s3 + $0x58] sm:$0xff] %v1457_v52   ;;  %1585 = vst [vmem:[%s2160_s3 + $0xd8] sm:$0xff] %v1537_v53  }
 0x15c   :  { %v681_v54 = vpop.f32.mrb[48].mxu0  ;;  %v809_v55 = vpop.f32.mrb[48].mxu1 }
 0x15d   :  { %v683_v56 = vpop.f32.mrb[49].mxu0  ;;  %v811_v57 = vpop.f32.mrb[49].mxu1  ;;  %v682_v60 = vadd.f32 %v1995_v11, %v681_v54  ;;  %v810_v61 = vadd.f32 %v1995_v11, %v809_v55 }
 0x15e   :  { %v684_v58 = vpop.f32.mrb[50].mxu0  ;;  %v812_v59 = vpop.f32.mrb[50].mxu1 }
 0x15f   :  { %v685_v62 = vadd.f32 %v1995_v11, %v684_v58  ;;  %v813_v63 = vadd.f32 %v1995_v11, %v812_v59  ;;  %v686_v0 = vpop.f32.mrb[51].mxu0  ;;  %v814_v1 = vpop.f32.mrb[51].mxu1 }
 0x161   :  { %v1462_v2 = vpack.c.bf16 %v685_v62, %v682_v60  ;;  %v1542_v3 = vpack.c.bf16 %v813_v63, %v810_v61 }
 0x163   :  { %1570 = vst [vmem:[%s2160_s3 + $0x60] sm:$0xff] %v1462_v2   ;;  %1586 = vst [vmem:[%s2160_s3 + $0xe0] sm:$0xff] %v1542_v3  }
 0x164   :  { %v689_v4 = vpop.f32.mrb[52].mxu0  ;;  %v817_v5 = vpop.f32.mrb[52].mxu1 }
 0x165   :  { %v691_v6 = vpop.f32.mrb[53].mxu0  ;;  %v819_v7 = vpop.f32.mrb[53].mxu1  ;;  %v690_v10 = vadd.f32 %v1995_v11, %v689_v4  ;;  %v818_v12 = vadd.f32 %v1995_v11, %v817_v5 }
 0x166   :  { %v692_v8 = vpop.f32.mrb[54].mxu0  ;;  %v820_v9 = vpop.f32.mrb[54].mxu1 }
 0x167   :  { %v693_v13 = vadd.f32 %v1995_v11, %v692_v8  ;;  %v821_v14 = vadd.f32 %v1995_v11, %v820_v9  ;;  %v694_v15 = vpop.f32.mrb[55].mxu0  ;;  %v822_v16 = vpop.f32.mrb[55].mxu1 }
 0x169   :  { %v1467_v17 = vpack.c.bf16 %v693_v13, %v690_v10  ;;  %v1547_v18 = vpack.c.bf16 %v821_v14, %v818_v12 }
 0x16b   :  { %1571 = vst [vmem:[%s2160_s3 + $0x68] sm:$0xff] %v1467_v17   ;;  %1587 = vst [vmem:[%s2160_s3 + $0xe8] sm:$0xff] %v1547_v18  }
 0x16c   :  { %v697_v19 = vpop.f32.mrb[56].mxu0  ;;  %v825_v20 = vpop.f32.mrb[56].mxu1 }
 0x16d   :  { %v699_v21 = vpop.f32.mrb[57].mxu0  ;;  %v827_v22 = vpop.f32.mrb[57].mxu1  ;;  %v698_v25 = vadd.f32 %v1995_v11, %v697_v19  ;;  %v826_v26 = vadd.f32 %v1995_v11, %v825_v20 }
 0x16e   :  { %v700_v23 = vpop.f32.mrb[58].mxu0  ;;  %v828_v24 = vpop.f32.mrb[58].mxu1 }
 0x16f   :  { %v701_v27 = vadd.f32 %v1995_v11, %v700_v23  ;;  %v829_v28 = vadd.f32 %v1995_v11, %v828_v24  ;;  %v702_v29 = vpop.f32.mrb[59].mxu0  ;;  %v830_v30 = vpop.f32.mrb[59].mxu1 }
 0x171   :  { %v1472_v31 = vpack.c.bf16 %v701_v27, %v698_v25  ;;  %v1552_v32 = vpack.c.bf16 %v829_v28, %v826_v26 }
 0x173   :  { %1572 = vst [vmem:[%s2160_s3 + $0x70] sm:$0xff] %v1472_v31   ;;  %1588 = vst [vmem:[%s2160_s3 + $0xf0] sm:$0xff] %v1552_v32  }
 0x174   :  { %v705_v33 = vpop.f32.mrb[60].mxu0  ;;  %v833_v34 = vpop.f32.mrb[60].mxu1 }
 0x175   :  { %v707_v35 = vpop.f32.mrb[61].mxu0  ;;  %v835_v36 = vpop.f32.mrb[61].mxu1  ;;  %v706_v39 = vadd.f32 %v1995_v11, %v705_v33  ;;  %v834_v40 = vadd.f32 %v1995_v11, %v833_v34 }
 0x176   :  { %v708_v37 = vpop.f32.mrb[62].mxu0  ;;  %v836_v38 = vpop.f32.mrb[62].mxu1 }
 0x177   :  { %v709_v41 = vadd.f32 %v1995_v11, %v708_v37  ;;  %v837_v42 = vadd.f32 %v1995_v11, %v836_v38  ;;  %v710_v43 = vpop.f32.mrb[63].mxu0  ;;  %v838_v44 = vpop.f32.mrb[63].mxu1 }
 0x179   :  { %v1477_v45 = vpack.c.bf16 %v709_v41, %v706_v39  ;;  %v1557_v46 = vpack.c.bf16 %v837_v42, %v834_v40 }
 0x17b   :  { %1573 = vst [vmem:[%s2160_s3 + $0x78] sm:$0xff] %v1477_v45   ;;  %1589 = vst [vmem:[%s2160_s3 + $0xf8] sm:$0xff] %v1557_v46  }

// kernel: hybridnet_forward.25
= control target key start
LH: loop header
LB: loop body
LE: loop exit
PB: predicated region body
PF: predicated region fallthrough
CT: control target
= control target key end

     0   :  { %v1741_v0 = vmov 0   ;;  %vm470_vm0 = vcmask 523264   ;;  %s2211_s1 = inlined_call_operand.vmem [shape: bf16[192,128], index: 1, kind: input, shape index: {}]   ;;  %s2212_s0 = inlined_call_operand.vmem [shape: bf16[512,192], index: 0, kind: input, shape index: {}]   ;;  %s2213_s2 = inlined_call_operand.vmem [shape: f32[1,128], index: 2, kind: input, shape index: {}]   ;;  %s2214_s3 = inlined_call_operand.vmem [shape: bf16[512,128], index: 3, kind: output, shape index: {}]  }
   0x1   :  { %567 = vmatprep.subr.bf16.mxu0 %v1741_v0  ;;  %1608 = vmatprep.subr.bf16.mxu1 %v1741_v0  ;;  %v1633_v1 = vld [vmem:[%s2211_s1] sm:$0xff]   ;;  %v1634_v2 = vld [vmem:[%s2211_s1 + $0x8] sm:$0xff]   ;;  %v1635_v3 = vld [vmem:[%s2211_s1 + $0x10] sm:$0xff]  }
   0x2   :  { %568 = vmatpush1.bf16.msra.mxu0 %v1633_v1  ;;  %1620 = vmatpush1.bf16.msra.mxu1 %v1633_v1  ;;  %v1636_v4 = vld [vmem:[%s2211_s1 + $0x18] sm:$0xff]   ;;  %v1647_v5 = vld [vmem:[%s2212_s0 + $0x4] ss:$8 sps:$4 sm:$0xff]   ;;  %v1639_v9 = vld [vmem:[%s2211_s1 + $0x30] sm:$0xff]  }
   0x3   :  { %569 = vmatprep.subr.bf16.mxu0 %v1741_v0  ;;  %1609 = vmatprep.subr.bf16.mxu1 %v1741_v0  ;;  %v1637_v6 = vld [vmem:[%s2211_s1 + $0x20] sm:$0xff]   ;;  %v1638_v8 = vld [vmem:[%s2211_s1 + $0x28] sm:$0xff]   ;;  %v1640_v10 = vld [vmem:[%s2211_s1 + $0x38] sm:$0xff]  }
   0x4   :  { %v1650_v7 = vld [vmem:[%s2212_s0 + $0x104] ss:$8 sps:$4 sm:$0xff]   ;;  %1257 = vmatprep.mubr.msk.bf16.mxu0 %vm470_vm0, %v1647_v5  ;;  %v1643_v13 = vld [vmem:[%s2211_s1 + $0x50] sm:$0xff]   ;;  %v1644_v14 = vld [vmem:[%s2211_s1 + $0x58] sm:$0xff]  }
   0x5   :  { %1273 = vmatprep.mubr.msk.bf16.mxu1 %vm470_vm0, %v1650_v7  ;;  %v1641_v11 = vld [vmem:[%s2211_s1 + $0x40] sm:$0xff]   ;;  %v1642_v12 = vld [vmem:[%s2211_s1 + $0x48] sm:$0xff]   ;;  %v1651_v17 = vld [vmem:[%s2212_s0 + $0x14] ss:$8 sps:$4 sm:$0xff]  }
   0x6   :  { %570 = vmatpush1.bf16.msra.mxu0 %v1634_v2  ;;  %1621 = vmatpush1.bf16.msra.mxu1 %v1634_v2  ;;  %v1645_v15 = vld [vmem:[%s2212_s0] ss:$8 sps:$4 sm:$0xff]   ;;  %v1653_v18 = vld [vmem:[%s2212_s0 + $0x114] ss:$8 sps:$4 sm:$0xff]   ;;  %v1655_v19 = vld [vmem:[%s2212_s0 + $0x10] ss:$8 sps:$4 sm:$0xff]  }
   0x7   :  { %571 = vmatprep.subr.bf16.mxu0 %v1741_v0  ;;  %1610 = vmatprep.subr.bf16.mxu1 %v1741_v0  ;;  %v1648_v16 = vld [vmem:[%s2212_s0 + $0x100] ss:$8 sps:$4 sm:$0xff]   ;;  %v1656_v20 = vld [vmem:[%s2212_s0 + $0x110] ss:$8 sps:$4 sm:$0xff]   ;;  %v1657_v21 = vld [vmem:[%s2212_s0 + $0x24] ss:$8 sps:$4 sm:$0xff]  }
   0x8   :  { %v1659_v22 = vld [vmem:[%s2212_s0 + $0x124] ss:$8 sps:$4 sm:$0xff]   ;;  %v1661_v23 = vld [vmem:[%s2212_s0 + $0x20] ss:$8 sps:$4 sm:$0xff]   ;;  %v1663_v25 = vld [vmem:[%s2212_s0 + $0x34] ss:$8 sps:$4 sm:$0xff]  }
   0x9   :  { %v1662_v24 = vld [vmem:[%s2212_s0 + $0x120] ss:$8 sps:$4 sm:$0xff]   ;;  %v1665_v26 = vld [vmem:[%s2212_s0 + $0x134] ss:$8 sps:$4 sm:$0xff]   ;;  %v1667_v27 = vld [vmem:[%s2212_s0 + $0x30] ss:$8 sps:$4 sm:$0xff]  }
   0xa   :  { %572 = vmatpush1.bf16.msra.mxu0 %v1635_v3  ;;  %1622 = vmatpush1.bf16.msra.mxu1 %v1635_v3  ;;  %v1668_v28 = vld [vmem:[%s2212_s0 + $0x130] ss:$8 sps:$4 sm:$0xff]   ;;  %v1669_v29 = vld [vmem:[%s2212_s0 + $0x44] ss:$8 sps:$4 sm:$0xff]   ;;  %v1673_v31 = vld [vmem:[%s2212_s0 + $0x40] ss:$8 sps:$4 sm:$0xff]  }
   0xb   :  { %573 = vmatprep.subr.bf16.mxu0 %v1741_v0  ;;  %1611 = vmatprep.subr.bf16.mxu1 %v1741_v0  ;;  %v1671_v30 = vld [vmem:[%s2212_s0 + $0x144] ss:$8 sps:$4 sm:$0xff]   ;;  %v1674_v32 = vld [vmem:[%s2212_s0 + $0x140] ss:$8 sps:$4 sm:$0xff]   ;;  %v1675_v33 = vld [vmem:[%s2212_s0 + $0x54] ss:$8 sps:$4 sm:$0xff]  }
   0xc   :  { %v1677_v34 = vld [vmem:[%s2212_s0 + $0x154] ss:$8 sps:$4 sm:$0xff]   ;;  %v1679_v35 = vld [vmem:[%s2212_s0 + $0x50] ss:$8 sps:$4 sm:$0xff]   ;;  %v1681_v37 = vld [vmem:[%s2212_s0 + $0x64] ss:$8 sps:$4 sm:$0xff]  }
   0xd   :  { %v1680_v36 = vld [vmem:[%s2212_s0 + $0x150] ss:$8 sps:$4 sm:$0xff]   ;;  %v1683_v38 = vld [vmem:[%s2212_s0 + $0x164] ss:$8 sps:$4 sm:$0xff]   ;;  %v1685_v39 = vld [vmem:[%s2212_s0 + $0x60] ss:$8 sps:$4 sm:$0xff]  }
   0xe   :  { %574 = vmatpush1.bf16.msra.mxu0 %v1636_v4  ;;  %1623 = vmatpush1.bf16.msra.mxu1 %v1636_v4  ;;  %v1686_v40 = vld [vmem:[%s2212_s0 + $0x160] ss:$8 sps:$4 sm:$0xff]   ;;  %v1687_v41 = vld [vmem:[%s2212_s0 + $0x74] ss:$8 sps:$4 sm:$0xff]   ;;  %v1691_v43 = vld [vmem:[%s2212_s0 + $0x70] ss:$8 sps:$4 sm:$0xff]  }
   0xf   :  { %575 = vmatprep.subr.bf16.mxu0 %v1741_v0  ;;  %1612 = vmatprep.subr.bf16.mxu1 %v1741_v0  ;;  %v1689_v42 = vld [vmem:[%s2212_s0 + $0x174] ss:$8 sps:$4 sm:$0xff]   ;;  %v1692_v44 = vld [vmem:[%s2212_s0 + $0x170] ss:$8 sps:$4 sm:$0xff]   ;;  %v1693_v45 = vld [vmem:[%s2212_s0 + $0x84] ss:$8 sps:$4 sm:$0xff]  }
  0x10   :  { %v1695_v46 = vld [vmem:[%s2212_s0 + $0x184] ss:$8 sps:$4 sm:$0xff]   ;;  %v1697_v47 = vld [vmem:[%s2212_s0 + $0x80] ss:$8 sps:$4 sm:$0xff]   ;;  %v1699_v49 = vld [vmem:[%s2212_s0 + $0x94] ss:$8 sps:$4 sm:$0xff]  }
  0x11   :  { %v1698_v48 = vld [vmem:[%s2212_s0 + $0x180] ss:$8 sps:$4 sm:$0xff]   ;;  %v1701_v50 = vld [vmem:[%s2212_s0 + $0x194] ss:$8 sps:$4 sm:$0xff]   ;;  %v1703_v51 = vld [vmem:[%s2212_s0 + $0x90] ss:$8 sps:$4 sm:$0xff]  }
  0x12   :  { %576 = vmatpush1.bf16.msra.mxu0 %v1637_v6  ;;  %1624 = vmatpush1.bf16.msra.mxu1 %v1637_v6  ;;  %v1704_v52 = vld [vmem:[%s2212_s0 + $0x190] ss:$8 sps:$4 sm:$0xff]   ;;  %v1705_v53 = vld [vmem:[%s2212_s0 + $0xa4] ss:$8 sps:$4 sm:$0xff]   ;;  %v1709_v55 = vld [vmem:[%s2212_s0 + $0xa0] ss:$8 sps:$4 sm:$0xff]  }
  0x13   :  { %577 = vmatprep.subr.bf16.mxu0 %v1741_v0  ;;  %1613 = vmatprep.subr.bf16.mxu1 %v1741_v0  ;;  %v1707_v54 = vld [vmem:[%s2212_s0 + $0x1a4] ss:$8 sps:$4 sm:$0xff]   ;;  %v1710_v56 = vld [vmem:[%s2212_s0 + $0x1a0] ss:$8 sps:$4 sm:$0xff]   ;;  %v1711_v57 = vld [vmem:[%s2212_s0 + $0xb4] ss:$8 sps:$4 sm:$0xff]  }
  0x14   :  { %v1713_v58 = vld [vmem:[%s2212_s0 + $0x1b4] ss:$8 sps:$4 sm:$0xff]   ;;  %v1715_v59 = vld [vmem:[%s2212_s0 + $0xb0] ss:$8 sps:$4 sm:$0xff]   ;;  %v1717_v61 = vld [vmem:[%s2212_s0 + $0xc4] ss:$8 sps:$4 sm:$0xff]  }
  0x15   :  { %v1716_v60 = vld [vmem:[%s2212_s0 + $0x1b0] ss:$8 sps:$4 sm:$0xff]   ;;  %v1719_v62 = vld [vmem:[%s2212_s0 + $0x1c4] ss:$8 sps:$4 sm:$0xff]   ;;  %v1721_v63 = vld [vmem:[%s2212_s0 + $0xc0] ss:$8 sps:$4 sm:$0xff]  }
  0x16   :  { %578 = vmatpush1.bf16.msra.mxu0 %v1638_v8  ;;  %1625 = vmatpush1.bf16.msra.mxu1 %v1638_v8  ;;  %v1723_v1 = vld [vmem:[%s2212_s0 + $0xd4] ss:$8 sps:$4 sm:$0xff]   ;;  %v1727_v3 = vld [vmem:[%s2212_s0 + $0xd0] ss:$8 sps:$4 sm:$0xff]   ;;  %v1729_v5 = vld [vmem:[%s2212_s0 + $0xe4] ss:$8 sps:$4 sm:$0xff]  }
  0x17   :  { %579 = vmatprep.subr.bf16.mxu0 %v1741_v0  ;;  %1614 = vmatprep.subr.bf16.mxu1 %v1741_v0  ;;  %v1725_v2 = vld [vmem:[%s2212_s0 + $0x1d4] ss:$8 sps:$4 sm:$0xff]   ;;  %v1728_v4 = vld [vmem:[%s2212_s0 + $0x1d0] ss:$8 sps:$4 sm:$0xff]   ;;  %v1731_v6 = vld [vmem:[%s2212_s0 + $0x1e4] ss:$8 sps:$4 sm:$0xff]  }
  0x18   :  { %v1733_v7 = vld [vmem:[%s2212_s0 + $0xe0] ss:$8 sps:$4 sm:$0xff]  }
  0x19   :  { %v1734_v8 = vld [vmem:[%s2212_s0 + $0x1e0] ss:$8 sps:$4 sm:$0xff]  }
  0x1a   :  { %580 = vmatpush1.bf16.msra.mxu0 %v1639_v9  ;;  %1626 = vmatpush1.bf16.msra.mxu1 %v1639_v9  ;;  %v1735_v9 = vld [vmem:[%s2212_s0 + $0xf4] ss:$8 sps:$4 sm:$0xff]  }
  0x1b   :  { %581 = vmatprep.subr.bf16.mxu0 %v1741_v0  ;;  %1615 = vmatprep.subr.bf16.mxu1 %v1741_v0 }
  0x1e   :  { %582 = vmatpush1.bf16.msra.mxu0 %v1640_v10  ;;  %1627 = vmatpush1.bf16.msra.mxu1 %v1640_v10  ;;  %v1737_v10 = vld [vmem:[%s2212_s0 + $0x1f4] ss:$8 sps:$4 sm:$0xff]  }
  0x1f   :  { %583 = vmatprep.subr.bf16.mxu0 %v1741_v0  ;;  %1616 = vmatprep.subr.bf16.mxu1 %v1741_v0 }
  0x22   :  { %584 = vmatpush1.bf16.msra.mxu0 %v1641_v11  ;;  %1628 = vmatpush1.bf16.msra.mxu1 %v1641_v11  ;;  %v1739_v11 = vld [vmem:[%s2212_s0 + $0xf0] ss:$8 sps:$4 sm:$0xff]  }
  0x23   :  { %585 = vmatprep.subr.bf16.mxu0 %v1741_v0  ;;  %1617 = vmatprep.subr.bf16.mxu1 %v1741_v0 }
  0x26   :  { %586 = vmatpush1.bf16.msra.mxu0 %v1642_v12  ;;  %1629 = vmatpush1.bf16.msra.mxu1 %v1642_v12  ;;  %v1740_v12 = vld [vmem:[%s2212_s0 + $0x1f0] ss:$8 sps:$4 sm:$0xff]  }
  0x27   :  { %587 = vmatprep.subr.bf16.mxu0 %v1741_v0  ;;  %1618 = vmatprep.subr.bf16.mxu1 %v1741_v0 }
  0x2a   :  { %588 = vmatpush1.bf16.msra.mxu0 %v1643_v13  ;;  %1630 = vmatpush1.bf16.msra.mxu1 %v1643_v13  ;;  %v2049_v13 = vld [vmem:[%s2213_s2] ss:$0 sm:$0xff] }
  0x2b   :  { %589 = vmatprep.subr.bf16.mxu0 %v1741_v0  ;;  %1619 = vmatprep.subr.bf16.mxu1 %v1741_v0  ;;  %v1722_v0 = vld [vmem:[%s2212_s0 + $0x1c0] ss:$8 sps:$4 sm:$0xff]  }
  0x2e   :  { %590 = vmatpush1.bf16.msra.mxu0 %v1644_v14  ;;  %1631 = vmatpush1.bf16.msra.mxu1 %v1644_v14 }
  0x31   :  { %600 = vmatmul.mubr.bf16.vlgmr.msra.gmra.mrb[0].mxu0 %v1645_v15  ;;  %728 = vmatmul.mubr.bf16.vlgmr.msra.gmra.mrb[0].mxu1 %v1648_v16 }
  0x32   :  { %1258 = vmatprep.mubr.msk.bf16.mxu0 %vm470_vm0, %v1651_v17  ;;  %1274 = vmatprep.mubr.msk.bf16.mxu1 %vm470_vm0, %v1653_v18 }
  0x39   :  { %608 = vmatmul.mubr.bf16.gmra.mrb[4].mxu0 %v1655_v19  ;;  %736 = vmatmul.mubr.bf16.gmra.mrb[4].mxu1 %v1656_v20 }
  0x3a   :  { %1259 = vmatprep.mubr.msk.bf16.mxu0 %vm470_vm0, %v1657_v21  ;;  %1275 = vmatprep.mubr.msk.bf16.mxu1 %vm470_vm0, %v1659_v22 }
  0x41   :  { %616 = vmatmul.mubr.bf16.gmra.mrb[8].mxu0 %v1661_v23  ;;  %744 = vmatmul.mubr.bf16.gmra.mrb[8].mxu1 %v1662_v24 }
  0x42   :  { %1260 = vmatprep.mubr.msk.bf16.mxu0 %vm470_vm0, %v1663_v25  ;;  %1276 = vmatprep.mubr.msk.bf16.mxu1 %vm470_vm0, %v1665_v26 }
  0x49   :  { %624 = vmatmul.mubr.bf16.gmra.mrb[12].mxu0 %v1667_v27  ;;  %752 = vmatmul.mubr.bf16.gmra.mrb[12].mxu1 %v1668_v28 }
  0x4a   :  { %1261 = vmatprep.mubr.msk.bf16.mxu0 %vm470_vm0, %v1669_v29  ;;  %1277 = vmatprep.mubr.msk.bf16.mxu1 %vm470_vm0, %v1671_v30 }
  0x51   :  { %632 = vmatmul.mubr.bf16.gmra.mrb[16].mxu0 %v1673_v31  ;;  %760 = vmatmul.mubr.bf16.gmra.mrb[16].mxu1 %v1674_v32 }
  0x52   :  { %1262 = vmatprep.mubr.msk.bf16.mxu0 %vm470_vm0, %v1675_v33  ;;  %1278 = vmatprep.mubr.msk.bf16.mxu1 %vm470_vm0, %v1677_v34 }
  0x59   :  { %640 = vmatmul.mubr.bf16.gmra.mrb[20].mxu0 %v1679_v35  ;;  %768 = vmatmul.mubr.bf16.gmra.mrb[20].mxu1 %v1680_v36 }
  0x5a   :  { %1263 = vmatprep.mubr.msk.bf16.mxu0 %vm470_vm0, %v1681_v37  ;;  %1279 = vmatprep.mubr.msk.bf16.mxu1 %vm470_vm0, %v1683_v38 }
  0x61   :  { %648 = vmatmul.mubr.bf16.gmra.mrb[24].mxu0 %v1685_v39  ;;  %776 = vmatmul.mubr.bf16.gmra.mrb[24].mxu1 %v1686_v40 }
  0x62   :  { %1264 = vmatprep.mubr.msk.bf16.mxu0 %vm470_vm0, %v1687_v41  ;;  %1280 = vmatprep.mubr.msk.bf16.mxu1 %vm470_vm0, %v1689_v42 }
  0x69   :  { %656 = vmatmul.mubr.bf16.gmra.mrb[28].mxu0 %v1691_v43  ;;  %784 = vmatmul.mubr.bf16.gmra.mrb[28].mxu1 %v1692_v44 }
  0x6a   :  { %1265 = vmatprep.mubr.msk.bf16.mxu0 %vm470_vm0, %v1693_v45  ;;  %1281 = vmatprep.mubr.msk.bf16.mxu1 %vm470_vm0, %v1695_v46 }
  0x71   :  { %664 = vmatmul.mubr.bf16.gmra.mrb[32].mxu0 %v1697_v47  ;;  %792 = vmatmul.mubr.bf16.gmra.mrb[32].mxu1 %v1698_v48 }
  0x72   :  { %1266 = vmatprep.mubr.msk.bf16.mxu0 %vm470_vm0, %v1699_v49  ;;  %1282 = vmatprep.mubr.msk.bf16.mxu1 %vm470_vm0, %v1701_v50 }
  0x79   :  { %672 = vmatmul.mubr.bf16.gmra.mrb[36].mxu0 %v1703_v51  ;;  %800 = vmatmul.mubr.bf16.gmra.mrb[36].mxu1 %v1704_v52 }
  0x7a   :  { %1267 = vmatprep.mubr.msk.bf16.mxu0 %vm470_vm0, %v1705_v53  ;;  %1283 = vmatprep.mubr.msk.bf16.mxu1 %vm470_vm0, %v1707_v54 }
  0x81   :  { %680 = vmatmul.mubr.bf16.gmra.mrb[40].mxu0 %v1709_v55  ;;  %808 = vmatmul.mubr.bf16.gmra.mrb[40].mxu1 %v1710_v56 }
  0x82   :  { %1268 = vmatprep.mubr.msk.bf16.mxu0 %vm470_vm0, %v1711_v57  ;;  %1284 = vmatprep.mubr.msk.bf16.mxu1 %vm470_vm0, %v1713_v58 }
  0x89   :  { %688 = vmatmul.mubr.bf16.gmra.mrb[44].mxu0 %v1715_v59  ;;  %816 = vmatmul.mubr.bf16.gmra.mrb[44].mxu1 %v1716_v60 }
  0x8a   :  { %1269 = vmatprep.mubr.msk.bf16.mxu0 %vm470_vm0, %v1717_v61  ;;  %1285 = vmatprep.mubr.msk.bf16.mxu1 %vm470_vm0, %v1719_v62 }
  0x91   :  { %696 = vmatmul.mubr.bf16.gmra.mrb[48].mxu0 %v1721_v63  ;;  %824 = vmatmul.mubr.bf16.gmra.mrb[48].mxu1 %v1722_v0 }
  0x92   :  { %1270 = vmatprep.mubr.msk.bf16.mxu0 %vm470_vm0, %v1723_v1  ;;  %1286 = vmatprep.mubr.msk.bf16.mxu1 %vm470_vm0, %v1725_v2 }
  0x99   :  { %704 = vmatmul.mubr.bf16.gmra.mrb[52].mxu0 %v1727_v3  ;;  %832 = vmatmul.mubr.bf16.gmra.mrb[52].mxu1 %v1728_v4 }
  0x9a   :  { %1271 = vmatprep.mubr.msk.bf16.mxu0 %vm470_vm0, %v1729_v5  ;;  %1287 = vmatprep.mubr.msk.bf16.mxu1 %vm470_vm0, %v1731_v6 }
  0xa1   :  { %712 = vmatmul.mubr.bf16.gmra.mrb[56].mxu0 %v1733_v7  ;;  %840 = vmatmul.mubr.bf16.gmra.mrb[56].mxu1 %v1734_v8 }
  0xa2   :  { %1272 = vmatprep.mubr.msk.bf16.mxu0 %vm470_vm0, %v1735_v9  ;;  %1288 = vmatprep.mubr.msk.bf16.mxu1 %vm470_vm0, %v1737_v10 }
  0xa9   :  { %720 = vmatmul.mubr.bf16.gmra.mrb[60].mxu0 %v1739_v11  ;;  %848 = vmatmul.mubr.bf16.gmra.mrb[60].mxu1 %v1740_v12 }
 0x104   :  { %v601_v14 = vpop.f32.mrb[0].mxu0  ;;  %v729_v15 = vpop.f32.mrb[0].mxu1 }
 0x105   :  { %v603_v16 = vpop.f32.mrb[1].mxu0  ;;  %v731_v17 = vpop.f32.mrb[1].mxu1  ;;  %v602_v20 = vadd.f32 %v2049_v13, %v601_v14  ;;  %v730_v21 = vadd.f32 %v2049_v13, %v729_v15 }
 0x106   :  { %v604_v18 = vpop.f32.mrb[2].mxu0  ;;  %v732_v19 = vpop.f32.mrb[2].mxu1 }
 0x107   :  { %v605_v22 = vadd.f32 %v2049_v13, %v604_v18  ;;  %v733_v23 = vadd.f32 %v2049_v13, %v732_v19  ;;  %v606_v24 = vpop.f32.mrb[3].mxu0  ;;  %v734_v25 = vpop.f32.mrb[3].mxu1 }
 0x109   :  { %v1420_v26 = vpack.c.bf16 %v605_v22, %v602_v20  ;;  %v1500_v27 = vpack.c.bf16 %v733_v23, %v730_v21 }
 0x10b   :  { %1421 = vst [vmem:[%s2214_s3] sm:$0xff] %v1420_v26   ;;  %1592 = vst [vmem:[%s2214_s3 + $0x80] sm:$0xff] %v1500_v27  }
 0x10c   :  { %v609_v28 = vpop.f32.mrb[4].mxu0  ;;  %v737_v29 = vpop.f32.mrb[4].mxu1 }
 0x10d   :  { %v611_v30 = vpop.f32.mrb[5].mxu0  ;;  %v739_v31 = vpop.f32.mrb[5].mxu1  ;;  %v610_v34 = vadd.f32 %v2049_v13, %v609_v28  ;;  %v738_v35 = vadd.f32 %v2049_v13, %v737_v29 }
 0x10e   :  { %v612_v32 = vpop.f32.mrb[6].mxu0  ;;  %v740_v33 = vpop.f32.mrb[6].mxu1 }
 0x10f   :  { %v613_v36 = vadd.f32 %v2049_v13, %v612_v32  ;;  %v741_v37 = vadd.f32 %v2049_v13, %v740_v33  ;;  %v614_v38 = vpop.f32.mrb[7].mxu0  ;;  %v742_v39 = vpop.f32.mrb[7].mxu1 }
 0x111   :  { %v1425_v40 = vpack.c.bf16 %v613_v36, %v610_v34  ;;  %v1505_v41 = vpack.c.bf16 %v741_v37, %v738_v35 }
 0x113   :  { %1577 = vst [vmem:[%s2214_s3 + $0x8] sm:$0xff] %v1425_v40   ;;  %1593 = vst [vmem:[%s2214_s3 + $0x88] sm:$0xff] %v1505_v41  }
 0x114   :  { %v617_v42 = vpop.f32.mrb[8].mxu0  ;;  %v745_v43 = vpop.f32.mrb[8].mxu1 }
 0x115   :  { %v619_v44 = vpop.f32.mrb[9].mxu0  ;;  %v747_v45 = vpop.f32.mrb[9].mxu1  ;;  %v618_v48 = vadd.f32 %v2049_v13, %v617_v42  ;;  %v746_v49 = vadd.f32 %v2049_v13, %v745_v43 }
 0x116   :  { %v620_v46 = vpop.f32.mrb[10].mxu0  ;;  %v748_v47 = vpop.f32.mrb[10].mxu1 }
 0x117   :  { %v621_v50 = vadd.f32 %v2049_v13, %v620_v46  ;;  %v749_v51 = vadd.f32 %v2049_v13, %v748_v47  ;;  %v622_v52 = vpop.f32.mrb[11].mxu0  ;;  %v750_v53 = vpop.f32.mrb[11].mxu1 }
 0x119   :  { %v1430_v54 = vpack.c.bf16 %v621_v50, %v618_v48  ;;  %v1510_v55 = vpack.c.bf16 %v749_v51, %v746_v49 }
 0x11b   :  { %1578 = vst [vmem:[%s2214_s3 + $0x10] sm:$0xff] %v1430_v54   ;;  %1594 = vst [vmem:[%s2214_s3 + $0x90] sm:$0xff] %v1510_v55  }
 0x11c   :  { %v625_v56 = vpop.f32.mrb[12].mxu0  ;;  %v753_v57 = vpop.f32.mrb[12].mxu1 }
 0x11d   :  { %v627_v58 = vpop.f32.mrb[13].mxu0  ;;  %v755_v59 = vpop.f32.mrb[13].mxu1  ;;  %v626_v62 = vadd.f32 %v2049_v13, %v625_v56  ;;  %v754_v63 = vadd.f32 %v2049_v13, %v753_v57 }
 0x11e   :  { %v628_v60 = vpop.f32.mrb[14].mxu0  ;;  %v756_v61 = vpop.f32.mrb[14].mxu1 }
 0x11f   :  { %v629_v0 = vadd.f32 %v2049_v13, %v628_v60  ;;  %v757_v1 = vadd.f32 %v2049_v13, %v756_v61  ;;  %v630_v2 = vpop.f32.mrb[15].mxu0  ;;  %v758_v3 = vpop.f32.mrb[15].mxu1 }
 0x121   :  { %v1435_v4 = vpack.c.bf16 %v629_v0, %v626_v62  ;;  %v1515_v5 = vpack.c.bf16 %v757_v1, %v754_v63 }
 0x123   :  { %1579 = vst [vmem:[%s2214_s3 + $0x18] sm:$0xff] %v1435_v4   ;;  %1595 = vst [vmem:[%s2214_s3 + $0x98] sm:$0xff] %v1515_v5  }
 0x124   :  { %v633_v6 = vpop.f32.mrb[16].mxu0  ;;  %v761_v7 = vpop.f32.mrb[16].mxu1 }
 0x125   :  { %v635_v8 = vpop.f32.mrb[17].mxu0  ;;  %v763_v9 = vpop.f32.mrb[17].mxu1  ;;  %v634_v12 = vadd.f32 %v2049_v13, %v633_v6  ;;  %v762_v14 = vadd.f32 %v2049_v13, %v761_v7 }
 0x126   :  { %v636_v10 = vpop.f32.mrb[18].mxu0  ;;  %v764_v11 = vpop.f32.mrb[18].mxu1 }
 0x127   :  { %v637_v15 = vadd.f32 %v2049_v13, %v636_v10  ;;  %v765_v16 = vadd.f32 %v2049_v13, %v764_v11  ;;  %v638_v17 = vpop.f32.mrb[19].mxu0  ;;  %v766_v18 = vpop.f32.mrb[19].mxu1 }
 0x129   :  { %v1440_v19 = vpack.c.bf16 %v637_v15, %v634_v12  ;;  %v1520_v20 = vpack.c.bf16 %v765_v16, %v762_v14 }
 0x12b   :  { %1580 = vst [vmem:[%s2214_s3 + $0x20] sm:$0xff] %v1440_v19   ;;  %1596 = vst [vmem:[%s2214_s3 + $0xa0] sm:$0xff] %v1520_v20  }
 0x12c   :  { %v641_v21 = vpop.f32.mrb[20].mxu0  ;;  %v769_v22 = vpop.f32.mrb[20].mxu1 }
 0x12d   :  { %v643_v23 = vpop.f32.mrb[21].mxu0  ;;  %v771_v24 = vpop.f32.mrb[21].mxu1  ;;  %v642_v27 = vadd.f32 %v2049_v13, %v641_v21  ;;  %v770_v28 = vadd.f32 %v2049_v13, %v769_v22 }
 0x12e   :  { %v644_v25 = vpop.f32.mrb[22].mxu0  ;;  %v772_v26 = vpop.f32.mrb[22].mxu1 }
 0x12f   :  { %v645_v29 = vadd.f32 %v2049_v13, %v644_v25  ;;  %v773_v30 = vadd.f32 %v2049_v13, %v772_v26  ;;  %v646_v31 = vpop.f32.mrb[23].mxu0  ;;  %v774_v32 = vpop.f32.mrb[23].mxu1 }
 0x131   :  { %v1445_v33 = vpack.c.bf16 %v645_v29, %v642_v27  ;;  %v1525_v34 = vpack.c.bf16 %v773_v30, %v770_v28 }
 0x133   :  { %1581 = vst [vmem:[%s2214_s3 + $0x28] sm:$0xff] %v1445_v33   ;;  %1597 = vst [vmem:[%s2214_s3 + $0xa8] sm:$0xff] %v1525_v34  }
 0x134   :  { %v649_v35 = vpop.f32.mrb[24].mxu0  ;;  %v777_v36 = vpop.f32.mrb[24].mxu1 }
 0x135   :  { %v651_v37 = vpop.f32.mrb[25].mxu0  ;;  %v779_v38 = vpop.f32.mrb[25].mxu1  ;;  %v650_v41 = vadd.f32 %v2049_v13, %v649_v35  ;;  %v778_v42 = vadd.f32 %v2049_v13, %v777_v36 }
 0x136   :  { %v652_v39 = vpop.f32.mrb[26].mxu0  ;;  %v780_v40 = vpop.f32.mrb[26].mxu1 }
 0x137   :  { %v653_v43 = vadd.f32 %v2049_v13, %v652_v39  ;;  %v781_v44 = vadd.f32 %v2049_v13, %v780_v40  ;;  %v654_v45 = vpop.f32.mrb[27].mxu0  ;;  %v782_v46 = vpop.f32.mrb[27].mxu1 }
 0x139   :  { %v1450_v47 = vpack.c.bf16 %v653_v43, %v650_v41  ;;  %v1530_v48 = vpack.c.bf16 %v781_v44, %v778_v42 }
 0x13b   :  { %1582 = vst [vmem:[%s2214_s3 + $0x30] sm:$0xff] %v1450_v47   ;;  %1598 = vst [vmem:[%s2214_s3 + $0xb0] sm:$0xff] %v1530_v48  }
 0x13c   :  { %v657_v49 = vpop.f32.mrb[28].mxu0  ;;  %v785_v50 = vpop.f32.mrb[28].mxu1 }
 0x13d   :  { %v659_v51 = vpop.f32.mrb[29].mxu0  ;;  %v787_v52 = vpop.f32.mrb[29].mxu1  ;;  %v658_v55 = vadd.f32 %v2049_v13, %v657_v49  ;;  %v786_v56 = vadd.f32 %v2049_v13, %v785_v50 }
 0x13e   :  { %v660_v53 = vpop.f32.mrb[30].mxu0  ;;  %v788_v54 = vpop.f32.mrb[30].mxu1 }
 0x13f   :  { %v661_v57 = vadd.f32 %v2049_v13, %v660_v53  ;;  %v789_v58 = vadd.f32 %v2049_v13, %v788_v54  ;;  %v662_v59 = vpop.f32.mrb[31].mxu0  ;;  %v790_v60 = vpop.f32.mrb[31].mxu1 }
 0x141   :  { %v1455_v61 = vpack.c.bf16 %v661_v57, %v658_v55  ;;  %v1535_v62 = vpack.c.bf16 %v789_v58, %v786_v56 }
 0x143   :  { %1583 = vst [vmem:[%s2214_s3 + $0x38] sm:$0xff] %v1455_v61   ;;  %1599 = vst [vmem:[%s2214_s3 + $0xb8] sm:$0xff] %v1535_v62  }
 0x144   :  { %v665_v63 = vpop.f32.mrb[32].mxu0  ;;  %v793_v0 = vpop.f32.mrb[32].mxu1 }
 0x145   :  { %v667_v1 = vpop.f32.mrb[33].mxu0  ;;  %v795_v2 = vpop.f32.mrb[33].mxu1  ;;  %v666_v5 = vadd.f32 %v2049_v13, %v665_v63  ;;  %v794_v6 = vadd.f32 %v2049_v13, %v793_v0 }
 0x146   :  { %v668_v3 = vpop.f32.mrb[34].mxu0  ;;  %v796_v4 = vpop.f32.mrb[34].mxu1 }
 0x147   :  { %v669_v7 = vadd.f32 %v2049_v13, %v668_v3  ;;  %v797_v8 = vadd.f32 %v2049_v13, %v796_v4  ;;  %v670_v9 = vpop.f32.mrb[35].mxu0  ;;  %v798_v10 = vpop.f32.mrb[35].mxu1 }
 0x149   :  { %v1460_v11 = vpack.c.bf16 %v669_v7, %v666_v5  ;;  %v1540_v12 = vpack.c.bf16 %v797_v8, %v794_v6 }
 0x14b   :  { %1584 = vst [vmem:[%s2214_s3 + $0x40] sm:$0xff] %v1460_v11   ;;  %1600 = vst [vmem:[%s2214_s3 + $0xc0] sm:$0xff] %v1540_v12  }
 0x14c   :  { %v673_v14 = vpop.f32.mrb[36].mxu0  ;;  %v801_v15 = vpop.f32.mrb[36].mxu1 }
 0x14d   :  { %v675_v16 = vpop.f32.mrb[37].mxu0  ;;  %v803_v17 = vpop.f32.mrb[37].mxu1  ;;  %v674_v20 = vadd.f32 %v2049_v13, %v673_v14  ;;  %v802_v21 = vadd.f32 %v2049_v13, %v801_v15 }
 0x14e   :  { %v676_v18 = vpop.f32.mrb[38].mxu0  ;;  %v804_v19 = vpop.f32.mrb[38].mxu1 }
 0x14f   :  { %v677_v22 = vadd.f32 %v2049_v13, %v676_v18  ;;  %v805_v23 = vadd.f32 %v2049_v13, %v804_v19  ;;  %v678_v24 = vpop.f32.mrb[39].mxu0  ;;  %v806_v25 = vpop.f32.mrb[39].mxu1 }
 0x151   :  { %v1465_v26 = vpack.c.bf16 %v677_v22, %v674_v20  ;;  %v1545_v27 = vpack.c.bf16 %v805_v23, %v802_v21 }
 0x153   :  { %1585 = vst [vmem:[%s2214_s3 + $0x48] sm:$0xff] %v1465_v26   ;;  %1601 = vst [vmem:[%s2214_s3 + $0xc8] sm:$0xff] %v1545_v27  }
 0x154   :  { %v681_v28 = vpop.f32.mrb[40].mxu0  ;;  %v809_v29 = vpop.f32.mrb[40].mxu1 }
 0x155   :  { %v683_v30 = vpop.f32.mrb[41].mxu0  ;;  %v811_v31 = vpop.f32.mrb[41].mxu1  ;;  %v682_v34 = vadd.f32 %v2049_v13, %v681_v28  ;;  %v810_v35 = vadd.f32 %v2049_v13, %v809_v29 }
 0x156   :  { %v684_v32 = vpop.f32.mrb[42].mxu0  ;;  %v812_v33 = vpop.f32.mrb[42].mxu1 }
 0x157   :  { %v685_v36 = vadd.f32 %v2049_v13, %v684_v32  ;;  %v813_v37 = vadd.f32 %v2049_v13, %v812_v33  ;;  %v686_v38 = vpop.f32.mrb[43].mxu0  ;;  %v814_v39 = vpop.f32.mrb[43].mxu1 }
 0x159   :  { %v1470_v40 = vpack.c.bf16 %v685_v36, %v682_v34  ;;  %v1550_v41 = vpack.c.bf16 %v813_v37, %v810_v35 }
 0x15b   :  { %1586 = vst [vmem:[%s2214_s3 + $0x50] sm:$0xff] %v1470_v40   ;;  %1602 = vst [vmem:[%s2214_s3 + $0xd0] sm:$0xff] %v1550_v41  }
 0x15c   :  { %v689_v42 = vpop.f32.mrb[44].mxu0  ;;  %v817_v43 = vpop.f32.mrb[44].mxu1 }
 0x15d   :  { %v691_v44 = vpop.f32.mrb[45].mxu0  ;;  %v819_v45 = vpop.f32.mrb[45].mxu1  ;;  %v690_v48 = vadd.f32 %v2049_v13, %v689_v42  ;;  %v818_v49 = vadd.f32 %v2049_v13, %v817_v43 }
 0x15e   :  { %v692_v46 = vpop.f32.mrb[46].mxu0  ;;  %v820_v47 = vpop.f32.mrb[46].mxu1 }
 0x15f   :  { %v693_v50 = vadd.f32 %v2049_v13, %v692_v46  ;;  %v821_v51 = vadd.f32 %v2049_v13, %v820_v47  ;;  %v694_v52 = vpop.f32.mrb[47].mxu0  ;;  %v822_v53 = vpop.f32.mrb[47].mxu1 }
 0x161   :  { %v1475_v54 = vpack.c.bf16 %v693_v50, %v690_v48  ;;  %v1555_v55 = vpack.c.bf16 %v821_v51, %v818_v49 }
 0x163   :  { %1587 = vst [vmem:[%s2214_s3 + $0x58] sm:$0xff] %v1475_v54   ;;  %1603 = vst [vmem:[%s2214_s3 + $0xd8] sm:$0xff] %v1555_v55  }
 0x164   :  { %v697_v56 = vpop.f32.mrb[48].mxu0  ;;  %v825_v57 = vpop.f32.mrb[48].mxu1 }
 0x165   :  { %v699_v58 = vpop.f32.mrb[49].mxu0  ;;  %v827_v59 = vpop.f32.mrb[49].mxu1  ;;  %v698_v62 = vadd.f32 %v2049_v13, %v697_v56  ;;  %v826_v63 = vadd.f32 %v2049_v13, %v825_v57 }
 0x166   :  { %v700_v60 = vpop.f32.mrb[50].mxu0  ;;  %v828_v61 = vpop.f32.mrb[50].mxu1 }
 0x167   :  { %v701_v0 = vadd.f32 %v2049_v13, %v700_v60  ;;  %v829_v1 = vadd.f32 %v2049_v13, %v828_v61  ;;  %v702_v2 = vpop.f32.mrb[51].mxu0  ;;  %v830_v3 = vpop.f32.mrb[51].mxu1 }
 0x169   :  { %v1480_v4 = vpack.c.bf16 %v701_v0, %v698_v62  ;;  %v1560_v5 = vpack.c.bf16 %v829_v1, %v826_v63 }
 0x16b   :  { %1588 = vst [vmem:[%s2214_s3 + $0x60] sm:$0xff] %v1480_v4   ;;  %1604 = vst [vmem:[%s2214_s3 + $0xe0] sm:$0xff] %v1560_v5  }
 0x16c   :  { %v705_v6 = vpop.f32.mrb[52].mxu0  ;;  %v833_v7 = vpop.f32.mrb[52].mxu1 }
 0x16d   :  { %v707_v8 = vpop.f32.mrb[53].mxu0  ;;  %v835_v9 = vpop.f32.mrb[53].mxu1  ;;  %v706_v12 = vadd.f32 %v2049_v13, %v705_v6  ;;  %v834_v14 = vadd.f32 %v2049_v13, %v833_v7 }
 0x16e   :  { %v708_v10 = vpop.f32.mrb[54].mxu0  ;;  %v836_v11 = vpop.f32.mrb[54].mxu1 }
 0x16f   :  { %v709_v15 = vadd.f32 %v2049_v13, %v708_v10  ;;  %v837_v16 = vadd.f32 %v2049_v13, %v836_v11  ;;  %v710_v17 = vpop.f32.mrb[55].mxu0  ;;  %v838_v18 = vpop.f32.mrb[55].mxu1 }
 0x171   :  { %v1485_v19 = vpack.c.bf16 %v709_v15, %v706_v12  ;;  %v1565_v20 = vpack.c.bf16 %v837_v16, %v834_v14 }
 0x173   :  { %1589 = vst [vmem:[%s2214_s3 + $0x68] sm:$0xff] %v1485_v19   ;;  %1605 = vst [vmem:[%s2214_s3 + $0xe8] sm:$0xff] %v1565_v20  }
 0x174   :  { %v713_v21 = vpop.f32.mrb[56].mxu0  ;;  %v841_v22 = vpop.f32.mrb[56].mxu1 }
 0x175   :  { %v715_v23 = vpop.f32.mrb[57].mxu0  ;;  %v843_v24 = vpop.f32.mrb[57].mxu1  ;;  %v714_v27 = vadd.f32 %v2049_v13, %v713_v21  ;;  %v842_v28 = vadd.f32 %v2049_v13, %v841_v22 }
 0x176   :  { %v716_v25 = vpop.f32.mrb[58].mxu0  ;;  %v844_v26 = vpop.f32.mrb[58].mxu1 }
 0x177   :  { %v717_v29 = vadd.f32 %v2049_v13, %v716_v25  ;;  %v845_v30 = vadd.f32 %v2049_v13, %v844_v26  ;;  %v718_v31 = vpop.f32.mrb[59].mxu0  ;;  %v846_v32 = vpop.f32.mrb[59].mxu1 }
 0x179   :  { %v1490_v33 = vpack.c.bf16 %v717_v29, %v714_v27  ;;  %v1570_v34 = vpack.c.bf16 %v845_v30, %v842_v28 }
 0x17b   :  { %1590 = vst [vmem:[%s2214_s3 + $0x70] sm:$0xff] %v1490_v33   ;;  %1606 = vst [vmem:[%s2214_s3 + $0xf0] sm:$0xff] %v1570_v34  }
 0x17c   :  { %v721_v35 = vpop.f32.mrb[60].mxu0  ;;  %v849_v36 = vpop.f32.mrb[60].mxu1 }
 0x17d   :  { %v723_v37 = vpop.f32.mrb[61].mxu0  ;;  %v851_v38 = vpop.f32.mrb[61].mxu1  ;;  %v722_v41 = vadd.f32 %v2049_v13, %v721_v35  ;;  %v850_v42 = vadd.f32 %v2049_v13, %v849_v36 }
 0x17e   :  { %v724_v39 = vpop.f32.mrb[62].mxu0  ;;  %v852_v40 = vpop.f32.mrb[62].mxu1 }
 0x17f   :  { %v725_v43 = vadd.f32 %v2049_v13, %v724_v39  ;;  %v853_v44 = vadd.f32 %v2049_v13, %v852_v40  ;;  %v726_v45 = vpop.f32.mrb[63].mxu0  ;;  %v854_v46 = vpop.f32.mrb[63].mxu1 }
 0x181   :  { %v1495_v47 = vpack.c.bf16 %v725_v43, %v722_v41  ;;  %v1575_v48 = vpack.c.bf16 %v853_v44, %v850_v42 }
 0x183   :  { %1591 = vst [vmem:[%s2214_s3 + $0x78] sm:$0xff] %v1495_v47   ;;  %1607 = vst [vmem:[%s2214_s3 + $0xf8] sm:$0xff] %v1575_v48  }

// kernel: hybridnet_forward.27
= control target key start
LH: loop header
LB: loop body
LE: loop exit
PB: predicated region body
PF: predicated region fallthrough
CT: control target
= control target key end

     0   :  { %v1765_v0 = vmov 0   ;;  %vm486_vm0 = vcmask 785408   ;;  %s2245_s1 = inlined_call_operand.vmem [shape: bf16[224,128], index: 1, kind: input, shape index: {}]   ;;  %s2246_s0 = inlined_call_operand.vmem [shape: bf16[512,224], index: 0, kind: input, shape index: {}]   ;;  %s2247_s2 = inlined_call_operand.vmem [shape: f32[1,128], index: 2, kind: input, shape index: {}]   ;;  %s2248_s3 = inlined_call_operand.vmem [shape: bf16[512,128], index: 3, kind: output, shape index: {}]  }
   0x1   :  { %583 = vmatprep.subr.bf16.mxu0 %v1765_v0  ;;  %1626 = vmatprep.subr.bf16.mxu1 %v1765_v0  ;;  %v1655_v1 = vld [vmem:[%s2245_s1] sm:$0xff]   ;;  %v1656_v2 = vld [vmem:[%s2245_s1 + $0x8] sm:$0xff]   ;;  %v1657_v3 = vld [vmem:[%s2245_s1 + $0x10] sm:$0xff]  }
   0x2   :  { %584 = vmatpush1.bf16.msra.mxu0 %v1655_v1  ;;  %1640 = vmatpush1.bf16.msra.mxu1 %v1655_v1  ;;  %v1658_v4 = vld [vmem:[%s2245_s1 + $0x18] sm:$0xff]   ;;  %v1659_v5 = vld [vmem:[%s2245_s1 + $0x20] sm:$0xff]   ;;  %v1660_v8 = vld [vmem:[%s2245_s1 + $0x28] sm:$0xff]  }
   0x3   :  { %585 = vmatprep.subr.bf16.mxu0 %v1765_v0  ;;  %1627 = vmatprep.subr.bf16.mxu1 %v1765_v0  ;;  %v1671_v6 = vld [vmem:[%s2246_s0 + $0x4] ss:$8 sps:$4 sm:$0xff]   ;;  %v1661_v9 = vld [vmem:[%s2245_s1 + $0x30] sm:$0xff]   ;;  %v1662_v10 = vld [vmem:[%s2245_s1 + $0x38] sm:$0xff]  }
   0x4   :  { %v1674_v7 = vld [vmem:[%s2246_s0 + $0x104] ss:$8 sps:$4 sm:$0xff]   ;;  %1275 = vmatprep.mubr.msk.bf16.mxu0 %vm486_vm0, %v1671_v6  ;;  %v1665_v13 = vld [vmem:[%s2245_s1 + $0x50] sm:$0xff]   ;;  %v1666_v14 = vld [vmem:[%s2245_s1 + $0x58] sm:$0xff]  }
   0x5   :  { %1291 = vmatprep.mubr.msk.bf16.mxu1 %vm486_vm0, %v1674_v7  ;;  %v1663_v11 = vld [vmem:[%s2245_s1 + $0x40] sm:$0xff]   ;;  %v1664_v12 = vld [vmem:[%s2245_s1 + $0x48] sm:$0xff]   ;;  %v1675_v19 = vld [vmem:[%s2246_s0 + $0x14] ss:$8 sps:$4 sm:$0xff]  }
   0x6   :  { %586 = vmatpush1.bf16.msra.mxu0 %v1656_v2  ;;  %1641 = vmatpush1.bf16.msra.mxu1 %v1656_v2  ;;  %v1667_v15 = vld [vmem:[%s2245_s1 + $0x60] sm:$0xff]   ;;  %v1668_v16 = vld [vmem:[%s2245_s1 + $0x68] sm:$0xff]   ;;  %v1677_v20 = vld [vmem:[%s2246_s0 + $0x114] ss:$8 sps:$4 sm:$0xff]  }
   0x7   :  { %587 = vmatprep.subr.bf16.mxu0 %v1765_v0  ;;  %1628 = vmatprep.subr.bf16.mxu1 %v1765_v0  ;;  %v1669_v17 = vld [vmem:[%s2246_s0] ss:$8 sps:$4 sm:$0xff]   ;;  %v1679_v21 = vld [vmem:[%s2246_s0 + $0x10] ss:$8 sps:$4 sm:$0xff]   ;;  %v1681_v23 = vld [vmem:[%s2246_s0 + $0x24] ss:$8 sps:$4 sm:$0xff]  }
   0x8   :  { %v1672_v18 = vld [vmem:[%s2246_s0 + $0x100] ss:$8 sps:$4 sm:$0xff]   ;;  %v1680_v22 = vld [vmem:[%s2246_s0 + $0x110] ss:$8 sps:$4 sm:$0xff]   ;;  %v1683_v24 = vld [vmem:[%s2246_s0 + $0x124] ss:$8 sps:$4 sm:$0xff]  }
   0x9   :  { %v1685_v25 = vld [vmem:[%s2246_s0 + $0x20] ss:$8 sps:$4 sm:$0xff]   ;;  %v1687_v27 = vld [vmem:[%s2246_s0 + $0x34] ss:$8 sps:$4 sm:$0xff]   ;;  %v1691_v29 = vld [vmem:[%s2246_s0 + $0x30] ss:$8 sps:$4 sm:$0xff]  }
   0xa   :  { %588 = vmatpush1.bf16.msra.mxu0 %v1657_v3  ;;  %1642 = vmatpush1.bf16.msra.mxu1 %v1657_v3  ;;  %v1686_v26 = vld [vmem:[%s2246_s0 + $0x120] ss:$8 sps:$4 sm:$0xff]   ;;  %v1689_v28 = vld [vmem:[%s2246_s0 + $0x134] ss:$8 sps:$4 sm:$0xff]   ;;  %v1692_v30 = vld [vmem:[%s2246_s0 + $0x130] ss:$8 sps:$4 sm:$0xff]  }
   0xb   :  { %589 = vmatprep.subr.bf16.mxu0 %v1765_v0  ;;  %1629 = vmatprep.subr.bf16.mxu1 %v1765_v0  ;;  %v1693_v31 = vld [vmem:[%s2246_s0 + $0x44] ss:$8 sps:$4 sm:$0xff]   ;;  %v1697_v33 = vld [vmem:[%s2246_s0 + $0x40] ss:$8 sps:$4 sm:$0xff]   ;;  %v1699_v35 = vld [vmem:[%s2246_s0 + $0x54] ss:$8 sps:$4 sm:$0xff]  }
   0xc   :  { %v1695_v32 = vld [vmem:[%s2246_s0 + $0x144] ss:$8 sps:$4 sm:$0xff]   ;;  %v1698_v34 = vld [vmem:[%s2246_s0 + $0x140] ss:$8 sps:$4 sm:$0xff]   ;;  %v1701_v36 = vld [vmem:[%s2246_s0 + $0x154] ss:$8 sps:$4 sm:$0xff]  }
   0xd   :  { %v1703_v37 = vld [vmem:[%s2246_s0 + $0x50] ss:$8 sps:$4 sm:$0xff]   ;;  %v1705_v39 = vld [vmem:[%s2246_s0 + $0x64] ss:$8 sps:$4 sm:$0xff]   ;;  %v1709_v41 = vld [vmem:[%s2246_s0 + $0x60] ss:$8 sps:$4 sm:$0xff]  }
   0xe   :  { %590 = vmatpush1.bf16.msra.mxu0 %v1658_v4  ;;  %1643 = vmatpush1.bf16.msra.mxu1 %v1658_v4  ;;  %v1704_v38 = vld [vmem:[%s2246_s0 + $0x150] ss:$8 sps:$4 sm:$0xff]   ;;  %v1707_v40 = vld [vmem:[%s2246_s0 + $0x164] ss:$8 sps:$4 sm:$0xff]   ;;  %v1710_v42 = vld [vmem:[%s2246_s0 + $0x160] ss:$8 sps:$4 sm:$0xff]  }
   0xf   :  { %591 = vmatprep.subr.bf16.mxu0 %v1765_v0  ;;  %1630 = vmatprep.subr.bf16.mxu1 %v1765_v0  ;;  %v1711_v43 = vld [vmem:[%s2246_s0 + $0x74] ss:$8 sps:$4 sm:$0xff]   ;;  %v1715_v45 = vld [vmem:[%s2246_s0 + $0x70] ss:$8 sps:$4 sm:$0xff]   ;;  %v1717_v47 = vld [vmem:[%s2246_s0 + $0x84] ss:$8 sps:$4 sm:$0xff]  }
  0x10   :  { %v1713_v44 = vld [vmem:[%s2246_s0 + $0x174] ss:$8 sps:$4 sm:$0xff]   ;;  %v1716_v46 = vld [vmem:[%s2246_s0 + $0x170] ss:$8 sps:$4 sm:$0xff]   ;;  %v1719_v48 = vld [vmem:[%s2246_s0 + $0x184] ss:$8 sps:$4 sm:$0xff]  }
  0x11   :  { %v1721_v49 = vld [vmem:[%s2246_s0 + $0x80] ss:$8 sps:$4 sm:$0xff]   ;;  %v1723_v51 = vld [vmem:[%s2246_s0 + $0x94] ss:$8 sps:$4 sm:$0xff]   ;;  %v1727_v53 = vld [vmem:[%s2246_s0 + $0x90] ss:$8 sps:$4 sm:$0xff]  }
  0x12   :  { %592 = vmatpush1.bf16.msra.mxu0 %v1659_v5  ;;  %1644 = vmatpush1.bf16.msra.mxu1 %v1659_v5  ;;  %v1722_v50 = vld [vmem:[%s2246_s0 + $0x180] ss:$8 sps:$4 sm:$0xff]   ;;  %v1725_v52 = vld [vmem:[%s2246_s0 + $0x194] ss:$8 sps:$4 sm:$0xff]   ;;  %v1728_v54 = vld [vmem:[%s2246_s0 + $0x190] ss:$8 sps:$4 sm:$0xff]  }
  0x13   :  { %593 = vmatprep.subr.bf16.mxu0 %v1765_v0  ;;  %1631 = vmatprep.subr.bf16.mxu1 %v1765_v0  ;;  %v1729_v55 = vld [vmem:[%s2246_s0 + $0xa4] ss:$8 sps:$4 sm:$0xff]   ;;  %v1733_v57 = vld [vmem:[%s2246_s0 + $0xa0] ss:$8 sps:$4 sm:$0xff]   ;;  %v1735_v59 = vld [vmem:[%s2246_s0 + $0xb4] ss:$8 sps:$4 sm:$0xff]  }
  0x14   :  { %v1731_v56 = vld [vmem:[%s2246_s0 + $0x1a4] ss:$8 sps:$4 sm:$0xff]   ;;  %v1734_v58 = vld [vmem:[%s2246_s0 + $0x1a0] ss:$8 sps:$4 sm:$0xff]   ;;  %v1737_v60 = vld [vmem:[%s2246_s0 + $0x1b4] ss:$8 sps:$4 sm:$0xff]  }
  0x15   :  { %v1739_v61 = vld [vmem:[%s2246_s0 + $0xb0] ss:$8 sps:$4 sm:$0xff]   ;;  %v1741_v63 = vld [vmem:[%s2246_s0 + $0xc4] ss:$8 sps:$4 sm:$0xff]   ;;  %v1745_v1 = vld [vmem:[%s2246_s0 + $0xc0] ss:$8 sps:$4 sm:$0xff]  }
  0x16   :  { %594 = vmatpush1.bf16.msra.mxu0 %v1660_v8  ;;  %1645 = vmatpush1.bf16.msra.mxu1 %v1660_v8  ;;  %v1740_v62 = vld [vmem:[%s2246_s0 + $0x1b0] ss:$8 sps:$4 sm:$0xff]   ;;  %v1746_v2 = vld [vmem:[%s2246_s0 + $0x1c0] ss:$8 sps:$4 sm:$0xff]   ;;  %v1747_v3 = vld [vmem:[%s2246_s0 + $0xd4] ss:$8 sps:$4 sm:$0xff]  }
  0x17   :  { %595 = vmatprep.subr.bf16.mxu0 %v1765_v0  ;;  %1632 = vmatprep.subr.bf16.mxu1 %v1765_v0  ;;  %v1749_v4 = vld [vmem:[%s2246_s0 + $0x1d4] ss:$8 sps:$4 sm:$0xff]   ;;  %v1751_v5 = vld [vmem:[%s2246_s0 + $0xd0] ss:$8 sps:$4 sm:$0xff]   ;;  %v1753_v7 = vld [vmem:[%s2246_s0 + $0xe4] ss:$8 sps:$4 sm:$0xff]  }
  0x18   :  { %v1752_v6 = vld [vmem:[%s2246_s0 + $0x1d0] ss:$8 sps:$4 sm:$0xff]   ;;  %v1755_v8 = vld [vmem:[%s2246_s0 + $0x1e4] ss:$8 sps:$4 sm:$0xff]  }
  0x1a   :  { %596 = vmatpush1.bf16.msra.mxu0 %v1661_v9  ;;  %1646 = vmatpush1.bf16.msra.mxu1 %v1661_v9  ;;  %v1757_v9 = vld [vmem:[%s2246_s0 + $0xe0] ss:$8 sps:$4 sm:$0xff]  }
  0x1b   :  { %597 = vmatprep.subr.bf16.mxu0 %v1765_v0  ;;  %1633 = vmatprep.subr.bf16.mxu1 %v1765_v0 }
  0x1e   :  { %598 = vmatpush1.bf16.msra.mxu0 %v1662_v10  ;;  %1647 = vmatpush1.bf16.msra.mxu1 %v1662_v10  ;;  %v1758_v10 = vld [vmem:[%s2246_s0 + $0x1e0] ss:$8 sps:$4 sm:$0xff]  }
  0x1f   :  { %599 = vmatprep.subr.bf16.mxu0 %v1765_v0  ;;  %1634 = vmatprep.subr.bf16.mxu1 %v1765_v0 }
  0x22   :  { %600 = vmatpush1.bf16.msra.mxu0 %v1663_v11  ;;  %1648 = vmatpush1.bf16.msra.mxu1 %v1663_v11  ;;  %v1759_v11 = vld [vmem:[%s2246_s0 + $0xf4] ss:$8 sps:$4 sm:$0xff]  }
  0x23   :  { %601 = vmatprep.subr.bf16.mxu0 %v1765_v0  ;;  %1635 = vmatprep.subr.bf16.mxu1 %v1765_v0 }
  0x26   :  { %602 = vmatpush1.bf16.msra.mxu0 %v1664_v12  ;;  %1649 = vmatpush1.bf16.msra.mxu1 %v1664_v12  ;;  %v1761_v12 = vld [vmem:[%s2246_s0 + $0x1f4] ss:$8 sps:$4 sm:$0xff]  }
  0x27   :  { %603 = vmatprep.subr.bf16.mxu0 %v1765_v0  ;;  %1636 = vmatprep.subr.bf16.mxu1 %v1765_v0 }
  0x2a   :  { %604 = vmatpush1.bf16.msra.mxu0 %v1665_v13  ;;  %1650 = vmatpush1.bf16.msra.mxu1 %v1665_v13  ;;  %v1763_v13 = vld [vmem:[%s2246_s0 + $0xf0] ss:$8 sps:$4 sm:$0xff]  }
  0x2b   :  { %605 = vmatprep.subr.bf16.mxu0 %v1765_v0  ;;  %1637 = vmatprep.subr.bf16.mxu1 %v1765_v0 }
  0x2e   :  { %606 = vmatpush1.bf16.msra.mxu0 %v1666_v14  ;;  %1651 = vmatpush1.bf16.msra.mxu1 %v1666_v14  ;;  %v1764_v14 = vld [vmem:[%s2246_s0 + $0x1f0] ss:$8 sps:$4 sm:$0xff]  }
  0x2f   :  { %607 = vmatprep.subr.bf16.mxu0 %v1765_v0  ;;  %1638 = vmatprep.subr.bf16.mxu1 %v1765_v0 }
  0x32   :  { %608 = vmatpush1.bf16.msra.mxu0 %v1667_v15  ;;  %1652 = vmatpush1.bf16.msra.mxu1 %v1667_v15  ;;  %v2083_v15 = vld [vmem:[%s2247_s2] ss:$0 sm:$0xff] }
  0x33   :  { %609 = vmatprep.subr.bf16.mxu0 %v1765_v0  ;;  %1639 = vmatprep.subr.bf16.mxu1 %v1765_v0  ;;  %v1743_v0 = vld [vmem:[%s2246_s0 + $0x1c4] ss:$8 sps:$4 sm:$0xff]  }
  0x36   :  { %610 = vmatpush1.bf16.msra.mxu0 %v1668_v16  ;;  %1653 = vmatpush1.bf16.msra.mxu1 %v1668_v16 }
  0x39   :  { %616 = vmatmul.mubr.bf16.vlgmr.msra.gmra.mrb[0].mxu0 %v1669_v17  ;;  %744 = vmatmul.mubr.bf16.vlgmr.msra.gmra.mrb[0].mxu1 %v1672_v18 }
  0x3a   :  { %1276 = vmatprep.mubr.msk.bf16.mxu0 %vm486_vm0, %v1675_v19  ;;  %1292 = vmatprep.mubr.msk.bf16.mxu1 %vm486_vm0, %v1677_v20 }
  0x41   :  { %624 = vmatmul.mubr.bf16.gmra.mrb[4].mxu0 %v1679_v21  ;;  %752 = vmatmul.mubr.bf16.gmra.mrb[4].mxu1 %v1680_v22 }
  0x42   :  { %1277 = vmatprep.mubr.msk.bf16.mxu0 %vm486_vm0, %v1681_v23  ;;  %1293 = vmatprep.mubr.msk.bf16.mxu1 %vm486_vm0, %v1683_v24 }
  0x49   :  { %632 = vmatmul.mubr.bf16.gmra.mrb[8].mxu0 %v1685_v25  ;;  %760 = vmatmul.mubr.bf16.gmra.mrb[8].mxu1 %v1686_v26 }
  0x4a   :  { %1278 = vmatprep.mubr.msk.bf16.mxu0 %vm486_vm0, %v1687_v27  ;;  %1294 = vmatprep.mubr.msk.bf16.mxu1 %vm486_vm0, %v1689_v28 }
  0x51   :  { %640 = vmatmul.mubr.bf16.gmra.mrb[12].mxu0 %v1691_v29  ;;  %768 = vmatmul.mubr.bf16.gmra.mrb[12].mxu1 %v1692_v30 }
  0x52   :  { %1279 = vmatprep.mubr.msk.bf16.mxu0 %vm486_vm0, %v1693_v31  ;;  %1295 = vmatprep.mubr.msk.bf16.mxu1 %vm486_vm0, %v1695_v32 }
  0x59   :  { %648 = vmatmul.mubr.bf16.gmra.mrb[16].mxu0 %v1697_v33  ;;  %776 = vmatmul.mubr.bf16.gmra.mrb[16].mxu1 %v1698_v34 }
  0x5a   :  { %1280 = vmatprep.mubr.msk.bf16.mxu0 %vm486_vm0, %v1699_v35  ;;  %1296 = vmatprep.mubr.msk.bf16.mxu1 %vm486_vm0, %v1701_v36 }
  0x61   :  { %656 = vmatmul.mubr.bf16.gmra.mrb[20].mxu0 %v1703_v37  ;;  %784 = vmatmul.mubr.bf16.gmra.mrb[20].mxu1 %v1704_v38 }
  0x62   :  { %1281 = vmatprep.mubr.msk.bf16.mxu0 %vm486_vm0, %v1705_v39  ;;  %1297 = vmatprep.mubr.msk.bf16.mxu1 %vm486_vm0, %v1707_v40 }
  0x69   :  { %664 = vmatmul.mubr.bf16.gmra.mrb[24].mxu0 %v1709_v41  ;;  %792 = vmatmul.mubr.bf16.gmra.mrb[24].mxu1 %v1710_v42 }
  0x6a   :  { %1282 = vmatprep.mubr.msk.bf16.mxu0 %vm486_vm0, %v1711_v43  ;;  %1298 = vmatprep.mubr.msk.bf16.mxu1 %vm486_vm0, %v1713_v44 }
  0x71   :  { %672 = vmatmul.mubr.bf16.gmra.mrb[28].mxu0 %v1715_v45  ;;  %800 = vmatmul.mubr.bf16.gmra.mrb[28].mxu1 %v1716_v46 }
  0x72   :  { %1283 = vmatprep.mubr.msk.bf16.mxu0 %vm486_vm0, %v1717_v47  ;;  %1299 = vmatprep.mubr.msk.bf16.mxu1 %vm486_vm0, %v1719_v48 }
  0x79   :  { %680 = vmatmul.mubr.bf16.gmra.mrb[32].mxu0 %v1721_v49  ;;  %808 = vmatmul.mubr.bf16.gmra.mrb[32].mxu1 %v1722_v50 }
  0x7a   :  { %1284 = vmatprep.mubr.msk.bf16.mxu0 %vm486_vm0, %v1723_v51  ;;  %1300 = vmatprep.mubr.msk.bf16.mxu1 %vm486_vm0, %v1725_v52 }
  0x81   :  { %688 = vmatmul.mubr.bf16.gmra.mrb[36].mxu0 %v1727_v53  ;;  %816 = vmatmul.mubr.bf16.gmra.mrb[36].mxu1 %v1728_v54 }
  0x82   :  { %1285 = vmatprep.mubr.msk.bf16.mxu0 %vm486_vm0, %v1729_v55  ;;  %1301 = vmatprep.mubr.msk.bf16.mxu1 %vm486_vm0, %v1731_v56 }
  0x89   :  { %696 = vmatmul.mubr.bf16.gmra.mrb[40].mxu0 %v1733_v57  ;;  %824 = vmatmul.mubr.bf16.gmra.mrb[40].mxu1 %v1734_v58 }
  0x8a   :  { %1286 = vmatprep.mubr.msk.bf16.mxu0 %vm486_vm0, %v1735_v59  ;;  %1302 = vmatprep.mubr.msk.bf16.mxu1 %vm486_vm0, %v1737_v60 }
  0x91   :  { %704 = vmatmul.mubr.bf16.gmra.mrb[44].mxu0 %v1739_v61  ;;  %832 = vmatmul.mubr.bf16.gmra.mrb[44].mxu1 %v1740_v62 }
  0x92   :  { %1287 = vmatprep.mubr.msk.bf16.mxu0 %vm486_vm0, %v1741_v63  ;;  %1303 = vmatprep.mubr.msk.bf16.mxu1 %vm486_vm0, %v1743_v0 }
  0x99   :  { %712 = vmatmul.mubr.bf16.gmra.mrb[48].mxu0 %v1745_v1  ;;  %840 = vmatmul.mubr.bf16.gmra.mrb[48].mxu1 %v1746_v2 }
  0x9a   :  { %1288 = vmatprep.mubr.msk.bf16.mxu0 %vm486_vm0, %v1747_v3  ;;  %1304 = vmatprep.mubr.msk.bf16.mxu1 %vm486_vm0, %v1749_v4 }
  0xa1   :  { %720 = vmatmul.mubr.bf16.gmra.mrb[52].mxu0 %v1751_v5  ;;  %848 = vmatmul.mubr.bf16.gmra.mrb[52].mxu1 %v1752_v6 }
  0xa2   :  { %1289 = vmatprep.mubr.msk.bf16.mxu0 %vm486_vm0, %v1753_v7  ;;  %1305 = vmatprep.mubr.msk.bf16.mxu1 %vm486_vm0, %v1755_v8 }
  0xa9   :  { %728 = vmatmul.mubr.bf16.gmra.mrb[56].mxu0 %v1757_v9  ;;  %856 = vmatmul.mubr.bf16.gmra.mrb[56].mxu1 %v1758_v10 }
  0xaa   :  { %1290 = vmatprep.mubr.msk.bf16.mxu0 %vm486_vm0, %v1759_v11  ;;  %1306 = vmatprep.mubr.msk.bf16.mxu1 %vm486_vm0, %v1761_v12 }
  0xb1   :  { %736 = vmatmul.mubr.bf16.gmra.mrb[60].mxu0 %v1763_v13  ;;  %864 = vmatmul.mubr.bf16.gmra.mrb[60].mxu1 %v1764_v14 }
 0x10c   :  { %v617_v16 = vpop.f32.mrb[0].mxu0  ;;  %v745_v17 = vpop.f32.mrb[0].mxu1 }
 0x10d   :  { %v619_v18 = vpop.f32.mrb[1].mxu0  ;;  %v747_v19 = vpop.f32.mrb[1].mxu1  ;;  %v618_v22 = vadd.f32 %v2083_v15, %v617_v16  ;;  %v746_v23 = vadd.f32 %v2083_v15, %v745_v17 }
 0x10e   :  { %v620_v20 = vpop.f32.mrb[2].mxu0  ;;  %v748_v21 = vpop.f32.mrb[2].mxu1 }
 0x10f   :  { %v621_v24 = vadd.f32 %v2083_v15, %v620_v20  ;;  %v749_v25 = vadd.f32 %v2083_v15, %v748_v21  ;;  %v622_v26 = vpop.f32.mrb[3].mxu0  ;;  %v750_v27 = vpop.f32.mrb[3].mxu1 }
 0x111   :  { %v1438_v28 = vpack.c.bf16 %v621_v24, %v618_v22  ;;  %v1518_v29 = vpack.c.bf16 %v749_v25, %v746_v23 }
 0x113   :  { %1439 = vst [vmem:[%s2248_s3] sm:$0xff] %v1438_v28   ;;  %1610 = vst [vmem:[%s2248_s3 + $0x80] sm:$0xff] %v1518_v29  }
 0x114   :  { %v625_v30 = vpop.f32.mrb[4].mxu0  ;;  %v753_v31 = vpop.f32.mrb[4].mxu1 }
 0x115   :  { %v627_v32 = vpop.f32.mrb[5].mxu0  ;;  %v755_v33 = vpop.f32.mrb[5].mxu1  ;;  %v626_v36 = vadd.f32 %v2083_v15, %v625_v30  ;;  %v754_v37 = vadd.f32 %v2083_v15, %v753_v31 }
 0x116   :  { %v628_v34 = vpop.f32.mrb[6].mxu0  ;;  %v756_v35 = vpop.f32.mrb[6].mxu1 }
 0x117   :  { %v629_v38 = vadd.f32 %v2083_v15, %v628_v34  ;;  %v757_v39 = vadd.f32 %v2083_v15, %v756_v35  ;;  %v630_v40 = vpop.f32.mrb[7].mxu0  ;;  %v758_v41 = vpop.f32.mrb[7].mxu1 }
 0x119   :  { %v1443_v42 = vpack.c.bf16 %v629_v38, %v626_v36  ;;  %v1523_v43 = vpack.c.bf16 %v757_v39, %v754_v37 }
 0x11b   :  { %1595 = vst [vmem:[%s2248_s3 + $0x8] sm:$0xff] %v1443_v42   ;;  %1611 = vst [vmem:[%s2248_s3 + $0x88] sm:$0xff] %v1523_v43  }
 0x11c   :  { %v633_v44 = vpop.f32.mrb[8].mxu0  ;;  %v761_v45 = vpop.f32.mrb[8].mxu1 }
 0x11d   :  { %v635_v46 = vpop.f32.mrb[9].mxu0  ;;  %v763_v47 = vpop.f32.mrb[9].mxu1  ;;  %v634_v50 = vadd.f32 %v2083_v15, %v633_v44  ;;  %v762_v51 = vadd.f32 %v2083_v15, %v761_v45 }
 0x11e   :  { %v636_v48 = vpop.f32.mrb[10].mxu0  ;;  %v764_v49 = vpop.f32.mrb[10].mxu1 }
 0x11f   :  { %v637_v52 = vadd.f32 %v2083_v15, %v636_v48  ;;  %v765_v53 = vadd.f32 %v2083_v15, %v764_v49  ;;  %v638_v54 = vpop.f32.mrb[11].mxu0  ;;  %v766_v55 = vpop.f32.mrb[11].mxu1 }
 0x121   :  { %v1448_v56 = vpack.c.bf16 %v637_v52, %v634_v50  ;;  %v1528_v57 = vpack.c.bf16 %v765_v53, %v762_v51 }
 0x123   :  { %1596 = vst [vmem:[%s2248_s3 + $0x10] sm:$0xff] %v1448_v56   ;;  %1612 = vst [vmem:[%s2248_s3 + $0x90] sm:$0xff] %v1528_v57  }
 0x124   :  { %v641_v58 = vpop.f32.mrb[12].mxu0  ;;  %v769_v59 = vpop.f32.mrb[12].mxu1 }
 0x125   :  { %v643_v60 = vpop.f32.mrb[13].mxu0  ;;  %v771_v61 = vpop.f32.mrb[13].mxu1  ;;  %v642_v0 = vadd.f32 %v2083_v15, %v641_v58  ;;  %v770_v1 = vadd.f32 %v2083_v15, %v769_v59 }
 0x126   :  { %v644_v62 = vpop.f32.mrb[14].mxu0  ;;  %v772_v63 = vpop.f32.mrb[14].mxu1 }
 0x127   :  { %v645_v2 = vadd.f32 %v2083_v15, %v644_v62  ;;  %v773_v3 = vadd.f32 %v2083_v15, %v772_v63  ;;  %v646_v4 = vpop.f32.mrb[15].mxu0  ;;  %v774_v5 = vpop.f32.mrb[15].mxu1 }
 0x129   :  { %v1453_v6 = vpack.c.bf16 %v645_v2, %v642_v0  ;;  %v1533_v7 = vpack.c.bf16 %v773_v3, %v770_v1 }
 0x12b   :  { %1597 = vst [vmem:[%s2248_s3 + $0x18] sm:$0xff] %v1453_v6   ;;  %1613 = vst [vmem:[%s2248_s3 + $0x98] sm:$0xff] %v1533_v7  }
 0x12c   :  { %v649_v8 = vpop.f32.mrb[16].mxu0  ;;  %v777_v9 = vpop.f32.mrb[16].mxu1 }
 0x12d   :  { %v651_v10 = vpop.f32.mrb[17].mxu0  ;;  %v779_v11 = vpop.f32.mrb[17].mxu1  ;;  %v650_v14 = vadd.f32 %v2083_v15, %v649_v8  ;;  %v778_v16 = vadd.f32 %v2083_v15, %v777_v9 }
 0x12e   :  { %v652_v12 = vpop.f32.mrb[18].mxu0  ;;  %v780_v13 = vpop.f32.mrb[18].mxu1 }
 0x12f   :  { %v653_v17 = vadd.f32 %v2083_v15, %v652_v12  ;;  %v781_v18 = vadd.f32 %v2083_v15, %v780_v13  ;;  %v654_v19 = vpop.f32.mrb[19].mxu0  ;;  %v782_v20 = vpop.f32.mrb[19].mxu1 }
 0x131   :  { %v1458_v21 = vpack.c.bf16 %v653_v17, %v650_v14  ;;  %v1538_v22 = vpack.c.bf16 %v781_v18, %v778_v16 }
 0x133   :  { %1598 = vst [vmem:[%s2248_s3 + $0x20] sm:$0xff] %v1458_v21   ;;  %1614 = vst [vmem:[%s2248_s3 + $0xa0] sm:$0xff] %v1538_v22  }
 0x134   :  { %v657_v23 = vpop.f32.mrb[20].mxu0  ;;  %v785_v24 = vpop.f32.mrb[20].mxu1 }
 0x135   :  { %v659_v25 = vpop.f32.mrb[21].mxu0  ;;  %v787_v26 = vpop.f32.mrb[21].mxu1  ;;  %v658_v29 = vadd.f32 %v2083_v15, %v657_v23  ;;  %v786_v30 = vadd.f32 %v2083_v15, %v785_v24 }
 0x136   :  { %v660_v27 = vpop.f32.mrb[22].mxu0  ;;  %v788_v28 = vpop.f32.mrb[22].mxu1 }
 0x137   :  { %v661_v31 = vadd.f32 %v2083_v15, %v660_v27  ;;  %v789_v32 = vadd.f32 %v2083_v15, %v788_v28  ;;  %v662_v33 = vpop.f32.mrb[23].mxu0  ;;  %v790_v34 = vpop.f32.mrb[23].mxu1 }
 0x139   :  { %v1463_v35 = vpack.c.bf16 %v661_v31, %v658_v29  ;;  %v1543_v36 = vpack.c.bf16 %v789_v32, %v786_v30 }
 0x13b   :  { %1599 = vst [vmem:[%s2248_s3 + $0x28] sm:$0xff] %v1463_v35   ;;  %1615 = vst [vmem:[%s2248_s3 + $0xa8] sm:$0xff] %v1543_v36  }
 0x13c   :  { %v665_v37 = vpop.f32.mrb[24].mxu0  ;;  %v793_v38 = vpop.f32.mrb[24].mxu1 }
 0x13d   :  { %v667_v39 = vpop.f32.mrb[25].mxu0  ;;  %v795_v40 = vpop.f32.mrb[25].mxu1  ;;  %v666_v43 = vadd.f32 %v2083_v15, %v665_v37  ;;  %v794_v44 = vadd.f32 %v2083_v15, %v793_v38 }
 0x13e   :  { %v668_v41 = vpop.f32.mrb[26].mxu0  ;;  %v796_v42 = vpop.f32.mrb[26].mxu1 }
 0x13f   :  { %v669_v45 = vadd.f32 %v2083_v15, %v668_v41  ;;  %v797_v46 = vadd.f32 %v2083_v15, %v796_v42  ;;  %v670_v47 = vpop.f32.mrb[27].mxu0  ;;  %v798_v48 = vpop.f32.mrb[27].mxu1 }
 0x141   :  { %v1468_v49 = vpack.c.bf16 %v669_v45, %v666_v43  ;;  %v1548_v50 = vpack.c.bf16 %v797_v46, %v794_v44 }
 0x143   :  { %1600 = vst [vmem:[%s2248_s3 + $0x30] sm:$0xff] %v1468_v49   ;;  %1616 = vst [vmem:[%s2248_s3 + $0xb0] sm:$0xff] %v1548_v50  }
 0x144   :  { %v673_v51 = vpop.f32.mrb[28].mxu0  ;;  %v801_v52 = vpop.f32.mrb[28].mxu1 }
 0x145   :  { %v675_v53 = vpop.f32.mrb[29].mxu0  ;;  %v803_v54 = vpop.f32.mrb[29].mxu1  ;;  %v674_v57 = vadd.f32 %v2083_v15, %v673_v51  ;;  %v802_v58 = vadd.f32 %v2083_v15, %v801_v52 }
 0x146   :  { %v676_v55 = vpop.f32.mrb[30].mxu0  ;;  %v804_v56 = vpop.f32.mrb[30].mxu1 }
 0x147   :  { %v677_v59 = vadd.f32 %v2083_v15, %v676_v55  ;;  %v805_v60 = vadd.f32 %v2083_v15, %v804_v56  ;;  %v678_v61 = vpop.f32.mrb[31].mxu0  ;;  %v806_v62 = vpop.f32.mrb[31].mxu1 }
 0x149   :  { %v1473_v63 = vpack.c.bf16 %v677_v59, %v674_v57  ;;  %v1553_v0 = vpack.c.bf16 %v805_v60, %v802_v58 }
 0x14b   :  { %1601 = vst [vmem:[%s2248_s3 + $0x38] sm:$0xff] %v1473_v63   ;;  %1617 = vst [vmem:[%s2248_s3 + $0xb8] sm:$0xff] %v1553_v0  }
 0x14c   :  { %v681_v1 = vpop.f32.mrb[32].mxu0  ;;  %v809_v2 = vpop.f32.mrb[32].mxu1 }
 0x14d   :  { %v683_v3 = vpop.f32.mrb[33].mxu0  ;;  %v811_v4 = vpop.f32.mrb[33].mxu1  ;;  %v682_v7 = vadd.f32 %v2083_v15, %v681_v1  ;;  %v810_v8 = vadd.f32 %v2083_v15, %v809_v2 }
 0x14e   :  { %v684_v5 = vpop.f32.mrb[34].mxu0  ;;  %v812_v6 = vpop.f32.mrb[34].mxu1 }
 0x14f   :  { %v685_v9 = vadd.f32 %v2083_v15, %v684_v5  ;;  %v813_v10 = vadd.f32 %v2083_v15, %v812_v6  ;;  %v686_v11 = vpop.f32.mrb[35].mxu0  ;;  %v814_v12 = vpop.f32.mrb[35].mxu1 }
 0x151   :  { %v1478_v13 = vpack.c.bf16 %v685_v9, %v682_v7  ;;  %v1558_v14 = vpack.c.bf16 %v813_v10, %v810_v8 }
 0x153   :  { %1602 = vst [vmem:[%s2248_s3 + $0x40] sm:$0xff] %v1478_v13   ;;  %1618 = vst [vmem:[%s2248_s3 + $0xc0] sm:$0xff] %v1558_v14  }
 0x154   :  { %v689_v16 = vpop.f32.mrb[36].mxu0  ;;  %v817_v17 = vpop.f32.mrb[36].mxu1 }
 0x155   :  { %v691_v18 = vpop.f32.mrb[37].mxu0  ;;  %v819_v19 = vpop.f32.mrb[37].mxu1  ;;  %v690_v22 = vadd.f32 %v2083_v15, %v689_v16  ;;  %v818_v23 = vadd.f32 %v2083_v15, %v817_v17 }
 0x156   :  { %v692_v20 = vpop.f32.mrb[38].mxu0  ;;  %v820_v21 = vpop.f32.mrb[38].mxu1 }
 0x157   :  { %v693_v24 = vadd.f32 %v2083_v15, %v692_v20  ;;  %v821_v25 = vadd.f32 %v2083_v15, %v820_v21  ;;  %v694_v26 = vpop.f32.mrb[39].mxu0  ;;  %v822_v27 = vpop.f32.mrb[39].mxu1 }
 0x159   :  { %v1483_v28 = vpack.c.bf16 %v693_v24, %v690_v22  ;;  %v1563_v29 = vpack.c.bf16 %v821_v25, %v818_v23 }
 0x15b   :  { %1603 = vst [vmem:[%s2248_s3 + $0x48] sm:$0xff] %v1483_v28   ;;  %1619 = vst [vmem:[%s2248_s3 + $0xc8] sm:$0xff] %v1563_v29  }
 0x15c   :  { %v697_v30 = vpop.f32.mrb[40].mxu0  ;;  %v825_v31 = vpop.f32.mrb[40].mxu1 }
 0x15d   :  { %v699_v32 = vpop.f32.mrb[41].mxu0  ;;  %v827_v33 = vpop.f32.mrb[41].mxu1  ;;  %v698_v36 = vadd.f32 %v2083_v15, %v697_v30  ;;  %v826_v37 = vadd.f32 %v2083_v15, %v825_v31 }
 0x15e   :  { %v700_v34 = vpop.f32.mrb[42].mxu0  ;;  %v828_v35 = vpop.f32.mrb[42].mxu1 }
 0x15f   :  { %v701_v38 = vadd.f32 %v2083_v15, %v700_v34  ;;  %v829_v39 = vadd.f32 %v2083_v15, %v828_v35  ;;  %v702_v40 = vpop.f32.mrb[43].mxu0  ;;  %v830_v41 = vpop.f32.mrb[43].mxu1 }
 0x161   :  { %v1488_v42 = vpack.c.bf16 %v701_v38, %v698_v36  ;;  %v1568_v43 = vpack.c.bf16 %v829_v39, %v826_v37 }
 0x163   :  { %1604 = vst [vmem:[%s2248_s3 + $0x50] sm:$0xff] %v1488_v42   ;;  %1620 = vst [vmem:[%s2248_s3 + $0xd0] sm:$0xff] %v1568_v43  }
 0x164   :  { %v705_v44 = vpop.f32.mrb[44].mxu0  ;;  %v833_v45 = vpop.f32.mrb[44].mxu1 }
 0x165   :  { %v707_v46 = vpop.f32.mrb[45].mxu0  ;;  %v835_v47 = vpop.f32.mrb[45].mxu1  ;;  %v706_v50 = vadd.f32 %v2083_v15, %v705_v44  ;;  %v834_v51 = vadd.f32 %v2083_v15, %v833_v45 }
 0x166   :  { %v708_v48 = vpop.f32.mrb[46].mxu0  ;;  %v836_v49 = vpop.f32.mrb[46].mxu1 }
 0x167   :  { %v709_v52 = vadd.f32 %v2083_v15, %v708_v48  ;;  %v837_v53 = vadd.f32 %v2083_v15, %v836_v49  ;;  %v710_v54 = vpop.f32.mrb[47].mxu0  ;;  %v838_v55 = vpop.f32.mrb[47].mxu1 }
 0x169   :  { %v1493_v56 = vpack.c.bf16 %v709_v52, %v706_v50  ;;  %v1573_v57 = vpack.c.bf16 %v837_v53, %v834_v51 }
 0x16b   :  { %1605 = vst [vmem:[%s2248_s3 + $0x58] sm:$0xff] %v1493_v56   ;;  %1621 = vst [vmem:[%s2248_s3 + $0xd8] sm:$0xff] %v1573_v57  }
 0x16c   :  { %v713_v58 = vpop.f32.mrb[48].mxu0  ;;  %v841_v59 = vpop.f32.mrb[48].mxu1 }
 0x16d   :  { %v715_v60 = vpop.f32.mrb[49].mxu0  ;;  %v843_v61 = vpop.f32.mrb[49].mxu1  ;;  %v714_v0 = vadd.f32 %v2083_v15, %v713_v58  ;;  %v842_v1 = vadd.f32 %v2083_v15, %v841_v59 }
 0x16e   :  { %v716_v62 = vpop.f32.mrb[50].mxu0  ;;  %v844_v63 = vpop.f32.mrb[50].mxu1 }
 0x16f   :  { %v717_v2 = vadd.f32 %v2083_v15, %v716_v62  ;;  %v845_v3 = vadd.f32 %v2083_v15, %v844_v63  ;;  %v718_v4 = vpop.f32.mrb[51].mxu0  ;;  %v846_v5 = vpop.f32.mrb[51].mxu1 }
 0x171   :  { %v1498_v6 = vpack.c.bf16 %v717_v2, %v714_v0  ;;  %v1578_v7 = vpack.c.bf16 %v845_v3, %v842_v1 }
 0x173   :  { %1606 = vst [vmem:[%s2248_s3 + $0x60] sm:$0xff] %v1498_v6   ;;  %1622 = vst [vmem:[%s2248_s3 + $0xe0] sm:$0xff] %v1578_v7  }
 0x174   :  { %v721_v8 = vpop.f32.mrb[52].mxu0  ;;  %v849_v9 = vpop.f32.mrb[52].mxu1 }
 0x175   :  { %v723_v10 = vpop.f32.mrb[53].mxu0  ;;  %v851_v11 = vpop.f32.mrb[53].mxu1  ;;  %v722_v14 = vadd.f32 %v2083_v15, %v721_v8  ;;  %v850_v16 = vadd.f32 %v2083_v15, %v849_v9 }
 0x176   :  { %v724_v12 = vpop.f32.mrb[54].mxu0  ;;  %v852_v13 = vpop.f32.mrb[54].mxu1 }
 0x177   :  { %v725_v17 = vadd.f32 %v2083_v15, %v724_v12  ;;  %v853_v18 = vadd.f32 %v2083_v15, %v852_v13  ;;  %v726_v19 = vpop.f32.mrb[55].mxu0  ;;  %v854_v20 = vpop.f32.mrb[55].mxu1 }
 0x179   :  { %v1503_v21 = vpack.c.bf16 %v725_v17, %v722_v14  ;;  %v1583_v22 = vpack.c.bf16 %v853_v18, %v850_v16 }
 0x17b   :  { %1607 = vst [vmem:[%s2248_s3 + $0x68] sm:$0xff] %v1503_v21   ;;  %1623 = vst [vmem:[%s2248_s3 + $0xe8] sm:$0xff] %v1583_v22  }
 0x17c   :  { %v729_v23 = vpop.f32.mrb[56].mxu0  ;;  %v857_v24 = vpop.f32.mrb[56].mxu1 }
 0x17d   :  { %v731_v25 = vpop.f32.mrb[57].mxu0  ;;  %v859_v26 = vpop.f32.mrb[57].mxu1  ;;  %v730_v29 = vadd.f32 %v2083_v15, %v729_v23  ;;  %v858_v30 = vadd.f32 %v2083_v15, %v857_v24 }
 0x17e   :  { %v732_v27 = vpop.f32.mrb[58].mxu0  ;;  %v860_v28 = vpop.f32.mrb[58].mxu1 }
 0x17f   :  { %v733_v31 = vadd.f32 %v2083_v15, %v732_v27  ;;  %v861_v32 = vadd.f32 %v2083_v15, %v860_v28  ;;  %v734_v33 = vpop.f32.mrb[59].mxu0  ;;  %v862_v34 = vpop.f32.mrb[59].mxu1 }
 0x181   :  { %v1508_v35 = vpack.c.bf16 %v733_v31, %v730_v29  ;;  %v1588_v36 = vpack.c.bf16 %v861_v32, %v858_v30 }
 0x183   :  { %1608 = vst [vmem:[%s2248_s3 + $0x70] sm:$0xff] %v1508_v35   ;;  %1624 = vst [vmem:[%s2248_s3 + $0xf0] sm:$0xff] %v1588_v36  }
 0x184   :  { %v737_v37 = vpop.f32.mrb[60].mxu0  ;;  %v865_v38 = vpop.f32.mrb[60].mxu1 }
 0x185   :  { %v739_v39 = vpop.f32.mrb[61].mxu0  ;;  %v867_v40 = vpop.f32.mrb[61].mxu1  ;;  %v738_v43 = vadd.f32 %v2083_v15, %v737_v37  ;;  %v866_v44 = vadd.f32 %v2083_v15, %v865_v38 }
 0x186   :  { %v740_v41 = vpop.f32.mrb[62].mxu0  ;;  %v868_v42 = vpop.f32.mrb[62].mxu1 }
 0x187   :  { %v741_v45 = vadd.f32 %v2083_v15, %v740_v41  ;;  %v869_v46 = vadd.f32 %v2083_v15, %v868_v42  ;;  %v742_v47 = vpop.f32.mrb[63].mxu0  ;;  %v870_v48 = vpop.f32.mrb[63].mxu1 }
 0x189   :  { %v1513_v49 = vpack.c.bf16 %v741_v45, %v738_v43  ;;  %v1593_v50 = vpack.c.bf16 %v869_v46, %v866_v44 }
 0x18b   :  { %1609 = vst [vmem:[%s2248_s3 + $0x78] sm:$0xff] %v1513_v49   ;;  %1625 = vst [vmem:[%s2248_s3 + $0xf8] sm:$0xff] %v1593_v50  }

// kernel: hybridnet_forward.29
= control target key start
LH: loop header
LB: loop body
LE: loop exit
PB: predicated region body
PF: predicated region fallthrough
CT: control target
= control target key end

     0   :  { %v1692_v0 = vmov 0   ;;  %s2150_s1 = inlined_call_operand.vmem [shape: bf16[256,128], index: 1, kind: input, shape index: {}]   ;;  %s2151_s0 = inlined_call_operand.vmem [shape: bf16[512,256], index: 0, kind: input, shape index: {}]   ;;  %s2152_s2 = inlined_call_operand.vmem [shape: f32[1,128], index: 2, kind: input, shape index: {}]   ;;  %s2153_s3 = inlined_call_operand.vmem [shape: bf16[512,128], index: 3, kind: output, shape index: {}]  }
   0x1   :  { %534 = vmatprep.subr.bf16.mxu0 %v1692_v0  ;;  %1547 = vmatprep.subr.bf16.mxu1 %v1692_v0  ;;  %v1580_v1 = vld [vmem:[%s2150_s1] sm:$0xff]   ;;  %v1581_v2 = vld [vmem:[%s2150_s1 + $0x8] sm:$0xff]   ;;  %v1582_v3 = vld [vmem:[%s2150_s1 + $0x10] sm:$0xff]  }
   0x2   :  { %535 = vmatpush1.bf16.msra.mxu0 %v1580_v1  ;;  %1563 = vmatpush1.bf16.msra.mxu1 %v1580_v1  ;;  %v1583_v4 = vld [vmem:[%s2150_s1 + $0x18] sm:$0xff]   ;;  %v1584_v5 = vld [vmem:[%s2150_s1 + $0x20] sm:$0xff]   ;;  %v1585_v7 = vld [vmem:[%s2150_s1 + $0x28] sm:$0xff]  }
   0x3   :  { %536 = vmatprep.subr.bf16.mxu0 %v1692_v0  ;;  %1548 = vmatprep.subr.bf16.mxu1 %v1692_v0  ;;  %v1598_v6 = vld [vmem:[%s2151_s0 + $0x4] ss:$8 sps:$4 sm:$0xff]   ;;  %v1586_v9 = vld [vmem:[%s2150_s1 + $0x30] sm:$0xff]   ;;  %v1587_v10 = vld [vmem:[%s2150_s1 + $0x38] sm:$0xff]  }
   0x4   :  { %v1601_v8 = vld [vmem:[%s2151_s0 + $0x104] ss:$8 sps:$4 sm:$0xff]   ;;  %566 = vmatprep.mubr.bf16.mxu0 %v1598_v6  ;;  %v1590_v13 = vld [vmem:[%s2150_s1 + $0x50] sm:$0xff]   ;;  %v1591_v14 = vld [vmem:[%s2150_s1 + $0x58] sm:$0xff]  }
   0x5   :  { %694 = vmatprep.mubr.bf16.mxu1 %v1601_v8  ;;  %v1588_v11 = vld [vmem:[%s2150_s1 + $0x40] sm:$0xff]   ;;  %v1589_v12 = vld [vmem:[%s2150_s1 + $0x48] sm:$0xff]   ;;  %v1594_v17 = vld [vmem:[%s2150_s1 + $0x70] sm:$0xff]  }
   0x6   :  { %537 = vmatpush1.bf16.msra.mxu0 %v1581_v2  ;;  %1564 = vmatpush1.bf16.msra.mxu1 %v1581_v2  ;;  %v1592_v15 = vld [vmem:[%s2150_s1 + $0x60] sm:$0xff]   ;;  %v1593_v16 = vld [vmem:[%s2150_s1 + $0x68] sm:$0xff]   ;;  %v1595_v18 = vld [vmem:[%s2150_s1 + $0x78] sm:$0xff]  }
   0x7   :  { %538 = vmatprep.subr.bf16.mxu0 %v1692_v0  ;;  %1549 = vmatprep.subr.bf16.mxu1 %v1692_v0  ;;  %v1596_v19 = vld [vmem:[%s2151_s0] ss:$8 sps:$4 sm:$0xff]   ;;  %v1602_v21 = vld [vmem:[%s2151_s0 + $0x14] ss:$8 sps:$4 sm:$0xff]   ;;  %v1606_v23 = vld [vmem:[%s2151_s0 + $0x10] ss:$8 sps:$4 sm:$0xff]  }
   0x8   :  { %v1599_v20 = vld [vmem:[%s2151_s0 + $0x100] ss:$8 sps:$4 sm:$0xff]   ;;  %v1604_v22 = vld [vmem:[%s2151_s0 + $0x114] ss:$8 sps:$4 sm:$0xff]   ;;  %v1607_v24 = vld [vmem:[%s2151_s0 + $0x110] ss:$8 sps:$4 sm:$0xff]  }
   0x9   :  { %v1608_v25 = vld [vmem:[%s2151_s0 + $0x24] ss:$8 sps:$4 sm:$0xff]   ;;  %v1612_v27 = vld [vmem:[%s2151_s0 + $0x20] ss:$8 sps:$4 sm:$0xff]   ;;  %v1614_v29 = vld [vmem:[%s2151_s0 + $0x34] ss:$8 sps:$4 sm:$0xff]  }
   0xa   :  { %539 = vmatpush1.bf16.msra.mxu0 %v1582_v3  ;;  %1565 = vmatpush1.bf16.msra.mxu1 %v1582_v3  ;;  %v1610_v26 = vld [vmem:[%s2151_s0 + $0x124] ss:$8 sps:$4 sm:$0xff]   ;;  %v1613_v28 = vld [vmem:[%s2151_s0 + $0x120] ss:$8 sps:$4 sm:$0xff]   ;;  %v1616_v30 = vld [vmem:[%s2151_s0 + $0x134] ss:$8 sps:$4 sm:$0xff]  }
   0xb   :  { %540 = vmatprep.subr.bf16.mxu0 %v1692_v0  ;;  %1550 = vmatprep.subr.bf16.mxu1 %v1692_v0  ;;  %v1618_v31 = vld [vmem:[%s2151_s0 + $0x30] ss:$8 sps:$4 sm:$0xff]   ;;  %v1620_v33 = vld [vmem:[%s2151_s0 + $0x44] ss:$8 sps:$4 sm:$0xff]   ;;  %v1624_v35 = vld [vmem:[%s2151_s0 + $0x40] ss:$8 sps:$4 sm:$0xff]  }
   0xc   :  { %v1619_v32 = vld [vmem:[%s2151_s0 + $0x130] ss:$8 sps:$4 sm:$0xff]   ;;  %v1622_v34 = vld [vmem:[%s2151_s0 + $0x144] ss:$8 sps:$4 sm:$0xff]   ;;  %v1625_v36 = vld [vmem:[%s2151_s0 + $0x140] ss:$8 sps:$4 sm:$0xff]  }
   0xd   :  { %v1626_v37 = vld [vmem:[%s2151_s0 + $0x54] ss:$8 sps:$4 sm:$0xff]   ;;  %v1630_v39 = vld [vmem:[%s2151_s0 + $0x50] ss:$8 sps:$4 sm:$0xff]   ;;  %v1632_v41 = vld [vmem:[%s2151_s0 + $0x64] ss:$8 sps:$4 sm:$0xff]  }
   0xe   :  { %541 = vmatpush1.bf16.msra.mxu0 %v1583_v4  ;;  %1566 = vmatpush1.bf16.msra.mxu1 %v1583_v4  ;;  %v1628_v38 = vld [vmem:[%s2151_s0 + $0x154] ss:$8 sps:$4 sm:$0xff]   ;;  %v1631_v40 = vld [vmem:[%s2151_s0 + $0x150] ss:$8 sps:$4 sm:$0xff]   ;;  %v1634_v42 = vld [vmem:[%s2151_s0 + $0x164] ss:$8 sps:$4 sm:$0xff]  }
   0xf   :  { %542 = vmatprep.subr.bf16.mxu0 %v1692_v0  ;;  %1551 = vmatprep.subr.bf16.mxu1 %v1692_v0  ;;  %v1636_v43 = vld [vmem:[%s2151_s0 + $0x60] ss:$8 sps:$4 sm:$0xff]   ;;  %v1638_v45 = vld [vmem:[%s2151_s0 + $0x74] ss:$8 sps:$4 sm:$0xff]   ;;  %v1642_v47 = vld [vmem:[%s2151_s0 + $0x70] ss:$8 sps:$4 sm:$0xff]  }
  0x10   :  { %v1637_v44 = vld [vmem:[%s2151_s0 + $0x160] ss:$8 sps:$4 sm:$0xff]   ;;  %v1640_v46 = vld [vmem:[%s2151_s0 + $0x174] ss:$8 sps:$4 sm:$0xff]   ;;  %v1643_v48 = vld [vmem:[%s2151_s0 + $0x170] ss:$8 sps:$4 sm:$0xff]  }
  0x11   :  { %v1644_v49 = vld [vmem:[%s2151_s0 + $0x84] ss:$8 sps:$4 sm:$0xff]   ;;  %v1648_v51 = vld [vmem:[%s2151_s0 + $0x80] ss:$8 sps:$4 sm:$0xff]   ;;  %v1650_v53 = vld [vmem:[%s2151_s0 + $0x94] ss:$8 sps:$4 sm:$0xff]  }
  0x12   :  { %543 = vmatpush1.bf16.msra.mxu0 %v1584_v5  ;;  %1567 = vmatpush1.bf16.msra.mxu1 %v1584_v5  ;;  %v1646_v50 = vld [vmem:[%s2151_s0 + $0x184] ss:$8 sps:$4 sm:$0xff]   ;;  %v1649_v52 = vld [vmem:[%s2151_s0 + $0x180] ss:$8 sps:$4 sm:$0xff]   ;;  %v1652_v54 = vld [vmem:[%s2151_s0 + $0x194] ss:$8 sps:$4 sm:$0xff]  }
  0x13   :  { %544 = vmatprep.subr.bf16.mxu0 %v1692_v0  ;;  %1552 = vmatprep.subr.bf16.mxu1 %v1692_v0  ;;  %v1654_v55 = vld [vmem:[%s2151_s0 + $0x90] ss:$8 sps:$4 sm:$0xff]   ;;  %v1656_v57 = vld [vmem:[%s2151_s0 + $0xa4] ss:$8 sps:$4 sm:$0xff]   ;;  %v1660_v59 = vld [vmem:[%s2151_s0 + $0xa0] ss:$8 sps:$4 sm:$0xff]  }
  0x14   :  { %v1655_v56 = vld [vmem:[%s2151_s0 + $0x190] ss:$8 sps:$4 sm:$0xff]   ;;  %v1658_v58 = vld [vmem:[%s2151_s0 + $0x1a4] ss:$8 sps:$4 sm:$0xff]   ;;  %v1661_v60 = vld [vmem:[%s2151_s0 + $0x1a0] ss:$8 sps:$4 sm:$0xff]  }
  0x15   :  { %v1662_v61 = vld [vmem:[%s2151_s0 + $0xb4] ss:$8 sps:$4 sm:$0xff]   ;;  %v1666_v63 = vld [vmem:[%s2151_s0 + $0xb0] ss:$8 sps:$4 sm:$0xff]   ;;  %v1668_v1 = vld [vmem:[%s2151_s0 + $0xc4] ss:$8 sps:$4 sm:$0xff]  }
  0x16   :  { %545 = vmatpush1.bf16.msra.mxu0 %v1585_v7  ;;  %1568 = vmatpush1.bf16.msra.mxu1 %v1585_v7  ;;  %v1664_v62 = vld [vmem:[%s2151_s0 + $0x1b4] ss:$8 sps:$4 sm:$0xff]   ;;  %v1670_v2 = vld [vmem:[%s2151_s0 + $0x1c4] ss:$8 sps:$4 sm:$0xff]   ;;  %v1672_v3 = vld [vmem:[%s2151_s0 + $0xc0] ss:$8 sps:$4 sm:$0xff]  }
  0x17   :  { %546 = vmatprep.subr.bf16.mxu0 %v1692_v0  ;;  %1553 = vmatprep.subr.bf16.mxu1 %v1692_v0  ;;  %v1673_v4 = vld [vmem:[%s2151_s0 + $0x1c0] ss:$8 sps:$4 sm:$0xff]   ;;  %v1674_v5 = vld [vmem:[%s2151_s0 + $0xd4] ss:$8 sps:$4 sm:$0xff]   ;;  %v1678_v7 = vld [vmem:[%s2151_s0 + $0xd0] ss:$8 sps:$4 sm:$0xff]  }
  0x18   :  { %v1676_v6 = vld [vmem:[%s2151_s0 + $0x1d4] ss:$8 sps:$4 sm:$0xff]   ;;  %v1679_v8 = vld [vmem:[%s2151_s0 + $0x1d0] ss:$8 sps:$4 sm:$0xff]  }
  0x1a   :  { %547 = vmatpush1.bf16.msra.mxu0 %v1586_v9  ;;  %1569 = vmatpush1.bf16.msra.mxu1 %v1586_v9  ;;  %v1680_v9 = vld [vmem:[%s2151_s0 + $0xe4] ss:$8 sps:$4 sm:$0xff]  }
  0x1b   :  { %548 = vmatprep.subr.bf16.mxu0 %v1692_v0  ;;  %1554 = vmatprep.subr.bf16.mxu1 %v1692_v0 }
  0x1e   :  { %549 = vmatpush1.bf16.msra.mxu0 %v1587_v10  ;;  %1570 = vmatpush1.bf16.msra.mxu1 %v1587_v10  ;;  %v1682_v10 = vld [vmem:[%s2151_s0 + $0x1e4] ss:$8 sps:$4 sm:$0xff]  }
  0x1f   :  { %550 = vmatprep.subr.bf16.mxu0 %v1692_v0  ;;  %1555 = vmatprep.subr.bf16.mxu1 %v1692_v0 }
  0x22   :  { %551 = vmatpush1.bf16.msra.mxu0 %v1588_v11  ;;  %1571 = vmatpush1.bf16.msra.mxu1 %v1588_v11  ;;  %v1684_v11 = vld [vmem:[%s2151_s0 + $0xe0] ss:$8 sps:$4 sm:$0xff]  }
  0x23   :  { %552 = vmatprep.subr.bf16.mxu0 %v1692_v0  ;;  %1556 = vmatprep.subr.bf16.mxu1 %v1692_v0 }
  0x26   :  { %553 = vmatpush1.bf16.msra.mxu0 %v1589_v12  ;;  %1572 = vmatpush1.bf16.msra.mxu1 %v1589_v12  ;;  %v1685_v12 = vld [vmem:[%s2151_s0 + $0x1e0] ss:$8 sps:$4 sm:$0xff]  }
  0x27   :  { %554 = vmatprep.subr.bf16.mxu0 %v1692_v0  ;;  %1557 = vmatprep.subr.bf16.mxu1 %v1692_v0 }
  0x2a   :  { %555 = vmatpush1.bf16.msra.mxu0 %v1590_v13  ;;  %1573 = vmatpush1.bf16.msra.mxu1 %v1590_v13  ;;  %v1686_v13 = vld [vmem:[%s2151_s0 + $0xf4] ss:$8 sps:$4 sm:$0xff]  }
  0x2b   :  { %556 = vmatprep.subr.bf16.mxu0 %v1692_v0  ;;  %1558 = vmatprep.subr.bf16.mxu1 %v1692_v0 }
  0x2e   :  { %557 = vmatpush1.bf16.msra.mxu0 %v1591_v14  ;;  %1574 = vmatpush1.bf16.msra.mxu1 %v1591_v14  ;;  %v1688_v14 = vld [vmem:[%s2151_s0 + $0x1f4] ss:$8 sps:$4 sm:$0xff]  }
  0x2f   :  { %558 = vmatprep.subr.bf16.mxu0 %v1692_v0  ;;  %1559 = vmatprep.subr.bf16.mxu1 %v1692_v0 }
  0x32   :  { %559 = vmatpush1.bf16.msra.mxu0 %v1592_v15  ;;  %1575 = vmatpush1.bf16.msra.mxu1 %v1592_v15  ;;  %v1690_v15 = vld [vmem:[%s2151_s0 + $0xf0] ss:$8 sps:$4 sm:$0xff]  }
  0x33   :  { %560 = vmatprep.subr.bf16.mxu0 %v1692_v0  ;;  %1560 = vmatprep.subr.bf16.mxu1 %v1692_v0 }
  0x36   :  { %561 = vmatpush1.bf16.msra.mxu0 %v1593_v16  ;;  %1576 = vmatpush1.bf16.msra.mxu1 %v1593_v16  ;;  %v1691_v16 = vld [vmem:[%s2151_s0 + $0x1f0] ss:$8 sps:$4 sm:$0xff]  }
  0x37   :  { %562 = vmatprep.subr.bf16.mxu0 %v1692_v0  ;;  %1561 = vmatprep.subr.bf16.mxu1 %v1692_v0 }
  0x3a   :  { %563 = vmatpush1.bf16.msra.mxu0 %v1594_v17  ;;  %1577 = vmatpush1.bf16.msra.mxu1 %v1594_v17  ;;  %v1988_v17 = vld [vmem:[%s2152_s2] ss:$0 sm:$0xff] }
  0x3b   :  { %564 = vmatprep.subr.bf16.mxu0 %v1692_v0  ;;  %1562 = vmatprep.subr.bf16.mxu1 %v1692_v0  ;;  %v1667_v0 = vld [vmem:[%s2151_s0 + $0x1b0] ss:$8 sps:$4 sm:$0xff]  }
  0x3e   :  { %565 = vmatpush1.bf16.msra.mxu0 %v1595_v18  ;;  %1578 = vmatpush1.bf16.msra.mxu1 %v1595_v18 }
  0x41   :  { %567 = vmatmul.mubr.bf16.vlgmr.msra.gmra.mrb[0].mxu0 %v1596_v19  ;;  %695 = vmatmul.mubr.bf16.vlgmr.msra.gmra.mrb[0].mxu1 %v1599_v20 }
  0x42   :  { %574 = vmatprep.mubr.bf16.mxu0 %v1602_v21  ;;  %702 = vmatprep.mubr.bf16.mxu1 %v1604_v22 }
  0x49   :  { %575 = vmatmul.mubr.bf16.gmra.mrb[4].mxu0 %v1606_v23  ;;  %703 = vmatmul.mubr.bf16.gmra.mrb[4].mxu1 %v1607_v24 }
  0x4a   :  { %582 = vmatprep.mubr.bf16.mxu0 %v1608_v25  ;;  %710 = vmatprep.mubr.bf16.mxu1 %v1610_v26 }
  0x51   :  { %583 = vmatmul.mubr.bf16.gmra.mrb[8].mxu0 %v1612_v27  ;;  %711 = vmatmul.mubr.bf16.gmra.mrb[8].mxu1 %v1613_v28 }
  0x52   :  { %590 = vmatprep.mubr.bf16.mxu0 %v1614_v29  ;;  %718 = vmatprep.mubr.bf16.mxu1 %v1616_v30 }
  0x59   :  { %591 = vmatmul.mubr.bf16.gmra.mrb[12].mxu0 %v1618_v31  ;;  %719 = vmatmul.mubr.bf16.gmra.mrb[12].mxu1 %v1619_v32 }
  0x5a   :  { %598 = vmatprep.mubr.bf16.mxu0 %v1620_v33  ;;  %726 = vmatprep.mubr.bf16.mxu1 %v1622_v34 }
  0x61   :  { %599 = vmatmul.mubr.bf16.gmra.mrb[16].mxu0 %v1624_v35  ;;  %727 = vmatmul.mubr.bf16.gmra.mrb[16].mxu1 %v1625_v36 }
  0x62   :  { %606 = vmatprep.mubr.bf16.mxu0 %v1626_v37  ;;  %734 = vmatprep.mubr.bf16.mxu1 %v1628_v38 }
  0x69   :  { %607 = vmatmul.mubr.bf16.gmra.mrb[20].mxu0 %v1630_v39  ;;  %735 = vmatmul.mubr.bf16.gmra.mrb[20].mxu1 %v1631_v40 }
  0x6a   :  { %614 = vmatprep.mubr.bf16.mxu0 %v1632_v41  ;;  %742 = vmatprep.mubr.bf16.mxu1 %v1634_v42 }
  0x71   :  { %615 = vmatmul.mubr.bf16.gmra.mrb[24].mxu0 %v1636_v43  ;;  %743 = vmatmul.mubr.bf16.gmra.mrb[24].mxu1 %v1637_v44 }
  0x72   :  { %622 = vmatprep.mubr.bf16.mxu0 %v1638_v45  ;;  %750 = vmatprep.mubr.bf16.mxu1 %v1640_v46 }
  0x79   :  { %623 = vmatmul.mubr.bf16.gmra.mrb[28].mxu0 %v1642_v47  ;;  %751 = vmatmul.mubr.bf16.gmra.mrb[28].mxu1 %v1643_v48 }
  0x7a   :  { %630 = vmatprep.mubr.bf16.mxu0 %v1644_v49  ;;  %758 = vmatprep.mubr.bf16.mxu1 %v1646_v50 }
  0x81   :  { %631 = vmatmul.mubr.bf16.gmra.mrb[32].mxu0 %v1648_v51  ;;  %759 = vmatmul.mubr.bf16.gmra.mrb[32].mxu1 %v1649_v52 }
  0x82   :  { %638 = vmatprep.mubr.bf16.mxu0 %v1650_v53  ;;  %766 = vmatprep.mubr.bf16.mxu1 %v1652_v54 }
  0x89   :  { %639 = vmatmul.mubr.bf16.gmra.mrb[36].mxu0 %v1654_v55  ;;  %767 = vmatmul.mubr.bf16.gmra.mrb[36].mxu1 %v1655_v56 }
  0x8a   :  { %646 = vmatprep.mubr.bf16.mxu0 %v1656_v57  ;;  %774 = vmatprep.mubr.bf16.mxu1 %v1658_v58 }
  0x91   :  { %647 = vmatmul.mubr.bf16.gmra.mrb[40].mxu0 %v1660_v59  ;;  %775 = vmatmul.mubr.bf16.gmra.mrb[40].mxu1 %v1661_v60 }
  0x92   :  { %654 = vmatprep.mubr.bf16.mxu0 %v1662_v61  ;;  %782 = vmatprep.mubr.bf16.mxu1 %v1664_v62 }
  0x99   :  { %655 = vmatmul.mubr.bf16.gmra.mrb[44].mxu0 %v1666_v63  ;;  %783 = vmatmul.mubr.bf16.gmra.mrb[44].mxu1 %v1667_v0 }
  0x9a   :  { %662 = vmatprep.mubr.bf16.mxu0 %v1668_v1  ;;  %790 = vmatprep.mubr.bf16.mxu1 %v1670_v2 }
  0xa1   :  { %663 = vmatmul.mubr.bf16.gmra.mrb[48].mxu0 %v1672_v3  ;;  %791 = vmatmul.mubr.bf16.gmra.mrb[48].mxu1 %v1673_v4 }
  0xa2   :  { %670 = vmatprep.mubr.bf16.mxu0 %v1674_v5  ;;  %798 = vmatprep.mubr.bf16.mxu1 %v1676_v6 }
  0xa9   :  { %671 = vmatmul.mubr.bf16.gmra.mrb[52].mxu0 %v1678_v7  ;;  %799 = vmatmul.mubr.bf16.gmra.mrb[52].mxu1 %v1679_v8 }
  0xaa   :  { %678 = vmatprep.mubr.bf16.mxu0 %v1680_v9  ;;  %806 = vmatprep.mubr.bf16.mxu1 %v1682_v10 }
  0xb1   :  { %679 = vmatmul.mubr.bf16.gmra.mrb[56].mxu0 %v1684_v11  ;;  %807 = vmatmul.mubr.bf16.gmra.mrb[56].mxu1 %v1685_v12 }
  0xb2   :  { %686 = vmatprep.mubr.bf16.mxu0 %v1686_v13  ;;  %814 = vmatprep.mubr.bf16.mxu1 %v1688_v14 }
  0xb9   :  { %687 = vmatmul.mubr.bf16.gmra.mrb[60].mxu0 %v1690_v15  ;;  %815 = vmatmul.mubr.bf16.gmra.mrb[60].mxu1 %v1691_v16 }
 0x114   :  { %v568_v18 = vpop.f32.mrb[0].mxu0  ;;  %v696_v19 = vpop.f32.mrb[0].mxu1 }
 0x115   :  { %v570_v20 = vpop.f32.mrb[1].mxu0  ;;  %v698_v21 = vpop.f32.mrb[1].mxu1  ;;  %v569_v24 = vadd.f32 %v1988_v17, %v568_v18  ;;  %v697_v25 = vadd.f32 %v1988_v17, %v696_v19 }
 0x116   :  { %v571_v22 = vpop.f32.mrb[2].mxu0  ;;  %v699_v23 = vpop.f32.mrb[2].mxu1 }
 0x117   :  { %v572_v26 = vadd.f32 %v1988_v17, %v571_v22  ;;  %v700_v27 = vadd.f32 %v1988_v17, %v699_v23  ;;  %v573_v28 = vpop.f32.mrb[3].mxu0  ;;  %v701_v29 = vpop.f32.mrb[3].mxu1 }
 0x119   :  { %v1359_v30 = vpack.c.bf16 %v572_v26, %v569_v24  ;;  %v1439_v31 = vpack.c.bf16 %v700_v27, %v697_v25 }
 0x11b   :  { %1360 = vst [vmem:[%s2153_s3] sm:$0xff] %v1359_v30   ;;  %1531 = vst [vmem:[%s2153_s3 + $0x80] sm:$0xff] %v1439_v31  }
 0x11c   :  { %v576_v32 = vpop.f32.mrb[4].mxu0  ;;  %v704_v33 = vpop.f32.mrb[4].mxu1 }
 0x11d   :  { %v578_v34 = vpop.f32.mrb[5].mxu0  ;;  %v706_v35 = vpop.f32.mrb[5].mxu1  ;;  %v577_v38 = vadd.f32 %v1988_v17, %v576_v32  ;;  %v705_v39 = vadd.f32 %v1988_v17, %v704_v33 }
 0x11e   :  { %v579_v36 = vpop.f32.mrb[6].mxu0  ;;  %v707_v37 = vpop.f32.mrb[6].mxu1 }
 0x11f   :  { %v580_v40 = vadd.f32 %v1988_v17, %v579_v36  ;;  %v708_v41 = vadd.f32 %v1988_v17, %v707_v37  ;;  %v581_v42 = vpop.f32.mrb[7].mxu0  ;;  %v709_v43 = vpop.f32.mrb[7].mxu1 }
 0x121   :  { %v1364_v44 = vpack.c.bf16 %v580_v40, %v577_v38  ;;  %v1444_v45 = vpack.c.bf16 %v708_v41, %v705_v39 }
 0x123   :  { %1516 = vst [vmem:[%s2153_s3 + $0x8] sm:$0xff] %v1364_v44   ;;  %1532 = vst [vmem:[%s2153_s3 + $0x88] sm:$0xff] %v1444_v45  }
 0x124   :  { %v584_v46 = vpop.f32.mrb[8].mxu0  ;;  %v712_v47 = vpop.f32.mrb[8].mxu1 }
 0x125   :  { %v586_v48 = vpop.f32.mrb[9].mxu0  ;;  %v714_v49 = vpop.f32.mrb[9].mxu1  ;;  %v585_v52 = vadd.f32 %v1988_v17, %v584_v46  ;;  %v713_v53 = vadd.f32 %v1988_v17, %v712_v47 }
 0x126   :  { %v587_v50 = vpop.f32.mrb[10].mxu0  ;;  %v715_v51 = vpop.f32.mrb[10].mxu1 }
 0x127   :  { %v588_v54 = vadd.f32 %v1988_v17, %v587_v50  ;;  %v716_v55 = vadd.f32 %v1988_v17, %v715_v51  ;;  %v589_v56 = vpop.f32.mrb[11].mxu0  ;;  %v717_v57 = vpop.f32.mrb[11].mxu1 }
 0x129   :  { %v1369_v58 = vpack.c.bf16 %v588_v54, %v585_v52  ;;  %v1449_v59 = vpack.c.bf16 %v716_v55, %v713_v53 }
 0x12b   :  { %1517 = vst [vmem:[%s2153_s3 + $0x10] sm:$0xff] %v1369_v58   ;;  %1533 = vst [vmem:[%s2153_s3 + $0x90] sm:$0xff] %v1449_v59  }
 0x12c   :  { %v592_v60 = vpop.f32.mrb[12].mxu0  ;;  %v720_v61 = vpop.f32.mrb[12].mxu1 }
 0x12d   :  { %v594_v62 = vpop.f32.mrb[13].mxu0  ;;  %v722_v63 = vpop.f32.mrb[13].mxu1  ;;  %v593_v2 = vadd.f32 %v1988_v17, %v592_v60  ;;  %v721_v3 = vadd.f32 %v1988_v17, %v720_v61 }
 0x12e   :  { %v595_v0 = vpop.f32.mrb[14].mxu0  ;;  %v723_v1 = vpop.f32.mrb[14].mxu1 }
 0x12f   :  { %v596_v4 = vadd.f32 %v1988_v17, %v595_v0  ;;  %v724_v5 = vadd.f32 %v1988_v17, %v723_v1  ;;  %v597_v6 = vpop.f32.mrb[15].mxu0  ;;  %v725_v7 = vpop.f32.mrb[15].mxu1 }
 0x131   :  { %v1374_v8 = vpack.c.bf16 %v596_v4, %v593_v2  ;;  %v1454_v9 = vpack.c.bf16 %v724_v5, %v721_v3 }
 0x133   :  { %1518 = vst [vmem:[%s2153_s3 + $0x18] sm:$0xff] %v1374_v8   ;;  %1534 = vst [vmem:[%s2153_s3 + $0x98] sm:$0xff] %v1454_v9  }
 0x134   :  { %v600_v10 = vpop.f32.mrb[16].mxu0  ;;  %v728_v11 = vpop.f32.mrb[16].mxu1 }
 0x135   :  { %v602_v12 = vpop.f32.mrb[17].mxu0  ;;  %v730_v13 = vpop.f32.mrb[17].mxu1  ;;  %v601_v16 = vadd.f32 %v1988_v17, %v600_v10  ;;  %v729_v18 = vadd.f32 %v1988_v17, %v728_v11 }
 0x136   :  { %v603_v14 = vpop.f32.mrb[18].mxu0  ;;  %v731_v15 = vpop.f32.mrb[18].mxu1 }
 0x137   :  { %v604_v19 = vadd.f32 %v1988_v17, %v603_v14  ;;  %v732_v20 = vadd.f32 %v1988_v17, %v731_v15  ;;  %v605_v21 = vpop.f32.mrb[19].mxu0  ;;  %v733_v22 = vpop.f32.mrb[19].mxu1 }
 0x139   :  { %v1379_v23 = vpack.c.bf16 %v604_v19, %v601_v16  ;;  %v1459_v24 = vpack.c.bf16 %v732_v20, %v729_v18 }
 0x13b   :  { %1519 = vst [vmem:[%s2153_s3 + $0x20] sm:$0xff] %v1379_v23   ;;  %1535 = vst [vmem:[%s2153_s3 + $0xa0] sm:$0xff] %v1459_v24  }
 0x13c   :  { %v608_v25 = vpop.f32.mrb[20].mxu0  ;;  %v736_v26 = vpop.f32.mrb[20].mxu1 }
 0x13d   :  { %v610_v27 = vpop.f32.mrb[21].mxu0  ;;  %v738_v28 = vpop.f32.mrb[21].mxu1  ;;  %v609_v31 = vadd.f32 %v1988_v17, %v608_v25  ;;  %v737_v32 = vadd.f32 %v1988_v17, %v736_v26 }
 0x13e   :  { %v611_v29 = vpop.f32.mrb[22].mxu0  ;;  %v739_v30 = vpop.f32.mrb[22].mxu1 }
 0x13f   :  { %v612_v33 = vadd.f32 %v1988_v17, %v611_v29  ;;  %v740_v34 = vadd.f32 %v1988_v17, %v739_v30  ;;  %v613_v35 = vpop.f32.mrb[23].mxu0  ;;  %v741_v36 = vpop.f32.mrb[23].mxu1 }
 0x141   :  { %v1384_v37 = vpack.c.bf16 %v612_v33, %v609_v31  ;;  %v1464_v38 = vpack.c.bf16 %v740_v34, %v737_v32 }
 0x143   :  { %1520 = vst [vmem:[%s2153_s3 + $0x28] sm:$0xff] %v1384_v37   ;;  %1536 = vst [vmem:[%s2153_s3 + $0xa8] sm:$0xff] %v1464_v38  }
 0x144   :  { %v616_v39 = vpop.f32.mrb[24].mxu0  ;;  %v744_v40 = vpop.f32.mrb[24].mxu1 }
 0x145   :  { %v618_v41 = vpop.f32.mrb[25].mxu0  ;;  %v746_v42 = vpop.f32.mrb[25].mxu1  ;;  %v617_v45 = vadd.f32 %v1988_v17, %v616_v39  ;;  %v745_v46 = vadd.f32 %v1988_v17, %v744_v40 }
 0x146   :  { %v619_v43 = vpop.f32.mrb[26].mxu0  ;;  %v747_v44 = vpop.f32.mrb[26].mxu1 }
 0x147   :  { %v620_v47 = vadd.f32 %v1988_v17, %v619_v43  ;;  %v748_v48 = vadd.f32 %v1988_v17, %v747_v44  ;;  %v621_v49 = vpop.f32.mrb[27].mxu0  ;;  %v749_v50 = vpop.f32.mrb[27].mxu1 }
 0x149   :  { %v1389_v51 = vpack.c.bf16 %v620_v47, %v617_v45  ;;  %v1469_v52 = vpack.c.bf16 %v748_v48, %v745_v46 }
 0x14b   :  { %1521 = vst [vmem:[%s2153_s3 + $0x30] sm:$0xff] %v1389_v51   ;;  %1537 = vst [vmem:[%s2153_s3 + $0xb0] sm:$0xff] %v1469_v52  }
 0x14c   :  { %v624_v53 = vpop.f32.mrb[28].mxu0  ;;  %v752_v54 = vpop.f32.mrb[28].mxu1 }
 0x14d   :  { %v626_v55 = vpop.f32.mrb[29].mxu0  ;;  %v754_v56 = vpop.f32.mrb[29].mxu1  ;;  %v625_v59 = vadd.f32 %v1988_v17, %v624_v53  ;;  %v753_v60 = vadd.f32 %v1988_v17, %v752_v54 }
 0x14e   :  { %v627_v57 = vpop.f32.mrb[30].mxu0  ;;  %v755_v58 = vpop.f32.mrb[30].mxu1 }
 0x14f   :  { %v628_v61 = vadd.f32 %v1988_v17, %v627_v57  ;;  %v756_v62 = vadd.f32 %v1988_v17, %v755_v58  ;;  %v629_v63 = vpop.f32.mrb[31].mxu0  ;;  %v757_v0 = vpop.f32.mrb[31].mxu1 }
 0x151   :  { %v1394_v1 = vpack.c.bf16 %v628_v61, %v625_v59  ;;  %v1474_v2 = vpack.c.bf16 %v756_v62, %v753_v60 }
 0x153   :  { %1522 = vst [vmem:[%s2153_s3 + $0x38] sm:$0xff] %v1394_v1   ;;  %1538 = vst [vmem:[%s2153_s3 + $0xb8] sm:$0xff] %v1474_v2  }
 0x154   :  { %v632_v3 = vpop.f32.mrb[32].mxu0  ;;  %v760_v4 = vpop.f32.mrb[32].mxu1 }
 0x155   :  { %v634_v5 = vpop.f32.mrb[33].mxu0  ;;  %v762_v6 = vpop.f32.mrb[33].mxu1  ;;  %v633_v9 = vadd.f32 %v1988_v17, %v632_v3  ;;  %v761_v10 = vadd.f32 %v1988_v17, %v760_v4 }
 0x156   :  { %v635_v7 = vpop.f32.mrb[34].mxu0  ;;  %v763_v8 = vpop.f32.mrb[34].mxu1 }
 0x157   :  { %v636_v11 = vadd.f32 %v1988_v17, %v635_v7  ;;  %v764_v12 = vadd.f32 %v1988_v17, %v763_v8  ;;  %v637_v13 = vpop.f32.mrb[35].mxu0  ;;  %v765_v14 = vpop.f32.mrb[35].mxu1 }
 0x159   :  { %v1399_v15 = vpack.c.bf16 %v636_v11, %v633_v9  ;;  %v1479_v16 = vpack.c.bf16 %v764_v12, %v761_v10 }
 0x15b   :  { %1523 = vst [vmem:[%s2153_s3 + $0x40] sm:$0xff] %v1399_v15   ;;  %1539 = vst [vmem:[%s2153_s3 + $0xc0] sm:$0xff] %v1479_v16  }
 0x15c   :  { %v640_v18 = vpop.f32.mrb[36].mxu0  ;;  %v768_v19 = vpop.f32.mrb[36].mxu1 }
 0x15d   :  { %v642_v20 = vpop.f32.mrb[37].mxu0  ;;  %v770_v21 = vpop.f32.mrb[37].mxu1  ;;  %v641_v24 = vadd.f32 %v1988_v17, %v640_v18  ;;  %v769_v25 = vadd.f32 %v1988_v17, %v768_v19 }
 0x15e   :  { %v643_v22 = vpop.f32.mrb[38].mxu0  ;;  %v771_v23 = vpop.f32.mrb[38].mxu1 }
 0x15f   :  { %v644_v26 = vadd.f32 %v1988_v17, %v643_v22  ;;  %v772_v27 = vadd.f32 %v1988_v17, %v771_v23  ;;  %v645_v28 = vpop.f32.mrb[39].mxu0  ;;  %v773_v29 = vpop.f32.mrb[39].mxu1 }
 0x161   :  { %v1404_v30 = vpack.c.bf16 %v644_v26, %v641_v24  ;;  %v1484_v31 = vpack.c.bf16 %v772_v27, %v769_v25 }
 0x163   :  { %1524 = vst [vmem:[%s2153_s3 + $0x48] sm:$0xff] %v1404_v30   ;;  %1540 = vst [vmem:[%s2153_s3 + $0xc8] sm:$0xff] %v1484_v31  }
 0x164   :  { %v648_v32 = vpop.f32.mrb[40].mxu0  ;;  %v776_v33 = vpop.f32.mrb[40].mxu1 }
 0x165   :  { %v650_v34 = vpop.f32.mrb[41].mxu0  ;;  %v778_v35 = vpop.f32.mrb[41].mxu1  ;;  %v649_v38 = vadd.f32 %v1988_v17, %v648_v32  ;;  %v777_v39 = vadd.f32 %v1988_v17, %v776_v33 }
 0x166   :  { %v651_v36 = vpop.f32.mrb[42].mxu0  ;;  %v779_v37 = vpop.f32.mrb[42].mxu1 }
 0x167   :  { %v652_v40 = vadd.f32 %v1988_v17, %v651_v36  ;;  %v780_v41 = vadd.f32 %v1988_v17, %v779_v37  ;;  %v653_v42 = vpop.f32.mrb[43].mxu0  ;;  %v781_v43 = vpop.f32.mrb[43].mxu1 }
 0x169   :  { %v1409_v44 = vpack.c.bf16 %v652_v40, %v649_v38  ;;  %v1489_v45 = vpack.c.bf16 %v780_v41, %v777_v39 }
 0x16b   :  { %1525 = vst [vmem:[%s2153_s3 + $0x50] sm:$0xff] %v1409_v44   ;;  %1541 = vst [vmem:[%s2153_s3 + $0xd0] sm:$0xff] %v1489_v45  }
 0x16c   :  { %v656_v46 = vpop.f32.mrb[44].mxu0  ;;  %v784_v47 = vpop.f32.mrb[44].mxu1 }
 0x16d   :  { %v658_v48 = vpop.f32.mrb[45].mxu0  ;;  %v786_v49 = vpop.f32.mrb[45].mxu1  ;;  %v657_v52 = vadd.f32 %v1988_v17, %v656_v46  ;;  %v785_v53 = vadd.f32 %v1988_v17, %v784_v47 }
 0x16e   :  { %v659_v50 = vpop.f32.mrb[46].mxu0  ;;  %v787_v51 = vpop.f32.mrb[46].mxu1 }
 0x16f   :  { %v660_v54 = vadd.f32 %v1988_v17, %v659_v50  ;;  %v788_v55 = vadd.f32 %v1988_v17, %v787_v51  ;;  %v661_v56 = vpop.f32.mrb[47].mxu0  ;;  %v789_v57 = vpop.f32.mrb[47].mxu1 }
 0x171   :  { %v1414_v58 = vpack.c.bf16 %v660_v54, %v657_v52  ;;  %v1494_v59 = vpack.c.bf16 %v788_v55, %v785_v53 }
 0x173   :  { %1526 = vst [vmem:[%s2153_s3 + $0x58] sm:$0xff] %v1414_v58   ;;  %1542 = vst [vmem:[%s2153_s3 + $0xd8] sm:$0xff] %v1494_v59  }
 0x174   :  { %v664_v60 = vpop.f32.mrb[48].mxu0  ;;  %v792_v61 = vpop.f32.mrb[48].mxu1 }
 0x175   :  { %v666_v62 = vpop.f32.mrb[49].mxu0  ;;  %v794_v63 = vpop.f32.mrb[49].mxu1  ;;  %v665_v2 = vadd.f32 %v1988_v17, %v664_v60  ;;  %v793_v3 = vadd.f32 %v1988_v17, %v792_v61 }
 0x176   :  { %v667_v0 = vpop.f32.mrb[50].mxu0  ;;  %v795_v1 = vpop.f32.mrb[50].mxu1 }
 0x177   :  { %v668_v4 = vadd.f32 %v1988_v17, %v667_v0  ;;  %v796_v5 = vadd.f32 %v1988_v17, %v795_v1  ;;  %v669_v6 = vpop.f32.mrb[51].mxu0  ;;  %v797_v7 = vpop.f32.mrb[51].mxu1 }
 0x179   :  { %v1419_v8 = vpack.c.bf16 %v668_v4, %v665_v2  ;;  %v1499_v9 = vpack.c.bf16 %v796_v5, %v793_v3 }
 0x17b   :  { %1527 = vst [vmem:[%s2153_s3 + $0x60] sm:$0xff] %v1419_v8   ;;  %1543 = vst [vmem:[%s2153_s3 + $0xe0] sm:$0xff] %v1499_v9  }
 0x17c   :  { %v672_v10 = vpop.f32.mrb[52].mxu0  ;;  %v800_v11 = vpop.f32.mrb[52].mxu1 }
 0x17d   :  { %v674_v12 = vpop.f32.mrb[53].mxu0  ;;  %v802_v13 = vpop.f32.mrb[53].mxu1  ;;  %v673_v16 = vadd.f32 %v1988_v17, %v672_v10  ;;  %v801_v18 = vadd.f32 %v1988_v17, %v800_v11 }
 0x17e   :  { %v675_v14 = vpop.f32.mrb[54].mxu0  ;;  %v803_v15 = vpop.f32.mrb[54].mxu1 }
 0x17f   :  { %v676_v19 = vadd.f32 %v1988_v17, %v675_v14  ;;  %v804_v20 = vadd.f32 %v1988_v17, %v803_v15  ;;  %v677_v21 = vpop.f32.mrb[55].mxu0  ;;  %v805_v22 = vpop.f32.mrb[55].mxu1 }
 0x181   :  { %v1424_v23 = vpack.c.bf16 %v676_v19, %v673_v16  ;;  %v1504_v24 = vpack.c.bf16 %v804_v20, %v801_v18 }
 0x183   :  { %1528 = vst [vmem:[%s2153_s3 + $0x68] sm:$0xff] %v1424_v23   ;;  %1544 = vst [vmem:[%s2153_s3 + $0xe8] sm:$0xff] %v1504_v24  }
 0x184   :  { %v680_v25 = vpop.f32.mrb[56].mxu0  ;;  %v808_v26 = vpop.f32.mrb[56].mxu1 }
 0x185   :  { %v682_v27 = vpop.f32.mrb[57].mxu0  ;;  %v810_v28 = vpop.f32.mrb[57].mxu1  ;;  %v681_v31 = vadd.f32 %v1988_v17, %v680_v25  ;;  %v809_v32 = vadd.f32 %v1988_v17, %v808_v26 }
 0x186   :  { %v683_v29 = vpop.f32.mrb[58].mxu0  ;;  %v811_v30 = vpop.f32.mrb[58].mxu1 }
 0x187   :  { %v684_v33 = vadd.f32 %v1988_v17, %v683_v29  ;;  %v812_v34 = vadd.f32 %v1988_v17, %v811_v30  ;;  %v685_v35 = vpop.f32.mrb[59].mxu0  ;;  %v813_v36 = vpop.f32.mrb[59].mxu1 }
 0x189   :  { %v1429_v37 = vpack.c.bf16 %v684_v33, %v681_v31  ;;  %v1509_v38 = vpack.c.bf16 %v812_v34, %v809_v32 }
 0x18b   :  { %1529 = vst [vmem:[%s2153_s3 + $0x70] sm:$0xff] %v1429_v37   ;;  %1545 = vst [vmem:[%s2153_s3 + $0xf0] sm:$0xff] %v1509_v38  }
 0x18c   :  { %v688_v39 = vpop.f32.mrb[60].mxu0  ;;  %v816_v40 = vpop.f32.mrb[60].mxu1 }
 0x18d   :  { %v690_v41 = vpop.f32.mrb[61].mxu0  ;;  %v818_v42 = vpop.f32.mrb[61].mxu1  ;;  %v689_v45 = vadd.f32 %v1988_v17, %v688_v39  ;;  %v817_v46 = vadd.f32 %v1988_v17, %v816_v40 }
 0x18e   :  { %v691_v43 = vpop.f32.mrb[62].mxu0  ;;  %v819_v44 = vpop.f32.mrb[62].mxu1 }
 0x18f   :  { %v692_v47 = vadd.f32 %v1988_v17, %v691_v43  ;;  %v820_v48 = vadd.f32 %v1988_v17, %v819_v44  ;;  %v693_v49 = vpop.f32.mrb[63].mxu0  ;;  %v821_v50 = vpop.f32.mrb[63].mxu1 }
 0x191   :  { %v1434_v51 = vpack.c.bf16 %v692_v47, %v689_v45  ;;  %v1514_v52 = vpack.c.bf16 %v820_v48, %v817_v46 }
 0x193   :  { %1530 = vst [vmem:[%s2153_s3 + $0x78] sm:$0xff] %v1434_v51   ;;  %1546 = vst [vmem:[%s2153_s3 + $0xf8] sm:$0xff] %v1514_v52  }

// kernel: hybridnet_forward.30
= control target key start
LH: loop header
LB: loop body
LE: loop exit
PB: predicated region body
PF: predicated region fallthrough
CT: control target
= control target key end

     0   :  { %s2874_s12 = smov 0   ;;  %s3469_s0 = inlined_call_operand.vmem [shape: bf16[2,102,128], index: 0, kind: input, shape index: {}]   ;;  %s3470_s1 = inlined_call_operand.vmem [shape: bf16[9,128,128], index: 1, kind: input, shape index: {}]   ;;  %s3471_s2 = inlined_call_operand.vmem [shape: f32[1,128], index: 2, kind: input, shape index: {}]   ;;  %s3472_s3 = inlined_call_operand.vmem [shape: bf16[2,80,128], index: 3, kind: output, shape index: {}]  }
   0x1 LB: > { %s1998_s13 = sadd.s32 4294967295, %s2850_s12   ;;  %p2002_p0 = scmp.ge.s32.totalorder %s2850_s12, 1  ;;  %s2850_s12 = sphi %s2874_s12, %s13_s12  }
   0x2   : > { %p137_p1 = scmp.lt.s32.totalorder %s2850_s12, 3 }
   0x4   : > { %p138_p2 = pnand %p2002_p0, %p137_p1 }
   0x5   : > { %v2749_v0 = vld [vmem:[%s3470_s1 + $0x40] sm:$0xff] (!%p138_p2)   ;;  %v2852_v1 = vmov (!%p138_p2), 0.0   ;;  %v2751_v3 = vld [vmem:[%s3470_s1 + $0x48] sm:$0xff] (!%p138_p2)   ;;  %vm2853_vm0 = vmmov (!%p138_p2), 0   ;;  %p161_p3 = scmp.lt.s32.totalorder (!%p138_p2), %s1998_s13, 1  ;;  %v2753_v5 = vld [vmem:[%s3470_s1 + $0x50] sm:$0xff] (!%p138_p2)  }
   0x6   : > { %141 = sbr.rel (%p138_p2) target bundleno = 435 (0x1b3), region = 32  ;;  %2397 = vmatprep.subr.bf16.mxu0 (!%p138_p2), %v2852_v1  ;;  %2433 = vmatprep.subr.bf16.mxu1 (!%p138_p2), %v2852_v1  ;;  %v2750_v2 = vld [vmem:[%s3470_s1] sm:$0xff] (!%p138_p2)   ;;  %v2752_v4 = vld [vmem:[%s3470_s1 + $0x8] sm:$0xff] (!%p138_p2)   ;;  %v2754_v6 = vld [vmem:[%s3470_s1 + $0x10] sm:$0xff] (!%p138_p2)   ;;  %vm244_vm1 = vsmask.f32 (!%p138_p2), 7424 }
   0x7   : > { %2398 = vmatpush3.bf16.msra.mxu0 (!%p138_p2), %v2749_v0  ;;  %2413 = vmatprep.mubr.msk.bf16.mxu0 (!%p138_p2), %vm2853_vm0, %v2852_v1  ;;  %v2755_v7 = vld [vmem:[%s3470_s1 + $0x58] sm:$0xff] (!%p138_p2)   ;;  %v2757_v9 = vld [vmem:[%s3470_s1 + $0x60] sm:$0xff] (!%p138_p2)   ;;  %v2759_v13 = vld [vmem:[%s3470_s1 + $0x68] sm:$0xff] (!%p138_p2)   ;;  %vm562_vm2 = vcmask (!%p138_p2), 1046528   ;;  %vm934_vm3 = vsmask.f32 (!%p138_p2), 6400 }
   0x8   : > { %2434 = vmatpush3.bf16.msra.mxu1 (!%p138_p2), %v2750_v2  ;;  %2399 = vmatprep.subr.bf16.mxu0 (!%p138_p2), %v2852_v1  ;;  %v2756_v8 = vld [vmem:[%s3470_s1 + $0x18] sm:$0xff] (!%p138_p2)   ;;  %v2758_v10 = vld [vmem:[%s3470_s1 + $0x20] sm:$0xff] (!%p138_p2)   ;;  %v2760_v16 = vld [vmem:[%s3470_s1 + $0x28] sm:$0xff] (!%p138_p2)   ;;  %vm1145_vm4 = vcmask (!%p138_p2), 1045504   ;;  %vm1517_vm5 = vsmask.f32 (!%p138_p2), 5376 }
   0x9   : > { %2435 = vmatprep.subr.bf16.mxu1 (!%p138_p2), %v2852_v1  ;;  %2449 = vmatprep.mubr.msk.bf16.mxu1 (!%p138_p2), %vm2853_vm0, %v2852_v1  ;;  %v2761_v18 = vld [vmem:[%s3470_s1 + $0x70] sm:$0xff] (!%p138_p2)   ;;  %v2763_v23 = vld [vmem:[%s3470_s1 + $0x78] sm:$0xff] (!%p138_p2)   ;;  %v2767_v28 = vld [vmem:[%s3470_s1 + $0x80] sm:$0xff] (!%p138_p2)   ;;  %vm1728_vm6 = vcmask (!%p138_p2), 1044480  }
   0xa   : > { %v2762_v22 = vld [vmem:[%s3470_s1 + $0x30] sm:$0xff] (!%p138_p2)   ;;  %v2764_v24 = vld [vmem:[%s3470_s1 + $0x38] sm:$0xff] (!%p138_p2)   ;;  %v2770_v32 = vld [vmem:[%s3470_s1 + $0xc0] sm:$0xff] (!%p138_p2)  }
   0xb   : > { %2400 = vmatpush3.bf16.msra.mxu0 (!%p138_p2), %v2751_v3  ;;  %v2768_v34 = vld [vmem:[%s3470_s1 + $0x88] sm:$0xff] (!%p138_p2)   ;;  %v2771_v40 = vld [vmem:[%s3470_s1 + $0x90] sm:$0xff] (!%p138_p2)   ;;  %v2774_v44 = vld [vmem:[%s3470_s1 + $0x98] sm:$0xff] (!%p138_p2)  }
   0xc   : > { %2436 = vmatpush3.bf16.msra.mxu1 (!%p138_p2), %v2752_v4  ;;  %2401 = vmatprep.subr.bf16.mxu0 (!%p138_p2), %v2852_v1  ;;  %v2772_v37 = vld [vmem:[%s3470_s1 + $0xc8] sm:$0xff] (!%p138_p2)   ;;  %v2775_v42 = vld [vmem:[%s3470_s1 + $0xd0] sm:$0xff] (!%p138_p2)   ;;  %v2777_v47 = vld [vmem:[%s3470_s1 + $0xd8] sm:$0xff] (!%p138_p2)  }
   0xd   : > { %s3474_s13 = smov (!%p161_p3, %s1998_s13), 1  ;;  %2437 = vmatprep.subr.bf16.mxu1 %v2852_v1  ;;  %v2776_v48 = vld [vmem:[%s3470_s1 + $0xa0] sm:$0xff]   ;;  %v2780_v56 = vld [vmem:[%s3470_s1 + $0xa8] sm:$0xff]   ;;  %v2782_v61 = vld [vmem:[%s3470_s1 + $0xb0] sm:$0xff]  }
   0xe   : > { %s2737_s26 = smul.u32 52, %s3474_s13  ;;  %v2779_v52 = vld [vmem:[%s3470_s1 + $0xe0] sm:$0xff]   ;;  %v2781_v57 = vld [vmem:[%s3470_s1 + $0xe8] sm:$0xff]   ;;  %v2784_v62 = vld [vmem:[%s3470_s1 + $0xf0] sm:$0xff]  }
   0xf   : > { %2402 = vmatpush3.bf16.msra.mxu0 %v2753_v5  ;;  %v2785_v63 = vld [vmem:[%s3470_s1 + $0xb8] sm:$0xff]   ;;  %s2738_s18 = smul.u32 40, %s3474_s13 }
  0x10   : > { %2438 = vmatpush3.bf16.msra.mxu1 %v2754_v6  ;;  %2403 = vmatprep.subr.bf16.mxu0 %v2852_v1  ;;  %s2924_s6 = scalar_lea.vmem %s3469_s0, %s2737_s26  ;;  %v2786_v3 = vld [vmem:[%s3470_s1 + $0xf8] sm:$0xff]  }
  0x11   : > { %2439 = vmatprep.subr.bf16.mxu1 %v2852_v1  ;;  %v172_v11 = vld [vmem:[%s2924_s6] sm:$0xf]  ;;  %v2936_v12 = vld [vmem:[%s2924_s6 + $0x4] sm:$0xf]  ;;  %v2943_v15 = vld [vmem:[%s2924_s6 + $0x8] sm:$0xff]   ;;  %s3455_s21 = scalar_lea.vmem %s3472_s3, %s2738_s18 }
  0x12   : > { %v2021_v14 = vcombine.low %v172_v11, %v2936_v12  ;;  %v253_v21 = vshll.u32 %v2943_v15, 16  ;;  %v2966_v27 = vld [vmem:[%s2924_s6 + $0x10] sm:$0xff]   ;;  %v257_v30 = vshrl.u32 %v2943_v15, 16  ;;  %v2982_v33 = vld [vmem:[%s2924_s6 + $0x18] sm:$0xff]   ;;  %v3011_v45 = vld [vmem:[%s2924_s6 + $0x20] sm:$0xff]  }
  0x13   : > { %2404 = vmatpush3.bf16.msra.mxu0 %v2755_v7  ;;  %v261_v31 = vshll.u32 %v2966_v27, 16  ;;  %v269_v38 = vshll.u32 %v2982_v33, 16  ;;  %v265_v41 = vshrl.u32 %v2966_v27, 16  ;;  %v273_v50 = vshrl.u32 %v2982_v33, 16  ;;  %v541_v4 = vld [vmem:[%s2924_s6] sm:$0xe] }
  0x14   : > { %2440 = vmatpush3.bf16.msra.mxu1 %v2756_v8  ;;  %2405 = vmatprep.subr.bf16.mxu0 %v2852_v1  ;;  %v248_v17 = vshll.u32 %v2021_v14, 16  ;;  %v246_v19 = vshrl.u32 %v2021_v14, 16  ;;  %v255_v26 = vrot.slane %v253_v21, 1  ;;  %v277_v51 = vshll.u32 %v3011_v45, 16  ;;  %v710_v5 = vld [vmem:[%s2924_s6 + $0x4] sm:$0xe] }
  0x15   : > { %2441 = vmatprep.subr.bf16.mxu1 %v2852_v1  ;;  %v263_v36 = vrot.slane %v261_v31, 1  ;;  %v271_v43 = vrot.slane %v269_v38, 1  ;;  %v3034_v53 = vld [vmem:[%s2924_s6 + $0x28] ss:$0 sps:$4 sm:$0x11]   ;;  %v281_v59 = vshrl.u32 %v3011_v45, 16  ;;  %v2059_v8 = vcombine.low %v541_v4, %v2936_v12 }
  0x16   : > { %v250_v20 = vrot.slane %v248_v17, 1  ;;  %v259_v35 = vor.u32 %v257_v30, %v255_v26  ;;  %v279_v55 = vrot.slane %v277_v51, 1  ;;  %v285_v60 = vshll.u32 %v3034_v53, 16  ;;  %v3076_v6 = vld [vmem:[%s2924_s6 + $0x8] sm:$0xf]  ;;  %v2790_v17 = vld [vmem:[%s3470_s1 + $0x100] sm:$0xff]  }
  0x17   : > { %2406 = vmatpush3.bf16.msra.mxu0 %v2757_v9  ;;  %v267_v46 = vor.u32 %v265_v41, %v263_v36  ;;  %v275_v54 = vor.u32 %v273_v50, %v271_v43  ;;  %v3082_v9 = vcombine.low %v710_v5, %v3076_v6  ;;  %v563_v11 = vrot.slane %v2059_v8, 1  ;;  %v2797_v30 = vld [vmem:[%s3470_s1 + $0x118] sm:$0xff]   ;;  %v2804_v41 = vld [vmem:[%s3470_s1 + $0x168] sm:$0xff]  }
  0x18   : > { %2442 = vmatpush3.bf16.msra.mxu1 %v2758_v10  ;;  %2407 = vmatprep.subr.bf16.mxu0 %v2852_v1  ;;  %v251_v25 = vor.u32 %v250_v20, %v246_v19  ;;  %v264_v39 = vsel %vm244_vm1, %v259_v35, %v263_v36  ;;  %v283_v0 = vor.u32 %v281_v59, %v279_v55  ;;  %v287_v2 = vrot.slane %v285_v60, 1  ;;  %v3085_v10 = vld [vmem:[%s2924_s6 + $0xc] sm:$0xff]   ;;  %v3103_v19 = vld [vmem:[%s2924_s6 + $0x14] sm:$0xff]   ;;  %v3156_v36 = vld [vmem:[%s2924_s6 + $0x24] sm:$0xff]  }
  0x19   : > { %2443 = vmatprep.subr.bf16.mxu1 %v2852_v1  ;;  %v272_v49 = vsel %vm244_vm1, %v267_v46, %v271_v43  ;;  %v280_v58 = vsel %vm244_vm1, %v275_v54, %v279_v55  ;;  %v564_v12 = vrot.slane %v2943_v15, 1  ;;  %v2791_v20 = vld [vmem:[%s3470_s1 + $0x108] sm:$0xff]   ;;  %v566_v21 = vrot.slane %v2966_v27, 1  ;;  %v2807_v46 = vld [vmem:[%s3470_s1 + $0x170] sm:$0xff]   ;;  %v2809_v54 = vld [vmem:[%s3470_s1 + $0x178] sm:$0xff]  }
  0x1a   : > { %v256_v29 = vsel %vm244_vm1, %v251_v25, %v255_v26  ;;  %v288_v7 = vsel %vm244_vm1, %v283_v0, %v287_v2  ;;  %v2794_v25 = vld [vmem:[%s3470_s1 + $0x110] sm:$0xff]   ;;  %v570_v38 = vrot.slane %v3011_v45, 1  ;;  %v2806_v43 = vld [vmem:[%s2924_s6 + $0x2c] ss:$0 sps:$4 sm:$0x11]   ;;  %v944_v50 = vshrl.u32 %v3085_v10, 16 }
  0x1b   : > { %2408 = vmatpush3.bf16.msra.mxu0 %v2759_v13  ;;  %v766_v13 = vrot.slane %v3082_v9, 1  ;;  %v947_v51 = vshll.u32 %v3085_v10, 16  ;;  %v1124_v55 = vld [vmem:[%s2924_s6 + $0x4] sm:$0xc]  ;;  %v953_v2 = vshrl.u32 %v3103_v19, 16  ;;  %v1147_v5 = vrot.slane %v3085_v10, 2 }
  0x1c   : > { %2444 = vmatpush3.bf16.msra.mxu1 %v2760_v16  ;;  %2409 = vmatprep.subr.bf16.mxu0 %v2852_v1  ;;  %v565_v16 = vsel %vm562_vm2, %v563_v11, %v564_v12  ;;  %v946_v59 = vrot.slane %v944_v50, 1 }
  0x1d   : > { %2445 = vmatprep.subr.bf16.mxu1 %v2852_v1  ;;  %v949_v60 = vrot.slane %v947_v51, 2  ;;  %v955_v8 = vrot.slane %v953_v2, 1  ;;  %v3301_v51 = vld [vmem:[%s2924_s6 + $0x10] sm:$0xff]  }
  0x1f   : > { %2410 = vmatpush3.bf16.msra.mxu0 %v2761_v18  ;;  %v950_v0 = vor.u32 %v949_v60, %v946_v59  ;;  %v1530_v59 = vshll.u32 %v3301_v51, 16  ;;  %v2827_v60 = vld [vmem:[%s3470_s1 + $0x1f8] sm:$0xff]  }
  0x20   : > { %2446 = vmatpush3.bf16.msra.mxu1 %v2762_v22  ;;  %2411 = vmatprep.subr.bf16.mxu0 %v2852_v1  ;;  %v769_v22 = vrot.slane %v3103_v19, 1 }
  0x21   : > { %2447 = vmatprep.subr.bf16.mxu1 %v2852_v1 }
  0x23   : > { %2412 = vmatpush3.bf16.msra.mxu0 %v2763_v23  ;;  %v2795_v23 = vld [vmem:[%s3470_s1 + $0x148] sm:$0xff]  }
  0x24   : > { %2448 = vmatpush3.bf16.msra.mxu1 %v2764_v24  ;;  %2469 = vmatprep.subr.bf16.mxu0 %v2852_v1  ;;  %v567_v24 = vsel %vm562_vm2, %v564_v12, %v566_v21  ;;  %v2813_v12 = vld [vmem:[%s3470_s1 + $0x1c0] sm:$0xff]  }
  0x25   : > { %2505 = vmatprep.subr.bf16.mxu1 %v2852_v1 }
  0x26   : > { %2414 = vmatmul.mubr.bf16.vlgmr.msra.gmra.mrb[0].mxu0 %v256_v29  ;;  %v568_v29 = vrot.slane %v2982_v33, 1 }
  0x27   : > { %2450 = vmatmul.mubr.bf16.vlgmr.msra.gmra.mrb[0].mxu1 %v2021_v14  ;;  %2470 = vmatpush3.bf16.msra.mxu0 %v2767_v28  ;;  %v767_v14 = vrot.slane %v3085_v10, 1  ;;  %v2798_v28 = vld [vmem:[%s3470_s1 + $0x150] sm:$0xff]   ;;  %v2812_v10 = vld [vmem:[%s3470_s1 + $0x188] sm:$0xff]  }
  0x28   : > { %2471 = vmatprep.subr.bf16.mxu0 %v2852_v1  ;;  %2417 = vmatprep.mubr.msk.bf16.mxu0 %vm2853_vm0, %v2852_v1 }
  0x29   : > { %2453 = vmatprep.mubr.msk.bf16.mxu1 %vm2853_vm0, %v2852_v1  ;;  %2506 = vmatpush3.bf16.msra.mxu1 %v2770_v32  ;;  %v768_v18 = vsel %vm562_vm2, %v766_v13, %v767_v14  ;;  %v770_v26 = vsel %vm562_vm2, %v767_v14, %v769_v22  ;;  %v2800_v32 = vld [vmem:[%s3470_s1 + $0x158] sm:$0xff]  }
  0x2a   : > { %2507 = vmatprep.subr.bf16.mxu1 %v2852_v1 }
  0x2b   : > { %2472 = vmatpush3.bf16.msra.mxu0 %v2768_v34  ;;  %v2799_v34 = vld [vmem:[%s3470_s1 + $0x120] sm:$0xff]  }
  0x2c   : > { %2473 = vmatprep.subr.bf16.mxu0 %v2852_v1 }
  0x2d   : > { %2508 = vmatpush3.bf16.msra.mxu1 %v2772_v37  ;;  %v2802_v37 = vld [vmem:[%s3470_s1 + $0x160] sm:$0xff]  }
  0x2e   : > { %2418 = vmatmul.mubr.bf16.gmra.mrb[4].mxu0 %v264_v39  ;;  %2509 = vmatprep.subr.bf16.mxu1 %v2852_v1  ;;  %v2803_v39 = vld [vmem:[%s3470_s1 + $0x128] sm:$0xff]  }
  0x2f   : > { %2454 = vmatmul.mubr.bf16.gmra.mrb[4].mxu1 %v2943_v15  ;;  %2474 = vmatpush3.bf16.msra.mxu0 %v2771_v40  ;;  %v2793_v15 = vld [vmem:[%s3470_s1 + $0x140] sm:$0xff]   ;;  %v773_v40 = vrot.slane %v3156_v36, 1 }
  0x30   : > { %2421 = vmatprep.mubr.msk.bf16.mxu0 %vm2853_vm0, %v2852_v1  ;;  %2457 = vmatprep.mubr.msk.bf16.mxu1 %vm2853_vm0, %v2852_v1 }
  0x31   : > { %2475 = vmatprep.subr.bf16.mxu0 %v2852_v1  ;;  %2510 = vmatpush3.bf16.msra.mxu1 %v2775_v42  ;;  %v571_v42 = vsel %vm562_vm2, %v568_v29, %v570_v38 }
  0x32   : > { %2511 = vmatprep.subr.bf16.mxu1 %v2852_v1 }
  0x33   : > { %2476 = vmatpush3.bf16.msra.mxu0 %v2774_v44 }
  0x34   : > { %2477 = vmatprep.subr.bf16.mxu0 %v2852_v1 }
  0x35   : > { %2512 = vmatpush3.bf16.msra.mxu1 %v2777_v47  ;;  %v572_v47 = vrot.slane %v3034_v53, 1  ;;  %v2808_v53 = vld [vmem:[%s3470_s1 + $0x138] sm:$0xff]  }
  0x36   : > { %2422 = vmatmul.mubr.bf16.gmra.mrb[8].mxu0 %v272_v49  ;;  %2513 = vmatprep.subr.bf16.mxu1 %v2852_v1  ;;  %v939_v49 = vshll.u32 %v3082_v9, 16 }
  0x37   : > { %2458 = vmatmul.mubr.bf16.gmra.mrb[8].mxu1 %v2966_v27  ;;  %2478 = vmatpush3.bf16.msra.mxu0 %v2776_v48  ;;  %v3129_v27 = vld [vmem:[%s2924_s6 + $0x1c] sm:$0xff]   ;;  %v936_v48 = vshrl.u32 %v3082_v9, 16 }
  0x38   : > { %2425 = vmatprep.mubr.msk.bf16.mxu0 %vm2853_vm0, %v2852_v1  ;;  %2461 = vmatprep.mubr.msk.bf16.mxu1 %vm2853_vm0, %v2852_v1  ;;  %v771_v31 = vrot.slane %v3129_v27, 1  ;;  %v962_v14 = vshrl.u32 %v3129_v27, 16 }
  0x39   : > { %2479 = vmatprep.subr.bf16.mxu0 %v2852_v1  ;;  %2514 = vmatpush3.bf16.msra.mxu1 %v2779_v52  ;;  %v775_v52 = vrot.slane %v2806_v43, 1  ;;  %v2822_v43 = vld [vmem:[%s3470_s1 + $0x1e8] sm:$0xff]  }
  0x3a   : > { %2515 = vmatprep.subr.bf16.mxu1 %v2852_v1  ;;  %v772_v35 = vsel %vm562_vm2, %v769_v22, %v771_v31  ;;  %v774_v44 = vsel %vm562_vm2, %v771_v31, %v773_v40 }
  0x3b   : > { %2480 = vmatpush3.bf16.msra.mxu0 %v2780_v56  ;;  %v573_v56 = vsel %vm562_vm2, %v570_v38, %v572_v47 }
  0x3c   : > { %2481 = vmatprep.subr.bf16.mxu0 %v2852_v1 }
  0x3d   : > { %2516 = vmatpush3.bf16.msra.mxu1 %v2781_v57  ;;  %v938_v57 = vrot.slane %v936_v48, 1 }
  0x3e   : > { %2426 = vmatmul.mubr.bf16.gmra.mrb[12].mxu0 %v280_v58  ;;  %2517 = vmatprep.subr.bf16.mxu1 %v2852_v1  ;;  %v941_v58 = vrot.slane %v939_v49, 2 }
  0x3f   : > { %2462 = vmatmul.mubr.bf16.gmra.mrb[12].mxu1 %v2982_v33  ;;  %2429 = vmatprep.mubr.msk.bf16.mxu0 %vm2853_vm0, %v2852_v1  ;;  %v569_v33 = vsel %vm562_vm2, %v566_v21, %v568_v29  ;;  %v964_v21 = vrot.slane %v962_v14, 1  ;;  %v1151_v29 = vrot.slane %v3129_v27, 2 }
  0x40   : > { %2465 = vmatprep.mubr.msk.bf16.mxu1 %vm2853_vm0, %v2852_v1  ;;  %2482 = vmatpush3.bf16.msra.mxu0 %v2782_v61  ;;  %v776_v61 = vsel %vm562_vm2, %v773_v40, %v775_v52  ;;  %v2825_v52 = vld [vmem:[%s3470_s1 + $0x1f0] sm:$0xff]  }
  0x41   : > { %2518 = vmatpush3.bf16.msra.mxu1 %v2784_v62  ;;  %2483 = vmatprep.subr.bf16.mxu0 %v2852_v1  ;;  %v2139_v62 = vcombine.low %v1124_v55, %v3076_v6  ;;  %v2826_v55 = vld [vmem:[%s3470_s1 + $0x1b8] sm:$0xff]  }
  0x42   : > { %2519 = vmatprep.subr.bf16.mxu1 %v2852_v1 }
  0x43   : > { %v1146_v4 = vrot.slane %v2139_v62, 2 }
  0x44   : > { %2484 = vmatpush3.bf16.msra.mxu0 %v2785_v63  ;;  %v942_v63 = vor.u32 %v941_v58, %v938_v57  ;;  %v1527_v58 = vshrl.u32 %v3301_v51, 16 }
  0x45   : > { %2520 = vmatpush3.bf16.msra.mxu1 %v2786_v3  ;;  %2541 = vmatprep.subr.bf16.mxu0 %v2852_v1  ;;  %v956_v3 = vshll.u32 %v3103_v19, 16  ;;  %v1148_v11 = vsel %vm1145_vm4, %v1146_v4, %v1147_v5  ;;  %v3324_v4 = vld [vmem:[%s2924_s6 + $0x18] sm:$0xff]  }
  0x46   : > { %2430 = vmatmul.mubr.bf16.gmra.mrb[16].mxu0 %v288_v7  ;;  %2577 = vmatprep.subr.bf16.mxu1 %v2852_v1  ;;  %v951_v6 = vsel %vm934_vm3, %v942_v63, %v950_v0  ;;  %v2811_v7 = vld [vmem:[%s3470_s1 + $0x180] sm:$0xff]   ;;  %v1529_v2 = vrot.slane %v1527_v58, 2 }
  0x47   : > { %2466 = vmatmul.mubr.bf16.gmra.mrb[16].mxu1 %v3011_v45  ;;  %2485 = vmatprep.mubr.msk.bf16.mxu0 %vm2853_vm0, %v2852_v1  ;;  %v2805_v45 = vld [vmem:[%s3470_s1 + $0x130] sm:$0xff]   ;;  %v958_v9 = vrot.slane %v956_v3, 2  ;;  %v1532_v3 = vrot.slane %v1530_v59, 3 }
  0x48   : > { %2521 = vmatprep.mubr.msk.bf16.mxu1 %vm2853_vm0, %v2852_v1 }
  0x49   : > { %v959_v13 = vor.u32 %v958_v9, %v955_v8  ;;  %v1533_v8 = vor.u32 %v1532_v3, %v1529_v2  ;;  %v1536_v9 = vshrl.u32 %v3324_v4, 16 }
  0x4b   : > { %v1538_v14 = vrot.slane %v1536_v9, 2 }
  0x4e   : > { %2486 = vmatmul.mubr.bf16.vlgmr.msra.gmra.mrb[20].mxu0 %v565_v16  ;;  %v965_v16 = vshll.u32 %v3129_v27, 16 }
  0x4f   : > { %2522 = vmatmul.mubr.bf16.vlgmr.msra.gmra.mrb[20].mxu1 %v768_v18  ;;  %2542 = vmatpush3.bf16.msra.mxu0 %v2790_v17  ;;  %v1149_v17 = vrot.slane %v3103_v19, 2  ;;  %v2815_v18 = vld [vmem:[%s3470_s1 + $0x1c8] sm:$0xff]  }
  0x50   : > { %2543 = vmatprep.subr.bf16.mxu0 %v2852_v1  ;;  %2489 = vmatprep.mubr.msk.bf16.mxu0 %vm2853_vm0, %v2852_v1  ;;  %v967_v22 = vrot.slane %v965_v16, 2 }
  0x51   : > { %2525 = vmatprep.mubr.msk.bf16.mxu1 %vm2853_vm0, %v2852_v1  ;;  %2578 = vmatpush3.bf16.msra.mxu1 %v2793_v15  ;;  %v960_v15 = vsel %vm934_vm3, %v950_v0, %v959_v13  ;;  %v1150_v19 = vsel %vm1145_vm4, %v1147_v5, %v1149_v17  ;;  %v1152_v27 = vsel %vm1145_vm4, %v1149_v17, %v1151_v29  ;;  %v3341_v17 = vld [vmem:[%s2924_s6 + $0x20] sm:$0xff]  }
  0x52   : > { %2579 = vmatprep.subr.bf16.mxu1 %v2852_v1 }
  0x53   : > { %2544 = vmatpush3.bf16.msra.mxu0 %v2791_v20  ;;  %v2814_v20 = vld [vmem:[%s3470_s1 + $0x190] sm:$0xff]  }
  0x54   : > { %2545 = vmatprep.subr.bf16.mxu0 %v2852_v1 }
  0x55   : > { %2580 = vmatpush3.bf16.msra.mxu1 %v2795_v23  ;;  %v2817_v23 = vld [vmem:[%s3470_s1 + $0x1d0] sm:$0xff]  }
  0x56   : > { %2490 = vmatmul.mubr.bf16.gmra.mrb[24].mxu0 %v567_v24  ;;  %2581 = vmatprep.subr.bf16.mxu1 %v2852_v1  ;;  %v968_v24 = vor.u32 %v967_v22, %v964_v21  ;;  %v1545_v21 = vshrl.u32 %v3341_v17, 16  ;;  %v1548_v22 = vshll.u32 %v3341_v17, 16 }
  0x57   : > { %2526 = vmatmul.mubr.bf16.gmra.mrb[24].mxu1 %v770_v26  ;;  %2546 = vmatpush3.bf16.msra.mxu0 %v2794_v25  ;;  %v2816_v25 = vld [vmem:[%s3470_s1 + $0x198] sm:$0xff]   ;;  %v971_v26 = vshrl.u32 %v3156_v36, 16 }
  0x58   : > { %2493 = vmatprep.mubr.msk.bf16.mxu0 %vm2853_vm0, %v2852_v1  ;;  %2529 = vmatprep.mubr.msk.bf16.mxu1 %vm2853_vm0, %v2852_v1  ;;  %v969_v31 = vsel %vm934_vm3, %v959_v13, %v968_v24 }
  0x59   : > { %2547 = vmatprep.subr.bf16.mxu0 %v2852_v1  ;;  %2582 = vmatpush3.bf16.msra.mxu1 %v2798_v28  ;;  %v974_v28 = vshll.u32 %v3156_v36, 16 }
  0x5a   : > { %2583 = vmatprep.subr.bf16.mxu1 %v2852_v1 }
  0x5b   : > { %2548 = vmatpush3.bf16.msra.mxu0 %v2797_v30  ;;  %v2819_v30 = vld [vmem:[%s3470_s1 + $0x1d8] sm:$0xff]  }
  0x5c   : > { %2549 = vmatprep.subr.bf16.mxu0 %v2852_v1 }
  0x5d   : > { %2584 = vmatpush3.bf16.msra.mxu1 %v2800_v32  ;;  %v2818_v32 = vld [vmem:[%s3470_s1 + $0x1a0] sm:$0xff]  }
  0x5e   : > { %2494 = vmatmul.mubr.bf16.gmra.mrb[28].mxu0 %v569_v33  ;;  %2585 = vmatprep.subr.bf16.mxu1 %v2852_v1  ;;  %v973_v33 = vrot.slane %v971_v26, 1  ;;  %v1550_v26 = vrot.slane %v1548_v22, 3 }
  0x5f   : > { %2530 = vmatmul.mubr.bf16.gmra.mrb[28].mxu1 %v772_v35  ;;  %2550 = vmatpush3.bf16.msra.mxu0 %v2799_v34  ;;  %v976_v34 = vrot.slane %v974_v28, 2  ;;  %v2824_v35 = vld [vmem:[%s2924_s6 + $0x2c] ss:$0 sps:$4 sm:$0x33]  }
  0x60   : > { %2497 = vmatprep.mubr.msk.bf16.mxu0 %vm2853_vm0, %v2852_v1  ;;  %2533 = vmatprep.mubr.msk.bf16.mxu1 %vm2853_vm0, %v2852_v1  ;;  %v980_v40 = vshrl.u32 %v2824_v35, 16  ;;  %v3362_v28 = vld [vmem:[%s2924_s6 + $0x28] sm:$0xff]  }
  0x61   : > { %2551 = vmatprep.subr.bf16.mxu0 %v2852_v1  ;;  %2586 = vmatpush3.bf16.msra.mxu1 %v2802_v37  ;;  %v2820_v37 = vld [vmem:[%s3470_s1 + $0x1e0] sm:$0xff]   ;;  %v977_v38 = vor.u32 %v976_v34, %v973_v33  ;;  %v1557_v33 = vshll.u32 %v3362_v28, 16 }
  0x62   : > { %2587 = vmatprep.subr.bf16.mxu1 %v2852_v1  ;;  %v982_v47 = vrot.slane %v980_v40, 1  ;;  %v1356_v40 = vrot.slane %v3362_v28, 2 }
  0x63   : > { %2552 = vmatpush3.bf16.msra.mxu0 %v2803_v39  ;;  %v2821_v39 = vld [vmem:[%s3470_s1 + $0x1a8] sm:$0xff]  }
  0x64   : > { %2553 = vmatprep.subr.bf16.mxu0 %v2852_v1 }
  0x65   : > { %2588 = vmatpush3.bf16.msra.mxu1 %v2804_v41  ;;  %v983_v41 = vshll.u32 %v2824_v35, 16 }
  0x66   : > { %2498 = vmatmul.mubr.bf16.gmra.mrb[32].mxu0 %v571_v42  ;;  %2589 = vmatprep.subr.bf16.mxu1 %v2852_v1  ;;  %v1153_v42 = vrot.slane %v3156_v36, 2  ;;  %v2823_v36 = vld [vmem:[%s3470_s1 + $0x1b0] sm:$0xff]  }
  0x67   : > { %2534 = vmatmul.mubr.bf16.gmra.mrb[32].mxu1 %v774_v44  ;;  %2501 = vmatprep.mubr.msk.bf16.mxu0 %vm2853_vm0, %v2852_v1  ;;  %v1293_v44 = vld [vmem:[%s2924_s6 + $0x8] sm:$0xc]  ;;  %v985_v48 = vrot.slane %v983_v41, 2 }
  0x68   : > { %2537 = vmatprep.mubr.msk.bf16.mxu1 %vm2853_vm0, %v2852_v1  ;;  %2554 = vmatpush3.bf16.msra.mxu0 %v2805_v45  ;;  %v3290_v45 = vld [vmem:[%s2924_s6 + $0xc] sm:$0xf]  ;;  %v1154_v49 = vsel %vm1145_vm4, %v1151_v29, %v1153_v42  ;;  %v1354_v29 = vrot.slane %v3341_v17, 2 }
  0x69   : > { %2590 = vmatpush3.bf16.msra.mxu1 %v2807_v46  ;;  %2555 = vmatprep.subr.bf16.mxu0 %v2852_v1  ;;  %v978_v46 = vsel %vm934_vm3, %v968_v24, %v977_v38  ;;  %v2164_v50 = vcombine.low %v1293_v44, %v3290_v45  ;;  %v2838_v41 = vld [vmem:[%s3470_s1 + $0x228] sm:$0xff]  }
  0x6a   : > { %2591 = vmatprep.subr.bf16.mxu1 %v2852_v1 }
  0x6b   : > { %v1522_v57 = vshll.u32 %v2164_v50, 16  ;;  %v1349_v5 = vrot.slane %v2164_v50, 2 }
  0x6c   : > { %2556 = vmatpush3.bf16.msra.mxu0 %v2808_v53  ;;  %v986_v53 = vor.u32 %v985_v48, %v982_v47  ;;  %v2840_v47 = vld [vmem:[%s2924_s6 + $0x30] ss:$0 sps:$4 sm:$0x33]  }
  0x6d   : > { %2592 = vmatpush3.bf16.msra.mxu1 %v2809_v54  ;;  %2613 = vmatprep.subr.bf16.mxu0 %v2852_v1  ;;  %v1155_v54 = vrot.slane %v2824_v35, 2  ;;  %v1524_v0 = vrot.slane %v1522_v57, 3  ;;  %v2836_v35 = vld [vmem:[%s3470_s1 + $0x220] sm:$0xff]  }
  0x6e   : > { %2502 = vmatmul.mubr.bf16.gmra.mrb[36].mxu0 %v573_v56  ;;  %2649 = vmatprep.subr.bf16.mxu1 %v2852_v1  ;;  %v1519_v56 = vshrl.u32 %v2164_v50, 16 }
  0x6f   : > { %2538 = vmatmul.mubr.bf16.gmra.mrb[36].mxu1 %v776_v61  ;;  %2557 = vmatprep.mubr.msk.bf16.mxu0 %vm2853_vm0, %v2852_v1  ;;  %v987_v61 = vsel %vm934_vm3, %v977_v38, %v986_v53  ;;  %v1156_v62 = vsel %vm1145_vm4, %v1153_v42, %v1155_v54  ;;  %v1559_v38 = vrot.slane %v1557_v33, 3  ;;  %v2842_v54 = vld [vmem:[%s3470_s1 + $0x238] sm:$0xff]  }
  0x70   : > { %2593 = vmatprep.mubr.msk.bf16.mxu1 %vm2853_vm0, %v2852_v1  ;;  %v1521_v63 = vrot.slane %v1519_v56, 2 }
  0x76   : > { %2558 = vmatmul.mubr.bf16.vlgmr.msra.gmra.mrb[40].mxu0 %v951_v6  ;;  %v1350_v6 = vrot.slane %v3301_v51, 2 }
  0x77   : > { %2594 = vmatmul.mubr.bf16.vlgmr.msra.gmra.mrb[40].mxu1 %v1148_v11  ;;  %2614 = vmatpush3.bf16.msra.mxu0 %v2811_v7  ;;  %v1525_v7 = vor.u32 %v1524_v0, %v1521_v63  ;;  %v1539_v11 = vshll.u32 %v3324_v4, 16  ;;  %v1732_v0 = vrot.slane %v3324_v4, 3 }
  0x78   : > { %2615 = vmatprep.subr.bf16.mxu0 %v2852_v1  ;;  %2561 = vmatprep.mubr.msk.bf16.mxu0 %vm2853_vm0, %v2852_v1 }
  0x79   : > { %2597 = vmatprep.mubr.msk.bf16.mxu1 %vm2853_vm0, %v2852_v1  ;;  %2650 = vmatpush3.bf16.msra.mxu1 %v2813_v12  ;;  %v1351_v12 = vsel %vm1145_vm4, %v1349_v5, %v1350_v6  ;;  %v1534_v13 = vsel %vm1517_vm5, %v1525_v7, %v1533_v8  ;;  %v1541_v16 = vrot.slane %v1539_v11, 3 }
  0x7a   : > { %2651 = vmatprep.subr.bf16.mxu1 %v2852_v1 }
  0x7b   : > { %2616 = vmatpush3.bf16.msra.mxu0 %v2812_v10  ;;  %v2830_v10 = vld [vmem:[%s3470_s1 + $0x200] sm:$0xff]  }
  0x7c   : > { %2617 = vmatprep.subr.bf16.mxu0 %v2852_v1 }
  0x7d   : > { %2652 = vmatpush3.bf16.msra.mxu1 %v2815_v18  ;;  %v2831_v18 = vld [vmem:[%s3470_s1 + $0x208] sm:$0xff]  }
  0x7e   : > { %2562 = vmatmul.mubr.bf16.gmra.mrb[44].mxu0 %v960_v15  ;;  %2653 = vmatprep.subr.bf16.mxu1 %v2852_v1  ;;  %v1352_v15 = vrot.slane %v3324_v4, 2 }
  0x7f   : > { %2598 = vmatmul.mubr.bf16.gmra.mrb[44].mxu1 %v1150_v19  ;;  %2618 = vmatpush3.bf16.msra.mxu0 %v2814_v20  ;;  %v1542_v20 = vor.u32 %v1541_v16, %v1538_v14 }
  0x80   : > { %2565 = vmatprep.mubr.msk.bf16.mxu0 %vm2853_vm0, %v2852_v1  ;;  %2601 = vmatprep.mubr.msk.bf16.mxu1 %vm2853_vm0, %v2852_v1  ;;  %v1353_v19 = vsel %vm1145_vm4, %v1350_v6, %v1352_v15  ;;  %v1355_v34 = vsel %vm1145_vm4, %v1352_v15, %v1354_v29 }
  0x81   : > { %2619 = vmatprep.subr.bf16.mxu0 %v2852_v1  ;;  %2654 = vmatpush3.bf16.msra.mxu1 %v2817_v23  ;;  %v2833_v23 = vld [vmem:[%s3470_s1 + $0x210] sm:$0xff]   ;;  %v1543_v24 = vsel %vm1517_vm5, %v1533_v8, %v1542_v20 }
  0x82   : > { %2655 = vmatprep.subr.bf16.mxu1 %v2852_v1 }
  0x83   : > { %2620 = vmatpush3.bf16.msra.mxu0 %v2816_v25  ;;  %v1547_v25 = vrot.slane %v1545_v21, 2 }
  0x84   : > { %2621 = vmatprep.subr.bf16.mxu0 %v2852_v1 }
  0x85   : > { %2656 = vmatpush3.bf16.msra.mxu1 %v2819_v30  ;;  %v2835_v30 = vld [vmem:[%s3470_s1 + $0x218] sm:$0xff]  }
  0x86   : > { %2566 = vmatmul.mubr.bf16.gmra.mrb[48].mxu0 %v969_v31  ;;  %2657 = vmatprep.subr.bf16.mxu1 %v2852_v1  ;;  %v1551_v31 = vor.u32 %v1550_v26, %v1547_v25 }
  0x87   : > { %2602 = vmatmul.mubr.bf16.gmra.mrb[48].mxu1 %v1152_v27  ;;  %2622 = vmatpush3.bf16.msra.mxu0 %v2818_v32  ;;  %v1554_v32 = vshrl.u32 %v3362_v28, 16 }
  0x88   : > { %2569 = vmatprep.mubr.msk.bf16.mxu0 %vm2853_vm0, %v2852_v1  ;;  %2605 = vmatprep.mubr.msk.bf16.mxu1 %vm2853_vm0, %v2852_v1  ;;  %v1552_v27 = vsel %vm1517_vm5, %v1542_v20, %v1551_v31 }
  0x89   : > { %2623 = vmatprep.subr.bf16.mxu0 %v2852_v1  ;;  %2658 = vmatpush3.bf16.msra.mxu1 %v2820_v37  ;;  %v1556_v37 = vrot.slane %v1554_v32, 2 }
  0x8a   : > { %2659 = vmatprep.subr.bf16.mxu1 %v2852_v1 }
  0x8b   : > { %2624 = vmatpush3.bf16.msra.mxu0 %v2821_v39  ;;  %v3384_v39 = vld [vmem:[%s2924_s6 + $0x30] ss:$0 sps:$4 sm:$0x77]   ;;  %v1560_v42 = vor.u32 %v1559_v38, %v1556_v37 }
  0x8c   : > { %2625 = vmatprep.subr.bf16.mxu0 %v2852_v1  ;;  %v1566_v44 = vshll.u32 %v3384_v39, 16 }
  0x8d   : > { %2660 = vmatpush3.bf16.msra.mxu1 %v2822_v43  ;;  %v1563_v43 = vshrl.u32 %v3384_v39, 16  ;;  %v1561_v48 = vsel %vm1517_vm5, %v1551_v31, %v1560_v42 }
  0x8e   : > { %2570 = vmatmul.mubr.bf16.gmra.mrb[52].mxu0 %v978_v46  ;;  %2661 = vmatprep.subr.bf16.mxu1 %v2852_v1  ;;  %v1357_v46 = vsel %vm1145_vm4, %v1354_v29, %v1356_v40  ;;  %v1568_v50 = vrot.slane %v1566_v44, 3 }
  0x8f   : > { %2606 = vmatmul.mubr.bf16.gmra.mrb[52].mxu1 %v1154_v49  ;;  %2573 = vmatprep.mubr.msk.bf16.mxu0 %vm2853_vm0, %v2852_v1  ;;  %v2839_v49 = vld [vmem:[%s3470_s1 + $0x230] sm:$0xff]  }
  0x90   : > { %2609 = vmatprep.mubr.msk.bf16.mxu1 %vm2853_vm0, %v2852_v1  ;;  %2626 = vmatpush3.bf16.msra.mxu0 %v2823_v36  ;;  %v1565_v36 = vrot.slane %v1563_v43, 2 }
  0x91   : > { %2662 = vmatpush3.bf16.msra.mxu1 %v2825_v52  ;;  %2627 = vmatprep.subr.bf16.mxu0 %v2852_v1  ;;  %v1358_v52 = vrot.slane %v2840_v47, 2 }
  0x92   : > { %2663 = vmatprep.subr.bf16.mxu1 %v2852_v1  ;;  %v1569_v53 = vor.u32 %v1568_v50, %v1565_v36 }
  0x93   : > { %v1359_v56 = vsel %vm1145_vm4, %v1356_v40, %v1358_v52 }
  0x94   : > { %2628 = vmatpush3.bf16.msra.mxu0 %v2826_v55  ;;  %v1707_v55 = vld [vmem:[%s2924_s6 + $0x8] sm:$0x8]  ;;  %v1570_v58 = vsel %vm1517_vm5, %v1560_v42, %v1569_v53 }
  0x95   : > { %2664 = vmatpush3.bf16.msra.mxu1 %v2827_v60  ;;  %2685 = vmatprep.subr.bf16.mxu0 %v2852_v1  ;;  %v2219_v57 = vcombine.low %v1707_v55, %v3290_v45  ;;  %v1730_v60 = vrot.slane %v3301_v51, 3  ;;  %v1736_v45 = vrot.slane %v3362_v28, 3  ;;  %v1738_v51 = vrot.slane %v3384_v39, 3 }
  0x96   : > { %2574 = vmatmul.mubr.bf16.gmra.mrb[56].mxu0 %v987_v61  ;;  %2721 = vmatprep.subr.bf16.mxu1 %v2852_v1  ;;  %v1734_v61 = vrot.slane %v3341_v17, 3 }
  0x97   : > { %2610 = vmatmul.mubr.bf16.gmra.mrb[56].mxu1 %v1156_v62  ;;  %2629 = vmatprep.mubr.msk.bf16.mxu0 %vm2853_vm0, %v2852_v1  ;;  %v1729_v59 = vrot.slane %v2219_v57, 3  ;;  %v1733_v2 = vsel %vm1728_vm6, %v1730_v60, %v1732_v0  ;;  %v1739_v3 = vsel %vm1728_vm6, %v1736_v45, %v1738_v51 }
  0x98   : > { %2665 = vmatprep.mubr.msk.bf16.mxu1 %vm2853_vm0, %v2852_v1  ;;  %v1737_v63 = vsel %vm1728_vm6, %v1734_v61, %v1736_v45  ;;  %v1735_v5 = vsel %vm1728_vm6, %v1732_v0, %v1734_v61 }
  0x99   : > { %v1731_v62 = vsel %vm1728_vm6, %v1729_v59, %v1730_v60 }
  0x9e   : > { %2630 = vmatmul.mubr.bf16.vlgmr.msra.gmra.mrb[60].mxu0 %v1351_v12 }
  0x9f   : > { %2666 = vmatmul.mubr.bf16.vlgmr.msra.gmra.mrb[60].mxu1 %v1534_v13  ;;  %2686 = vmatpush3.bf16.msra.mxu0 %v2830_v10 }
  0xa0   : > { %2687 = vmatprep.subr.bf16.mxu0 %v2852_v1  ;;  %2633 = vmatprep.mubr.msk.bf16.mxu0 %vm2853_vm0, %v2852_v1 }
  0xa1   : > { %2669 = vmatprep.mubr.msk.bf16.mxu1 %vm2853_vm0, %v2852_v1  ;;  %2729 = vmatpush3.bf16.msra.mxu1 %v2830_v10 }
  0xa2   : > { %2722 = vmatprep.subr.bf16.mxu1 %v2852_v1 }
  0xa3   : > { %2688 = vmatpush3.bf16.msra.mxu0 %v2831_v18 }
  0xa4   : > { %2689 = vmatprep.subr.bf16.mxu0 %v2852_v1 }
  0xa5   : > { %2730 = vmatpush3.bf16.msra.mxu1 %v2831_v18 }
  0xa6   : > { %2634 = vmatmul.mubr.bf16.gmra.mrb[64].mxu0 %v1353_v19  ;;  %2723 = vmatprep.subr.bf16.mxu1 %v2852_v1 }
  0xa7   : > { %2670 = vmatmul.mubr.bf16.gmra.mrb[64].mxu1 %v1543_v24  ;;  %2690 = vmatpush3.bf16.msra.mxu0 %v2833_v23 }
  0xa8   : > { %2637 = vmatprep.mubr.msk.bf16.mxu0 %vm2853_vm0, %v2852_v1  ;;  %2673 = vmatprep.mubr.msk.bf16.mxu1 %vm2853_vm0, %v2852_v1 }
  0xa9   : > { %2691 = vmatprep.subr.bf16.mxu0 %v2852_v1  ;;  %2731 = vmatpush3.bf16.msra.mxu1 %v2833_v23 }
  0xaa   : > { %2724 = vmatprep.subr.bf16.mxu1 %v2852_v1 }
  0xab   : > { %2692 = vmatpush3.bf16.msra.mxu0 %v2835_v30 }
  0xac   : > { %2693 = vmatprep.subr.bf16.mxu0 %v2852_v1 }
  0xad   : > { %2732 = vmatpush3.bf16.msra.mxu1 %v2835_v30 }
  0xae   : > { %2638 = vmatmul.mubr.bf16.gmra.mrb[68].mxu0 %v1355_v34  ;;  %2725 = vmatprep.subr.bf16.mxu1 %v2852_v1 }
  0xaf   : > { %2674 = vmatmul.mubr.bf16.gmra.mrb[68].mxu1 %v1552_v27  ;;  %2694 = vmatpush3.bf16.msra.mxu0 %v2836_v35 }
  0xb0   : > { %2641 = vmatprep.mubr.msk.bf16.mxu0 %vm2853_vm0, %v2852_v1  ;;  %2677 = vmatprep.mubr.msk.bf16.mxu1 %vm2853_vm0, %v2852_v1 }
  0xb1   : > { %2733 = vmatpush3.bf16.msra.mxu1 %v2836_v35  ;;  %2695 = vmatprep.subr.bf16.mxu0 %v2852_v1 }
  0xb2   : > { %2726 = vmatprep.subr.bf16.mxu1 %v2852_v1 }
  0xb3   : > { %2696 = vmatpush3.bf16.msra.mxu0 %v2838_v41 }
  0xb4   : > { %2697 = vmatprep.subr.bf16.mxu0 %v2852_v1 }
  0xb5   : > { %2734 = vmatpush3.bf16.msra.mxu1 %v2838_v41 }
  0xb6   : > { %2642 = vmatmul.mubr.bf16.gmra.mrb[72].mxu0 %v1357_v46  ;;  %2727 = vmatprep.subr.bf16.mxu1 %v2852_v1 }
  0xb7   : > { %2678 = vmatmul.mubr.bf16.gmra.mrb[72].mxu1 %v1561_v48  ;;  %2645 = vmatprep.mubr.msk.bf16.mxu0 %vm2853_vm0, %v2852_v1 }
  0xb8   : > { %2681 = vmatprep.mubr.msk.bf16.mxu1 %vm2853_vm0, %v2852_v1  ;;  %2698 = vmatpush3.bf16.msra.mxu0 %v2839_v49 }
  0xb9   : > { %2735 = vmatpush3.bf16.msra.mxu1 %v2839_v49  ;;  %2699 = vmatprep.subr.bf16.mxu0 %v2852_v1 }
  0xba   : > { %2728 = vmatprep.subr.bf16.mxu1 %v2852_v1 }
  0xbc   : > { %2700 = vmatpush3.bf16.msra.mxu0 %v2842_v54 }
  0xbd   : > { %2736 = vmatpush3.bf16.msra.mxu1 %v2842_v54 }
  0xbe   : > { %2646 = vmatmul.mubr.bf16.gmra.mrb[76].mxu0 %v1359_v56 }
  0xbf   : > { %2682 = vmatmul.mubr.bf16.gmra.mrb[76].mxu1 %v1570_v58  ;;  %2701 = vmatprep.mubr.msk.bf16.mxu0 %vm2853_vm0, %v2852_v1 }
  0xc0   : > { %2713 = vmatprep.mubr.msk.bf16.mxu1 %vm2853_vm0, %v2852_v1 }
  0xc6   : > { %2702 = vmatmul.mubr.bf16.vlgmr.msra.gmra.mrb[80].mxu0 %v1731_v62 }
  0xc7   : > { %2714 = vmatmul.mubr.bf16.vlgmr.msra.gmra.mrb[80].mxu1 %v1737_v63  ;;  %2705 = vmatprep.mubr.msk.bf16.mxu0 %vm2853_vm0, %v2852_v1 }
  0xc8   : > { %2717 = vmatprep.mubr.msk.bf16.mxu1 %vm2853_vm0, %v2852_v1 }
  0xce   : > { %2706 = vmatmul.mubr.bf16.gmra.mrb[84].mxu0 %v1733_v2 }
  0xcf   : > { %2718 = vmatmul.mubr.bf16.gmra.mrb[84].mxu1 %v1739_v3  ;;  %2709 = vmatprep.mubr.msk.bf16.mxu0 %vm2853_vm0, %v2852_v1 }
  0xd6   : > { %2710 = vmatmul.mubr.bf16.gmra.mrb[88].mxu0 %v1735_v5 }
  0xf9   : > { %v376_v6 = vpop.f32.mrb[0].mxu0 }
  0xfa   : > { %v502_v7 = vpop.f32.mrb[0].mxu1  ;;  %v2415_v4 = vpop.f32.mrb[1].mxu0 }
  0xfb   : > { %v503_v8 = vadd.f32 %v502_v7, %v376_v6  ;;  %v2451_v9 = vpop.f32.mrb[1].mxu1  ;;  %v379_v11 = vpop.f32.mrb[2].mxu0 }
  0xfc   : > { %v505_v12 = vpop.f32.mrb[2].mxu1  ;;  %v2416_v10 = vpop.f32.mrb[3].mxu0 }
  0xfd   : > { %v506_v13 = vadd.f32 %v505_v12, %v379_v11  ;;  %v2452_v14 = vpop.f32.mrb[3].mxu1 }
 0x101   : > { %v384_v16 = vpop.f32.mrb[4].mxu0 }
 0x102   : > { %v510_v17 = vpop.f32.mrb[4].mxu1  ;;  %v2419_v18 = vpop.f32.mrb[5].mxu0 }
 0x103   : > { %v511_v15 = vadd.f32 %v510_v17, %v384_v16  ;;  %v2455_v20 = vpop.f32.mrb[5].mxu1  ;;  %v387_v21 = vpop.f32.mrb[6].mxu0 }
 0x104   : > { %v513_v1 = vpop.f32.mrb[6].mxu1  ;;  %v2420_v22 = vpop.f32.mrb[7].mxu0 }
 0x105   : > { %v514_v19 = vadd.f32 %v513_v1, %v387_v21  ;;  %v2456_v23 = vpop.f32.mrb[7].mxu1 }
 0x109   : > { %v392_v24 = vpop.f32.mrb[8].mxu0 }
 0x10a   : > { %v518_v25 = vpop.f32.mrb[8].mxu1  ;;  %v2423_v26 = vpop.f32.mrb[9].mxu0 }
 0x10b   : > { %v519_v28 = vadd.f32 %v518_v25, %v392_v24  ;;  %v2459_v29 = vpop.f32.mrb[9].mxu1  ;;  %v395_v30 = vpop.f32.mrb[10].mxu0 }
 0x10c   : > { %v521_v31 = vpop.f32.mrb[10].mxu1  ;;  %v2424_v32 = vpop.f32.mrb[11].mxu0 }
 0x10d   : > { %v522_v33 = vadd.f32 %v521_v31, %v395_v30  ;;  %v2460_v34 = vpop.f32.mrb[11].mxu1 }
 0x111   : > { %v400_v35 = vpop.f32.mrb[12].mxu0 }
 0x112   : > { %v526_v27 = vpop.f32.mrb[12].mxu1  ;;  %v2427_v37 = vpop.f32.mrb[13].mxu0 }
 0x113   : > { %v527_v38 = vadd.f32 %v526_v27, %v400_v35  ;;  %v2463_v39 = vpop.f32.mrb[13].mxu1  ;;  %v403_v40 = vpop.f32.mrb[14].mxu0 }
 0x114   : > { %v529_v41 = vpop.f32.mrb[14].mxu1  ;;  %v2428_v42 = vpop.f32.mrb[15].mxu0 }
 0x115   : > { %v530_v43 = vadd.f32 %v529_v41, %v403_v40  ;;  %v2464_v44 = vpop.f32.mrb[15].mxu1 }
 0x119   : > { %v408_v46 = vpop.f32.mrb[16].mxu0 }
 0x11a   : > { %v534_v47 = vpop.f32.mrb[16].mxu1  ;;  %v2431_v48 = vpop.f32.mrb[17].mxu0 }
 0x11b   : > { %v535_v49 = vadd.f32 %v534_v47, %v408_v46  ;;  %v2467_v36 = vpop.f32.mrb[17].mxu1  ;;  %v411_v50 = vpop.f32.mrb[18].mxu0 }
 0x11c   : > { %v537_v52 = vpop.f32.mrb[18].mxu1  ;;  %v2432_v53 = vpop.f32.mrb[19].mxu0 }
 0x11d   : > { %v538_v54 = vadd.f32 %v537_v52, %v411_v50  ;;  %v2468_v55 = vpop.f32.mrb[19].mxu1 }
 0x121   : > { %v661_v56 = vpop.f32.mrb[20].mxu0 }
 0x122   : > { %v700_v57 = vadd.f32 %v661_v56, %v503_v8  ;;  %v2487_v58 = vpop.f32.mrb[21].mxu0  ;;  %v864_v59 = vpop.f32.mrb[20].mxu1 }
 0x123   : > { %v664_v60 = vpop.f32.mrb[22].mxu0  ;;  %v2523_v61 = vpop.f32.mrb[21].mxu1 }
 0x124   : > { %v701_v45 = vadd.f32 %v664_v60, %v506_v13  ;;  %v903_v62 = vadd.f32 %v864_v59, %v700_v57  ;;  %v2488_v63 = vpop.f32.mrb[23].mxu0  ;;  %v867_v0 = vpop.f32.mrb[22].mxu1 }
 0x125   : > { %v2524_v51 = vpop.f32.mrb[23].mxu1 }
 0x126   : > { %v904_v2 = vadd.f32 %v867_v0, %v701_v45 }
 0x129   : > { %v669_v3 = vpop.f32.mrb[24].mxu0 }
 0x12a   : > { %v702_v5 = vadd.f32 %v669_v3, %v511_v15  ;;  %v2491_v6 = vpop.f32.mrb[25].mxu0  ;;  %v872_v7 = vpop.f32.mrb[24].mxu1 }
 0x12b   : > { %v672_v4 = vpop.f32.mrb[26].mxu0  ;;  %v2527_v9 = vpop.f32.mrb[25].mxu1 }
 0x12c   : > { %v703_v11 = vadd.f32 %v672_v4, %v514_v19  ;;  %v905_v12 = vadd.f32 %v872_v7, %v702_v5  ;;  %v2492_v10 = vpop.f32.mrb[27].mxu0  ;;  %v875_v8 = vpop.f32.mrb[26].mxu1 }
 0x12d   : > { %v2528_v14 = vpop.f32.mrb[27].mxu1 }
 0x12e   : > { %v906_v16 = vadd.f32 %v875_v8, %v703_v11 }
 0x131   : > { %v677_v17 = vpop.f32.mrb[28].mxu0 }
 0x132   : > { %v704_v18 = vadd.f32 %v677_v17, %v519_v28  ;;  %v2495_v13 = vpop.f32.mrb[29].mxu0  ;;  %v880_v20 = vpop.f32.mrb[28].mxu1 }
 0x133   : > { %v680_v21 = vpop.f32.mrb[30].mxu0  ;;  %v2531_v1 = vpop.f32.mrb[29].mxu1 }
 0x134   : > { %v705_v22 = vadd.f32 %v680_v21, %v522_v33  ;;  %v907_v23 = vadd.f32 %v880_v20, %v704_v18  ;;  %v2496_v24 = vpop.f32.mrb[31].mxu0  ;;  %v883_v15 = vpop.f32.mrb[30].mxu1 }
 0x135   : > { %v2532_v25 = vpop.f32.mrb[31].mxu1 }
 0x136   : > { %v908_v26 = vadd.f32 %v883_v15, %v705_v22 }
 0x139   : > { %v685_v29 = vpop.f32.mrb[32].mxu0 }
 0x13a   : > { %v706_v30 = vadd.f32 %v685_v29, %v527_v38  ;;  %v2499_v19 = vpop.f32.mrb[33].mxu0  ;;  %v888_v31 = vpop.f32.mrb[32].mxu1 }
 0x13b   : > { %v688_v32 = vpop.f32.mrb[34].mxu0  ;;  %v2535_v34 = vpop.f32.mrb[33].mxu1 }
 0x13c   : > { %v707_v35 = vadd.f32 %v688_v32, %v530_v43  ;;  %v909_v27 = vadd.f32 %v888_v31, %v706_v30  ;;  %v2500_v37 = vpop.f32.mrb[35].mxu0  ;;  %v891_v28 = vpop.f32.mrb[34].mxu1 }
 0x13d   : > { %v2536_v39 = vpop.f32.mrb[35].mxu1 }
 0x13e   : > { %v910_v40 = vadd.f32 %v891_v28, %v707_v35 }
 0x141   : > { %v693_v41 = vpop.f32.mrb[36].mxu0 }
 0x142   : > { %v708_v42 = vadd.f32 %v693_v41, %v535_v49  ;;  %v2503_v33 = vpop.f32.mrb[37].mxu0  ;;  %v896_v44 = vpop.f32.mrb[36].mxu1 }
 0x143   : > { %v696_v46 = vpop.f32.mrb[38].mxu0  ;;  %v2539_v47 = vpop.f32.mrb[37].mxu1 }
 0x144   : > { %v709_v48 = vadd.f32 %v696_v46, %v538_v54  ;;  %v911_v36 = vadd.f32 %v896_v44, %v708_v42  ;;  %v2504_v50 = vpop.f32.mrb[39].mxu0  ;;  %v899_v38 = vpop.f32.mrb[38].mxu1 }
 0x145   : > { %v2540_v52 = vpop.f32.mrb[39].mxu1 }
 0x146   : > { %v912_v53 = vadd.f32 %v899_v38, %v709_v48 }
 0x149   : > { %v1075_v55 = vpop.f32.mrb[40].mxu0 }
 0x14a   : > { %v1114_v56 = vadd.f32 %v1075_v55, %v903_v62  ;;  %v2559_v43 = vpop.f32.mrb[41].mxu0  ;;  %v1244_v57 = vpop.f32.mrb[40].mxu1 }
 0x14b   : > { %v1078_v58 = vpop.f32.mrb[42].mxu0  ;;  %v2595_v59 = vpop.f32.mrb[41].mxu1 }
 0x14c   : > { %v1115_v60 = vadd.f32 %v1078_v58, %v904_v2  ;;  %v1283_v61 = vadd.f32 %v1244_v57, %v1114_v56  ;;  %v2560_v45 = vpop.f32.mrb[43].mxu0  ;;  %v1247_v49 = vpop.f32.mrb[42].mxu1 }
 0x14d   : > { %v2596_v63 = vpop.f32.mrb[43].mxu1 }
 0x14e   : > { %v1284_v0 = vadd.f32 %v1247_v49, %v1115_v60 }
 0x151   : > { %v1083_v51 = vpop.f32.mrb[44].mxu0 }
 0x152   : > { %v1116_v3 = vadd.f32 %v1083_v51, %v905_v12  ;;  %v2563_v54 = vpop.f32.mrb[45].mxu0  ;;  %v1252_v5 = vpop.f32.mrb[44].mxu1 }
 0x153   : > { %v1086_v6 = vpop.f32.mrb[46].mxu0  ;;  %v2599_v7 = vpop.f32.mrb[45].mxu1 }
 0x154   : > { %v1117_v4 = vadd.f32 %v1086_v6, %v906_v16  ;;  %v1285_v9 = vadd.f32 %v1252_v5, %v1116_v3  ;;  %v2564_v11 = vpop.f32.mrb[47].mxu0  ;;  %v1255_v62 = vpop.f32.mrb[46].mxu1 }
 0x155   : > { %v2600_v10 = vpop.f32.mrb[47].mxu1 }
 0x156   : > { %v1286_v8 = vadd.f32 %v1255_v62, %v1117_v4 }
 0x159   : > { %v1091_v14 = vpop.f32.mrb[48].mxu0 }
 0x15a   : > { %v1118_v17 = vadd.f32 %v1091_v14, %v907_v23  ;;  %v2567_v2 = vpop.f32.mrb[49].mxu0  ;;  %v1260_v18 = vpop.f32.mrb[48].mxu1 }
 0x15b   : > { %v1094_v13 = vpop.f32.mrb[50].mxu0  ;;  %v2603_v20 = vpop.f32.mrb[49].mxu1 }
 0x15c   : > { %v1119_v21 = vadd.f32 %v1094_v13, %v908_v26  ;;  %v1287_v1 = vadd.f32 %v1260_v18, %v1118_v17  ;;  %v2568_v22 = vpop.f32.mrb[51].mxu0  ;;  %v1263_v12 = vpop.f32.mrb[50].mxu1 }
 0x15d   : > { %v2604_v24 = vpop.f32.mrb[51].mxu1 }
 0x15e   : > { %v1288_v15 = vadd.f32 %v1263_v12, %v1119_v21 }
 0x161   : > { %v1099_v25 = vpop.f32.mrb[52].mxu0 }
 0x162   : > { %v1120_v29 = vadd.f32 %v1099_v25, %v909_v27  ;;  %v2571_v16 = vpop.f32.mrb[53].mxu0  ;;  %v1268_v30 = vpop.f32.mrb[52].mxu1 }
 0x163   : > { %v1102_v19 = vpop.f32.mrb[54].mxu0  ;;  %v2607_v31 = vpop.f32.mrb[53].mxu1 }
 0x164   : > { %v1121_v32 = vadd.f32 %v1102_v19, %v910_v40  ;;  %v1289_v34 = vadd.f32 %v1268_v30, %v1120_v29  ;;  %v2572_v35 = vpop.f32.mrb[55].mxu0  ;;  %v1271_v23 = vpop.f32.mrb[54].mxu1 }
 0x165   : > { %v2608_v37 = vpop.f32.mrb[55].mxu1 }
 0x166   : > { %v1290_v28 = vadd.f32 %v1271_v23, %v1121_v32 }
 0x169   : > { %v1107_v39 = vpop.f32.mrb[56].mxu0 }
 0x16a   : > { %v1122_v41 = vadd.f32 %v1107_v39, %v911_v36  ;;  %v2575_v26 = vpop.f32.mrb[57].mxu0  ;;  %v1276_v42 = vpop.f32.mrb[56].mxu1 }
 0x16b   : > { %v1110_v33 = vpop.f32.mrb[58].mxu0  ;;  %v2611_v44 = vpop.f32.mrb[57].mxu1 }
 0x16c   : > { %v1123_v46 = vadd.f32 %v1110_v33, %v912_v53  ;;  %v1291_v47 = vadd.f32 %v1276_v42, %v1122_v41  ;;  %v2576_v48 = vpop.f32.mrb[59].mxu0  ;;  %v1279_v27 = vpop.f32.mrb[58].mxu1 }
 0x16d   : > { %v2612_v50 = vpop.f32.mrb[59].mxu1 }
 0x16e   : > { %v1292_v38 = vadd.f32 %v1279_v27, %v1123_v46 }
 0x171   : > { %v1447_v52 = vpop.f32.mrb[60].mxu0 }
 0x172   : > { %v1486_v55 = vadd.f32 %v1447_v52, %v1283_v61  ;;  %v2631_v40 = vpop.f32.mrb[61].mxu0  ;;  %v1658_v56 = vpop.f32.mrb[60].mxu1 }
 0x173   : > { %v1450_v43 = vpop.f32.mrb[62].mxu0  ;;  %v2667_v57 = vpop.f32.mrb[61].mxu1  ;;  %v2228_v40 = vld [vmem:[%s3471_s2] ss:$0 sm:$0xff] }
 0x174   : > { %v1487_v58 = vadd.f32 %v1450_v43, %v1284_v0  ;;  %v1697_v59 = vadd.f32 %v1658_v56, %v1486_v55  ;;  %v2632_v60 = vpop.f32.mrb[63].mxu0  ;;  %v1661_v36 = vpop.f32.mrb[62].mxu1 }
 0x175   : > { %v2668_v45 = vpop.f32.mrb[63].mxu1 }
 0x176   : > { %v1698_v49 = vadd.f32 %v1661_v36, %v1487_v58 }
 0x179   : > { %v1455_v63 = vpop.f32.mrb[64].mxu0 }
 0x17a   : > { %v1488_v51 = vadd.f32 %v1455_v63, %v1285_v9  ;;  %v2635_v53 = vpop.f32.mrb[65].mxu0  ;;  %v1666_v3 = vpop.f32.mrb[64].mxu1 }
 0x17b   : > { %v1458_v54 = vpop.f32.mrb[66].mxu0  ;;  %v2671_v5 = vpop.f32.mrb[65].mxu1 }
 0x17c   : > { %v1489_v6 = vadd.f32 %v1458_v54, %v1286_v8  ;;  %v3440_v7 = vadd.f32 %v1666_v3, %v1488_v51  ;;  %v2636_v61 = vpop.f32.mrb[67].mxu0  ;;  %v1669_v4 = vpop.f32.mrb[66].mxu1 }
 0x17d   : > { %v2672_v11 = vpop.f32.mrb[67].mxu1 }
 0x17e   : > { %v3442_v62 = vadd.f32 %v1669_v4, %v1489_v6 }
 0x181   : > { %v1463_v0 = vpop.f32.mrb[68].mxu0 }
 0x182   : > { %v1490_v10 = vadd.f32 %v1463_v0, %v1287_v1  ;;  %v2639_v14 = vpop.f32.mrb[69].mxu0  ;;  %v1674_v17 = vpop.f32.mrb[68].mxu1 }
 0x183   : > { %v1466_v2 = vpop.f32.mrb[70].mxu0  ;;  %v2675_v18 = vpop.f32.mrb[69].mxu1 }
 0x184   : > { %v1491_v13 = vadd.f32 %v1466_v2, %v1288_v15  ;;  %v3444_v9 = vadd.f32 %v1674_v17, %v1490_v10  ;;  %v2640_v20 = vpop.f32.mrb[71].mxu0  ;;  %v1677_v21 = vpop.f32.mrb[70].mxu1 }
 0x185   : > { %v2676_v22 = vpop.f32.mrb[71].mxu1 }
 0x186   : > { %v3446_v8 = vadd.f32 %v1677_v21, %v1491_v13 }
 0x189   : > { %v1471_v12 = vpop.f32.mrb[72].mxu0 }
 0x18a   : > { %v1492_v24 = vadd.f32 %v1471_v12, %v1289_v34  ;;  %v2643_v25 = vpop.f32.mrb[73].mxu0  ;;  %v1682_v29 = vpop.f32.mrb[72].mxu1 }
 0x18b   : > { %v1474_v16 = vpop.f32.mrb[74].mxu0  ;;  %v2679_v30 = vpop.f32.mrb[73].mxu1 }
 0x18c   : > { %v1493_v19 = vadd.f32 %v1474_v16, %v1290_v28  ;;  %v1703_v1 = vadd.f32 %v1682_v29, %v1492_v24  ;;  %v2644_v31 = vpop.f32.mrb[75].mxu0  ;;  %v1685_v32 = vpop.f32.mrb[74].mxu1 }
 0x18d   : > { %v2680_v35 = vpop.f32.mrb[75].mxu1 }
 0x18e   : > { %v1704_v23 = vadd.f32 %v1685_v32, %v1493_v19 }
 0x191   : > { %v1479_v15 = vpop.f32.mrb[76].mxu0 }
 0x192   : > { %v1494_v37 = vadd.f32 %v1479_v15, %v1291_v47  ;;  %v2647_v39 = vpop.f32.mrb[77].mxu0  ;;  %v1690_v41 = vpop.f32.mrb[76].mxu1 }
 0x193   : > { %v1482_v26 = vpop.f32.mrb[78].mxu0  ;;  %v2683_v42 = vpop.f32.mrb[77].mxu1 }
 0x194   : > { %v1495_v33 = vadd.f32 %v1482_v26, %v1292_v38  ;;  %v1705_v44 = vadd.f32 %v1690_v41, %v1494_v37  ;;  %v2648_v34 = vpop.f32.mrb[79].mxu0  ;;  %v1693_v46 = vpop.f32.mrb[78].mxu1 }
 0x195   : > { %v2684_v48 = vpop.f32.mrb[79].mxu1 }
 0x196   : > { %v1706_v27 = vadd.f32 %v1693_v46, %v1495_v33 }
 0x199   : > { %v1827_v50 = vpop.f32.mrb[80].mxu0 }
 0x19a   : > { %v1866_v28 = vadd.f32 %v1827_v50, %v1697_v59  ;;  %v1851_v52 = vpop.f32.mrb[80].mxu1  ;;  %v2703_v55 = vpop.f32.mrb[81].mxu0 }
 0x19b   : > { %v1872_v47 = vadd.f32 %v1851_v52, %v1703_v1  ;;  %v2715_v56 = vpop.f32.mrb[81].mxu1  ;;  %v1830_v43 = vpop.f32.mrb[82].mxu0 }
 0x19c   : > { %v1867_v57 = vadd.f32 %v1830_v43, %v1698_v49  ;;  %v1854_v58 = vpop.f32.mrb[82].mxu1  ;;  %v2704_v38 = vpop.f32.mrb[83].mxu0  ;;  %v1883_v45 = vadd.f32 %v2228_v40, %v1866_v28 }
 0x19d   : > { %v1873_v60 = vadd.f32 %v1854_v58, %v1704_v23  ;;  %v2716_v36 = vpop.f32.mrb[83].mxu1  ;;  %v1889_v51 = vadd.f32 %v2228_v40, %v1872_v47 }
 0x19e   : > { %v1884_v63 = vadd.f32 %v2228_v40, %v1867_v57 }
 0x19f   : > { %v1890_v59 = vadd.f32 %v2228_v40, %v1873_v60 }
 0x1a0   : > { %v2254_v53 = vpack.c.bf16 %v1884_v63, %v1883_v45 }
 0x1a1   : > { %v2269_v3 = vpack.c.bf16 %v1890_v59, %v1889_v51  ;;  %v1835_v54 = vpop.f32.mrb[84].mxu0 }
 0x1a2   : > { %2255 = vst [vmem:[%s3455_s21] sm:$0xff] %v2254_v53   ;;  %v1868_v49 = vadd.f32 %v1835_v54, %v3440_v7  ;;  %v1859_v5 = vpop.f32.mrb[84].mxu1  ;;  %v2707_v6 = vpop.f32.mrb[85].mxu0 }
 0x1a3   : > { %2278 = vst [vmem:[%s3455_s21 + $0x18] sm:$0xff] %v2269_v3   ;;  %v1874_v61 = vadd.f32 %v1859_v5, %v1705_v44  ;;  %v2719_v4 = vpop.f32.mrb[85].mxu1  ;;  %v1838_v11 = vpop.f32.mrb[86].mxu0 }
 0x1a4   : > { %v1869_v0 = vadd.f32 %v1838_v11, %v3442_v62  ;;  %v1862_v10 = vpop.f32.mrb[86].mxu1  ;;  %v2708_v14 = vpop.f32.mrb[87].mxu0  ;;  %v1885_v18 = vadd.f32 %v2228_v40, %v1868_v49 }
 0x1a5   : > { %v1875_v17 = vadd.f32 %v1862_v10, %v1706_v27  ;;  %v2720_v2 = vpop.f32.mrb[87].mxu1  ;;  %v1891_v20 = vadd.f32 %v2228_v40, %v1874_v61 }
 0x1a6   : > { %v1886_v13 = vadd.f32 %v2228_v40, %v1869_v0 }
 0x1a7   : > { %v1892_v21 = vadd.f32 %v2228_v40, %v1875_v17 }
 0x1a8   : > { %v2259_v7 = vpack.c.bf16 %v1886_v13, %v1885_v18 }
 0x1a9   : > { %v2274_v22 = vpack.c.bf16 %v1892_v21, %v1891_v20  ;;  %v1843_v12 = vpop.f32.mrb[88].mxu0 }
 0x1aa   : > { %2276 = vst [vmem:[%s3455_s21 + $0x8] sm:$0xff] %v2259_v7   ;;  %v1870_v24 = vadd.f32 %v1843_v12, %v3444_v9  ;;  %v2711_v25 = vpop.f32.mrb[89].mxu0 }
 0x1ab   : > { %2279 = vst [vmem:[%s3455_s21 + $0x20] sm:$0xff] %v2274_v22   ;;  %v1846_v29 = vpop.f32.mrb[90].mxu0 }
 0x1ac   : > { %v1871_v62 = vadd.f32 %v1846_v29, %v3446_v8  ;;  %v2712_v16 = vpop.f32.mrb[91].mxu0  ;;  %v1887_v30 = vadd.f32 %v2228_v40, %v1870_v24 }
 0x1ae   : > { %v1888_v19 = vadd.f32 %v2228_v40, %v1871_v62 }
 0x1b0   : > { %v2264_v1 = vpack.c.bf16 %v1888_v19, %v1887_v30 }
 0x1b2   : > { %2277 = vst [vmem:[%s3455_s21 + $0x10] sm:$0xff] %v2264_v1  }
 0x1b3 PF: > { %s13_s12 = sadd.s32 1, %s2850_s12  }
 0x1b4   : > { %p10_p4 = scmp.ge.s32.totalorder %s13_s12, 4  }
 0x1b6   :  { %12 = sbr.rel (!%p10_p4) target bundleno = 1 (0x1), region = 70 }

</bundles_post_ra>
